<compile_context>
chip_gen: v5e
topology: v5e:2x2
jax: 0.10.0
libtpu: 0.0.40
codegen_flags: <defaults>
</compile_context>

<pallas_src>
import functools
import math

import jax
import jax.numpy as jnp
from jax.experimental import pallas as pl
from jax.experimental.pallas import tpu as pltpu


# ----------------------------------------------------------------------------
# Parameter-only preprocessing (mirrors the PyTorch module's buffers/cpb_mlp).
# ----------------------------------------------------------------------------
def _relative_position_tables(window_size, pretrained_window_size=(0, 0)):
    Wh, Ww = window_size
    rch = jnp.arange(-(Wh - 1), Wh, dtype=jnp.float32)
    rcw = jnp.arange(-(Ww - 1), Ww, dtype=jnp.float32)
    ty, tx = jnp.meshgrid(rch, rcw, indexing="ij")
    table = jnp.stack([ty, tx], axis=-1)                      # (2Wh-1, 2Ww-1, 2)
    if pretrained_window_size[0] > 0:
        denom = jnp.array([pretrained_window_size[0] - 1,
                           pretrained_window_size[1] - 1], jnp.float32)
    else:
        denom = jnp.array([Wh - 1, Ww - 1], jnp.float32)
    table = table / denom * 8.0
    table = jnp.sign(table) * jnp.log2(jnp.abs(table) + 1.0) / math.log2(8.0)

    cy, cx = jnp.meshgrid(jnp.arange(Wh), jnp.arange(Ww), indexing="ij")
    coords = jnp.stack([cy, cx]).reshape(2, -1)               # (2, N)
    rel = coords[:, :, None] - coords[:, None, :]             # (2, N, N)
    rel = jnp.transpose(rel, (1, 2, 0)) + jnp.array([Wh - 1, Ww - 1])
    rel_index = rel[..., 0] * (2 * Ww - 1) + rel[..., 1]      # (N, N) int32
    return table, rel_index


def _relative_position_bias(params, window_size, num_heads,
                            pretrained_window_size=(0, 0)):
    Wh, Ww = window_size
    N = Wh * Ww
    table, rel_index = _relative_position_tables(window_size,
                                                 pretrained_window_size)
    h = jnp.maximum(table.reshape(-1, 2) @ params["cpb_w1"]
                    + params["cpb_b1"], 0.0)                  # ReLU
    tbl = h @ params["cpb_w2"]                                # (T, H)
    bias = tbl[rel_index.reshape(-1)].reshape(N, N, num_heads)
    bias = jnp.transpose(bias, (2, 0, 1))                     # (H, N, N)
    return 16.0 * jax.nn.sigmoid(bias)


# ----------------------------------------------------------------------------
# Pallas kernel: WB windows per grid step, fused lane-dense projections.
# ----------------------------------------------------------------------------
def _wmsa_kernel(z_ref, x_ref, wq_ref, wk_ref, wv_ref, bq_ref, bv_ref,
                 scale_ref, bias_ref, wp_ref, bp_ref, o_ref, oh_ref):
    """Ref shapes (per grid step):
      z_ref, x_ref : (WB, N, C)          query-side / key-value-side tokens
      wq/wk/wv_ref : (C, C)   bf16       fused lane-dense projection weights
      bq/bv_ref    : (1, C)   f32
      scale_ref    : (H,)     f32 SMEM   clamped+exp'ed per-head logit scale
      bias_ref     : (H, WBb, N, N) f32  rel-pos bias (+mask); WBb in {1, WB}
      wp_ref       : (C, C)   bf16       output projection
      bp_ref       : (1, C)   f32
      o_ref        : (WB, N, C)
      oh_ref       : (WB*N, C) f32 VMEM scratch (head-major attention output)
    """
    WB, N, C = z_ref.shape
    H = bias_ref.shape[0]
    d = C // H

    zf = z_ref[...].reshape(WB * N, C).astype(jnp.bfloat16)
    xf = x_ref[...].reshape(WB * N, C).astype(jnp.bfloat16)

    # ---- fused, lane-dense projections (bf16 MXU, f32 accumulation) --------
    q = jnp.dot(zf, wq_ref[...], preferred_element_type=jnp.float32) + bq_ref[...]
    k = jnp.dot(xf, wk_ref[...], preferred_element_type=jnp.float32)
    v = jnp.dot(xf, wv_ref[...], preferred_element_type=jnp.float32) + bv_ref[...]
    v_bf = v.astype(jnp.bfloat16)

    # ---- per-head cosine attention; logits/softmax path stays f32 ----------
    # TODO(synk): use lax.fori_loop(unroll=True) / head-batched dot_general
    #             for production H to bound vreg live ranges.
    for h in range(H):
        lo = h * d
        q_h = q[:, lo:lo + d].reshape(WB, N, d)
        k_h = k[:, lo:lo + d].reshape(WB, N, d)
        v_h = v_bf[:, lo:lo + d].reshape(WB, N, d)

        qn = q_h / jnp.maximum(
            jnp.sqrt(jnp.sum(q_h * q_h, axis=-1, keepdims=True)), 1e-12)
        kn = k_h / jnp.maximum(
            jnp.sqrt(jnp.sum(k_h * k_h, axis=-1, keepdims=True)), 1e-12)
        qn = qn * scale_ref[h]                      # per-head logit scale (SMEM)

        logits = jax.lax.dot_general(               # (WB, N, N), f32
            qn, kn, (((2,), (2,)), ((0,), (0,))),
            preferred_element_type=jnp.float32)
        logits = logits + bias_ref[h]               # (1|WB, N, N) broadcasts

        m = jnp.max(logits, axis=-1, keepdims=True)
        p = jnp.exp(logits - m)
        attn = p * pl.reciprocal(jnp.sum(p, axis=-1, keepdims=True), approx=True)

        o_h = jax.lax.dot_general(                  # (WB, N, d), f32
            attn.astype(jnp.bfloat16), v_h,
            (((2,), (1,)), ((0,), (0,))),
            preferred_element_type=jnp.float32)
        oh_ref[:, lo:lo + d] = o_h.reshape(WB * N, d)

    # ---- single lane-dense output projection over all heads / windows ------
    out = jnp.dot(oh_ref[...].astype(jnp.bfloat16), wp_ref[...],
                  preferred_element_type=jnp.float32) + bp_ref[...]
    o_ref[...] = out.reshape(WB, N, C).astype(o_ref.dtype)


# ----------------------------------------------------------------------------
# Wrapper
# ----------------------------------------------------------------------------
def _vmem_capacity_bytes():
    try:
        info = pltpu.get_tpu_info()
        for name in ("vmem_capacity_bytes", "vmem_size_bytes", "vmem_bytes"):
            val = getattr(info, name, None)
            if val:
                return int(val)
    except Exception:
        pass
    return 64 * 1024 * 1024     # conservative default (v7x per-core VMEM)


def _pick_window_batch(B_, base, per_window_bytes, budget_bytes, cap=512):
    """Largest WB that divides B_, is a multiple of `base`, fits the budget."""
    best = base
    wb = base
    while wb <= min(B_, cap):
        if B_ % wb == 0 and wb * per_window_bytes <= budget_bytes:
            best = wb
        wb += base
    return best


@functools.partial(jax.jit, static_argnames=("window_size", "num_heads"))
def window_attention_forward(z, x, params, *, window_size, num_heads,
                             mask=None):
    """z, x: (B_, N, C) with B_ = num_windows * B, N = Wh*Ww.  -> (B_, N, C)."""
    B_, N, C = x.shape
    H = num_heads
    assert C % H == 0 and N == window_size[0] * window_size[1]

    # ---- tiny, parameter-only preprocessing (resident in VMEM / SMEM) ------
    scale = jnp.exp(jnp.minimum(params["logit_scale"],
                                math.log(1.0 / 0.01))).reshape(H)
    rel_bias = _relative_position_bias(params, window_size, H)      # (H, N, N)

    # ---- window batch: amortize per-step overhead, respect VMEM budget -----
    nW = 1 if mask is None else int(mask.shape[0])
    if mask is not None:
        assert B_ % nW == 0
    vmem_cap = _vmem_capacity_bytes()
    per_window = (3 * 2 * N * C * 4          # double-buffered z/x/out blocks
                  + H * N * N * 4            # (tiled) bias table slice
                  + N * C * 4)               # head-major output scratch
    resident = 4 * C * C * 2 + 3 * C * 4 + 4096
    budget = max(vmem_cap // 4 - resident, per_window)
    WB = _pick_window_batch(B_, nW, per_window, budget)

    # ---- bias (+ shifted-window mask) table, resident across the grid ------
    if mask is None:
        bias_all = rel_bias[:, None, :, :]                           # (H,1,N,N)
    else:
        # window index of global window b is b % nW; WB is a multiple of nW,
        # so the per-window bias selection is static inside a block.
        bias_nw = (rel_bias[:, None, :, :]
                   + mask.astype(jnp.float32)[None, :, :, :])        # (H,nW,N,N)
        bias_all = jnp.tile(bias_nw, (1, WB // nW, 1, 1))            # (H,WB,N,N)

    # ---- lane-dense weights (bf16 MXU operands, f32 accumulation) ----------
    wq = params["wq"].astype(jnp.bfloat16)          # (C, C)
    wk = params["wk"].astype(jnp.bfloat16)
    wv = params["wv"].astype(jnp.bfloat16)
    wp = params["wp"].astype(jnp.bfloat16)
    bq = params["bq"].reshape(1, C)
    bv = params["bv"].reshape(1, C)
    bp = params["bp"].reshape(1, C)

    vmem_limit = int(min(vmem_cap - (2 << 20),
                         max(32 * 1024 * 1024,
                             2 * (resident + WB * per_window))))

    zero2 = lambda i: (0, 0)
    zero4 = lambda i: (0, 0, 0, 0)

    out = pl.pallas_call(
        _wmsa_kernel,
        out_shape=jax.ShapeDtypeStruct((B_, N, C), z.dtype),
        grid_spec=pltpu.PrefetchScalarGridSpec(
            num_scalar_prefetch=0,
            grid=(B_ // WB,),
            in_specs=[
                pl.BlockSpec((WB, N, C), lambda i: (i, 0, 0)),       # z
                pl.BlockSpec((WB, N, C), lambda i: (i, 0, 0)),       # x
                pl.BlockSpec((C, C), zero2),                         # wq (bf16)
                pl.BlockSpec((C, C), zero2),                         # wk (bf16)
                pl.BlockSpec((C, C), zero2),                         # wv (bf16)
                pl.BlockSpec((1, C), zero2),                         # bq
                pl.BlockSpec((1, C), zero2),                         # bv
                pl.BlockSpec(memory_space=pltpu.MemorySpace.SMEM),   # logit scale
                pl.BlockSpec(bias_all.shape, zero4),                 # bias(+mask)
                pl.BlockSpec((C, C), zero2),                         # wp (bf16)
                pl.BlockSpec((1, C), zero2),                         # bp
            ],
            out_specs=pl.BlockSpec((WB, N, C), lambda i: (i, 0, 0)),
            scratch_shapes=[pltpu.VMEM((WB * N, C), jnp.float32)],
        ),
        compiler_params=pltpu.CompilerParams(
            dimension_semantics=("parallel",),
            vmem_limit_bytes=vmem_limit),
    )(z, x, wq, wk, wv, bq, bv, scale, bias_all, wp, bp)
    return out


# ----------------------------------------------------------------------------
# Parameters + pure-JAX reference (mirrors the PyTorch forward exactly)
# ----------------------------------------------------------------------------
def init_params(key, dim, num_heads, cpb_hidden=512):
    ks = jax.random.split(key, 10)
    s = 1.0 / math.sqrt(dim)
    return {
        "wq": s * jax.random.normal(ks[0], (dim, dim), jnp.float32),
        "bq": 0.1 * jax.random.normal(ks[1], (dim,), jnp.float32),
        "wk": s * jax.random.normal(ks[2], (dim, dim), jnp.float32),   # no bias
        "wv": s * jax.random.normal(ks[3], (dim, dim), jnp.float32),
        "bv": 0.1 * jax.random.normal(ks[4], (dim,), jnp.float32),
        "wp": s * jax.random.normal(ks[5], (dim, dim), jnp.float32),
        "bp": 0.1 * jax.random.normal(ks[6], (dim,), jnp.float32),
        "logit_scale": jnp.log(10.0 * jnp.ones((num_heads,), jnp.float32)),
        "cpb_w1": (1.0 / math.sqrt(2.0))
                  * jax.random.normal(ks[7], (2, cpb_hidden), jnp.float32),
        "cpb_b1": 0.1 * jax.random.normal(ks[8], (cpb_hidden,), jnp.float32),
        "cpb_w2": (1.0 / math.sqrt(cpb_hidden))
                  * jax.random.normal(ks[9], (cpb_hidden, num_heads), jnp.float32),
    }


def reference_forward(z, x, params, *, window_size, num_heads, mask=None):
    B_, N, C = x.shape
    H = num_heads
    d = C // H
    q = z @ params["wq"] + params["bq"]
    k = x @ params["wk"]
    v = x @ params["wv"] + params["bv"]

    def split(t):
        return t.reshape(B_, N, H, d).transpose(0, 2, 1, 3)

    q, k, v = split(q), split(k), split(v)
    qn = q / jnp.maximum(jnp.sqrt(jnp.sum(q * q, -1, keepdims=True)), 1e-12)
    kn = k / jnp.maximum(jnp.sqrt(jnp.sum(k * k, -1, keepdims=True)), 1e-12)
    attn = jnp.einsum("bhnd,bhmd->bhnm", qn, kn)
    scale = jnp.exp(jnp.minimum(params["logit_scale"], math.log(1.0 / 0.01)))
    attn = attn * scale[None, :, None, None]
    attn = attn + _relative_position_bias(params, window_size, H)[None]
    if mask is not None:
        nW = mask.shape[0]
        attn = attn.reshape(B_ // nW, nW, H, N, N) + mask[None, :, None]
        attn = attn.reshape(B_, H, N, N)
    attn = jax.nn.softmax(attn, axis=-1)
    out = jnp.einsum("bhnm,bhmd->bhnd", attn, v)
    out = out.transpose(0, 2, 1, 3).reshape(B_, N, C)
    return out @ params["wp"] + params["bp"]


# ----------------------------------------------------------------------------
if __name__ == "__main__":
    key = jax.random.PRNGKey(0)
    kz, kx, kp = jax.random.split(key, 3)

    B, nW = 2, 4                 # outer batch x windows per image
    window_size = (4, 4)
    num_heads = 4
    dim = 32
    N = window_size[0] * window_size[1]
    B_ = B * nW

    z = jax.random.normal(kz, (B_, N, dim), jnp.float32)
    x = jax.random.normal(kx, (B_, N, dim), jnp.float32)
    params = init_params(kp, dim, num_heads)

    # bf16 MXU operands (q/k/v/proj) vs an f32 reference: allow ~bf16-level
    # deviation.
    TOL = dict(atol=3e-2, rtol=3e-2)

    # ---- non-shifted path (mask=None) --------------------------------------
    out = jax.block_until_ready(
        window_attention_forward(z, x, params, window_size=window_size,
                                 num_heads=num_heads, mask=None))
    ref = reference_forward(z, x, params, window_size=window_size,
                            num_heads=num_heads, mask=None)
    assert out.shape == (B_, N, dim), out.shape
    assert jnp.allclose(out, ref, **TOL), float(jnp.max(jnp.abs(out - ref)))

    # ---- shifted-window path (additive 0/-100 mask) -------------------------
    idx = jnp.arange(N)
    blocky = jnp.where((idx[:, None] // (N // 2)) == (idx[None, :] // (N // 2)),
                       0.0, -100.0).astype(jnp.float32)
    mask = jnp.stack([jnp.zeros((N, N), jnp.float32), blocky,
                      jnp.zeros((N, N), jnp.float32), blocky])    # (nW, N, N)
    out_m = jax.block_until_ready(
        window_attention_forward(z, x, params, window_size=window_size,
                                 num_heads=num_heads, mask=mask))
    ref_m = reference_forward(z, x, params, window_size=window_size,
                              num_heads=num_heads, mask=mask)
    assert jnp.allclose(out_m, ref_m, **TOL), float(
        jnp.max(jnp.abs(out_m - ref_m)))

    print("KERNEL_OK")
</pallas_src>

<mosaic_0001>
module attributes {stable_mosaic.version = 11 : i64} {
  func.func @_wmsa_kernel(%arg0: i32, %arg1: memref<8x16x32xf32, #tpu.memory_space<vmem>>, %arg2: memref<8x16x32xf32, #tpu.memory_space<vmem>>, %arg3: memref<32x32xbf16, #tpu.memory_space<vmem>>, %arg4: memref<32x32xbf16, #tpu.memory_space<vmem>>, %arg5: memref<32x32xbf16, #tpu.memory_space<vmem>>, %arg6: memref<1x32xf32, #tpu.memory_space<vmem>>, %arg7: memref<1x32xf32, #tpu.memory_space<vmem>>, %arg8: memref<4xf32, #tpu.memory_space<smem>>, %arg9: memref<4x1x16x16xf32, #tpu.memory_space<vmem>>, %arg10: memref<32x32xbf16, #tpu.memory_space<vmem>>, %arg11: memref<1x32xf32, #tpu.memory_space<vmem>>, %arg12: memref<8x16x32xf32, #tpu.memory_space<vmem>>, %arg13: memref<128x32xf32, #tpu.memory_space<vmem>>) attributes {dimension_semantics = [#tpu.dimension_semantics<parallel>], iteration_bounds = array<i64: 1>, scalar_prefetch = 0 : i64, scratch_operands = 1 : i64, tpu.core_type = #tpu.core_type<tc>, window_params = [{transform_indices = @transform_0, window_bounds = array<i64: 8, 16, 32>}, {transform_indices = @transform_1, window_bounds = array<i64: 8, 16, 32>}, {pipeline_mode = #tpu.pipeline_mode<synchronous>, transform_indices = @transform_2, window_bounds = array<i64: 32, 32>}, {pipeline_mode = #tpu.pipeline_mode<synchronous>, transform_indices = @transform_3, window_bounds = array<i64: 32, 32>}, {pipeline_mode = #tpu.pipeline_mode<synchronous>, transform_indices = @transform_4, window_bounds = array<i64: 32, 32>}, {pipeline_mode = #tpu.pipeline_mode<synchronous>, transform_indices = @transform_5, window_bounds = array<i64: 1, 32>}, {pipeline_mode = #tpu.pipeline_mode<synchronous>, transform_indices = @transform_6, window_bounds = array<i64: 1, 32>}, {transform_indices = @transform_7, window_bounds = array<i64: 4>}, {pipeline_mode = #tpu.pipeline_mode<synchronous>, transform_indices = @transform_8, window_bounds = array<i64: 4, 1, 16, 16>}, {pipeline_mode = #tpu.pipeline_mode<synchronous>, transform_indices = @transform_9, window_bounds = array<i64: 32, 32>}, {pipeline_mode = #tpu.pipeline_mode<synchronous>, transform_indices = @transform_10, window_bounds = array<i64: 1, 32>}, {transform_indices = @transform_11, window_bounds = array<i64: 8, 16, 32>}]} {
    %c0 = arith.constant 0 : index
    %c0_0 = arith.constant 0 : index
    %c0_1 = arith.constant 0 : index
    %0 = vector.load %arg1[%c0, %c0_0, %c0_1] : memref<8x16x32xf32, #tpu.memory_space<vmem>>, vector<8x16x32xf32>
    %1 = vector.shape_cast %0 : vector<8x16x32xf32> to vector<128x32xf32>
    %2 = arith.truncf %1 : vector<128x32xf32> to vector<128x32xbf16>
    %c0_2 = arith.constant 0 : index
    %c0_3 = arith.constant 0 : index
    %c0_4 = arith.constant 0 : index
    %3 = vector.load %arg2[%c0_2, %c0_3, %c0_4] : memref<8x16x32xf32, #tpu.memory_space<vmem>>, vector<8x16x32xf32>
    %4 = vector.shape_cast %3 : vector<8x16x32xf32> to vector<128x32xf32>
    %5 = arith.truncf %4 : vector<128x32xf32> to vector<128x32xbf16>
    %c0_5 = arith.constant 0 : index
    %c0_6 = arith.constant 0 : index
    %6 = vector.load %arg3[%c0_5, %c0_6] : memref<32x32xbf16, #tpu.memory_space<vmem>>, vector<32x32xbf16>
    %cst = arith.constant dense<0.000000e+00> : vector<128x32xf32>
    %7 = tpu.matmul %2, %6, %cst {dimension_numbers = #tpu.dot_dimension_numbers<[1], [0], [0], [1], [0, 0, 1, 1], [], []>} : vector<128x32xbf16>, vector<32x32xbf16>, vector<128x32xf32> -> vector<128x32xf32>
    %c0_7 = arith.constant 0 : index
    %c0_8 = arith.constant 0 : index
    %8 = vector.load %arg6[%c0_7, %c0_8] : memref<1x32xf32, #tpu.memory_space<vmem>>, vector<1x32xf32>
    %9 = vector.broadcast %8 : vector<1x32xf32> to vector<128x32xf32>
    %10 = arith.addf %7, %9 : vector<128x32xf32>
    %c0_9 = arith.constant 0 : index
    %c0_10 = arith.constant 0 : index
    %11 = vector.load %arg4[%c0_9, %c0_10] : memref<32x32xbf16, #tpu.memory_space<vmem>>, vector<32x32xbf16>
    %cst_11 = arith.constant dense<0.000000e+00> : vector<128x32xf32>
    %12 = tpu.matmul %5, %11, %cst_11 {dimension_numbers = #tpu.dot_dimension_numbers<[1], [0], [0], [1], [0, 0, 1, 1], [], []>} : vector<128x32xbf16>, vector<32x32xbf16>, vector<128x32xf32> -> vector<128x32xf32>
    %c0_12 = arith.constant 0 : index
    %c0_13 = arith.constant 0 : index
    %13 = vector.load %arg5[%c0_12, %c0_13] : memref<32x32xbf16, #tpu.memory_space<vmem>>, vector<32x32xbf16>
    %cst_14 = arith.constant dense<0.000000e+00> : vector<128x32xf32>
    %14 = tpu.matmul %5, %13, %cst_14 {dimension_numbers = #tpu.dot_dimension_numbers<[1], [0], [0], [1], [0, 0, 1, 1], [], []>} : vector<128x32xbf16>, vector<32x32xbf16>, vector<128x32xf32> -> vector<128x32xf32>
    %c0_15 = arith.constant 0 : index
    %c0_16 = arith.constant 0 : index
    %15 = vector.load %arg7[%c0_15, %c0_16] : memref<1x32xf32, #tpu.memory_space<vmem>>, vector<1x32xf32>
    %16 = vector.broadcast %15 : vector<1x32xf32> to vector<128x32xf32>
    %17 = arith.addf %14, %16 : vector<128x32xf32>
    %18 = arith.truncf %17 : vector<128x32xf32> to vector<128x32xbf16>
    %19 = vector.extract_strided_slice %10 {offsets = [0, 0], sizes = [128, 8], strides = [1, 1]} : vector<128x32xf32> to vector<128x8xf32>
    %20 = vector.shape_cast %19 : vector<128x8xf32> to vector<8x16x8xf32>
    %21 = vector.extract_strided_slice %12 {offsets = [0, 0], sizes = [128, 8], strides = [1, 1]} : vector<128x32xf32> to vector<128x8xf32>
    %22 = vector.shape_cast %21 : vector<128x8xf32> to vector<8x16x8xf32>
    %23 = vector.extract_strided_slice %18 {offsets = [0, 0], sizes = [128, 8], strides = [1, 1]} : vector<128x32xbf16> to vector<128x8xbf16>
    %24 = vector.shape_cast %23 : vector<128x8xbf16> to vector<8x16x8xbf16>
    %25 = arith.mulf %20, %20 : vector<8x16x8xf32>
    %cst_17 = arith.constant dense<0.000000e+00> : vector<8x16xf32>
    %26 = vector.multi_reduction <add>, %25, %cst_17 [2] : vector<8x16x8xf32> to vector<8x16xf32>
    %27 = vector.shape_cast %26 : vector<8x16xf32> to vector<8x16x1xf32>
    %28 = math.sqrt %27 : vector<8x16x1xf32>
    %cst_18 = arith.constant 9.99999996E-13 : f32
    %29 = vector.broadcast %cst_18 : f32 to vector<8x16x1xf32>
    %30 = arith.maximumf %28, %29 : vector<8x16x1xf32>
    %31 = vector.broadcast %30 : vector<8x16x1xf32> to vector<8x16x8xf32>
    %32 = arith.divf %20, %31 : vector<8x16x8xf32>
    %33 = arith.mulf %22, %22 : vector<8x16x8xf32>
    %cst_19 = arith.constant dense<0.000000e+00> : vector<8x16xf32>
    %34 = vector.multi_reduction <add>, %33, %cst_19 [2] : vector<8x16x8xf32> to vector<8x16xf32>
    %35 = vector.shape_cast %34 : vector<8x16xf32> to vector<8x16x1xf32>
    %36 = math.sqrt %35 : vector<8x16x1xf32>
    %cst_20 = arith.constant 9.99999996E-13 : f32
    %37 = vector.broadcast %cst_20 : f32 to vector<8x16x1xf32>
    %38 = arith.maximumf %36, %37 : vector<8x16x1xf32>
    %39 = vector.broadcast %38 : vector<8x16x1xf32> to vector<8x16x8xf32>
    %40 = arith.divf %22, %39 : vector<8x16x8xf32>
    %c0_21 = arith.constant 0 : index
    %41 = memref.load %arg8[%c0_21] : memref<4xf32, #tpu.memory_space<smem>>
    %42 = vector.broadcast %41 : f32 to vector<8x16x8xf32>
    %43 = arith.mulf %32, %42 : vector<8x16x8xf32>
    %cst_22 = arith.constant dense<0.000000e+00> : vector<8x16x16xf32>
    %44 = tpu.matmul %43, %40, %cst_22 {dimension_numbers = #tpu.dot_dimension_numbers<[2], [2], [1], [1], [0, 0, 0, 1, 1, 1], [0], [0]>} : vector<8x16x8xf32>, vector<8x16x8xf32>, vector<8x16x16xf32> -> vector<8x16x16xf32>
    %c0_23 = arith.constant 0 : index
    %c0_24 = arith.constant 0 : index
    %c0_25 = arith.constant 0 : index
    %c0_26 = arith.constant 0 : index
    %45 = vector.load %arg9[%c0_23, %c0_24, %c0_25, %c0_26] : memref<4x1x16x16xf32, #tpu.memory_space<vmem>>, vector<1x1x16x16xf32>
    %46 = vector.shape_cast %45 : vector<1x1x16x16xf32> to vector<1x16x16xf32>
    %47 = vector.broadcast %46 : vector<1x16x16xf32> to vector<8x16x16xf32>
    %48 = arith.addf %44, %47 : vector<8x16x16xf32>
    %cst_27 = arith.constant dense<0xFF800000> : vector<8x16xf32>
    %49 = vector.multi_reduction <maximumf>, %48, %cst_27 [2] : vector<8x16x16xf32> to vector<8x16xf32>
    %50 = vector.shape_cast %49 : vector<8x16xf32> to vector<8x16x1xf32>
    %51 = vector.broadcast %50 : vector<8x16x1xf32> to vector<8x16x16xf32>
    %52 = arith.subf %48, %51 : vector<8x16x16xf32>
    %53 = math.exp %52 : vector<8x16x16xf32>
    %cst_28 = arith.constant dense<0.000000e+00> : vector<8x16xf32>
    %54 = vector.multi_reduction <add>, %53, %cst_28 [2] : vector<8x16x16xf32> to vector<8x16xf32>
    %55 = vector.shape_cast %54 : vector<8x16xf32> to vector<8x16x1xf32>
    %56 = tpu.reciprocal %55 {approx = true} : vector<8x16x1xf32> -> vector<8x16x1xf32>
    %57 = vector.broadcast %56 : vector<8x16x1xf32> to vector<8x16x16xf32>
    %58 = arith.mulf %53, %57 : vector<8x16x16xf32>
    %59 = arith.truncf %58 : vector<8x16x16xf32> to vector<8x16x16xbf16>
    %cst_29 = arith.constant dense<0.000000e+00> : vector<8x16x8xf32>
    %60 = tpu.matmul %59, %24, %cst_29 {dimension_numbers = #tpu.dot_dimension_numbers<[2], [1], [1], [2], [0, 0, 0, 1, 1, 2], [0], [0]>} : vector<8x16x16xbf16>, vector<8x16x8xbf16>, vector<8x16x8xf32> -> vector<8x16x8xf32>
    %61 = vector.shape_cast %60 : vector<8x16x8xf32> to vector<128x8xf32>
    %c0_30 = arith.constant 0 : index
    %c0_31 = arith.constant 0 : index
    %62 = vector.load %arg13[%c0_30, %c0_31] : memref<128x32xf32, #tpu.memory_space<vmem>>, vector<128x8xf32>
    tpu.vector_store %arg13[%c0_30, %c0_31], %61 {strides = array<i32>} : memref<128x32xf32, #tpu.memory_space<vmem>>, vector<128x8xf32>,
    %63 = vector.extract_strided_slice %10 {offsets = [0, 8], sizes = [128, 8], strides = [1, 1]} : vector<128x32xf32> to vector<128x8xf32>
    %64 = vector.shape_cast %63 : vector<128x8xf32> to vector<8x16x8xf32>
    %65 = vector.extract_strided_slice %12 {offsets = [0, 8], sizes = [128, 8], strides = [1, 1]} : vector<128x32xf32> to vector<128x8xf32>
    %66 = vector.shape_cast %65 : vector<128x8xf32> to vector<8x16x8xf32>
    %67 = vector.extract_strided_slice %18 {offsets = [0, 8], sizes = [128, 8], strides = [1, 1]} : vector<128x32xbf16> to vector<128x8xbf16>
    %68 = vector.shape_cast %67 : vector<128x8xbf16> to vector<8x16x8xbf16>
    %69 = arith.mulf %64, %64 : vector<8x16x8xf32>
    %cst_32 = arith.constant dense<0.000000e+00> : vector<8x16xf32>
    %70 = vector.multi_reduction <add>, %69, %cst_32 [2] : vector<8x16x8xf32> to vector<8x16xf32>
    %71 = vector.shape_cast %70 : vector<8x16xf32> to vector<8x16x1xf32>
    %72 = math.sqrt %71 : vector<8x16x1xf32>
    %cst_33 = arith.constant 9.99999996E-13 : f32
    %73 = vector.broadcast %cst_33 : f32 to vector<8x16x1xf32>
    %74 = arith.maximumf %72, %73 : vector<8x16x1xf32>
    %75 = vector.broadcast %74 : vector<8x16x1xf32> to vector<8x16x8xf32>
    %76 = arith.divf %64, %75 : vector<8x16x8xf32>
    %77 = arith.mulf %66, %66 : vector<8x16x8xf32>
    %cst_34 = arith.constant dense<0.000000e+00> : vector<8x16xf32>
    %78 = vector.multi_reduction <add>, %77, %cst_34 [2] : vector<8x16x8xf32> to vector<8x16xf32>
    %79 = vector.shape_cast %78 : vector<8x16xf32> to vector<8x16x1xf32>
    %80 = math.sqrt %79 : vector<8x16x1xf32>
    %cst_35 = arith.constant 9.99999996E-13 : f32
    %81 = vector.broadcast %cst_35 : f32 to vector<8x16x1xf32>
    %82 = arith.maximumf %80, %81 : vector<8x16x1xf32>
    %83 = vector.broadcast %82 : vector<8x16x1xf32> to vector<8x16x8xf32>
    %84 = arith.divf %66, %83 : vector<8x16x8xf32>
    %c1 = arith.constant 1 : index
    %85 = memref.load %arg8[%c1] : memref<4xf32, #tpu.memory_space<smem>>
    %86 = vector.broadcast %85 : f32 to vector<8x16x8xf32>
    %87 = arith.mulf %76, %86 : vector<8x16x8xf32>
    %cst_36 = arith.constant dense<0.000000e+00> : vector<8x16x16xf32>
    %88 = tpu.matmul %87, %84, %cst_36 {dimension_numbers = #tpu.dot_dimension_numbers<[2], [2], [1], [1], [0, 0, 0, 1, 1, 1], [0], [0]>} : vector<8x16x8xf32>, vector<8x16x8xf32>, vector<8x16x16xf32> -> vector<8x16x16xf32>
    %c1_37 = arith.constant 1 : index
    %c0_38 = arith.constant 0 : index
    %c0_39 = arith.constant 0 : index
    %c0_40 = arith.constant 0 : index
    %89 = vector.load %arg9[%c1_37, %c0_38, %c0_39, %c0_40] : memref<4x1x16x16xf32, #tpu.memory_space<vmem>>, vector<1x1x16x16xf32>
    %90 = vector.shape_cast %89 : vector<1x1x16x16xf32> to vector<1x16x16xf32>
    %91 = vector.broadcast %90 : vector<1x16x16xf32> to vector<8x16x16xf32>
    %92 = arith.addf %88, %91 : vector<8x16x16xf32>
    %cst_41 = arith.constant dense<0xFF800000> : vector<8x16xf32>
    %93 = vector.multi_reduction <maximumf>, %92, %cst_41 [2] : vector<8x16x16xf32> to vector<8x16xf32>
    %94 = vector.shape_cast %93 : vector<8x16xf32> to vector<8x16x1xf32>
    %95 = vector.broadcast %94 : vector<8x16x1xf32> to vector<8x16x16xf32>
    %96 = arith.subf %92, %95 : vector<8x16x16xf32>
    %97 = math.exp %96 : vector<8x16x16xf32>
    %cst_42 = arith.constant dense<0.000000e+00> : vector<8x16xf32>
    %98 = vector.multi_reduction <add>, %97, %cst_42 [2] : vector<8x16x16xf32> to vector<8x16xf32>
    %99 = vector.shape_cast %98 : vector<8x16xf32> to vector<8x16x1xf32>
    %100 = tpu.reciprocal %99 {approx = true} : vector<8x16x1xf32> -> vector<8x16x1xf32>
    %101 = vector.broadcast %100 : vector<8x16x1xf32> to vector<8x16x16xf32>
    %102 = arith.mulf %97, %101 : vector<8x16x16xf32>
    %103 = arith.truncf %102 : vector<8x16x16xf32> to vector<8x16x16xbf16>
    %cst_43 = arith.constant dense<0.000000e+00> : vector<8x16x8xf32>
    %104 = tpu.matmul %103, %68, %cst_43 {dimension_numbers = #tpu.dot_dimension_numbers<[2], [1], [1], [2], [0, 0, 0, 1, 1, 2], [0], [0]>} : vector<8x16x16xbf16>, vector<8x16x8xbf16>, vector<8x16x8xf32> -> vector<8x16x8xf32>
    %105 = vector.shape_cast %104 : vector<8x16x8xf32> to vector<128x8xf32>
    %c0_44 = arith.constant 0 : index
    %c8 = arith.constant 8 : index
    %106 = vector.load %arg13[%c0_44, %c8] : memref<128x32xf32, #tpu.memory_space<vmem>>, vector<128x8xf32>
    tpu.vector_store %arg13[%c0_44, %c8], %105 {strides = array<i32>} : memref<128x32xf32, #tpu.memory_space<vmem>>, vector<128x8xf32>,
    %107 = vector.extract_strided_slice %10 {offsets = [0, 16], sizes = [128, 8], strides = [1, 1]} : vector<128x32xf32> to vector<128x8xf32>
    %108 = vector.shape_cast %107 : vector<128x8xf32> to vector<8x16x8xf32>
    %109 = vector.extract_strided_slice %12 {offsets = [0, 16], sizes = [128, 8], strides = [1, 1]} : vector<128x32xf32> to vector<128x8xf32>
    %110 = vector.shape_cast %109 : vector<128x8xf32> to vector<8x16x8xf32>
    %111 = vector.extract_strided_slice %18 {offsets = [0, 16], sizes = [128, 8], strides = [1, 1]} : vector<128x32xbf16> to vector<128x8xbf16>
    %112 = vector.shape_cast %111 : vector<128x8xbf16> to vector<8x16x8xbf16>
    %113 = arith.mulf %108, %108 : vector<8x16x8xf32>
    %cst_45 = arith.constant dense<0.000000e+00> : vector<8x16xf32>
    %114 = vector.multi_reduction <add>, %113, %cst_45 [2] : vector<8x16x8xf32> to vector<8x16xf32>
    %115 = vector.shape_cast %114 : vector<8x16xf32> to vector<8x16x1xf32>
    %116 = math.sqrt %115 : vector<8x16x1xf32>
    %cst_46 = arith.constant 9.99999996E-13 : f32
    %117 = vector.broadcast %cst_46 : f32 to vector<8x16x1xf32>
    %118 = arith.maximumf %116, %117 : vector<8x16x1xf32>
    %119 = vector.broadcast %118 : vector<8x16x1xf32> to vector<8x16x8xf32>
    %120 = arith.divf %108, %119 : vector<8x16x8xf32>
    %121 = arith.mulf %110, %110 : vector<8x16x8xf32>
    %cst_47 = arith.constant dense<0.000000e+00> : vector<8x16xf32>
    %122 = vector.multi_reduction <add>, %121, %cst_47 [2] : vector<8x16x8xf32> to vector<8x16xf32>
    %123 = vector.shape_cast %122 : vector<8x16xf32> to vector<8x16x1xf32>
    %124 = math.sqrt %123 : vector<8x16x1xf32>
    %cst_48 = arith.constant 9.99999996E-13 : f32
    %125 = vector.broadcast %cst_48 : f32 to vector<8x16x1xf32>
    %126 = arith.maximumf %124, %125 : vector<8x16x1xf32>
    %127 = vector.broadcast %126 : vector<8x16x1xf32> to vector<8x16x8xf32>
    %128 = arith.divf %110, %127 : vector<8x16x8xf32>
    %c2 = arith.constant 2 : index
    %129 = memref.load %arg8[%c2] : memref<4xf32, #tpu.memory_space<smem>>
    %130 = vector.broadcast %129 : f32 to vector<8x16x8xf32>
    %131 = arith.mulf %120, %130 : vector<8x16x8xf32>
    %cst_49 = arith.constant dense<0.000000e+00> : vector<8x16x16xf32>
    %132 = tpu.matmul %131, %128, %cst_49 {dimension_numbers = #tpu.dot_dimension_numbers<[2], [2], [1], [1], [0, 0, 0, 1, 1, 1], [0], [0]>} : vector<8x16x8xf32>, vector<8x16x8xf32>, vector<8x16x16xf32> -> vector<8x16x16xf32>
    %c2_50 = arith.constant 2 : index
    %c0_51 = arith.constant 0 : index
    %c0_52 = arith.constant 0 : index
    %c0_53 = arith.constant 0 : index
    %133 = vector.load %arg9[%c2_50, %c0_51, %c0_52, %c0_53] : memref<4x1x16x16xf32, #tpu.memory_space<vmem>>, vector<1x1x16x16xf32>
    %134 = vector.shape_cast %133 : vector<1x1x16x16xf32> to vector<1x16x16xf32>
    %135 = vector.broadcast %134 : vector<1x16x16xf32> to vector<8x16x16xf32>
    %136 = arith.addf %132, %135 : vector<8x16x16xf32>
    %cst_54 = arith.constant dense<0xFF800000> : vector<8x16xf32>
    %137 = vector.multi_reduction <maximumf>, %136, %cst_54 [2] : vector<8x16x16xf32> to vector<8x16xf32>
    %138 = vector.shape_cast %137 : vector<8x16xf32> to vector<8x16x1xf32>
    %139 = vector.broadcast %138 : vector<8x16x1xf32> to vector<8x16x16xf32>
    %140 = arith.subf %136, %139 : vector<8x16x16xf32>
    %141 = math.exp %140 : vector<8x16x16xf32>
    %cst_55 = arith.constant dense<0.000000e+00> : vector<8x16xf32>
    %142 = vector.multi_reduction <add>, %141, %cst_55 [2] : vector<8x16x16xf32> to vector<8x16xf32>
    %143 = vector.shape_cast %142 : vector<8x16xf32> to vector<8x16x1xf32>
    %144 = tpu.reciprocal %143 {approx = true} : vector<8x16x1xf32> -> vector<8x16x1xf32>
    %145 = vector.broadcast %144 : vector<8x16x1xf32> to vector<8x16x16xf32>
    %146 = arith.mulf %141, %145 : vector<8x16x16xf32>
    %147 = arith.truncf %146 : vector<8x16x16xf32> to vector<8x16x16xbf16>
    %cst_56 = arith.constant dense<0.000000e+00> : vector<8x16x8xf32>
    %148 = tpu.matmul %147, %112, %cst_56 {dimension_numbers = #tpu.dot_dimension_numbers<[2], [1], [1], [2], [0, 0, 0, 1, 1, 2], [0], [0]>} : vector<8x16x16xbf16>, vector<8x16x8xbf16>, vector<8x16x8xf32> -> vector<8x16x8xf32>
    %149 = vector.shape_cast %148 : vector<8x16x8xf32> to vector<128x8xf32>
    %c0_57 = arith.constant 0 : index
    %c16 = arith.constant 16 : index
    %150 = vector.load %arg13[%c0_57, %c16] : memref<128x32xf32, #tpu.memory_space<vmem>>, vector<128x8xf32>
    tpu.vector_store %arg13[%c0_57, %c16], %149 {strides = array<i32>} : memref<128x32xf32, #tpu.memory_space<vmem>>, vector<128x8xf32>,
    %151 = vector.extract_strided_slice %10 {offsets = [0, 24], sizes = [128, 8], strides = [1, 1]} : vector<128x32xf32> to vector<128x8xf32>
    %152 = vector.shape_cast %151 : vector<128x8xf32> to vector<8x16x8xf32>
    %153 = vector.extract_strided_slice %12 {offsets = [0, 24], sizes = [128, 8], strides = [1, 1]} : vector<128x32xf32> to vector<128x8xf32>
    %154 = vector.shape_cast %153 : vector<128x8xf32> to vector<8x16x8xf32>
    %155 = vector.extract_strided_slice %18 {offsets = [0, 24], sizes = [128, 8], strides = [1, 1]} : vector<128x32xbf16> to vector<128x8xbf16>
    %156 = vector.shape_cast %155 : vector<128x8xbf16> to vector<8x16x8xbf16>
    %157 = arith.mulf %152, %152 : vector<8x16x8xf32>
    %cst_58 = arith.constant dense<0.000000e+00> : vector<8x16xf32>
    %158 = vector.multi_reduction <add>, %157, %cst_58 [2] : vector<8x16x8xf32> to vector<8x16xf32>
    %159 = vector.shape_cast %158 : vector<8x16xf32> to vector<8x16x1xf32>
    %160 = math.sqrt %159 : vector<8x16x1xf32>
    %cst_59 = arith.constant 9.99999996E-13 : f32
    %161 = vector.broadcast %cst_59 : f32 to vector<8x16x1xf32>
    %162 = arith.maximumf %160, %161 : vector<8x16x1xf32>
    %163 = vector.broadcast %162 : vector<8x16x1xf32> to vector<8x16x8xf32>
    %164 = arith.divf %152, %163 : vector<8x16x8xf32>
    %165 = arith.mulf %154, %154 : vector<8x16x8xf32>
    %cst_60 = arith.constant dense<0.000000e+00> : vector<8x16xf32>
    %166 = vector.multi_reduction <add>, %165, %cst_60 [2] : vector<8x16x8xf32> to vector<8x16xf32>
    %167 = vector.shape_cast %166 : vector<8x16xf32> to vector<8x16x1xf32>
    %168 = math.sqrt %167 : vector<8x16x1xf32>
    %cst_61 = arith.constant 9.99999996E-13 : f32
    %169 = vector.broadcast %cst_61 : f32 to vector<8x16x1xf32>
    %170 = arith.maximumf %168, %169 : vector<8x16x1xf32>
    %171 = vector.broadcast %170 : vector<8x16x1xf32> to vector<8x16x8xf32>
    %172 = arith.divf %154, %171 : vector<8x16x8xf32>
    %c3 = arith.constant 3 : index
    %173 = memref.load %arg8[%c3] : memref<4xf32, #tpu.memory_space<smem>>
    %174 = vector.broadcast %173 : f32 to vector<8x16x8xf32>
    %175 = arith.mulf %164, %174 : vector<8x16x8xf32>
    %cst_62 = arith.constant dense<0.000000e+00> : vector<8x16x16xf32>
    %176 = tpu.matmul %175, %172, %cst_62 {dimension_numbers = #tpu.dot_dimension_numbers<[2], [2], [1], [1], [0, 0, 0, 1, 1, 1], [0], [0]>} : vector<8x16x8xf32>, vector<8x16x8xf32>, vector<8x16x16xf32> -> vector<8x16x16xf32>
    %c3_63 = arith.constant 3 : index
    %c0_64 = arith.constant 0 : index
    %c0_65 = arith.constant 0 : index
    %c0_66 = arith.constant 0 : index
    %177 = vector.load %arg9[%c3_63, %c0_64, %c0_65, %c0_66] : memref<4x1x16x16xf32, #tpu.memory_space<vmem>>, vector<1x1x16x16xf32>
    %178 = vector.shape_cast %177 : vector<1x1x16x16xf32> to vector<1x16x16xf32>
    %179 = vector.broadcast %178 : vector<1x16x16xf32> to vector<8x16x16xf32>
    %180 = arith.addf %176, %179 : vector<8x16x16xf32>
    %cst_67 = arith.constant dense<0xFF800000> : vector<8x16xf32>
    %181 = vector.multi_reduction <maximumf>, %180, %cst_67 [2] : vector<8x16x16xf32> to vector<8x16xf32>
    %182 = vector.shape_cast %181 : vector<8x16xf32> to vector<8x16x1xf32>
    %183 = vector.broadcast %182 : vector<8x16x1xf32> to vector<8x16x16xf32>
    %184 = arith.subf %180, %183 : vector<8x16x16xf32>
    %185 = math.exp %184 : vector<8x16x16xf32>
    %cst_68 = arith.constant dense<0.000000e+00> : vector<8x16xf32>
    %186 = vector.multi_reduction <add>, %185, %cst_68 [2] : vector<8x16x16xf32> to vector<8x16xf32>
    %187 = vector.shape_cast %186 : vector<8x16xf32> to vector<8x16x1xf32>
    %188 = tpu.reciprocal %187 {approx = true} : vector<8x16x1xf32> -> vector<8x16x1xf32>
    %189 = vector.broadcast %188 : vector<8x16x1xf32> to vector<8x16x16xf32>
    %190 = arith.mulf %185, %189 : vector<8x16x16xf32>
    %191 = arith.truncf %190 : vector<8x16x16xf32> to vector<8x16x16xbf16>
    %cst_69 = arith.constant dense<0.000000e+00> : vector<8x16x8xf32>
    %192 = tpu.matmul %191, %156, %cst_69 {dimension_numbers = #tpu.dot_dimension_numbers<[2], [1], [1], [2], [0, 0, 0, 1, 1, 2], [0], [0]>} : vector<8x16x16xbf16>, vector<8x16x8xbf16>, vector<8x16x8xf32> -> vector<8x16x8xf32>
    %193 = vector.shape_cast %192 : vector<8x16x8xf32> to vector<128x8xf32>
    %c0_70 = arith.constant 0 : index
    %c24 = arith.constant 24 : index
    %194 = vector.load %arg13[%c0_70, %c24] : memref<128x32xf32, #tpu.memory_space<vmem>>, vector<128x8xf32>
    tpu.vector_store %arg13[%c0_70, %c24], %193 {strides = array<i32>} : memref<128x32xf32, #tpu.memory_space<vmem>>, vector<128x8xf32>,
    %c0_71 = arith.constant 0 : index
    %c0_72 = arith.constant 0 : index
    %195 = vector.load %arg13[%c0_71, %c0_72] : memref<128x32xf32, #tpu.memory_space<vmem>>, vector<128x32xf32>
    %196 = arith.truncf %195 : vector<128x32xf32> to vector<128x32xbf16>
    %c0_73 = arith.constant 0 : index
    %c0_74 = arith.constant 0 : index
    %197 = vector.load %arg10[%c0_73, %c0_74] : memref<32x32xbf16, #tpu.memory_space<vmem>>, vector<32x32xbf16>
    %cst_75 = arith.constant dense<0.000000e+00> : vector<128x32xf32>
    %198 = tpu.matmul %196, %197, %cst_75 {dimension_numbers = #tpu.dot_dimension_numbers<[1], [0], [0], [1], [0, 0, 1, 1], [], []>} : vector<128x32xbf16>, vector<32x32xbf16>, vector<128x32xf32> -> vector<128x32xf32>
    %c0_76 = arith.constant 0 : index
    %c0_77 = arith.constant 0 : index
    %199 = vector.load %arg11[%c0_76, %c0_77] : memref<1x32xf32, #tpu.memory_space<vmem>>, vector<1x32xf32>
    %200 = vector.broadcast %199 : vector<1x32xf32> to vector<128x32xf32>
    %201 = arith.addf %198, %200 : vector<128x32xf32>
    %202 = vector.shape_cast %201 : vector<128x32xf32> to vector<8x16x32xf32>
    %c0_78 = arith.constant 0 : index
    %c0_79 = arith.constant 0 : index
    %c0_80 = arith.constant 0 : index
    %203 = vector.load %arg12[%c0_78, %c0_79, %c0_80] : memref<8x16x32xf32, #tpu.memory_space<vmem>>, vector<8x16x32xf32>
    tpu.vector_store %arg12[%c0_78, %c0_79, %c0_80], %202 {strides = array<i32>} : memref<8x16x32xf32, #tpu.memory_space<vmem>>, vector<8x16x32xf32>,
    return
  }
  func.func @transform_0(%arg0: i32) -> (i32, i32, i32) {
    %c0_i32 = arith.constant 0 : i32
    %c0_i32_0 = arith.constant 0 : i32
    %c0_i32_1 = arith.constant 0 : i32
    return %arg0, %c0_i32, %c0_i32_0 : i32, i32, i32
  }
  func.func @transform_1(%arg0: i32) -> (i32, i32, i32) {
    %c0_i32 = arith.constant 0 : i32
    %c0_i32_0 = arith.constant 0 : i32
    %c0_i32_1 = arith.constant 0 : i32
    return %arg0, %c0_i32, %c0_i32_0 : i32, i32, i32
  }
  func.func @transform_2(%arg0: i32) -> (i32, i32) {
    %c0_i32 = arith.constant 0 : i32
    %c0_i32_0 = arith.constant 0 : i32
    %c0_i32_1 = arith.constant 0 : i32
    return %c0_i32, %c0_i32_0 : i32, i32
  }
  func.func @transform_3(%arg0: i32) -> (i32, i32) {
    %c0_i32 = arith.constant 0 : i32
    %c0_i32_0 = arith.constant 0 : i32
    %c0_i32_1 = arith.constant 0 : i32
    return %c0_i32, %c0_i32_0 : i32, i32
  }
  func.func @transform_4(%arg0: i32) -> (i32, i32) {
    %c0_i32 = arith.constant 0 : i32
    %c0_i32_0 = arith.constant 0 : i32
    %c0_i32_1 = arith.constant 0 : i32
    return %c0_i32, %c0_i32_0 : i32, i32
  }
  func.func @transform_5(%arg0: i32) -> (i32, i32) {
    %c0_i32 = arith.constant 0 : i32
    %c0_i32_0 = arith.constant 0 : i32
    %c0_i32_1 = arith.constant 0 : i32
    return %c0_i32, %c0_i32_0 : i32, i32
  }
  func.func @transform_6(%arg0: i32) -> (i32, i32) {
    %c0_i32 = arith.constant 0 : i32
    %c0_i32_0 = arith.constant 0 : i32
    %c0_i32_1 = arith.constant 0 : i32
    return %c0_i32, %c0_i32_0 : i32, i32
  }
  func.func @transform_7(%arg0: i32) -> i32 {
    %c0_i32 = arith.constant 0 : i32
    %c0_i32_0 = arith.constant 0 : i32
    return %c0_i32 : i32
  }
  func.func @transform_8(%arg0: i32) -> (i32, i32, i32, i32) {
    %c0_i32 = arith.constant 0 : i32
    %c0_i32_0 = arith.constant 0 : i32
    %c0_i32_1 = arith.constant 0 : i32
    %c0_i32_2 = arith.constant 0 : i32
    %c0_i32_3 = arith.constant 0 : i32
    return %c0_i32, %c0_i32_0, %c0_i32_1, %c0_i32_2 : i32, i32, i32, i32
  }
  func.func @transform_9(%arg0: i32) -> (i32, i32) {
    %c0_i32 = arith.constant 0 : i32
    %c0_i32_0 = arith.constant 0 : i32
    %c0_i32_1 = arith.constant 0 : i32
    return %c0_i32, %c0_i32_0 : i32, i32
  }
  func.func @transform_10(%arg0: i32) -> (i32, i32) {
    %c0_i32 = arith.constant 0 : i32
    %c0_i32_0 = arith.constant 0 : i32
    %c0_i32_1 = arith.constant 0 : i32
    return %c0_i32, %c0_i32_0 : i32, i32
  }
  func.func @transform_11(%arg0: i32) -> (i32, i32, i32) {
    %c0_i32 = arith.constant 0 : i32
    %c0_i32_0 = arith.constant 0 : i32
    %c0_i32_1 = arith.constant 0 : i32
    return %arg0, %c0_i32, %c0_i32_0 : i32, i32, i32
  }
}

</mosaic_0001>

<bundles_post_ra>
// kernel: sub.8
= control target key start
LH: loop header
LB: loop body
LE: loop exit
PB: predicated region body
PF: predicated region fallthrough
CT: control target
= control target key end

     0   :  { %s29_s10 = smov 3  ;;  %s45_s11 = smov 12   ;;  %vm12_vm0 = vcmask 31744   ;;  %vm19_vm1 = vcmask 130144   ;;  %vm26_vm2 = vcmask 97344   ;;  %vm33_vm3 = vcmask 64544   ;;  %s67_s0 = inlined_call_operand.vmem [shape: s32[2,4,4], index: 0, kind: input, shape index: {}]   ;;  %s68_s1 = inlined_call_operand.vmem [shape: s32[2,16], index: 1, kind: output, shape index: {}]  }
   0x1   :  { %v41_v0 = vld [vmem:[%s67_s0 + $0x4] sm:$0xf]  ;;  %v8_v1 = vld [vmem:[%s67_s0] sm:$0xf]  ;;  %s15_s0 = smov 3  ;;  %s46_s12 = smov 4  }
   0x2   :  { %7 = vst [vmem:[#allocation1 + $0x8] sm:$0xf] %v41_v0  ;;  %s22_s13 = smov 3  ;;  %s47_s14 = smov 8  }
   0x3   :  { %9 = vst [vmem:[#allocation1] sm:$0xf] %v8_v1  ;;  %s10_s15 = smov 3 }
   0xa   :  { %v16_v2 = vld [vmem:[#allocation1 + $0x3] ss:$8 sm:%s15_s0]   ;;  %v30_v3 = vld [vmem:[#allocation1 + $0x1] ss:$8 sm:%s29_s10]   ;;  %v23_v4 = vld [vmem:[#allocation1 + $0x2] ss:$8 sm:%s22_s13]  }
   0xb   :  { %17 = vrot.lane.b32.xlu0 %v16_v2, %s45_s11  ;;  %31 = vrot.lane.b32.xlu1 %v30_v3, %s46_s12  ;;  %v11_v5 = vld [vmem:[#allocation1] ss:$8 sm:%s10_s15]  }
   0xc   :  { %13 = vst.msk [vmem:[#allocation0] sm:$0x3] %vm12_vm0, %v11_v5  }
  0x13   :  { %24 = vrot.lane.b32.xlu0 %v23_v4, %s47_s14 }
  0x7d   :  { %v18_v6 = vpop.permute.xlu0 %17   ;;  %v32_v7 = vpop.permute.xlu1 %31  }
  0x7e   :  { %20 = vst.msk [vmem:[#allocation0] sm:$0x3] %vm19_vm1, %v18_v6  }
  0x85   :  { %v25_v8 = vpop.permute.xlu0 %24  }
  0x86   :  { %27 = vst.msk [vmem:[#allocation0] sm:$0x3] %vm26_vm2, %v25_v8  }
  0x87   :  { %34 = vst.msk [vmem:[#allocation0] sm:$0x3] %vm33_vm3, %v32_v7  }
  0x8e   :  { %v37_v9 = vld [vmem:[#allocation0] sm:$0x3] }
  0x8f   :  { %40 = vst [vmem:[%s68_s1] sm:$0x3] %v37_v9 }

// kernel: window_attention_forward.1
= control target key start
LH: loop header
LB: loop body
LE: loop exit
PB: predicated region body
PF: predicated region fallthrough
CT: control target
= control target key end

     0   :  { %16 = vsyncpa [#allocation5], 0  ;;  %s15673_s0 = inlined_call_operand.vmem [shape: f32[8,16,32], index: 0, kind: input, shape index: {}]   ;;  %s15674_s1 = inlined_call_operand.vmem [shape: f32[8,16,32], index: 1, kind: input, shape index: {}]   ;;  %s15675_s2 = inlined_call_operand.vmem [shape: bf16[32,32], index: 2, kind: input, shape index: {}]   ;;  %s15676_s3 = inlined_call_operand.vmem [shape: bf16[32,32], index: 3, kind: input, shape index: {}]   ;;  %s15677_s4 = inlined_call_operand.vmem [shape: bf16[32,32], index: 4, kind: input, shape index: {}]   ;;  %s15678_s5 = inlined_call_operand.vmem [shape: f32[1,32], index: 5, kind: input, shape index: {}]   ;;  %s15679_s6 = inlined_call_operand.vmem [shape: f32[1,32], index: 6, kind: input, shape index: {}]   ;;  %s15680_s7 = inlined_call_operand.vmem [shape: f32[4], index: 7, kind: input, shape index: {}]   ;;  %s15681_s8 = inlined_call_operand.vmem [shape: f32[4,1,16,16], index: 8, kind: input, shape index: {}]   ;;  %s15682_s9 = inlined_call_operand.vmem [shape: bf16[32,32], index: 9, kind: input, shape index: {}]   ;;  %s15683_s10 = inlined_call_operand.vmem [shape: f32[1,32], index: 10, kind: input, shape index: {}]   ;;  %s15684_s11 = inlined_call_operand.hbm [shape: f32[8,16,32], index: 11, kind: output, shape index: {}]  }
   0x1   :  { %17 = vsyncpa [#allocation4], 0  ;;  %s37_s19 = sshll.u32 %s15680_s7, 4  ;;  %s9158_s20 = smov [#allocation3]   ;;  %s38_s19 = int_to_ptr.vmem [resolvable:$true] %s37_s19 }
   0x2   :  { %40 = dma.vmem_to_smem %s38_s19, 16, %s9158_s20, [#allocation5]  }
   0x3   :  { %9154 = dma.done.wait [#allocation5], 16  }
   0x4   :  { %9155 = vsyncadd [#allocation5], 4294967280 }
   0x5   :  { %51 = sfence }
   0x6   :  { %v8323_v0 = vld [vmem:[%s15675_s2 + $0x8] sm:$0xff]  ;;  %v8322_v1 = vld [vmem:[%s15675_s2] sm:$0xff]  ;;  %vm121_vm0 = vcmask 261120   ;;  %v55_v14 = vld [vmem:[%s15673_s0 + $0x10] sm:$0xff]  ;;  %vm385_vm1 = vcmask 64512   ;;  %s10958_s7 = sld [smem:[#allocation3 + $0x1]] }
   0x7   :  { %v53_v2 = vld [vmem:[%s15673_s0] sm:$0xff]  ;;  %v54_v3 = vld [vmem:[%s15673_s0 + $0x8] sm:$0xff]  ;;  %152 = vmatpush.bf16.msra.mxu0 %v8323_v0  ;;  %8330 = vmatpush.bf16.msra.mxu1 %v8323_v0  ;;  %v56_v15 = vld [vmem:[%s15673_s0 + $0x18] sm:$0xff]  ;;  %s9160_s28 = smov 112   ;;  %s9163_s12 = smov 16  }
   0x8   :  { %v57_v4 = vld [vmem:[%s15673_s0 + $0x20] sm:$0xff]  ;;  %v58_v5 = vld [vmem:[%s15673_s0 + $0x28] sm:$0xff]  ;;  %8332 = vmatpush.bf16.msra.mxu3 %v8323_v0  ;;  %8331 = vmatpush.bf16.msra.mxu2 %v8323_v0  ;;  %v69_v10 = vpack.c.bf16 %v54_v3, %v53_v2  ;;  %v59_v16 = vld [vmem:[%s15673_s0 + $0x30] sm:$0xff]  ;;  %v70_v20 = vpack.c.bf16 %v56_v15, %v55_v14  ;;  %s9164_s13 = smov 24   ;;  %s9166_s19 = smov 128  }
   0x9   :  { %v65_v6 = vld [vmem:[%s15673_s0 + $0x60] sm:$0xff]  ;;  %v66_v7 = vld [vmem:[%s15673_s0 + $0x68] sm:$0xff]  ;;  %v71_v11 = vpack.c.bf16 %v58_v5, %v57_v4  ;;  %v60_v17 = vld [vmem:[%s15673_s0 + $0x38] sm:$0xff] }
   0xa   :  { %v61_v8 = vld [vmem:[%s15673_s0 + $0x40] sm:$0xff]  ;;  %v62_v9 = vld [vmem:[%s15673_s0 + $0x48] sm:$0xff]  ;;  %v75_v12 = vpack.c.bf16 %v66_v7, %v65_v6  ;;  %v63_v18 = vld [vmem:[%s15673_s0 + $0x50] sm:$0xff]  ;;  %v72_v21 = vpack.c.bf16 %v60_v17, %v59_v16 }
   0xb   :  { %153 = vmatpush.bf16.msra.mxu0 %v8322_v1  ;;  %8333 = vmatpush.bf16.msra.mxu1 %v8322_v1  ;;  %v73_v13 = vpack.c.bf16 %v62_v9, %v61_v8  ;;  %v64_v19 = vld [vmem:[%s15673_s0 + $0x58] sm:$0xff]  ;;  %v67_v23 = vld [vmem:[%s15673_s0 + $0x70] sm:$0xff]  ;;  %v8325_v26 = vld [vmem:[%s15676_s3 + $0x8] sm:$0xff] }
   0xc   :  { %8335 = vmatpush.bf16.msra.mxu3 %v8322_v1  ;;  %8334 = vmatpush.bf16.msra.mxu2 %v8322_v1  ;;  %v74_v22 = vpack.c.bf16 %v64_v19, %v63_v18  ;;  %v68_v24 = vld [vmem:[%s15673_s0 + $0x78] sm:$0xff]  ;;  %v8324_v27 = vld [vmem:[%s15676_s3] sm:$0xff]  ;;  %v78_v30 = vld [vmem:[%s15674_s1 + $0x8] sm:$0xff]  ;;  %s9159_s3 = smov 120  }
   0xd   :  { %v76_v25 = vpack.c.bf16 %v68_v24, %v67_v23  ;;  %v9301_v28 = vld [vmem:[%s15678_s5] ss:$0 sm:$0xff]  ;;  %v79_v51 = vld [vmem:[%s15674_s1 + $0x10] sm:$0xff]  ;;  %v80_v52 = vld [vmem:[%s15674_s1 + $0x18] sm:$0xff]  ;;  %s9161_s5 = smov 104  }
   0xe   :  { %8097 = vmatmul.msk.bf16.vlgmr.msra.gmra.mxu0 %vm121_vm0, %v69_v10  ;;  %8099 = vmatmul.msk.bf16.vlgmr.msra.gmra.mxu1 %vm121_vm0, %v71_v11  ;;  %v77_v29 = vld [vmem:[%s15674_s1] sm:$0xff]  ;;  %v9375_v54 = vpack.c.bf16 %v80_v52, %v79_v51  ;;  %v83_v15 = vld [vmem:[%s15674_s1 + $0x30] sm:$0xff]  ;;  %v84_v16 = vld [vmem:[%s15674_s1 + $0x38] sm:$0xff] }
   0xf   :  { %8103 = vmatmul.msk.bf16.vlgmr.msra.gmra.mxu3 %vm121_vm0, %v75_v12  ;;  %8101 = vmatmul.msk.bf16.vlgmr.msra.gmra.mxu2 %vm121_vm0, %v73_v13  ;;  %v9309_v31 = vpack.c.bf16 %v78_v30, %v77_v29  ;;  %v81_v12 = vld [vmem:[%s15674_s1 + $0x20] sm:$0xff]  ;;  %v82_v13 = vld [vmem:[%s15674_s1 + $0x28] sm:$0xff]  ;;  %v9450_v17 = vpack.c.bf16 %v84_v16, %v83_v15 }
  0x10   :  { %241 = vmatpush.bf16.msrb.mxu1 %v8325_v26  ;;  %15866 = vst [vmem:[#allocation22_spill] sm:$0xff] %v9375_v54  ;;  %v9434_v14 = vpack.c.bf16 %v82_v13, %v81_v12  ;;  %v85_v24 = vld [vmem:[%s15674_s1 + $0x40] sm:$0xff] }
  0x11   :  { %15853 = vst [vmem:[#allocation9_spill] sm:$0xff] %v9309_v31 }
  0x12   :  { %15877 = vst [vmem:[#allocation33_spill] sm:$0xff] %v9434_v14 }
  0x13   :  { %15878 = vst [vmem:[#allocation34_spill] sm:$0xff] %v9450_v17 }
  0x14   :  { %242 = vmatpush.bf16.msrb.mxu1 %v8324_v27 }
  0x1e   :  { %8098 = vmatmul.msk.bf16.gmra.mxu0 %vm121_vm0, %v70_v20  ;;  %8100 = vmatmul.msk.bf16.gmra.mxu1 %vm121_vm0, %v72_v21 }
  0x1f   :  { %8102 = vmatmul.msk.bf16.gmra.mxu2 %vm121_vm0, %v74_v22  ;;  %8104 = vmatmul.msk.bf16.gmra.mxu3 %vm121_vm0, %v76_v25  ;;  %v86_v25 = vld [vmem:[%s15674_s1 + $0x48] sm:$0xff] }
  0x20   :  { %v9476_v27 = vpack.c.bf16 %v86_v25, %v85_v24  ;;  %v90_v24 = vld [vmem:[%s15674_s1 + $0x68] sm:$0xff] }
  0x22   :  { %15883 = vst [vmem:[#allocation39_spill] sm:$0xff] %v9476_v27 }
  0x2e   :  { %8113 = vmatmul.msk.bf16.vlgmr.msrb.gmra.mxu1 %vm121_vm0, %v9309_v31 }
  0x3e   :  { %8114 = vmatmul.msk.bf16.gmra.mxu1 %vm121_vm0, %v9375_v54 }
  0x4e   :  { %8115 = vmatmul.msk.bf16.gmra.mxu1 %vm121_vm0, %v9434_v14 }
  0x5e   :  { %8116 = vmatmul.msk.bf16.gmra.mxu1 %vm121_vm0, %v9450_v17 }
  0x6e   :  { %8117 = vmatmul.msk.bf16.gmra.mxu1 %vm121_vm0, %v9476_v27 }
  0x8b   :  { %v155_v32 = vpop.f32.mrf.mxu0  ;;  %v165_v33 = vpop.f32.mrf.mxu1 }
  0x8c   :  { %v9312_v34 = vadd.f32 %v9301_v28, %v155_v32  ;;  %v9315_v35 = vadd.f32 %v9301_v28, %v165_v33 }
  0x8e   :  { %15854 = vst [vmem:[#allocation10_spill] sm:$0xff] %v9312_v34  ;;  %v9321_v36 = vmul.f32 %v9312_v34, %v9312_v34  ;;  %v9325_v37 = vmul.f32 %v9315_v35, %v9315_v35 }
  0x8f   :  { %15855 = vst [vmem:[#allocation11_spill] sm:$0xff] %v9315_v35 }
  0x90   :  { %15856 = vst [vmem:[#allocation12_spill] sm:$0xff] %v9321_v36  ;;  %2143 = vrot.lane.b32.xlu1 %v9321_v36, %s9159_s3  ;;  %v398_v38 = vsel %vm385_vm1, %v9325_v37, 0.0  ;;  %v386_v39 = vsel %vm385_vm1, %v9321_v36, 0.0 }
  0x91   :  { %15857 = vst [vmem:[#allocation13_spill] sm:$0xff] %v9325_v37  ;;  %399 = vadd.xlane.f32.xlu2 %v398_v38  ;;  %387 = vadd.xlane.f32.xlu0 %v386_v39 }
  0x92   :  { %v185_v40 = vpop.f32.mrf.mxu3  ;;  %v175_v43 = vpop.f32.mrf.mxu2 }
  0x93   :  { %v9339_v44 = vadd.f32 %v9301_v28, %v175_v43  ;;  %v9348_v46 = vadd.f32 %v9301_v28, %v185_v40  ;;  %v167_v48 = vpop.f32.mrf.mxu1  ;;  %v157_v55 = vpop.f32.mrf.mxu0 }
  0x94   :  { %v9361_v50 = vadd.f32 %v9301_v28, %v167_v48  ;;  %v9391_v60 = vadd.f32 %v9301_v28, %v157_v55 }
  0x95   :  { %15859 = vst [vmem:[#allocation15_spill] sm:$0xff] %v9339_v44  ;;  %v9352_v47 = vmul.f32 %v9339_v44, %v9339_v44  ;;  %v9358_v49 = vmul.f32 %v9348_v46, %v9348_v46 }
  0x96   :  { %15861 = vst [vmem:[#allocation17_spill] sm:$0xff] %v9348_v46  ;;  %v9373_v53 = vmul.f32 %v9361_v50, %v9361_v50  ;;  %v9397_v63 = vmul.f32 %v9391_v60, %v9391_v60 }
  0x97   :  { %15862 = vst [vmem:[#allocation18_spill] sm:$0xff] %v9352_v47  ;;  %v410_v62 = vsel %vm385_vm1, %v9352_v47, 0.0  ;;  %v422_v4 = vsel %vm385_vm1, %v9358_v49, 0.0 }
  0x98   :  { %2151 = vrot.lane.b32.xlu1 %v9325_v37, %s9159_s3  ;;  %15863 = vst [vmem:[#allocation19_spill] sm:$0xff] %v9358_v49  ;;  %v389_v1 = vsel %vm385_vm1, %v9397_v63, 0.0  ;;  %v401_v30 = vsel %vm385_vm1, %v9373_v53, 0.0 }
  0x99   :  { %15864 = vst [vmem:[#allocation20_spill] sm:$0xff] %v9361_v50 }
  0x9a   :  { %v187_v41 = vpop.f32.mrf.mxu3  ;;  %15865 = vst [vmem:[#allocation21_spill] sm:$0xff] %v9373_v53  ;;  %v177_v61 = vpop.f32.mrf.mxu2 }
  0x9b   :  { %v9336_v42 = vadd.f32 %v9301_v28, %v187_v41  ;;  %v160_v56 = vpop.f32.mrf.mxu0  ;;  %15869 = vst [vmem:[#allocation25_spill] sm:$0xff] %v9391_v60  ;;  %v9400_v0 = vadd.f32 %v9301_v28, %v177_v61  ;;  %v170_v2 = vpop.f32.mrf.mxu1 }
  0x9c   :  { %v9382_v57 = vadd.f32 %v9301_v28, %v160_v56  ;;  %15870 = vst [vmem:[#allocation26_spill] sm:$0xff] %v9397_v63  ;;  %v9462_v21 = vadd.f32 %v9301_v28, %v170_v2 }
  0x9d   :  { %15858 = vst [vmem:[#allocation14_spill] sm:$0xff] %v9336_v42  ;;  %v9343_v45 = vmul.f32 %v9336_v42, %v9336_v42  ;;  %v9408_v5 = vmul.f32 %v9400_v0, %v9400_v0 }
  0x9e   :  { %15867 = vst [vmem:[#allocation23_spill] sm:$0xff] %v9382_v57  ;;  %v9386_v58 = vmul.f32 %v9382_v57, %v9382_v57  ;;  %v9474_v26 = vmul.f32 %v9462_v21, %v9462_v21 }
  0x9f   :  { %15860 = vst [vmem:[#allocation16_spill] sm:$0xff] %v9343_v45  ;;  %v413_v7 = vsel %vm385_vm1, %v9408_v5, 0.0  ;;  %v425_v12 = vsel %vm385_vm1, %v9343_v45, 0.0 }
  0xa0   :  { %2169 = vrot.lane.b32.xlu1 %v9343_v45, %s9159_s3  ;;  %15868 = vst [vmem:[#allocation24_spill] sm:$0xff] %v9386_v58  ;;  %v392_v59 = vsel %vm385_vm1, %v9386_v58, 0.0  ;;  %v404_v33 = vsel %vm385_vm1, %v9474_v26, 0.0 }
  0xa1   :  { %15871 = vst [vmem:[#allocation27_spill] sm:$0xff] %v9400_v0 }
  0xa2   :  { %v180_v3 = vpop.f32.mrf.mxu2  ;;  %15872 = vst [vmem:[#allocation28_spill] sm:$0xff] %v9408_v5  ;;  %v190_v23 = vpop.f32.mrf.mxu3 }
  0xa3   :  { %v9411_v6 = vadd.f32 %v9301_v28, %v180_v3  ;;  %v172_v9 = vpop.f32.mrf.mxu1  ;;  %v162_v18 = vpop.f32.mrf.mxu0  ;;  %15881 = vst [vmem:[#allocation37_spill] sm:$0xff] %v9462_v21  ;;  %v9505_v52 = vadd.f32 %v9301_v28, %v190_v23  ;;  %v89_v23 = vld [vmem:[%s15674_s1 + $0x60] sm:$0xff] }
  0xa4   :  { %v9422_v10 = vadd.f32 %v9301_v28, %v172_v9  ;;  %v9455_v19 = vadd.f32 %v9301_v28, %v162_v18  ;;  %15882 = vst [vmem:[#allocation38_spill] sm:$0xff] %v9474_v26 }
  0xa5   :  { %2159 = vrot.lane.b32.xlu0 %v9352_v47, %s9159_s3  ;;  %15873 = vst [vmem:[#allocation29_spill] sm:$0xff] %v9411_v6  ;;  %v9417_v8 = vmul.f32 %v9411_v6, %v9411_v6 }
  0xa6   :  { %15875 = vst [vmem:[#allocation31_spill] sm:$0xff] %v9422_v10  ;;  %v9426_v11 = vmul.f32 %v9422_v10, %v9422_v10  ;;  %v9459_v20 = vmul.f32 %v9455_v19, %v9455_v19 }
  0xa7   :  { %15874 = vst [vmem:[#allocation30_spill] sm:$0xff] %v9417_v8  ;;  %v416_v9 = vsel %vm385_vm1, %v9417_v8, 0.0 }
  0xa8   :  { %15876 = vst [vmem:[#allocation32_spill] sm:$0xff] %v9426_v11  ;;  %v395_v22 = vsel %vm385_vm1, %v9459_v20, 0.0  ;;  %v407_v32 = vsel %vm385_vm1, %v9426_v11, 0.0 }
  0xa9   :  { %2167 = vrot.lane.b32.xlu2 %v9358_v49, %s9159_s3  ;;  %15879 = vst [vmem:[#allocation35_spill] sm:$0xff] %v9455_v19 }
  0xaa   :  { %15880 = vst [vmem:[#allocation36_spill] sm:$0xff] %v9459_v20  ;;  %v182_v29 = vpop.f32.mrf.mxu2  ;;  %v192_v40 = vpop.f32.mrf.mxu3 }
  0xab   :  { %v9487_v38 = vadd.f32 %v9301_v28, %v182_v29  ;;  %v9493_v41 = vpop.f32.mrf.mxu1  ;;  %v9498_v48 = vadd.f32 %v9301_v28, %v192_v40  ;;  %15889 = vst [vmem:[#allocation45_spill] sm:$0xff] %v9505_v52  ;;  %v9569_v29 = vpack.c.bf16 %v90_v24, %v89_v23 }
  0xac   :  { %15886 = vst [vmem:[#allocation42_spill] sm:$0xff] %v9493_v41 }
  0xad   :  { %2153 = vrot.lane.b32.xlu0 %v9373_v53, %s9159_s3  ;;  %15884 = vst [vmem:[#allocation40_spill] sm:$0xff] %v9487_v38  ;;  %v9491_v39 = vmul.f32 %v9487_v38, %v9487_v38  ;;  %v9502_v51 = vmul.f32 %v9498_v48, %v9498_v48 }
  0xae   :  { %15887 = vst [vmem:[#allocation43_spill] sm:$0xff] %v9498_v48 }
  0xaf   :  { %15885 = vst [vmem:[#allocation41_spill] sm:$0xff] %v9491_v39  ;;  %v419_v43 = vsel %vm385_vm1, %v9491_v39, 0.0  ;;  %v431_v55 = vsel %vm385_vm1, %v9502_v51, 0.0 }
  0xb0   :  { %15888 = vst [vmem:[#allocation44_spill] sm:$0xff] %v9502_v51 }
  0xb1   :  { %15897 = vst [vmem:[#allocation53_spill] sm:$0xff] %v9569_v29 }
  0xb3   :  { %v9509_v56 = vpop.f32.mrf.mxu1 }
  0xb4   :  { %15890 = vst [vmem:[#allocation46_spill] sm:$0xff] %v9509_v56  ;;  %v9517_v61 = vmul.f32 %v9509_v56, %v9509_v56 }
  0xb6   :  { %15892 = vst [vmem:[#allocation48_spill] sm:$0xff] %v9517_v61  ;;  %v901_v28 = vsel %vm385_vm1, %v9517_v61, 0.0 }
  0xbb   :  { %v9535_v3 = vpop.f32.mrf.mxu1 }
  0xbc   :  { %15894 = vst [vmem:[#allocation50_spill] sm:$0xff] %v9535_v3 }
  0xca   :  { %393 = vadd.xlane.f32.xlu1 %v392_v59  ;;  %v9513_v59 = vmul.f32 %v9505_v52, %v9505_v52 }
  0xcc   :  { %15891 = vst [vmem:[#allocation47_spill] sm:$0xff] %v9513_v59  ;;  %v428_v15 = vsel %vm385_vm1, %v9513_v59, 0.0 }
  0xd2   :  { %411 = vadd.xlane.f32.xlu2 %v410_v62  ;;  %v87_v62 = vld [vmem:[%s15674_s1 + $0x50] sm:$0xff] }
  0xd7   :  { %390 = vadd.xlane.f32.xlu0 %v389_v1  ;;  %v88_v1 = vld [vmem:[%s15674_s1 + $0x58] sm:$0xff] }
  0xd8   :  { %v9531_v2 = vpack.c.bf16 %v88_v1, %v87_v62 }
  0xda   :  { %423 = vadd.xlane.f32.xlu2 %v422_v4  ;;  %15893 = vst [vmem:[#allocation49_spill] sm:$0xff] %v9531_v2  ;;  %8118 = vmatmul.msk.bf16.gmra.mxu1 %vm121_vm0, %v9531_v2  ;;  %v9539_v4 = vmul.f32 %v9535_v3, %v9535_v3 }
  0xdc   :  { %15895 = vst [vmem:[#allocation51_spill] sm:$0xff] %v9539_v4  ;;  %v904_v25 = vsel %vm385_vm1, %v9539_v4, 0.0 }
  0xdf   :  { %414 = vadd.xlane.f32.xlu0 %v413_v7 }
  0xe3   :  { %2163 = vrot.lane.b32.xlu1 %v9417_v8, %s9159_s3 }
  0xea   :  { %8119 = vmatmul.msk.bf16.gmra.mxu1 %vm121_vm0, %v9569_v29 }
  0xeb   :  { %2157 = vrot.lane.b32.xlu1 %v9426_v11, %s9159_s3 }
  0xf2   :  { %2145 = vrot.lane.b32.xlu2 %v9397_v63, %s9159_s3 }
  0xf3   :  { %2147 = vrot.lane.b32.xlu0 %v9386_v58, %s9159_s3 }
 0x102   :  { %v9543_v7 = vpop.permute.xlu1 %2143 }
 0x104   :  { %v9621_v2 = vpop.xlane.xlu0 %387  ;;  %v9629_v14 = vpop.xlane.xlu2 %399 }
 0x105   :  { %vm441_vm8 = vcmp.eq.f32.partialorder %v9621_v2, inf  ;;  %vm443_vm9 = vcmp.eq.f32.partialorder %v9621_v2, 0.0 }
 0x10a   :  { %v9549_v13 = vpop.permute.xlu1 %2151 }
 0x112   :  { %v9553_v16 = vpop.permute.xlu1 %2169 }
 0x115   :  { %396 = vadd.xlane.f32.xlu1 %v395_v22 }
 0x11b   :  { %402 = vadd.xlane.f32.xlu2 %v401_v30  ;;  %v9571_v30 = vpop.f32.mrf.mxu1 }
 0x11c   :  { %15898 = vst [vmem:[#allocation54_spill] sm:$0xff] %v9571_v30 }
 0x11d   :  { %408 = vadd.xlane.f32.xlu1 %v407_v32  ;;  %405 = vadd.xlane.f32.xlu0 %v404_v33 }
 0x123   :  { %v9583_v33 = vpop.f32.mrf.mxu1 }
 0x124   :  { %15900 = vst [vmem:[#allocation56_spill] sm:$0xff] %v9583_v33 }
 0x125   :  { %420 = vadd.xlane.f32.xlu1 %v419_v43  ;;  %v9591_v43 = vmul.f32 %v9493_v41, %v9493_v41 }
 0x127   :  { %15901 = vst [vmem:[#allocation57_spill] sm:$0xff] %v9591_v43  ;;  %v898_v11 = vsel %vm385_vm1, %v9591_v43, 0.0 }
 0x12d   :  { %432 = vadd.xlane.f32.xlu1 %v431_v55  ;;  %v9593_v55 = vpop.f32.mrf.mxu1 }
 0x12e   :  { %15902 = vst [vmem:[#allocation58_spill] sm:$0xff] %v9593_v55 }
 0x131   :  { %2171 = vrot.lane.b32.xlu0 %v9513_v59, %s9159_s3 }
 0x133   :  { %2161 = vrot.lane.b32.xlu2 %v9408_v5, %s9159_s3  ;;  %v2168_v5 = vpop.permute.xlu2 %2167 }
 0x134   :  { %v2227_v42 = vsel %vm385_vm1, %v2168_v5, 0.0 }
 0x135   :  { %902 = vadd.xlane.f32.xlu1 %v901_v28  ;;  %v9599_v28 = vmul.f32 %v9593_v55, %v9593_v55 }
 0x137   :  { %15903 = vst [vmem:[#allocation59_spill] sm:$0xff] %v9599_v28 }
 0x13d   :  { %v9555_v18 = vpop.xlane.xlu1 %393 }
 0x13e   :  { %vm465_vm11 = vcmp.eq.f32.partialorder %v9555_v18, inf  ;;  %vm467_vm13 = vcmp.eq.f32.partialorder %v9555_v18, 0.0 }
 0x145   :  { %v9651_v47 = vpop.xlane.xlu2 %411 }
 0x14e   :  { %2707 = vrot.lane.b32.xlu1 %v9539_v4, %s9159_s3 }
 0x155   :  { %v9559_v22 = vpop.permute.xlu1 %2163 }
 0x156   :  { %15896 = vst [vmem:[#allocation52_spill] sm:$0xff] %v9559_v22 }
 0x15b   :  { %417 = vadd.xlane.f32.xlu0 %v416_v9  ;;  %v9607_v9 = vpop.f32.mrf.mxu1 }
 0x15c   :  { %426 = vadd.xlane.f32.xlu2 %v425_v12  ;;  %15904 = vst [vmem:[#allocation60_spill] sm:$0xff] %v9607_v9  ;;  %v9627_v45 = vmul.f32 %v9607_v9, %v9607_v9 }
 0x15d   :  { %v9579_v32 = vpop.permute.xlu1 %2157 }
 0x15e   :  { %15899 = vst [vmem:[#allocation55_spill] sm:$0xff] %v9579_v32 }
 0x15f   :  { %15908 = vst [vmem:[#allocation64_spill] sm:$0xff] %v9627_v45 }
 0x163   :  { %429 = vadd.xlane.f32.xlu0 %v428_v15  ;;  %v9613_v15 = vmul.f32 %v9571_v30, %v9571_v30  ;;  %v9615_v23 = vpop.f32.mrf.mxu1 }
 0x164   :  { %15906 = vst [vmem:[#allocation62_spill] sm:$0xff] %v9615_v23 }
 0x165   :  { %15905 = vst [vmem:[#allocation61_spill] sm:$0xff] %v9613_v15 }
 0x174   :  { %2155 = vrot.lane.b32.xlu2 %v9474_v26, %s9159_s3 }
 0x177   :  { %2165 = vrot.lane.b32.xlu0 %v9491_v39, %s9159_s3 }
 0x178   :  { %905 = vadd.xlane.f32.xlu1 %v904_v25  ;;  %v907_v25 = vsel %vm385_vm1, %v9613_v15, 0.0 }
 0x17c   :  { %2149 = vrot.lane.b32.xlu2 %v9459_v20, %s9159_s3 }
 0x17f   :  { %2705 = vrot.lane.b32.xlu0 %v9517_v61, %s9159_s3 }
 0x184   :  { %2173 = vrot.lane.b32.xlu2 %v9502_v51, %s9159_s3  ;;  %v9619_v51 = vpop.f32.mrf.mxu1 }
 0x185   :  { %15907 = vst [vmem:[#allocation63_spill] sm:$0xff] %v9619_v51 }
 0x188   :  { %v9587_v40 = vpop.xlane.xlu1 %396 }
 0x18c   :  { %2703 = vrot.lane.b32.xlu2 %v9591_v43, %s9159_s3  ;;  %v9637_v8 = vpop.f32.mrf.mxu1  ;;  %v9705_v43 = vmul.f32 %v9615_v23, %v9615_v23 }
 0x18d   :  { %15910 = vst [vmem:[#allocation66_spill] sm:$0xff] %v9637_v8 }
 0x18e   :  { %15918 = vst [vmem:[#allocation74_spill] sm:$0xff] %v9705_v43 }
 0x190   :  { %v9601_v62 = vpop.xlane.xlu1 %408 }
 0x191   :  { %2713 = vrot.lane.b32.xlu1 %v9599_v28, %s9159_s3 }
 0x194   :  { %v9668_v53 = vpop.f32.mrf.mxu1 }
 0x195   :  { %15913 = vst [vmem:[#allocation69_spill] sm:$0xff] %v9668_v53 }
 0x198   :  { %v9605_v1 = vpop.xlane.xlu1 %420 }
 0x1a0   :  { %v9609_v12 = vpop.xlane.xlu1 %432 }
 0x1a8   :  { %v903_v24 = vpop.xlane.xlu1 %902 }
 0x1a9   :  { %908 = vadd.xlane.f32.xlu0 %v907_v25  ;;  %8348 = vrsqrt.f32 %v903_v24  ;;  %v916_v25 = vsel %vm385_vm1, %v9627_v45, 0.0  ;;  %vm965_vm2 = vcmp.eq.f32.partialorder %v903_v24, inf  ;;  %v968_v31 = vand.u32 2147483648, %v903_v24 }
 0x1aa   :  { %vm967_vm3 = vcmp.eq.f32.partialorder %v903_v24, 0.0 }
 0x1af   :  { %v8349_v39 = vpop.eup %8348 }
 0x1b0   :  { %v959_v29 = vmul.f32 %v8349_v39, %v903_v24 }
 0x1b2   :  { %v960_v59 = vmul.f32 %v8349_v39, %v959_v29  ;;  %v9635_v29 = vmul.f32 %v9583_v33, %v9583_v33 }
 0x1b4   :  { %v961_v27 = vmul.f32 0.5, %v960_v59  ;;  %15909 = vst [vmem:[#allocation65_spill] sm:$0xff] %v9635_v29  ;;  %v9639_v59 = vpop.permute.xlu0 %2159 }
 0x1b5   :  { %899 = vadd.xlane.f32.xlu2 %v898_v11  ;;  %v9643_v11 = vmul.f32 %v9637_v8, %v9637_v8 }
 0x1b6   :  { %v962_v17 = vsub.f32 1.5, %v961_v27 }
 0x1b7   :  { %15911 = vst [vmem:[#allocation67_spill] sm:$0xff] %v9643_v11  ;;  %v925_v26 = vsel %vm385_vm1, %v9643_v11, 0.0 }
 0x1b8   :  { %v963_v54 = vmul.f32 %v8349_v39, %v962_v17 }
 0x1ba   :  { %v964_v49 = vmul.f32 %v963_v54, %v903_v24 }
 0x1bb   :  { %917 = vadd.xlane.f32.xlu1 %v916_v25 }
 0x1bc   :  { %v966_v27 = vsel %vm965_vm2, %v903_v24, %v964_v49  ;;  %v9649_v54 = vpop.permute.xlu0 %2153  ;;  %v2191_v49 = vsel %vm385_vm1, %v9543_v7, 0.0  ;;  %v91_v7 = vld [vmem:[%s15674_s1 + $0x70] sm:$0xff] }
 0x1bd   :  { %2711 = vrot.lane.b32.xlu0 %v9635_v29, %s9159_s3  ;;  %v969_v17 = vsel %vm967_vm3, %v968_v31, %v966_v27 }
 0x1be   :  { %v1139_v39 = vmax.f32 %v969_v17, 1e-12 }
 0x1c0   :  { %8350 = vrcp.f32 %v1139_v39  ;;  %v1180_v4 = vand.u32 2147483648, %v1139_v39  ;;  %vm1174_vm4 = vweird.f32 %v1139_v39  ;;  %v1178_v31 = vand.u32 2147483647, %v1139_v39 }
 0x1c1   :  { %8352 = vrsqrt.f32 %v9621_v2 }
 0x1c2   :  { %v1181_v58 = vor.u32 1.1754944e-38, %v1180_v4  ;;  %vm1179_vm7 = vcmp.eq.f32.partialorder %v1178_v31, 8.507059e+37  ;;  %v9672_v4 = vpop.xlane.xlu2 %423 }
 0x1c3   :  { %926 = vadd.xlane.f32.xlu1 %v925_v26 }
 0x1c4   :  { %v9657_v26 = vpop.xlane.xlu0 %390 }
 0x1c5   :  { %8354 = vrsqrt.f32 %v9657_v26  ;;  %vm453_vm12 = vcmp.eq.f32.partialorder %v9657_v26, inf  ;;  %vm455_vm15 = vcmp.eq.f32.partialorder %v9657_v26, 0.0 }
 0x1c6   :  { %v8351_v25 = vpop.eup %8350 }
 0x1c7   :  { %v1170_v20 = vmul.f32 %v8351_v25, %v1139_v39  ;;  %vm1175_vm5 = vweird.f32 %v8351_v25 }
 0x1c8   :  { %vm1176_vm6 = vmor %vm1174_vm4, %vm1175_vm5 }
 0x1c9   :  { %v1171_v24 = vsub.f32 1.0, %v1170_v20  ;;  %v92_v20 = vld [vmem:[%s15674_s1 + $0x78] sm:$0xff]  ;;  %s1394_s1 = sld [smem:[#allocation3]] }
 0x1ca   :  { %v9665_v39 = vpack.c.bf16 %v92_v20, %v91_v7 }
 0x1cb   :  { %2192 = vadd.xlane.f32.xlu1 %v2191_v49  ;;  %v1172_v27 = vmul.f32 %v8351_v25, %v1171_v24 }
 0x1cc   :  { %15912 = vst [vmem:[#allocation68_spill] sm:$0xff] %v9665_v39  ;;  %8120 = vmatmul.msk.bf16.gmra.mxu1 %vm121_vm0, %v9665_v39  ;;  %v9675_v31 = vpop.xlane.xlu0 %414 }
 0x1cd   :  { %2709 = vrot.lane.b32.xlu2 %v9613_v15, %s9159_s3  ;;  %v1173_v17 = vadd.f32 %v8351_v25, %v1172_v27  ;;  %v9677_v27 = vpop.f32.mrf.mxu1  ;;  %v9679_v15 = vpop.permute.xlu2 %2145 }
 0x1ce   :  { %15914 = vst [vmem:[#allocation70_spill] sm:$0xff] %v9677_v27 }
 0x1cf   :  { %v1177_v49 = vsel %vm1176_vm6, %v8351_v25, %v1173_v17 }
 0x1d0   :  { %v1182_v24 = vsel %vm1179_vm7, %v1181_v58, %v1177_v49  ;;  %v9685_v58 = vmul.f32 %v9677_v27, %v9677_v27  ;;  %vm477_vm7 = vcmp.eq.f32.partialorder %v9587_v40, inf }
 0x1d1   :  { %v1183_v37 = vmul.f32 %v1182_v24, %v9509_v56  ;;  %v913_v24 = vsel %vm385_vm1, %v9599_v28, 0.0  ;;  %v8353_v56 = vpop.eup %8352 }
 0x1d2   :  { %15915 = vst [vmem:[#allocation71_spill] sm:$0xff] %v9685_v58  ;;  %v8355_v6 = vpop.eup %8354 }
 0x1d3   :  { %8137 = vmatpush.xpose.msk.msrb.mxu3 %vm385_vm1, %v1183_v37  ;;  %v910_v37 = vsel %vm385_vm1, %v9635_v29, 0.0  ;;  %v447_v8 = vmul.f32 %v8355_v6, %v9657_v26 }
 0x1d4   :  { %v9681_v25 = vpop.permute.xlu0 %2147 }
 0x1d5   :  { %v9689_v17 = vpop.xlane.xlu2 %402  ;;  %v9723_v27 = vpop.f32.mrf.mxu1 }
 0x1d6   :  { %15922 = vst [vmem:[#allocation78_spill] sm:$0xff] %v9723_v27 }
 0x1dc   :  { %v9693_v7 = vpop.xlane.xlu0 %405 }
 0x1dd   :  { %v2162_v20 = vpop.permute.xlu2 %2161 }
 0x1e4   :  { %2725 = vrot.lane.b32.xlu1 %v9685_v58, %s9159_s3  ;;  %v9695_v49 = vpop.permute.xlu0 %2171 }
 0x1e5   :  { %15916 = vst [vmem:[#allocation72_spill] sm:$0xff] %v9695_v49  ;;  %v9701_v63 = vpop.xlane.xlu2 %426 }
 0x1e6   :  { %15917 = vst [vmem:[#allocation73_spill] sm:$0xff] %v9701_v63 }
 0x1e7   :  { %911 = vadd.xlane.f32.xlu0 %v910_v37  ;;  %v9710_v37 = vpop.permute.xlu1 %2707 }
 0x1e8   :  { %15919 = vst [vmem:[#allocation75_spill] sm:$0xff] %v9710_v37 }
 0x1ec   :  { %v9699_v39 = vpop.xlane.xlu0 %417 }
 0x1ed   :  { %v2156_v61 = vpop.permute.xlu2 %2155 }
 0x1ef   :  { %v9715_v48 = vpop.xlane.xlu1 %905 }
 0x1f0   :  { %8356 = vrsqrt.f32 %v9715_v48  ;;  %vm977_vm10 = vcmp.eq.f32.partialorder %v9715_v48, inf  ;;  %vm979_vm14 = vcmp.eq.f32.partialorder %v9715_v48, 0.0 }
 0x1f1   :  { %8358 = vrsqrt.f32 %v9555_v18 }
 0x1f4   :  { %v9712_v29 = vpop.xlane.xlu0 %429 }
 0x1f5   :  { %15920 = vst [vmem:[#allocation76_spill] sm:$0xff] %v9712_v29  ;;  %v9720_v52 = vpop.permute.xlu2 %2149 }
 0x1f6   :  { %914 = vadd.xlane.f32.xlu2 %v913_v24  ;;  %v435_v24 = vmul.f32 %v8353_v56, %v9621_v2  ;;  %v8357_v38 = vpop.eup %8356 }
 0x1f7   :  { %v8359_v46 = vpop.eup %8358  ;;  %v971_v5 = vmul.f32 %v8357_v38, %v9715_v48 }
 0x1f8   :  { %v436_v28 = vmul.f32 %v8353_v56, %v435_v24  ;;  %v9731_v24 = vmul.f32 %v9723_v27, %v9723_v27  ;;  %v448_v27 = vmul.f32 %v8355_v6, %v447_v8  ;;  %v444_v8 = vand.u32 2147483648, %v9621_v2 }
 0x1f9   :  { %v972_v23 = vmul.f32 %v8357_v38, %v971_v5 }
 0x1fa   :  { %v437_v37 = vmul.f32 0.5, %v436_v28  ;;  %15923 = vst [vmem:[#allocation79_spill] sm:$0xff] %v9731_v24  ;;  %v934_v0 = vsel %vm385_vm1, %v9731_v24, 0.0 }
 0x1fb   :  { %2717 = vrot.lane.b32.xlu0 %v9705_v43, %s9159_s3  ;;  %v973_v49 = vmul.f32 0.5, %v972_v23 }
 0x1fc   :  { %v9717_v36 = vpop.permute.xlu0 %2165  ;;  %v438_v10 = vsub.f32 1.5, %v437_v37 }
 0x1fd   :  { %15921 = vst [vmem:[#allocation77_spill] sm:$0xff] %v9717_v36  ;;  %v449_v36 = vmul.f32 0.5, %v448_v27 }
 0x1fe   :  { %v439_v28 = vmul.f32 %v8353_v56, %v438_v10  ;;  %v2218_v10 = vsel %vm385_vm1, %v2162_v20, 0.0 }
 0x1ff   :  { %v450_v27 = vsub.f32 1.5, %v449_v36  ;;  %v2209_v36 = vsel %vm385_vm1, %v2156_v61, 0.0 }
 0x200   :  { %v440_v37 = vmul.f32 %v439_v28, %v9621_v2  ;;  %v974_v28 = vsub.f32 1.5, %v973_v49 }
 0x202   :  { %v442_v56 = vsel %vm441_vm8, %v9621_v2, %v440_v37  ;;  %v975_v29 = vmul.f32 %v8357_v38, %v974_v28 }
 0x203   :  { %v445_v5 = vsel %vm443_vm9, %v444_v8, %v442_v56  ;;  %v980_v8 = vand.u32 2147483648, %v9715_v48 }
 0x204   :  { %v9736_v9 = vpop.permute.xlu0 %2705  ;;  %v976_v38 = vmul.f32 %v975_v29, %v9715_v48  ;;  %v456_v29 = vand.u32 2147483648, %v9657_v26 }
 0x20e   :  { %2715 = vrot.lane.b32.xlu2 %v9627_v45, %s9159_s3  ;;  %2228 = vadd.xlane.f32.xlu1 %v2227_v42  ;;  %v459_v42 = vmul.f32 %v8359_v46, %v9555_v18  ;;  %v9740_v45 = vpop.permute.xlu2 %2173 }
 0x210   :  { %v460_v21 = vmul.f32 %v8359_v46, %v459_v42 }
 0x212   :  { %v461_v32 = vmul.f32 0.5, %v460_v21 }
 0x214   :  { %v462_v20 = vsub.f32 1.5, %v461_v32 }
 0x216   :  { %935 = vadd.xlane.f32.xlu1 %v934_v0  ;;  %v9752_v0 = vmul.f32 %v9619_v51, %v9619_v51  ;;  %v9756_v23 = vpop.permute.xlu2 %2703  ;;  %v451_v51 = vmul.f32 %v8355_v6, %v450_v27  ;;  %v463_v2 = vmul.f32 %v8359_v46, %v462_v20 }
 0x217   :  { %15925 = vst [vmem:[#allocation81_spill] sm:$0xff] %v9756_v23 }
 0x218   :  { %15924 = vst [vmem:[#allocation80_spill] sm:$0xff] %v9752_v0  ;;  %v922_v21 = vsel %vm385_vm1, %v9752_v0, 0.0  ;;  %v452_v49 = vmul.f32 %v451_v51, %v9657_v26  ;;  %v464_v46 = vmul.f32 %v463_v2, %v9555_v18 }
 0x21a   :  { %v454_v51 = vsel %vm453_vm12, %v9657_v26, %v452_v49  ;;  %v466_v20 = vsel %vm465_vm11, %v9555_v18, %v464_v46  ;;  %vm489_vm12 = vcmp.eq.f32.partialorder %v9629_v14, inf }
 0x21b   :  { %v457_v2 = vsel %vm455_vm15, %v456_v29, %v454_v51 }
 0x21c   :  { %v9743_v22 = vpop.xlane.xlu0 %908 }
 0x21d   :  { %8360 = vrsqrt.f32 %v9743_v22  ;;  %vm989_vm2 = vcmp.eq.f32.partialorder %v9743_v22, inf  ;;  %v992_v49 = vand.u32 2147483648, %v9743_v22  ;;  %vm991_vm3 = vcmp.eq.f32.partialorder %v9743_v22, 0.0 }
 0x21e   :  { %8362 = vrsqrt.f32 %v9587_v40  ;;  %2219 = vadd.xlane.f32.xlu1 %v2218_v10  ;;  %v9762_v10 = vmax.f32 %v445_v5, 1e-12  ;;  %v978_v5 = vsel %vm977_vm10, %v9715_v48, %v976_v38  ;;  %vm479_vm10 = vcmp.eq.f32.partialorder %v9587_v40, 0.0 }
 0x21f   :  { %8364 = vrsqrt.f32 %v9629_v14 }
 0x220   :  { %8366 = vrcp.f32 %v9762_v10  ;;  %vm647_vm8 = vweird.f32 %v9762_v10 }
 0x223   :  { %v8361_v42 = vpop.eup %8360 }
 0x224   :  { %v9760_v37 = vpop.eup %8362  ;;  %v983_v44 = vmul.f32 %v8361_v42, %v9743_v22 }
 0x225   :  { %923 = vadd.xlane.f32.xlu0 %v922_v21  ;;  %v471_v32 = vmul.f32 %v9760_v37, %v9587_v40  ;;  %v468_v21 = vand.u32 2147483648, %v9555_v18 }
 0x226   :  { %v984_v23 = vmul.f32 %v8361_v42, %v983_v44  ;;  %2210 = vadd.xlane.f32.xlu1 %v2209_v36 }
 0x227   :  { %v472_v61 = vmul.f32 %v9760_v37, %v471_v32 }
 0x228   :  { %v985_v56 = vmul.f32 0.5, %v984_v23  ;;  %v9771_v6 = vpop.xlane.xlu2 %899  ;;  %v9782_v23 = vpop.eup %8364 }
 0x229   :  { %8368 = vrsqrt.f32 %v9771_v6  ;;  %v9788_v28 = vpop.eup %8366  ;;  %v473_v32 = vmul.f32 0.5, %v472_v61  ;;  %v483_v46 = vmul.f32 %v9782_v23, %v9629_v14  ;;  %vm953_vm4 = vcmp.eq.f32.partialorder %v9771_v6, inf }
 0x22a   :  { %v986_v44 = vsub.f32 1.5, %v985_v56  ;;  %v981_v56 = vsel %vm979_vm14, %v980_v8, %v978_v5  ;;  %v469_v8 = vsel %vm467_vm13, %v468_v21, %v466_v20  ;;  %v9820_v21 = vpop.f32.mrf.mxu1  ;;  %vm955_vm5 = vcmp.eq.f32.partialorder %v9771_v6, 0.0 }
 0x22b   :  { %v474_v29 = vsub.f32 1.5, %v473_v32  ;;  %v9809_v5 = vmax.f32 %v981_v56, 1e-12  ;;  %15926 = vst [vmem:[#allocation82_spill] sm:$0xff] %v9820_v21  ;;  %vm648_vm6 = vweird.f32 %v9788_v28 }
 0x22c   :  { %v987_v27 = vmul.f32 %v8361_v42, %v986_v44  ;;  %v643_v44 = vmul.f32 %v9788_v28, %v9762_v10  ;;  %vm649_vm9 = vmor %vm647_vm8, %vm648_vm6 }
 0x22d   :  { %v475_v18 = vmul.f32 %v9760_v37, %v474_v29  ;;  %vm1189_vm14 = vweird.f32 %v9809_v5 }
 0x22e   :  { %v988_v42 = vmul.f32 %v987_v27, %v9743_v22  ;;  %v9805_v27 = vmax.f32 %v457_v2, 1e-12 }
 0x22f   :  { %v8369_v36 = vpop.eup %8368  ;;  %v476_v37 = vmul.f32 %v475_v18, %v9587_v40  ;;  %v651_v18 = vand.u32 2147483647, %v9762_v10 }
 0x230   :  { %v990_v48 = vsel %vm989_vm2, %v9743_v22, %v988_v42  ;;  %v947_v38 = vmul.f32 %v8369_v36, %v9771_v6  ;;  %v484_v42 = vmul.f32 %v9782_v23, %v483_v46  ;;  %vm662_vm6 = vweird.f32 %v9805_v27 }
 0x231   :  { %v993_v26 = vsel %vm991_vm3, %v992_v49, %v990_v48  ;;  %v644_v49 = vsub.f32 1.0, %v643_v44  ;;  %v9813_v48 = vmax.f32 %v469_v8, 1e-12  ;;  %vm652_vm11 = vcmp.eq.f32.partialorder %v651_v18, 8.507059e+37 }
 0x232   :  { %v9803_v51 = vmax.f32 %v993_v26, 1e-12  ;;  %v948_v61 = vmul.f32 %v8369_v36, %v947_v38  ;;  %v919_v38 = vsel %vm385_vm1, %v9705_v43, 0.0  ;;  %v485_v2 = vmul.f32 0.5, %v484_v42 }
 0x233   :  { %v645_v32 = vmul.f32 %v9788_v28, %v644_v49 }
 0x234   :  { %8370 = vrcp.f32 %v9803_v51  ;;  %v949_v22 = vmul.f32 0.5, %v948_v61  ;;  %v486_v29 = vsub.f32 1.5, %v485_v2  ;;  %vm1204_vm15 = vweird.f32 %v9803_v51 }
 0x235   :  { %8372 = vrcp.f32 %v9805_v27  ;;  %v646_v42 = vadd.f32 %v9788_v28, %v645_v32  ;;  %v480_v32 = vand.u32 2147483648, %v9587_v40 }
 0x236   :  { %v950_v50 = vsub.f32 1.5, %v949_v22  ;;  %8374 = vrcp.f32 %v9809_v5 }
 0x237   :  { %920 = vadd.xlane.f32.xlu2 %v919_v38  ;;  %8376 = vrcp.f32 %v9813_v48  ;;  %v653_v38 = vand.u32 2147483648, %v9762_v10  ;;  %v650_v10 = vsel %vm649_vm9, %v9788_v28, %v646_v42 }
 0x238   :  { %v951_v20 = vmul.f32 %v8369_v36, %v950_v50  ;;  %v956_v50 = vand.u32 2147483648, %v9771_v6  ;;  %v9834_v36 = vmul.f32 %v9820_v21, %v9820_v21  ;;  %8378 = vrsqrt.f32 %v9651_v47 }
 0x239   :  { %2721 = vrot.lane.b32.xlu0 %v9643_v11, %s9159_s3 }
 0x23a   :  { %v9825_v56 = vpop.eup %8370  ;;  %v952_v46 = vmul.f32 %v951_v20, %v9771_v6  ;;  %15927 = vst [vmem:[#allocation83_spill] sm:$0xff] %v9834_v36 }
 0x23b   :  { %v9836_v26 = vpop.eup %8372  ;;  %v1200_v61 = vmul.f32 %v9825_v56, %v9803_v51  ;;  %vm1205_vm13 = vweird.f32 %v9825_v56 }
 0x23c   :  { %v954_v44 = vsel %vm953_vm4, %v9771_v6, %v952_v46  ;;  %v9842_v8 = vpop.eup %8374  ;;  %v478_v6 = vsel %vm477_vm7, %v9587_v40, %v476_v37  ;;  %v658_v20 = vmul.f32 %v9836_v26, %v9805_v27  ;;  %vm9899_vm4 = vmor %vm1204_vm15, %vm1205_vm13 }
 0x23d   :  { %v957_v22 = vsel %vm955_vm5, %v956_v50, %v954_v44  ;;  %v9858_v2 = vpop.eup %8376  ;;  %v1201_v46 = vsub.f32 1.0, %v1200_v61  ;;  %v1185_v37 = vmul.f32 %v9842_v8, %v9809_v5  ;;  %v487_v50 = vmul.f32 %v9782_v23, %v486_v29 }
 0x23e   :  { %v9848_v49 = vmax.f32 %v957_v22, 1e-12  ;;  %v481_v44 = vsel %vm479_vm10, %v480_v32, %v478_v6  ;;  %v654_v22 = vor.u32 1.1754944e-38, %v653_v38  ;;  %v9871_v43 = vmul.f32 %v9858_v2, %v9813_v48  ;;  %v9873_v61 = vpop.eup %8378 }
 0x23f   :  { %2729 = vrot.lane.b32.xlu1 %v9834_v36, %s9159_s3  ;;  %v1202_v11 = vmul.f32 %v9825_v56, %v1201_v46  ;;  %v1186_v36 = vsub.f32 1.0, %v1185_v37  ;;  %v659_v63 = vsub.f32 1.0, %v658_v20  ;;  %v9876_v33 = vmax.f32 %v481_v44, 1e-12 }
 0x240   :  { %8380 = vrcp.f32 %v9848_v49  ;;  %v655_v21 = vsel %vm652_vm11, %v654_v22, %v650_v10  ;;  %v488_v28 = vmul.f32 %v487_v50, %v9629_v14  ;;  %v9879_v23 = vstv %s1394_s1  ;;  %s8263_s1 = sld [smem:[#allocation3 + $0x3]] }
 0x241   :  { %v531_v29 = vmul.f32 %v9873_v61, %v9651_v47  ;;  %v656_v38 = vmul.f32 %v655_v21, %v9312_v34  ;;  %v674_v6 = vsub.f32 1.0, %v9871_v43  ;;  %v1203_v18 = vadd.f32 %v9825_v56, %v1202_v11 }
 0x242   :  { %v1187_v20 = vmul.f32 %v9842_v8, %v1186_v36  ;;  %v660_v32 = vmul.f32 %v9836_v26, %v659_v63  ;;  %v1210_v37 = vand.u32 2147483648, %v9803_v51  ;;  %8382 = vrcp.f32 %v9876_v33 }
 0x243   :  { %v1165_v21 = vand.u32 2147483648, %v9848_v49  ;;  %v1208_v43 = vand.u32 2147483647, %v9803_v51  ;;  %vm1190_vm2 = vweird.f32 %v9842_v8  ;;  %v1163_v36 = vand.u32 2147483647, %v9848_v49 }
 0x244   :  { %v1195_v10 = vand.u32 2147483648, %v9809_v5  ;;  %vm491_vm5 = vcmp.eq.f32.partialorder %v9629_v14, 0.0  ;;  %v1207_v50 = vsel %vm9899_vm4, %v9825_v56, %v1203_v18  ;;  %v1188_v51 = vadd.f32 %v9842_v8, %v1187_v20  ;;  %vm9914_vm8 = vmor %vm1189_vm14, %vm1190_vm2 }
 0x245   :  { %v1193_v44 = vand.u32 2147483647, %v9809_v5  ;;  %vm1159_vm7 = vweird.f32 %v9848_v49  ;;  %v668_v34 = vand.u32 2147483648, %v9805_v27  ;;  %v1166_v56 = vor.u32 1.1754944e-38, %v1165_v21 }
 0x246   :  { %v8381_v40 = vpop.eup %8380  ;;  %vm1209_vm10 = vcmp.eq.f32.partialorder %v1208_v43, 8.507059e+37  ;;  %v661_v18 = vadd.f32 %v9836_v26, %v660_v32  ;;  %vm663_vm11 = vweird.f32 %v9836_v26  ;;  %vm1164_vm13 = vcmp.eq.f32.partialorder %v1163_v36, 8.507059e+37 }
 0x247   :  { %v1155_v42 = vmul.f32 %v8381_v40, %v9848_v49  ;;  %vm1160_vm3 = vweird.f32 %v8381_v40  ;;  %v1192_v63 = vsel %vm9914_vm8, %v9842_v8, %v1188_v51  ;;  %vm1194_vm14 = vcmp.eq.f32.partialorder %v1193_v44, 8.507059e+37  ;;  %vm9939_vm15 = vmor %vm662_vm6, %vm663_vm11  ;;  %v9943_v8 = vpop.permute.xlu0 %2711 }
 0x248   :  { %vm1161_vm9 = vmor %vm1159_vm7, %vm1160_vm3  ;;  %v9921_v20 = vpop.eup %8382  ;;  %v666_v21 = vand.u32 2147483647, %v9805_v27  ;;  %v490_v32 = vsel %vm489_vm12, %v9629_v14, %v488_v28  ;;  %v492_v43 = vand.u32 2147483648, %v9629_v14  ;;  %8384 = vrsqrt.f32 %v9672_v4 }
 0x249   :  { %v1156_v46 = vsub.f32 1.0, %v1155_v42  ;;  %v1211_v42 = vor.u32 1.1754944e-38, %v1210_v37  ;;  %v1196_v37 = vor.u32 1.1754944e-38, %v1195_v10  ;;  %v665_v28 = vsel %vm9939_vm15, %v9836_v26, %v661_v18 }
 0x24a   :  { %v688_v51 = vmul.f32 %v9921_v20, %v9876_v33  ;;  %v532_v44 = vmul.f32 %v9873_v61, %v531_v29  ;;  %v1396_v27 = vmul.f32 %v9879_v23, %v656_v38  ;;  %8386 = vrsqrt.f32 %v9689_v17 }
 0x24b   :  { %v1157_v11 = vmul.f32 %v8381_v40, %v1156_v46  ;;  %v1212_v5 = vsel %vm1209_vm10, %v1211_v42, %v1207_v50  ;;  %v675_v50 = vmul.f32 %v9858_v2, %v674_v6  ;;  %v669_v42 = vor.u32 1.1754944e-38, %v668_v34 }
 0x24c   :  { %v1213_v10 = vmul.f32 %v1212_v5, %v9571_v30  ;;  %vm667_vm12 = vcmp.eq.f32.partialorder %v666_v21, 8.507059e+37  ;;  %vm677_vm2 = vweird.f32 %v9813_v48  ;;  %vm678_vm3 = vweird.f32 %v9858_v2 }
 0x24d   :  { %v1158_v22 = vadd.f32 %v8381_v40, %v1157_v11  ;;  %v493_v26 = vsel %vm491_vm5, %v492_v43, %v490_v32  ;;  %v9963_v29 = vmul.f32 %v9668_v53, %v9668_v53  ;;  %v670_v6 = vsel %vm667_vm12, %v669_v42, %v665_v28  ;;  %vm9974_vm4 = vmor %vm677_vm2, %vm678_vm3 }
 0x24e   :  { %v683_v38 = vand.u32 2147483648, %v9813_v48  ;;  %v676_v46 = vadd.f32 %v9858_v2, %v675_v50  ;;  %v689_v18 = vsub.f32 1.0, %v688_v51  ;;  %v533_v14 = vmul.f32 0.5, %v532_v44 }
 0x24f   :  { %2719 = vrot.lane.b32.xlu2 %v9752_v0, %s9159_s3  ;;  %v1162_v49 = vsel %vm1161_vm9, %v8381_v40, %v1158_v22  ;;  %v1197_v22 = vsel %vm1194_vm14, %v1196_v37, %v1192_v63  ;;  %15934 = vst [vmem:[#allocation84_spill] sm:$0xff] %v9963_v29  ;;  %v671_v37 = vmul.f32 %v670_v6, %v9391_v60  ;;  %8388 = vrsqrt.f32 %v9675_v31 }
 0x250   :  { %v1167_v11 = vsel %vm1164_vm13, %v1166_v56, %v1162_v49  ;;  %v1198_v34 = vmul.f32 %v1197_v22, %v9535_v3  ;;  %v681_v56 = vand.u32 2147483647, %v9813_v48  ;;  %v9970_v49 = vpop.eup %8384  ;;  %v684_v63 = vor.u32 1.1754944e-38, %v683_v38 }
 0x251   :  { %v1168_v40 = vmul.f32 %v1167_v11, %v9493_v41  ;;  %v9980_v11 = vmax.f32 %v493_v26, 1e-12  ;;  %v9982_v21 = vpop.eup %8386  ;;  %v680_v32 = vsel %vm9974_vm4, %v9858_v2, %v676_v46  ;;  %v690_v43 = vmul.f32 %v9921_v20, %v689_v18 }
 0x252   :  { %vm682_vm5 = vcmp.eq.f32.partialorder %v681_v56, 8.507059e+37  ;;  %v579_v36 = vmul.f32 %v9970_v49, %v9672_v4  ;;  %v495_v28 = vmul.f32 %v9982_v21, %v9689_v17  ;;  %vm693_vm6 = vweird.f32 %v9921_v20 }
 0x253   :  { %8138 = vmatpush.xpose.msk.msrb.mxu3 %vm385_vm1, %v1168_v40  ;;  %v534_v40 = vsub.f32 1.5, %v533_v14  ;;  %v685_v50 = vsel %vm682_vm5, %v684_v63, %v680_v32  ;;  %v691_v2 = vadd.f32 %v9921_v20, %v690_v43  ;;  %vm692_vm7 = vweird.f32 %v9876_v33 }
 0x254   :  { %v580_v44 = vmul.f32 %v9970_v49, %v579_v36  ;;  %v686_v42 = vmul.f32 %v685_v50, %v9382_v57  ;;  %v696_v26 = vand.u32 2147483647, %v9876_v33  ;;  %v496_v38 = vmul.f32 %v9982_v21, %v495_v28  ;;  %vm10012_vm8 = vmor %vm692_vm7, %vm693_vm6 }
 0x255   :  { %v535_v51 = vmul.f32 %v9873_v61, %v534_v40  ;;  %v10004_v22 = vpop.eup %8388  ;;  %v2203_v56 = vsel %vm385_vm1, %v9549_v13, 0.0  ;;  %v695_v18 = vsel %vm10012_vm8, %v9921_v20, %v691_v2  ;;  %v10028_v13 = vpop.f32.mrf.mxu1  ;;  %vm537_vm10 = vcmp.eq.f32.partialorder %v9651_v47, inf }
 0x256   :  { %8139 = vmatmul.msk.f32.vlgmr.msrb.gmra.mxu3 %vm385_vm1, %v1396_v27  ;;  %v698_v27 = vand.u32 2147483648, %v9876_v33  ;;  %v581_v14 = vmul.f32 0.5, %v580_v44  ;;  %v543_v63 = vmul.f32 %v10004_v22, %v9675_v31  ;;  %v1398_v43 = vmul.f32 %v9879_v23, %v686_v42  ;;  %15939 = vst [vmem:[#allocation85_spill] sm:$0xff] %v10028_v13 }
 0x257   :  { %8141 = vmatpush.xpose.msk.msra.mxu3 %vm385_vm1, %v1213_v10  ;;  %2723 = vrot.lane.b32.xlu2 %v9963_v29, %s9159_s3  ;;  %v1397_v10 = vmul.f32 %v9879_v23, %v671_v37  ;;  %v536_v33 = vmul.f32 %v535_v51, %v9651_v47  ;;  %vm697_vm9 = vcmp.eq.f32.partialorder %v696_v26, 8.507059e+37  ;;  %v497_v40 = vmul.f32 0.5, %v496_v38 }
 0x258   :  { %v699_v5 = vor.u32 1.1754944e-38, %v698_v27  ;;  %v582_v28 = vsub.f32 1.5, %v581_v14  ;;  %v544_v2 = vmul.f32 %v10004_v22, %v543_v63  ;;  %v2200_v44 = vsel %vm385_vm1, %v9720_v52, 0.0 }
 0x259   :  { %v540_v42 = vand.u32 2147483648, %v9651_v47  ;;  %v498_v26 = vsub.f32 1.5, %v497_v40  ;;  %vm539_vm11 = vcmp.eq.f32.partialorder %v9651_v47, 0.0  ;;  %vm585_vm15 = vcmp.eq.f32.partialorder %v9672_v4, inf }
 0x25a   :  { %v9985_v48 = vpop.xlane.xlu0 %911  ;;  %v700_v36 = vsel %vm697_vm9, %v699_v5, %v695_v18  ;;  %v583_v52 = vmul.f32 %v9970_v49, %v582_v28  ;;  %vm501_vm2 = vcmp.eq.f32.partialorder %v9689_v17, inf  ;;  %vm587_vm3 = vcmp.eq.f32.partialorder %v9672_v4, 0.0 }
 0x25b   :  { %8142 = vmatpush.xpose.msk.msra.mxu3 %vm385_vm1, %v1198_v34  ;;  %8390 = vrsqrt.f32 %v9985_v48  ;;  %v10010_v34 = vpop.permute.xlu2 %2709  ;;  %v701_v27 = vmul.f32 %v700_v36, %v9455_v19  ;;  %v499_v63 = vmul.f32 %v9982_v21, %v498_v26  ;;  %vm1001_vm13 = vcmp.eq.f32.partialorder %v9985_v48, inf }
 0x25c   :  { %8392 = vrcp.f32 %v9980_v11  ;;  %v584_v40 = vmul.f32 %v583_v52, %v9672_v4  ;;  %v2236_v21 = vsel %vm385_vm1, %v9740_v45, 0.0  ;;  %vm1003_vm14 = vcmp.eq.f32.partialorder %v9985_v48, 0.0 }
 0x25d   :  { %v1399_v5 = vmul.f32 %v9879_v23, %v701_v27  ;;  %vm503_vm4 = vcmp.eq.f32.partialorder %v9689_v17, 0.0  ;;  %vm707_vm5 = vweird.f32 %v9980_v11  ;;  %vm549_vm8 = vcmp.eq.f32.partialorder %v9675_v31, inf }
 0x25e   :  { %8140 = vmatmul.msk.f32.gmra.mxu3 %vm385_vm1, %v1397_v10  ;;  %v538_v10 = vsel %vm537_vm10, %v9651_v47, %v536_v33  ;;  %v545_v33 = vmul.f32 0.5, %v544_v2  ;;  %v586_v27 = vsel %vm585_vm15, %v9672_v4, %v584_v40  ;;  %vm551_vm10 = vcmp.eq.f32.partialorder %v9675_v31, 0.0 }
 0x260   :  { %v546_v36 = vsub.f32 1.5, %v545_v33 }
 0x261   :  { %v8391_v6 = vpop.eup %8390 }
 0x262   :  { %v995_v61 = vmul.f32 %v8391_v6, %v9985_v48  ;;  %v10023_v37 = vpop.eup %8392  ;;  %v547_v26 = vmul.f32 %v10004_v22, %v546_v36  ;;  %v713_v22 = vand.u32 2147483648, %v9980_v11 }
 0x263   :  { %2204 = vadd.xlane.f32.xlu0 %v2203_v56  ;;  %v703_v50 = vmul.f32 %v10023_v37, %v9980_v11  ;;  %v541_v56 = vsel %vm539_vm11, %v540_v42, %v538_v10  ;;  %v500_v10 = vmul.f32 %v499_v63, %v9689_v17  ;;  %vm708_vm12 = vweird.f32 %v10023_v37 }
 0x264   :  { %v996_v32 = vmul.f32 %v8391_v6, %v995_v61  ;;  %v931_v61 = vsel %vm385_vm1, %v9685_v58, 0.0  ;;  %v588_v42 = vand.u32 2147483648, %v9672_v4  ;;  %vm10097_vm6 = vmor %vm707_vm5, %vm708_vm12  ;;  %v714_v40 = vor.u32 1.1754944e-38, %v713_v22 }
 0x265   :  { %v704_v18 = vsub.f32 1.0, %v703_v50  ;;  %v711_v50 = vand.u32 2147483647, %v9980_v11  ;;  %v10155_v4 = vsel %vm385_vm1, %v9553_v16, 0.0 }
 0x266   :  { %v997_v20 = vmul.f32 0.5, %v996_v32  ;;  %8143 = vmatmul.msk.f32.vlgmr.msra.gmra.mxu3 %vm385_vm1, %v1398_v43  ;;  %v10050_v32 = vmax.f32 %v541_v56, 1e-12  ;;  %v504_v56 = vand.u32 2147483648, %v9689_v17  ;;  %v589_v33 = vsel %vm587_vm3, %v588_v42, %v586_v27 }
 0x267   :  { %v705_v43 = vmul.f32 %v10023_v37, %v704_v18  ;;  %v10086_v18 = vpop.permute.xlu1 %2713  ;;  %v10106_v11 = vmax.f32 %v589_v33, 1e-12  ;;  %vm712_vm7 = vcmp.eq.f32.partialorder %v711_v50, 8.507059e+37  ;;  %v928_v42 = vsel %vm385_vm1, %v9963_v29, 0.0 }
 0x268   :  { %v998_v51 = vsub.f32 1.5, %v997_v20  ;;  %v1004_v20 = vand.u32 2147483648, %v9985_v48 }
 0x269   :  { %v10040_v38 = vpop.xlane.xlu2 %914  ;;  %2201 = vadd.xlane.f32.xlu1 %v2200_v44 }
 0x26a   :  { %v999_v46 = vmul.f32 %v8391_v6, %v998_v51  ;;  %8394 = vrsqrt.f32 %v10040_v38  ;;  %v10055_v6 = vpop.f32.mrf.mxu1  ;;  %v2194_v51 = vsel %vm385_vm1, %v9679_v15, 0.0  ;;  %v502_v15 = vsel %vm501_vm2, %v9689_v17, %v500_v10 }
 0x26b   :  { %932 = vadd.xlane.f32.xlu0 %v931_v61  ;;  %15940 = vst [vmem:[#allocation86_spill] sm:$0xff] %v10055_v6  ;;  %8396 = vrcp.f32 %v10050_v32  ;;  %v10071_v44 = vmul.f32 %v10055_v6, %v10055_v6  ;;  %v505_v63 = vsel %vm503_vm4, %v504_v56, %v502_v15  ;;  %vm1013_vm9 = vcmp.eq.f32.partialorder %v10040_v38, inf }
 0x26c   :  { %v1000_v14 = vmul.f32 %v999_v46, %v9985_v48  ;;  %8398 = vrsqrt.f32 %v9693_v7  ;;  %vm1015_vm11 = vcmp.eq.f32.partialorder %v10040_v38, 0.0 }
 0x26d   :  { %15941 = vst [vmem:[#allocation87_spill] sm:$0xff] %v10071_v44  ;;  %v943_v52 = vsel %vm385_vm1, %v10071_v44, 0.0 }
 0x26e   :  { %8144 = vmatmul.msk.f32.gmra.mxu3 %vm385_vm1, %v1399_v5  ;;  %v1002_v47 = vsel %vm1001_vm13, %v9985_v48, %v1000_v14  ;;  %v706_v48 = vadd.f32 %v10023_v37, %v705_v43  ;;  %vm767_vm13 = vweird.f32 %v10050_v32 }
 0x26f   :  { %v1005_v2 = vsel %vm1003_vm14, %v1004_v20, %v1002_v47  ;;  %v548_v47 = vmul.f32 %v547_v26, %v9675_v31 }
 0x270   :  { %v8395_v49 = vpop.eup %8394  ;;  %v10082_v46 = vmax.f32 %v1005_v2, 1e-12  ;;  %v710_v17 = vsel %vm10097_vm6, %v10023_v37, %v706_v48  ;;  %v1016_v37 = vand.u32 2147483648, %v10040_v38  ;;  %v552_v2 = vand.u32 2147483648, %v9675_v31 }
 0x271   :  { %v1007_v28 = vmul.f32 %v8395_v49, %v10040_v38  ;;  %2237 = vadd.xlane.f32.xlu1 %v2236_v21  ;;  %v10093_v5 = vpop.eup %8396  ;;  %v10112_v21 = vmax.f32 %v505_v63, 1e-12  ;;  %v715_v10 = vsel %vm712_vm7, %v714_v40, %v710_v17  ;;  %v2206_v17 = vsel %vm385_vm1, %v9649_v54, 0.0 }
 0x272   :  { %8400 = vrcp.f32 %v10082_v46  ;;  %v10108_v36 = vpop.eup %8398  ;;  %v716_v56 = vmul.f32 %v715_v10, %v9315_v35  ;;  %vm768_vm14 = vweird.f32 %v10093_v5  ;;  %v833_v10 = vand.u32 2147483648, %v10106_v11 }
 0x273   :  { %v1008_v45 = vmul.f32 %v8395_v49, %v1007_v28  ;;  %2195 = vadd.xlane.f32.xlu0 %v2194_v51  ;;  %8402 = vrsqrt.f32 %v9601_v62  ;;  %v550_v28 = vsel %vm549_vm8, %v9675_v31, %v548_v47  ;;  %v507_v51 = vmul.f32 %v10108_v36, %v9693_v7  ;;  %vm10206_vm15 = vmor %vm767_vm13, %vm768_vm14 }
 0x274   :  { %8404 = vrcp.f32 %v10106_v11  ;;  %v553_v15 = vsel %vm551_vm10, %v552_v2, %v550_v28  ;;  %v2754_v31 = vsel %vm385_vm1, %v9736_v9, 0.0  ;;  %v10164_v40 = vmul.f32 %v9879_v23, %v716_v56 }
 0x275   :  { %v1009_v61 = vmul.f32 0.5, %v1008_v45  ;;  %8406 = vrcp.f32 %v10112_v21  ;;  %v2763_v2 = vsel %vm385_vm1, %v9943_v8, 0.0  ;;  %vm1219_vm5 = vweird.f32 %v10082_v46 }
 0x276   :  { %vm827_vm10 = vweird.f32 %v10106_v11  ;;  %vm513_vm14 = vcmp.eq.f32.partialorder %v9693_v7, inf }
 0x277   :  { %v1010_v14 = vsub.f32 1.5, %v1009_v61 }
 0x278   :  { %v10127_v48 = vpop.eup %8400 }
 0x279   :  { %v1011_v43 = vmul.f32 %v8395_v49, %v1010_v14  ;;  %944 = vadd.xlane.f32.xlu1 %v943_v52  ;;  %v763_v49 = vmul.f32 %v10093_v5, %v10050_v32  ;;  %v10138_v61 = vpop.eup %8402  ;;  %v508_v52 = vmul.f32 %v10108_v36, %v507_v51  ;;  %v1215_v22 = vmul.f32 %v10127_v48, %v10082_v46 }
 0x27a   :  { %v10147_v14 = vmax.f32 %v553_v15, 1e-12  ;;  %v10149_v63 = vpop.eup %8404  ;;  %v519_v9 = vmul.f32 %v10138_v61, %v9601_v62  ;;  %vm1220_vm2 = vweird.f32 %v10127_v48 }
 0x27b   :  { %v1012_v20 = vmul.f32 %v1011_v43, %v10040_v38  ;;  %v764_v26 = vsub.f32 1.0, %v763_v49  ;;  %v10157_v47 = vpop.eup %8406  ;;  %v2215_v43 = vsel %vm385_vm1, %v9639_v59, 0.0  ;;  %v509_v49 = vmul.f32 0.5, %v508_v52  ;;  %vm10250_vm6 = vmor %vm1219_vm5, %vm1220_vm2 }
 0x27c   :  { %v10179_v54 = vmul.f32 %v10149_v63, %v10106_v11  ;;  %vm828_vm7 = vweird.f32 %v10149_v63  ;;  %vm723_vm13 = vweird.f32 %v10157_v47  ;;  %v15969_v58 = vand.u32 2147483647, %v10147_v14 }
 0x27d   :  { %v1014_v50 = vsel %vm1013_vm9, %v10040_v38, %v1012_v20  ;;  %v10134_v38 = vpop.xlane.xlu1 %917  ;;  %v765_v33 = vmul.f32 %v10093_v5, %v764_v26  ;;  %v773_v20 = vand.u32 2147483648, %v10050_v32  ;;  %v771_v26 = vand.u32 2147483647, %v10050_v32 }
 0x27e   :  { %v1017_v45 = vsel %vm1015_vm11, %v1016_v37, %v1014_v50  ;;  %v1216_v37 = vsub.f32 1.0, %v1215_v22  ;;  %v520_v50 = vmul.f32 %v10138_v61, %v519_v9  ;;  %v510_v56 = vsub.f32 1.5, %v509_v49 }
 0x27f   :  { %v10129_v27 = vmax.f32 %v1017_v45, 1e-12  ;;  %v10174_v59 = vadd.f32 %v10093_v5, %v765_v33  ;;  %v718_v45 = vmul.f32 %v10157_v47, %v10112_v21  ;;  %v10196_v15 = vor.u32 1.1754944e-38, %v773_v20 }
 0x280   :  { %929 = vadd.xlane.f32.xlu2 %v928_v42  ;;  %v10193_v42 = vsel %vm385_vm1, %v9681_v25, 0.0  ;;  %v1217_v8 = vmul.f32 %v10127_v48, %v1216_v37  ;;  %v10218_v49 = vor.u32 1.1754944e-38, %v833_v10  ;;  %v521_v32 = vmul.f32 0.5, %v520_v50 }
 0x281   :  { %8408 = vrcp.f32 %v10129_v27  ;;  %2755 = vadd.xlane.f32.xlu1 %v2754_v31  ;;  %v719_v37 = vsub.f32 1.0, %v718_v45  ;;  %v2718_v31 = vpop.permute.xlu0 %2717  ;;  %v1240_v33 = vand.u32 2147483648, %v10129_v27  ;;  %v511_v10 = vmul.f32 %v10108_v36, %v510_v56 }
 0x282   :  { %8410 = vrsqrt.f32 %v9605_v1  ;;  %v1238_v50 = vand.u32 2147483647, %v10129_v27  ;;  %v1218_v20 = vadd.f32 %v10127_v48, %v1217_v8  ;;  %vm1234_vm3 = vweird.f32 %v10129_v27 }
 0x283   :  { %8412 = vrcp.f32 %v10147_v14  ;;  %v2772_v29 = vsel %vm385_vm1, %v2718_v31, 0.0  ;;  %v1223_v36 = vand.u32 2147483647, %v10082_v46  ;;  %v522_v8 = vsub.f32 1.5, %v521_v32 }
 0x284   :  { %8414 = vrsqrt.f32 %v10134_v38  ;;  %v512_v32 = vmul.f32 %v511_v10, %v9693_v7  ;;  %vm1239_vm8 = vcmp.eq.f32.partialorder %v1238_v50, 8.507059e+37  ;;  %vm10263_vm9 = vcmp.eq.f32.partialorder %v771_v26, 8.507059e+37 }
 0x285   :  { %v10199_v52 = vpop.xlane.xlu1 %926  ;;  %vm1224_vm11 = vcmp.eq.f32.partialorder %v1223_v36, 8.507059e+37  ;;  %v728_v36 = vand.u32 2147483648, %v10112_v21 }
 0x286   :  { %8416 = vrsqrt.f32 %v10199_v52 }
 0x287   :  { %v10169_v16 = vpop.eup %8408  ;;  %2727 = vrot.lane.b32.xlu0 %v9731_v24, %s9159_s3  ;;  %8418 = vrsqrt.f32 %v9609_v12  ;;  %v1222_v24 = vsel %vm10250_vm6, %v10127_v48, %v1218_v20  ;;  %vm10337_vm6 = vmor %vm827_vm10, %vm828_vm7  ;;  %vm525_vm7 = vcmp.eq.f32.partialorder %v9601_v62, inf  ;;  %vm573_vm10 = vcmp.eq.f32.partialorder %v9605_v1, inf }
 0x288   :  { %v10182_v28 = vpop.eup %8410  ;;  %2216 = vadd.xlane.f32.xlu2 %v2215_v43  ;;  %v1230_v51 = vmul.f32 %v10169_v16, %v10129_v27  ;;  %vm1235_vm12 = vweird.f32 %v10169_v16  ;;  %8420 = vrsqrt.f32 %v9699_v39 }
 0x289   :  { %2764 = vadd.xlane.f32.xlu1 %v2763_v2  ;;  %v567_v9 = vmul.f32 %v10182_v28, %v9605_v1  ;;  %v824_v2 = vsub.f32 1.0, %v10179_v54  ;;  %v10222_v25 = vpop.eup %8412  ;;  %vm10237_vm4 = vmor %vm1234_vm3, %vm1235_vm12  ;;  %vm722_vm12 = vweird.f32 %v10112_v21  ;;  %vm782_vm3 = vweird.f32 %v10147_v14 }
 0x28a   :  { %v1231_v43 = vsub.f32 1.0, %v1230_v51  ;;  %v778_v56 = vmul.f32 %v10222_v25, %v10147_v14  ;;  %vm10295_vm2 = vmor %vm722_vm12, %vm723_vm13  ;;  %vm575_vm13 = vcmp.eq.f32.partialorder %v9605_v1, 0.0  ;;  %vm1025_vm12 = vcmp.eq.f32.partialorder %v10134_v38, inf }
 0x28b   :  { %v568_v54 = vmul.f32 %v10182_v28, %v567_v9  ;;  %v720_v9 = vmul.f32 %v10157_v47, %v719_v37 }
 0x28c   :  { %v1232_v51 = vmul.f32 %v10169_v16, %v1231_v43  ;;  %v1225_v43 = vand.u32 2147483648, %v10082_v46  ;;  %v10256_v46 = vpop.eup %8414  ;;  %v779_v50 = vsub.f32 1.0, %v778_v56 }
 0x28d   :  { %v1019_v48 = vmul.f32 %v10256_v46, %v10134_v38  ;;  %v721_v20 = vadd.f32 %v10157_v47, %v720_v9 }
 0x28e   :  { %v1233_v45 = vadd.f32 %v10169_v16, %v1232_v51  ;;  %v1226_v51 = vor.u32 1.1754944e-38, %v1225_v43 }
 0x290   :  { %2207 = vadd.xlane.f32.xlu2 %v2206_v17  ;;  %v1237_v27 = vsel %vm10237_vm4, %v10169_v16, %v1233_v45  ;;  %v1241_v17 = vor.u32 1.1754944e-38, %v1240_v33  ;;  %v10267_v16 = vpop.eup %8416  ;;  %v569_v33 = vmul.f32 0.5, %v568_v54  ;;  %v825_v45 = vmul.f32 %v10149_v63, %v824_v2 }
 0x291   :  { %2773 = vadd.xlane.f32.xlu1 %v2772_v29  ;;  %v1227_v26 = vsel %vm1224_vm11, %v1226_v51, %v1222_v24  ;;  %v523_v54 = vmul.f32 %v10138_v61, %v522_v8  ;;  %v1055_v43 = vmul.f32 %v10267_v16, %v10199_v52  ;;  %v514_v2 = vsel %vm513_vm14, %v9693_v7, %v512_v32  ;;  %v15952_v8 = vld [vmem:[#allocation56_spill] sm:$0xff] }
 0x292   :  { %v1242_v37 = vsel %vm1239_vm8, %v1241_v17, %v1237_v27  ;;  %v570_v56 = vsub.f32 1.5, %v569_v33  ;;  %v726_v27 = vand.u32 2147483647, %v10112_v21  ;;  %v10286_v17 = vpop.eup %8418  ;;  %v516_v61 = vand.u32 2147483648, %v9693_v7 }
 0x293   :  { %v1243_v10 = vmul.f32 %v1242_v37, %v9593_v55  ;;  %v1228_v31 = vmul.f32 %v1227_v26, %v15952_v8  ;;  %v780_v32 = vmul.f32 %v10222_v25, %v779_v50  ;;  %v10302_v21 = vadd.f32 %v10149_v63, %v825_v45  ;;  %v10304_v33 = vpop.eup %8420  ;;  %v10314_v26 = vpop.xlane.xlu1 %2192 }
 0x294   :  { %vm515_vm4 = vcmp.eq.f32.partialorder %v9693_v7, 0.0  ;;  %v725_v37 = vsel %vm10295_vm2, %v10157_v47, %v721_v20  ;;  %v1056_v50 = vmul.f32 %v10267_v16, %v1055_v43  ;;  %v729_v45 = vor.u32 1.1754944e-38, %v728_v36 }
 0x295   :  { %8145 = vmatpush.xpose.msk.msrb.mxu3 %vm385_vm1, %v1243_v10  ;;  %v517_v51 = vsel %vm515_vm4, %v516_v61, %v514_v2  ;;  %v15955_v10 = vld [vmem:[#allocation73_spill] sm:$0xff]  ;;  %v524_v7 = vmul.f32 %v523_v54, %v9601_v62  ;;  %vm727_vm5 = vcmp.eq.f32.partialorder %v726_v27, 8.507059e+37  ;;  %v15956_v47 = vsel %vm10206_vm15, %v10093_v5, %v10174_v59 }
 0x296   :  { %v775_v20 = vsel %vm10263_vm9, %v10196_v15, %v15956_v47  ;;  %v615_v43 = vmul.f32 %v10286_v17, %v9609_v12  ;;  %v555_v36 = vmul.f32 %v10304_v33, %v9699_v39  ;;  %v730_v2 = vsel %vm727_vm5, %v729_v45, %v725_v37  ;;  %v15963_v37 = vld [vmem:[#allocation83_spill] sm:$0xff] }
 0x297   :  { %v15957_v54 = vand.u32 2147483648, %v10147_v14  ;;  %v10341_v59 = vmax.f32 %v517_v51, 1e-12  ;;  %vm783_vm15 = vweird.f32 %v10222_v25  ;;  %v830_v22 = vsel %vm10337_vm6, %v10149_v63, %v10302_v21 }
 0x298   :  { %2198 = vadd.xlane.f32.xlu2 %v10193_v42  ;;  %v10291_v9 = vpop.xlane.xlu0 %923  ;;  %v1020_v42 = vmul.f32 %v10256_v46, %v1019_v48  ;;  %v571_v48 = vmul.f32 %v10182_v28, %v570_v56  ;;  %v15960_v29 = vand.u32 2147483647, %v10106_v11  ;;  %v528_v27 = vand.u32 2147483648, %v9601_v62  ;;  %v15964_v11 = vld [vmem:[#allocation20_spill] sm:$0xff]  ;;  %vm10377_vm11 = vmor %vm782_vm3, %vm783_vm15 }
 0x299   :  { %8422 = vrsqrt.f32 %v10291_v9  ;;  %8146 = vmatpush.xpose.msk.msrb.mxu3 %vm385_vm1, %v1228_v31  ;;  %v789_v28 = vor.u32 1.1754944e-38, %v15957_v54  ;;  %v1057_v61 = vmul.f32 0.5, %v1056_v50  ;;  %v526_v24 = vsel %vm525_vm7, %v9601_v62, %v524_v7  ;;  %v15965_v54 = vld [vmem:[#allocation76_spill] sm:$0xff] }
 0x29a   :  { %8424 = vrsqrt.f32 %v15955_v10  ;;  %v1021_v15 = vmul.f32 0.5, %v1020_v42  ;;  %vm10352_vm8 = vcmp.eq.f32.partialorder %v15960_v29, 8.507059e+37  ;;  %v572_v42 = vmul.f32 %v571_v48, %v9605_v1 }
 0x29b   :  { %v937_v63 = vsel %vm385_vm1, %v15963_v37, 0.0  ;;  %v731_v21 = vmul.f32 %v730_v2, %v15964_v11  ;;  %v616_v45 = vmul.f32 %v10286_v17, %v615_v43  ;;  %v556_v47 = vmul.f32 %v10304_v33, %v555_v36  ;;  %v10381_v36 = vpop.permute.xlu2 %2715  ;;  %v10383_v2 = vpop.permute.xlu1 %2725 }
 0x29c   :  { %8147 = vmatmul.msk.f32.vlgmr.msrb.gmra.mxu3 %vm385_vm1, %v10164_v40  ;;  %v781_v40 = vadd.f32 %v10222_v25, %v780_v32  ;;  %8426 = vrsqrt.f32 %v15965_v54  ;;  %vm527_vm9 = vcmp.eq.f32.partialorder %v9601_v62, 0.0  ;;  %v1022_v50 = vsub.f32 1.5, %v1021_v15 }
 0x29d   :  { %8428 = vrcp.f32 %v10341_v59  ;;  %v529_v48 = vsel %vm527_vm9, %v528_v27, %v526_v24  ;;  %v1058_v43 = vsub.f32 1.5, %v1057_v61  ;;  %v576_v15 = vand.u32 2147483648, %v9605_v1 }
 0x29e   :  { %v785_v5 = vsel %vm10377_vm11, %v10222_v25, %v781_v40  ;;  %v574_v27 = vsel %vm573_vm10, %v9605_v1, %v572_v42  ;;  %v617_v61 = vmul.f32 0.5, %v616_v45  ;;  %v557_v24 = vmul.f32 0.5, %v556_v47  ;;  %v15968_v25 = vld [vmem:[#allocation15_spill] sm:$0xff] }
 0x29f   :  { %v8423_v31 = vpop.eup %8422  ;;  %v10396_v7 = vmax.f32 %v529_v48, 1e-12  ;;  %v10399_v40 = vmul.f32 %v775_v20, %v15968_v25  ;;  %vm787_vm14 = vcmp.eq.f32.partialorder %v15969_v58, 8.507059e+37  ;;  %v15970_v42 = vld [vmem:[#allocation55_spill] sm:$0xff]  ;;  %v577_v58 = vsel %vm575_vm13, %v576_v15, %v574_v27 }
 0x2a0   :  { %v10364_v51 = vpop.eup %8424  ;;  %v1043_v32 = vmul.f32 %v8423_v31, %v10291_v9  ;;  %938 = vadd.xlane.f32.xlu2 %v937_v63  ;;  %v1401_v63 = vmul.f32 %v9879_v23, %v731_v21  ;;  %v1059_v21 = vmul.f32 %v10267_v16, %v1058_v43  ;;  %v10408_v45 = vsel %vm385_vm1, %v15970_v42, 0.0  ;;  %v15971_v16 = vld [vmem:[#allocation72_spill] sm:$0xff] }
 0x2a1   :  { %v591_v29 = vmul.f32 %v10364_v51, %v15955_v10  ;;  %v10410_v47 = vsel %vm787_vm14, %v789_v28, %v785_v5  ;;  %v2233_v48 = vsel %vm385_vm1, %v15971_v16, 0.0  ;;  %v618_v43 = vsub.f32 1.5, %v617_v61  ;;  %v15972_v5 = vld [vmem:[#allocation52_spill] sm:$0xff] }
 0x2a2   :  { %v1044_v62 = vmul.f32 %v8423_v31, %v1043_v32  ;;  %v1023_v32 = vmul.f32 %v10256_v46, %v1022_v50  ;;  %v10403_v8 = vpop.eup %8426  ;;  %v10415_v46 = vsel %vm10352_vm8, %v10218_v49, %v830_v22  ;;  %v10427_v49 = vsel %vm385_vm1, %v15972_v5, 0.0  ;;  %v15973_v5 = vld [vmem:[#allocation77_spill] sm:$0xff] }
 0x2a3   :  { %v10417_v20 = vpop.eup %8428  ;;  %v592_v14 = vmul.f32 %v10364_v51, %v591_v29  ;;  %v603_v22 = vmul.f32 %v10403_v8, %v15965_v54  ;;  %v743_v56 = vand.u32 2147483648, %v10341_v59  ;;  %8430 = vrcp.f32 %v10396_v7  ;;  %v10447_v16 = vpop.xlane.xlu1 %2228 }
 0x2a4   :  { %v1045_v37 = vmul.f32 0.5, %v1044_v62  ;;  %8148 = vmatmul.msk.f32.gmra.mxu3 %vm385_vm1, %v1401_v63  ;;  %v558_v62 = vsub.f32 1.5, %v557_v24  ;;  %v1024_v1 = vmul.f32 %v1023_v32, %v10134_v38  ;;  %v733_v29 = vmul.f32 %v10417_v20, %v10341_v59 }
 0x2a5   :  { %v10440_v63 = vmax.f32 %v577_v58, 1e-12  ;;  %v593_v27 = vmul.f32 0.5, %v592_v14  ;;  %vm1061_vm2 = vcmp.eq.f32.partialorder %v10199_v52, inf  ;;  %v619_v32 = vmul.f32 %v10286_v17, %v618_v43 }
 0x2a6   :  { %v1046_v50 = vsub.f32 1.5, %v1045_v37  ;;  %v1060_v37 = vmul.f32 %v1059_v21, %v10199_v52  ;;  %v559_v42 = vmul.f32 %v10304_v33, %v558_v62  ;;  %v1028_v21 = vand.u32 2147483648, %v10134_v38 }
 0x2a7   :  { %v604_v58 = vmul.f32 %v10403_v8, %v603_v22  ;;  %v1026_v14 = vsel %vm1025_vm12, %v10134_v38, %v1024_v1  ;;  %vm1027_vm3 = vcmp.eq.f32.partialorder %v10134_v38, 0.0  ;;  %vm1063_vm4 = vcmp.eq.f32.partialorder %v10199_v52, 0.0 }
 0x2a8   :  { %2234 = vadd.xlane.f32.xlu2 %v2233_v48  ;;  %v1047_v61 = vmul.f32 %v8423_v31, %v1046_v50  ;;  %v1064_v31 = vand.u32 2147483648, %v10199_v52  ;;  %v1062_v17 = vsel %vm1061_vm2, %v10199_v52, %v1060_v37  ;;  %v734_v33 = vsub.f32 1.0, %v733_v29 }
 0x2a9   :  { %v10459_v50 = vpop.eup %8430  ;;  %v594_v43 = vsub.f32 1.5, %v593_v27  ;;  %v2224_v38 = vsel %vm385_vm1, %v15973_v5, 0.0  ;;  %vm621_vm5 = vcmp.eq.f32.partialorder %v9609_v12, inf  ;;  %v560_v22 = vmul.f32 %v559_v42, %v9699_v39 }
 0x2aa   :  { %v10436_v15 = vpop.xlane.xlu2 %920  ;;  %v1048_v62 = vmul.f32 %v1047_v61, %v10291_v9  ;;  %v1029_v1 = vsel %vm1027_vm3, %v1028_v21, %v1026_v14  ;;  %v741_v37 = vand.u32 2147483647, %v10341_v59  ;;  %v10468_v29 = vor.u32 1.1754944e-38, %v743_v56 }
 0x2ab   :  { %8432 = vrsqrt.f32 %v10436_v15  ;;  %v2722_v24 = vpop.permute.xlu0 %2721  ;;  %v620_v27 = vmul.f32 %v619_v32, %v9609_v12  ;;  %v1065_v61 = vsel %vm1063_vm4, %v1064_v31, %v1062_v17  ;;  %vm737_vm6 = vweird.f32 %v10341_v59 }
 0x2ac   :  { %v2778_v48 = vsel %vm385_vm1, %v2722_v24, 0.0  ;;  %8434 = vrcp.f32 %v10440_v63  ;;  %vm738_vm15 = vweird.f32 %v10417_v20  ;;  %vm1049_vm8 = vcmp.eq.f32.partialorder %v10291_v9, inf }
 0x2ad   :  { %2779 = vadd.xlane.f32.xlu1 %v2778_v48  ;;  %8436 = vrsqrt.f32 %v10314_v26  ;;  %v605_v48 = vmul.f32 0.5, %v604_v58  ;;  %v735_v56 = vmul.f32 %v10417_v20, %v734_v33  ;;  %v748_v21 = vmul.f32 %v10459_v50, %v10396_v7  ;;  %vm10527_vm14 = vmor %vm737_vm6, %vm738_vm15 }
 0x2ae   :  { %vm561_vm7 = vcmp.eq.f32.partialorder %v9699_v39, inf  ;;  %v595_v52 = vmul.f32 %v10364_v51, %v594_v43  ;;  %v10483_v32 = vmax.f32 %v1029_v1, 1e-12  ;;  %v10489_v31 = vmax.f32 %v1065_v61, 1e-12  ;;  %v10498_v43 = vpop.xlane.xlu1 %935 }
 0x2af   :  { %v562_v14 = vsel %vm561_vm7, %v9699_v39, %v560_v22  ;;  %v1052_v17 = vand.u32 2147483648, %v10291_v9  ;;  %v606_v28 = vsub.f32 1.5, %v605_v48  ;;  %vm1051_vm9 = vcmp.eq.f32.partialorder %v10291_v9, 0.0 }
 0x2b0   :  { %2225 = vadd.xlane.f32.xlu2 %v2224_v38  ;;  %v564_v38 = vand.u32 2147483648, %v9699_v39  ;;  %vm563_vm10 = vcmp.eq.f32.partialorder %v9699_v39, 0.0  ;;  %v736_v1 = vadd.f32 %v10417_v20, %v735_v56  ;;  %8438 = vrcp.f32 %v10483_v32 }
 0x2b1   :  { %v8433_v24 = vpop.eup %8432  ;;  %2231 = vadd.xlane.f32.xlu0 %v10155_v4  ;;  %v1050_v4 = vsel %vm1049_vm8, %v10291_v9, %v1048_v62  ;;  %v596_v48 = vmul.f32 %v595_v52, %v15955_v10  ;;  %8440 = vrcp.f32 %v10489_v31  ;;  %vm10508_vm11 = vcmp.eq.f32.partialorder %v741_v37, 8.507059e+37 }
 0x2b2   :  { %v1031_v42 = vmul.f32 %v8433_v24, %v10436_v15  ;;  %v10486_v58 = vpop.eup %8434  ;;  %v1053_v62 = vsel %vm1051_vm9, %v1052_v17, %v1050_v4  ;;  %v565_v61 = vsel %vm563_vm10, %v564_v38, %v562_v14  ;;  %v622_v56 = vsel %vm621_vm5, %v9609_v12, %v620_v27 }
 0x2b3   :  { %v10492_v5 = vpop.eup %8436  ;;  %v808_v30 = vmul.f32 %v10486_v58, %v10440_v63  ;;  %v10516_v14 = vmax.f32 %v1053_v62, 1e-12  ;;  %v758_v52 = vand.u32 2147483648, %v10396_v7  ;;  %vm623_vm13 = vcmp.eq.f32.partialorder %v9609_v12, 0.0 }
 0x2b4   :  { %v1032_v33 = vmul.f32 %v8433_v24, %v1031_v42  ;;  %v749_v42 = vsub.f32 1.0, %v748_v21  ;;  %v2240_v39 = vmul.f32 %v10492_v5, %v10314_v26  ;;  %v607_v21 = vmul.f32 %v10403_v8, %v606_v28 }
 0x2b5   :  { %v10521_v17 = vmax.f32 %v565_v61, 1e-12  ;;  %vm812_vm12 = vweird.f32 %v10440_v63  ;;  %v818_v8 = vand.u32 2147483648, %v10440_v63  ;;  %vm597_vm2 = vcmp.eq.f32.partialorder %v15955_v10, inf }
 0x2b6   :  { %v1033_v22 = vmul.f32 0.5, %v1032_v33  ;;  %v740_v28 = vsel %vm10527_vm14, %v10417_v20, %v736_v1  ;;  %vm753_vm3 = vweird.f32 %v10459_v50  ;;  %v2241_v59 = vmul.f32 %v10492_v5, %v2240_v39  ;;  %v10543_v62 = vpop.eup %8438 }
 0x2b7   :  { %v750_v38 = vmul.f32 %v10459_v50, %v749_v42  ;;  %vm752_vm4 = vweird.f32 %v10396_v7  ;;  %8442 = vrcp.f32 %v10516_v14  ;;  %vm1037_vm5 = vcmp.eq.f32.partialorder %v10436_v15, inf  ;;  %v10549_v20 = vpop.eup %8440 }
 0x2b8   :  { %v1034_v9 = vsub.f32 1.5, %v1033_v22  ;;  %v608_v22 = vmul.f32 %v607_v21, %v15965_v54  ;;  %8444 = vrcp.f32 %v10521_v17  ;;  %v600_v1 = vand.u32 2147483648, %v15955_v10  ;;  %v10558_v21 = vpop.xlane.xlu1 %2219 }
 0x2b9   :  { %2222 = vadd.xlane.f32.xlu0 %v10427_v49  ;;  %v809_v49 = vsub.f32 1.0, %v808_v30  ;;  %v1040_v30 = vand.u32 2147483648, %v10436_v15  ;;  %vm1039_vm6 = vcmp.eq.f32.partialorder %v10436_v15, 0.0  ;;  %vm599_vm15 = vcmp.eq.f32.partialorder %v15955_v10, 0.0 }
 0x2ba   :  { %v1035_v37 = vmul.f32 %v8433_v24, %v1034_v9  ;;  %v598_v24 = vsel %vm597_vm2, %v15955_v10, %v596_v48  ;;  %vm609_vm8 = vcmp.eq.f32.partialorder %v15965_v54, inf  ;;  %v2242_v9 = vmul.f32 0.5, %v2241_v59 }
 0x2bb   :  { %v810_v48 = vmul.f32 %v10486_v58, %v809_v49  ;;  %v601_v39 = vsel %vm599_vm15, %v600_v1, %v598_v24  ;;  %v1245_v33 = vmul.f32 %v10543_v62, %v10483_v32  ;;  %v1290_v10 = vmul.f32 %v10549_v20, %v10489_v31 }
 0x2bc   :  { %v1036_v27 = vmul.f32 %v1035_v37, %v10436_v15  ;;  %vm813_vm7 = vweird.f32 %v10486_v58  ;;  %v612_v49 = vand.u32 2147483648, %v15965_v54  ;;  %v10576_v24 = vmul.f32 %v10028_v13, %v10028_v13 }
 0x2bd   :  { %v10579_v59 = vadd.f32 %v10459_v50, %v750_v38  ;;  %vm611_vm9 = vcmp.eq.f32.partialorder %v15965_v54, 0.0  ;;  %v10591_v4 = vadd.f32 %v10486_v58, %v810_v48  ;;  %v2243_v38 = vsub.f32 1.5, %v2242_v9  ;;  %vm10603_vm10 = vmor %vm812_vm12, %vm813_vm7 }
 0x2be   :  { %v1038_v61 = vsel %vm1037_vm5, %v10436_v15, %v1036_v27  ;;  %v610_v27 = vsel %vm609_vm8, %v15965_v54, %v608_v22  ;;  %v745_v15 = vsel %vm10508_vm11, %v10468_v29, %v740_v28  ;;  %15978 = vst [vmem:[#allocation73_spill] sm:$0xff] %v10576_v24  ;;  %v15979_v22 = vand.u32 2147483648, %v9609_v12  ;;  %vm10614_vm11 = vmor %vm752_vm4, %vm753_vm3  ;;  %v16003_v12 = vld [vmem:[#allocation60_spill] sm:$0xff] }
 0x2bf   :  { %v1041_v42 = vsel %vm1039_vm6, %v1040_v30, %v1038_v61  ;;  %v10593_v28 = vmax.f32 %v601_v39, 1e-12  ;;  %v613_v1 = vsel %vm611_vm9, %v612_v49, %v610_v27  ;;  %v1246_v61 = vsub.f32 1.0, %v1245_v33 }
 0x2c0   :  { %v10560_v37 = vmax.f32 %v1041_v42, 1e-12  ;;  %v10587_v29 = vsel %vm623_vm13, %v15979_v22, %v622_v56  ;;  %v10597_v42 = vor.u32 1.1754944e-38, %v758_v52  ;;  %v1291_v54 = vsub.f32 1.0, %v1290_v10  ;;  %v15982_v56 = vld [vmem:[#allocation37_spill] sm:$0xff]  ;;  %v10651_v51 = vpop.xlane.xlu1 %2210 }
 0x2c1   :  { %2213 = vadd.xlane.f32.xlu0 %v10408_v45  ;;  %v10581_v45 = vpop.eup %8442  ;;  %v10608_v48 = vmul.f32 %v745_v15, %v15982_v56  ;;  %v816_v52 = vand.u32 2147483647, %v10440_v63  ;;  %v10619_v9 = vor.u32 1.1754944e-38, %v818_v8  ;;  %v940_v33 = vsel %vm385_vm1, %v10576_v24, 0.0 }
 0x2c2   :  { %8446 = vrcp.f32 %v10560_v37  ;;  %v10595_v30 = vpop.eup %8444  ;;  %v1275_v27 = vmul.f32 %v10581_v45, %v10516_v14  ;;  %v10630_v15 = vmax.f32 %v613_v1, 1e-12  ;;  %v2244_v22 = vmul.f32 %v10492_v5, %v2243_v38 }
 0x2c3   :  { %8448 = vrsqrt.f32 %v10498_v43  ;;  %v10634_v63 = vmul.f32 %v10595_v30, %v10521_v17  ;;  %vm2246_vm13 = vcmp.eq.f32.partialorder %v10314_v26, inf  ;;  %v1247_v1 = vmul.f32 %v10543_v62, %v1246_v61  ;;  %v16004_v61 = vld [vmem:[#allocation66_spill] sm:$0xff] }
 0x2c4   :  { %8450 = vrcp.f32 %v10593_v28  ;;  %vm1249_vm14 = vweird.f32 %v10483_v32  ;;  %v1292_v8 = vmul.f32 %v10549_v20, %v1291_v54  ;;  %vm1250_vm12 = vweird.f32 %v10543_v62 }
 0x2c5   :  { %8452 = vrsqrt.f32 %v10447_v16  ;;  %v1253_v5 = vand.u32 2147483647, %v10483_v32  ;;  %v1255_v38 = vand.u32 2147483648, %v10483_v32  ;;  %vm10656_vm2 = vcmp.eq.f32.partialorder %v816_v52, 8.507059e+37  ;;  %vm10682_vm15 = vmor %vm1249_vm14, %vm1250_vm12 }
 0x2c6   :  { %8454 = vrsqrt.f32 %v10558_v21  ;;  %vm1294_vm3 = vweird.f32 %v10489_v31  ;;  %vm1295_vm4 = vweird.f32 %v10549_v20  ;;  %v1298_v54 = vand.u32 2147483647, %v10489_v31 }
 0x2c7   :  { %v2245_v55 = vmul.f32 %v2244_v22, %v10314_v26  ;;  %v1270_v3 = vand.u32 2147483648, %v10560_v37  ;;  %v1248_v0 = vadd.f32 %v10543_v62, %v1247_v1  ;;  %v1300_v52 = vand.u32 2147483648, %v10489_v31  ;;  %vm10698_vm7 = vmor %vm1294_vm3, %vm1295_vm4 }
 0x2c8   :  { %v8447_v49 = vpop.eup %8446  ;;  %2731 = vrot.lane.b32.xlu2 %v10576_v24, %s9159_s3  ;;  %v1276_v24 = vsub.f32 1.0, %v1275_v27  ;;  %v15987_v27 = vand.u32 2147483647, %v10396_v7  ;;  %v1268_v13 = vand.u32 2147483647, %v10560_v37  ;;  %v1293_v7 = vadd.f32 %v10549_v20, %v1292_v8  ;;  %v10726_v60 = vpop.permute.xlu1 %2729 }
 0x2c9   :  { %941 = vadd.xlane.f32.xlu0 %v940_v33  ;;  %v1260_v10 = vmul.f32 %v8447_v49, %v10560_v37  ;;  %v10663_v41 = vpop.eup %8448  ;;  %vm1265_vm6 = vweird.f32 %v8447_v49  ;;  %vm10690_vm8 = vcmp.eq.f32.partialorder %v1253_v5, 8.507059e+37  ;;  %vm1264_vm9 = vweird.f32 %v10560_v37 }
 0x2ca   :  { %vm10671_vm5 = vcmp.eq.f32.partialorder %v15987_v27, 8.507059e+37  ;;  %v10675_v56 = vpop.eup %8450  ;;  %v2249_v27 = vand.u32 2147483648, %v10314_v26  ;;  %v1277_v11 = vmul.f32 %v10581_v45, %v1276_v24  ;;  %v1091_v57 = vmul.f32 %v10663_v41, %v10498_v43  ;;  %vm1266_vm12 = vmor %vm1264_vm9, %vm1265_vm6 }
 0x2cb   :  { %v1261_v33 = vsub.f32 1.0, %v1260_v10  ;;  %v10687_v1 = vpop.eup %8452  ;;  %vm10708_vm14 = vcmp.eq.f32.partialorder %v1298_v54, 8.507059e+37  ;;  %v2247_v31 = vsel %vm2246_vm13, %v10314_v26, %v2245_v55  ;;  %v1271_v6 = vor.u32 1.1754944e-38, %v1270_v3 }
 0x2cc   :  { %v10703_v8 = vpop.eup %8454  ;;  %v1252_v24 = vsel %vm10682_vm15, %v10543_v62, %v1248_v0  ;;  %v1301_v35 = vor.u32 1.1754944e-38, %v1300_v52  ;;  %vm1269_vm3 = vcmp.eq.f32.partialorder %v1268_v13, 8.507059e+37  ;;  %v1297_v54 = vsel %vm10698_vm7, %v10549_v20, %v1293_v7  ;;  %v15998_v62 = vld [vmem:[#allocation62_spill] sm:$0xff] }
 0x2cd   :  { %v1262_v19 = vmul.f32 %v8447_v49, %v1261_v33  ;;  %v1256_v33 = vor.u32 1.1754944e-38, %v1255_v38  ;;  %v2348_v55 = vmul.f32 %v10703_v8, %v10558_v21  ;;  %v1278_v53 = vadd.f32 %v10581_v45, %v1277_v11 }
 0x2ce   :  { %vm1280_vm13 = vweird.f32 %v10581_v45  ;;  %vm2248_vm4 = vcmp.eq.f32.partialorder %v10314_v26, 0.0  ;;  %v1092_v0 = vmul.f32 %v10663_v41, %v1091_v57  ;;  %vm1279_vm6 = vweird.f32 %v10516_v14 }
 0x2cf   :  { %v1263_v5 = vadd.f32 %v8447_v49, %v1262_v19  ;;  %v2384_v19 = vmul.f32 %v10687_v1, %v10447_v16  ;;  %v2250_v52 = vsel %vm2248_vm4, %v2249_v27, %v2247_v31  ;;  %v1257_v20 = vsel %vm10690_vm8, %v1256_v33, %v1252_v24  ;;  %vm10742_vm15 = vmor %vm1279_vm6, %vm1280_vm13 }
 0x2d0   :  { %v1302_v26 = vsel %vm10708_vm14, %v1301_v35, %v1297_v54  ;;  %v16001_v25 = vsel %vm10614_vm11, %v10459_v50, %v10579_v59  ;;  %v16002_v22 = vsel %vm10603_vm10, %v10486_v58, %v10591_v4  ;;  %8456 = vrcp.f32 %v10630_v15 }
 0x2d1   :  { %v1267_v37 = vsel %vm1266_vm12, %v8447_v49, %v1263_v5  ;;  %v1285_v49 = vand.u32 2147483648, %v10516_v14  ;;  %v2385_v11 = vmul.f32 %v10687_v1, %v2384_v19  ;;  %v820_v35 = vsel %vm10656_vm2, %v10619_v9, %v16002_v22  ;;  %v16006_v5 = vld [vmem:[#allocation17_spill] sm:$0xff]  ;;  %v16007_v19 = vld [vmem:[#allocation31_spill] sm:$0xff] }
 0x2d2   :  { %v1272_v3 = vsel %vm1269_vm3, %v1271_v6, %v1267_v37  ;;  %v1283_v6 = vand.u32 2147483647, %v10516_v14  ;;  %v760_v14 = vsel %vm10671_vm5, %v10597_v42, %v16001_v25  ;;  %v2349_v39 = vmul.f32 %v10703_v8, %v2348_v55 }
 0x2d3   :  { %v1273_v13 = vmul.f32 %v1272_v3, %v15998_v62  ;;  %v1282_v50 = vsel %vm10742_vm15, %v10581_v45, %v1278_v53  ;;  %v794_v59 = vsub.f32 1.0, %v10634_v63  ;;  %v1093_v42 = vmul.f32 0.5, %v1092_v0  ;;  %v16005_v45 = vld [vmem:[#allocation27_spill] sm:$0xff] }
 0x2d4   :  { %v1258_v10 = vmul.f32 %v1257_v20, %v16003_v12  ;;  %v1286_v58 = vor.u32 1.1754944e-38, %v1285_v49  ;;  %v10771_v4 = vmax.f32 %v2250_v52, 1e-12  ;;  %v1303_v9 = vmul.f32 %v1302_v26, %v16004_v61 }
 0x2d5   :  { %8149 = vmatpush.xpose.msk.msra.mxu3 %vm385_vm1, %v1273_v13  ;;  %vm1284_vm10 = vcmp.eq.f32.partialorder %v1283_v6, 8.507059e+37  ;;  %v838_v27 = vmul.f32 %v10675_v56, %v10593_v28  ;;  %v10777_v33 = vmax.f32 %v10587_v29, 1e-12  ;;  %v2386_v32 = vmul.f32 0.5, %v2385_v11  ;;  %v16008_v29 = vld [vmem:[#allocation40_spill] sm:$0xff] }
 0x2d6   :  { %v10764_v7 = vpop.xlane.xlu0 %2204  ;;  %v1287_v53 = vsel %vm1284_vm10, %v1286_v58, %v1282_v50  ;;  %v791_v63 = vmul.f32 %v10410_v47, %v16005_v45  ;;  %v836_v38 = vmul.f32 %v10415_v46, %v16006_v5  ;;  %v2350_v31 = vmul.f32 0.5, %v2349_v39  ;;  %v10795_v46 = vpop.eup %8456 }
 0x2d7   :  { %v1402_v24 = vmul.f32 %v9879_v23, %v10608_v48  ;;  %v761_v37 = vmul.f32 %v760_v14, %v16007_v19  ;;  %v821_v54 = vmul.f32 %v820_v35, %v16008_v29  ;;  %v1094_v55 = vsub.f32 1.5, %v1093_v42  ;;  %v16009_v48 = vld [vmem:[#allocation63_spill] sm:$0xff]  ;;  %v10834_v58 = vpop.permute.xlu2 %2719 }
 0x2d8   :  { %v10791_v3 = vmul.f32 %v9879_v23, %v10399_v40  ;;  %v795_v47 = vmul.f32 %v10595_v30, %v794_v59  ;;  %8458 = vrcp.f32 %v10771_v4  ;;  %v1288_v13 = vmul.f32 %v1287_v53, %v16009_v48  ;;  %v16012_v53 = vld [vmem:[#allocation81_spill] sm:$0xff] }
 0x2d9   :  { %8150 = vmatpush.xpose.msk.msra.mxu3 %vm385_vm1, %v1258_v10  ;;  %v801_v49 = vand.u32 2147483647, %v10521_v17  ;;  %v839_v52 = vsub.f32 1.0, %v838_v27  ;;  %8460 = vrcp.f32 %v10777_v33  ;;  %v2387_v20 = vsub.f32 1.5, %v2386_v32 }
 0x2da   :  { %v10806_v40 = vmul.f32 %v9879_v23, %v791_v63  ;;  %v803_v6 = vand.u32 2147483648, %v10521_v17  ;;  %v10810_v11 = vmul.f32 %v9879_v23, %v836_v38  ;;  %v2351_v26 = vsub.f32 1.5, %v2350_v31 }
 0x2db   :  { %v1403_v25 = vmul.f32 %v9879_v23, %v761_v37  ;;  %v10817_v14 = vmul.f32 %v9879_v23, %v821_v54  ;;  %v848_v22 = vand.u32 2147483648, %v10593_v28  ;;  %v1095_v35 = vmul.f32 %v10663_v41, %v1094_v55 }
 0x2dc   :  { %v10797_v0 = vpop.xlane.xlu1 %2201  ;;  %8151 = vmatmul.msk.f32.vlgmr.msra.gmra.mxu3 %vm385_vm1, %v1402_v24  ;;  %v796_v39 = vadd.f32 %v10595_v30, %v795_v47  ;;  %vm798_vm11 = vweird.f32 %v10595_v30  ;;  %vm797_vm2 = vweird.f32 %v10521_v17  ;;  %vm10825_vm5 = vcmp.eq.f32.partialorder %v801_v49, 8.507059e+37 }
 0x2dd   :  { %8153 = vmatpush.xpose.msk.msrb.mxu3 %vm385_vm1, %v1303_v9  ;;  %2733 = vrot.lane.b32.xlu0 %v10071_v44, %s9159_s3  ;;  %v840_v59 = vmul.f32 %v10675_v56, %v839_v52  ;;  %v846_v42 = vand.u32 2147483647, %v10593_v28  ;;  %v2388_v41 = vmul.f32 %v10687_v1, %v2387_v20  ;;  %v804_v9 = vor.u32 1.1754944e-38, %v803_v6  ;;  %vm10846_vm7 = vmor %vm797_vm2, %vm798_vm11 }
 0x2de   :  { %v10813_v57 = vpop.xlane.xlu0 %932  ;;  %v10831_v10 = vpop.eup %8458  ;;  %vm842_vm8 = vweird.f32 %v10593_v28  ;;  %v853_v17 = vmul.f32 %v10795_v46, %v10630_v15  ;;  %v2352_v32 = vmul.f32 %v10703_v8, %v2351_v26  ;;  %v10844_v63 = vsel %vm385_vm1, %v16012_v53, 0.0 }
 0x2df   :  { %8462 = vrsqrt.f32 %v10813_v57  ;;  %v10839_v27 = vpop.eup %8460  ;;  %vm843_vm9 = vweird.f32 %v10675_v56  ;;  %v849_v1 = vor.u32 1.1754944e-38, %v848_v22  ;;  %v1096_v31 = vmul.f32 %v1095_v35, %v10498_v43 }
 0x2e0   :  { %v800_v24 = vsel %vm10846_vm7, %v10595_v30, %v796_v39  ;;  %v861_v37 = vand.u32 2147483647, %v10630_v15  ;;  %v863_v8 = vand.u32 2147483648, %v10630_v15  ;;  %vm1097_vm14 = vcmp.eq.f32.partialorder %v10498_v43, inf  ;;  %vm10890_vm13 = vmor %vm842_vm8, %vm843_vm9 }
 0x2e1   :  { %8154 = vmatpush.xpose.msk.msrb.mxu3 %vm385_vm1, %v1288_v13  ;;  %8464 = vrsqrt.f32 %v10651_v51  ;;  %v2448_v54 = vmul.f32 %v10831_v10, %v10771_v4  ;;  %v841_v55 = vadd.f32 %v10675_v56, %v840_v59  ;;  %vm10863_vm12 = vcmp.eq.f32.partialorder %v846_v42, 8.507059e+37 }
 0x2e2   :  { %v2389_v13 = vmul.f32 %v2388_v41, %v10447_v16  ;;  %v854_v52 = vsub.f32 1.0, %v853_v17  ;;  %v868_v20 = vmul.f32 %v10839_v27, %v10777_v33  ;;  %v878_v6 = vand.u32 2147483648, %v10777_v33 }
 0x2e3   :  { %v1100_v26 = vand.u32 2147483648, %v10498_v43  ;;  %8466 = vrsqrt.f32 %v10764_v7  ;;  %v1098_v39 = vsel %vm1097_vm14, %v10498_v43, %v1096_v31  ;;  %vm1099_vm3 = vcmp.eq.f32.partialorder %v10498_v43, 0.0 }
 0x2e4   :  { %8152 = vmatmul.msk.f32.gmra.mxu3 %vm385_vm1, %v1403_v25  ;;  %v10868_v49 = vpop.xlane.xlu1 %2237  ;;  %v2353_v25 = vmul.f32 %v2352_v32, %v10558_v21  ;;  %v805_v59 = vsel %vm10825_vm5, %v804_v9, %v800_v24  ;;  %vm2390_vm4 = vcmp.eq.f32.partialorder %v10447_v16, inf  ;;  %v2449_v17 = vsub.f32 1.0, %v2448_v54  ;;  %v10908_v54 = vpop.permute.xlu2 %2723 }
 0x2e5   :  { %v8463_v30 = vpop.eup %8462  ;;  %v845_v43 = vsel %vm10890_vm13, %v10675_v56, %v841_v55  ;;  %v2391_v32 = vsel %vm2390_vm4, %v10447_v16, %v2389_v13  ;;  %vm2354_vm6 = vcmp.eq.f32.partialorder %v10558_v21, inf  ;;  %v855_v50 = vmul.f32 %v10795_v46, %v854_v52  ;;  %v16019_v55 = vld [vmem:[#allocation29_spill] sm:$0xff] }
 0x2e6   :  { %v1079_v22 = vmul.f32 %v8463_v30, %v10813_v57  ;;  %v10877_v35 = vpop.xlane.xlu0 %2195  ;;  %v869_v9 = vsub.f32 1.0, %v868_v20  ;;  %v2393_v53 = vand.u32 2147483648, %v10447_v16  ;;  %v1101_v38 = vsel %vm1099_vm3, %v1100_v26, %v1098_v39 }
 0x2e7   :  { %8468 = vrsqrt.f32 %v10877_v35  ;;  %v10901_v28 = vpop.eup %8464  ;;  %v2355_v31 = vsel %vm2354_vm6, %v10558_v21, %v2353_v25  ;;  %vm857_vm15 = vweird.f32 %v10630_v15  ;;  %vm2392_vm10 = vcmp.eq.f32.partialorder %v10447_v16, 0.0 }
 0x2e8   :  { %v1080_v41 = vmul.f32 %v8463_v30, %v1079_v22  ;;  %v2357_v56 = vand.u32 2147483648, %v10558_v21  ;;  %v10911_v13 = vmul.f32 %v805_v59, %v16019_v55  ;;  %vm858_vm11 = vweird.f32 %v10795_v46 }
 0x2e9   :  { %v10914_v52 = vpop.eup %8466  ;;  %v2394_v20 = vsel %vm2392_vm10, %v2393_v53, %v2391_v32  ;;  %vm2356_vm2 = vcmp.eq.f32.partialorder %v10558_v21, 0.0  ;;  %v2450_v16 = vmul.f32 %v10831_v10, %v2449_v17  ;;  %v10922_v22 = vmax.f32 %v1101_v38, 1e-12  ;;  %v16020_v53 = vld [vmem:[#allocation75_spill] sm:$0xff]  ;;  %vm10967_vm3 = vmor %vm857_vm15, %vm858_vm11 }
 0x2ea   :  { %v1081_v24 = vmul.f32 0.5, %v1080_v41  ;;  %v2358_v39 = vsel %vm2356_vm2, %v2357_v56, %v2355_v31  ;;  %v2312_v59 = vmul.f32 %v10901_v28, %v10651_v51  ;;  %v850_v42 = vsel %vm10863_vm12, %v849_v1, %v845_v43 }
 0x2eb   :  { %vm873_vm5 = vweird.f32 %v10839_v27  ;;  %v870_v17 = vmul.f32 %v10839_v27, %v869_v9  ;;  %v2757_v38 = vsel %vm385_vm1, %v16020_v53, 0.0  ;;  %vm2453_vm8 = vweird.f32 %v10831_v10 }
 0x2ec   :  { %v1082_v26 = vsub.f32 1.5, %v1081_v24  ;;  %8155 = vmatmul.msk.f32.vlgmr.msrb.gmra.mxu3 %vm385_vm1, %v10791_v3  ;;  %v856_v3 = vadd.f32 %v10795_v46, %v855_v50  ;;  %v10933_v32 = vpop.xlane.xlu1 %944  ;;  %v2458_v47 = vand.u32 2147483648, %v10771_v4  ;;  %v10939_v1 = vmax.f32 %v2394_v20, 1e-12 }
 0x2ed   :  { %v10920_v25 = vpop.eup %8468  ;;  %vm872_vm7 = vweird.f32 %v10777_v33  ;;  %v10945_v50 = vmax.f32 %v2358_v39, 1e-12  ;;  %v2451_v9 = vadd.f32 %v10831_v10, %v2450_v16  ;;  %8470 = vrcp.f32 %v10922_v22 }
 0x2ee   :  { %v1083_v21 = vmul.f32 %v8463_v30, %v1082_v26  ;;  %v2252_v41 = vmul.f32 %v10920_v25, %v10877_v35  ;;  %v2288_v30 = vmul.f32 %v10914_v52, %v10764_v7  ;;  %v2313_v31 = vmul.f32 %v10901_v28, %v2312_v59  ;;  %vm11010_vm15 = vmor %vm872_vm7, %vm873_vm5 }
 0x2ef   :  { %vm1085_vm9 = vcmp.eq.f32.partialorder %v10813_v57, inf  ;;  %v1088_v24 = vand.u32 2147483648, %v10813_v57  ;;  %vm1087_vm14 = vcmp.eq.f32.partialorder %v10813_v57, 0.0  ;;  %8472 = vrsqrt.f32 %v10933_v32 }
 0x2f0   :  { %v1084_v43 = vmul.f32 %v1083_v21, %v10813_v57  ;;  %v2253_v20 = vmul.f32 %v10920_v25, %v2252_v41  ;;  %vm2452_vm12 = vweird.f32 %v10771_v4  ;;  %v2456_v16 = vand.u32 2147483647, %v10771_v4  ;;  %v16025_v41 = vld [vmem:[#allocation14_spill] sm:$0xff] }
 0x2f1   :  { %2758 = vadd.xlane.f32.xlu2 %v2757_v38  ;;  %8474 = vrcp.f32 %v10939_v1  ;;  %v2289_v59 = vmul.f32 %v10914_v52, %v2288_v30  ;;  %vm10979_vm13 = vmor %vm2452_vm12, %vm2453_vm8  ;;  %v851_v53 = vmul.f32 %v850_v42, %v16025_v41  ;;  %v10992_v30 = vadd.f32 %v10839_v27, %v870_v17 }
 0x2f2   :  { %v1086_v56 = vsel %vm1085_vm9, %v10813_v57, %v1084_v43  ;;  %8476 = vrcp.f32 %v10945_v50  ;;  %v2455_v38 = vsel %vm10979_vm13, %v10831_v10, %v2451_v9  ;;  %v2314_v43 = vmul.f32 0.5, %v2313_v31 }
 0x2f3   :  { %v1089_v26 = vsel %vm1087_vm14, %v1088_v24, %v1086_v56  ;;  %v10956_v39 = vpop.xlane.xlu2 %929  ;;  %v2254_v24 = vmul.f32 0.5, %v2253_v20  ;;  %v2459_v56 = vor.u32 1.1754944e-38, %v2458_v47  ;;  %vm2457_vm4 = vcmp.eq.f32.partialorder %v2456_v16, 8.507059e+37 }
 0x2f4   :  { %v10972_v21 = vmax.f32 %v1089_v26, 1e-12  ;;  %8156 = vmatmul.msk.f32.gmra.mxu3 %vm385_vm1, %v10806_v40  ;;  %8478 = vrsqrt.f32 %v10956_v39  ;;  %v860_v40 = vsel %vm10967_vm3, %v10795_v46, %v856_v3  ;;  %v10995_v26 = vpop.eup %8470  ;;  %vm862_vm6 = vcmp.eq.f32.partialorder %v861_v37, 8.507059e+37 }
 0x2f5   :  { %v864_v10 = vor.u32 1.1754944e-38, %v863_v8  ;;  %v11002_v46 = vpop.eup %8472  ;;  %v2290_v3 = vmul.f32 0.5, %v2289_v59  ;;  %v2766_v17 = vsel %vm385_vm1, %v10086_v18, 0.0  ;;  %v2460_v9 = vsel %vm2457_vm4, %v2459_v56, %v2455_v38 }
 0x2f6   :  { %8480 = vrcp.f32 %v10972_v21  ;;  %v11016_v15 = vor.u32 1.1754944e-38, %v878_v6  ;;  %v11022_v18 = vmul.f32 %v9879_v23, %v10911_v13  ;;  %v11025_v31 = vmul.f32 %v9879_v23, %v851_v53 }
 0x2f7   :  { %v11018_v37 = vpop.eup %8474  ;;  %v11027_v20 = vsel %vm862_vm6, %v864_v10, %v860_v40  ;;  %v2315_v57 = vsub.f32 1.5, %v2314_v43  ;;  %v2255_v59 = vsub.f32 1.5, %v2254_v24  ;;  %v1335_v13 = vmul.f32 %v10995_v26, %v10922_v22  ;;  %v16028_v43 = vld [vmem:[#allocation10_spill] sm:$0xff] }
 0x2f8   :  { %v11033_v16 = vpop.eup %8476  ;;  %v1127_v53 = vmul.f32 %v11002_v46, %v10933_v32  ;;  %v11044_v56 = vsel %vm385_vm1, %v10010_v34, 0.0  ;;  %v11047_v10 = vstv %s10958_s7  ;;  %v11050_v24 = vmul.f32 %v2460_v9, %v16028_v43 }
 0x2f9   :  { %2767 = vadd.xlane.f32.xlu2 %v2766_v17  ;;  %v2728_v8 = vpop.permute.xlu0 %2727  ;;  %8482 = vrsqrt.f32 %v10797_v0  ;;  %v11058_v42 = vsel %vm385_vm1, %v10381_v36, 0.0  ;;  %v11063_v34 = vmul.f32 %v11018_v37, %v10939_v1  ;;  %v2256_v44 = vmul.f32 %v10920_v25, %v2255_v59 }
 0x2fa   :  { %v2787_v4 = vsel %vm385_vm1, %v2728_v8, 0.0  ;;  %v8479_v38 = vpop.eup %8478  ;;  %v2291_v8 = vsub.f32 1.5, %v2290_v3  ;;  %v2316_v3 = vmul.f32 %v10901_v28, %v2315_v57  ;;  %v1336_v61 = vsub.f32 1.0, %v1335_v13 }
 0x2fb   :  { %v11040_v40 = vpop.xlane.xlu2 %2216  ;;  %2788 = vadd.xlane.f32.xlu1 %v2787_v4  ;;  %v1067_v6 = vmul.f32 %v8479_v38, %v10956_v39  ;;  %v1128_v62 = vmul.f32 %v11002_v46, %v1127_v53  ;;  %v11075_v12 = vmul.f32 %v11033_v16, %v10945_v50  ;;  %v2784_v28 = vsel %vm385_vm1, %v10383_v2, 0.0 }
 0x2fc   :  { %v11052_v17 = vpop.eup %8480  ;;  %v2292_v9 = vmul.f32 %v10914_v52, %v2291_v8  ;;  %v2629_v13 = vsub.f32 1.0, %v11063_v34  ;;  %v11087_v4 = vmul.f32 %v2316_v3, %v10651_v51  ;;  %v1337_v2 = vmul.f32 %v10995_v26, %v1336_v61 }
 0x2fd   :  { %v1068_v48 = vmul.f32 %v8479_v38, %v1067_v6  ;;  %v1320_v36 = vmul.f32 %v11052_v17, %v10972_v21  ;;  %vm2294_vm10 = vcmp.eq.f32.partialorder %v10764_v7, inf  ;;  %vm2296_vm11 = vcmp.eq.f32.partialorder %v10764_v7, 0.0 }
 0x2fe   :  { %v1129_v8 = vmul.f32 0.5, %v1128_v62  ;;  %vm1339_vm2 = vweird.f32 %v10922_v22  ;;  %vm1340_vm5 = vweird.f32 %v10995_v26  ;;  %v2584_v34 = vsub.f32 1.0, %v11075_v12 }
 0x2ff   :  { %v1069_v43 = vmul.f32 0.5, %v1068_v48  ;;  %v1321_v6 = vsub.f32 1.0, %v1320_v36  ;;  %v11084_v53 = vpop.eup %8482  ;;  %v2257_v48 = vmul.f32 %v2256_v44, %v10877_v35  ;;  %v2293_v3 = vmul.f32 %v2292_v9, %v10764_v7 }
 0x300   :  { %v2297_v44 = vand.u32 2147483648, %v10764_v7  ;;  %v2790_v61 = vsel %vm385_vm1, %v10726_v60, 0.0  ;;  %vm2258_vm8 = vcmp.eq.f32.partialorder %v10877_v35, inf  ;;  %v2261_v62 = vand.u32 2147483648, %v10877_v35 }
 0x301   :  { %2785 = vadd.xlane.f32.xlu2 %v2784_v28  ;;  %v1070_v52 = vsub.f32 1.5, %v1069_v43  ;;  %v2276_v28 = vmul.f32 %v11084_v53, %v10797_v0  ;;  %v1322_v59 = vmul.f32 %v11052_v17, %v1321_v6  ;;  %v2259_v57 = vsel %vm2258_vm8, %v10877_v35, %v2257_v48 }
 0x302   :  { %vm1073_vm7 = vcmp.eq.f32.partialorder %v10956_v39, inf  ;;  %vm2318_vm9 = vcmp.eq.f32.partialorder %v10651_v51, inf  ;;  %v1130_v60 = vsub.f32 1.5, %v1129_v8  ;;  %v1076_v9 = vand.u32 2147483648, %v10956_v39 }
 0x303   :  { %v11093_v36 = vpop.xlane.xlu2 %2207  ;;  %v1071_v43 = vmul.f32 %v8479_v38, %v1070_v52  ;;  %v1330_v38 = vand.u32 2147483648, %v10972_v21  ;;  %vm1325_vm14 = vweird.f32 %v11052_v17  ;;  %v1328_v52 = vand.u32 2147483647, %v10972_v21 }
 0x304   :  { %v2295_v6 = vsel %vm2294_vm10, %v10764_v7, %v2293_v3  ;;  %vm2260_vm12 = vcmp.eq.f32.partialorder %v10877_v35, 0.0  ;;  %vm1075_vm3 = vcmp.eq.f32.partialorder %v10956_v39, 0.0  ;;  %v1323_v25 = vadd.f32 %v11052_v17, %v1322_v59 }
 0x305   :  { %v1072_v12 = vmul.f32 %v1071_v43, %v10956_v39  ;;  %v2262_v43 = vsel %vm2260_vm12, %v2261_v62, %v2259_v57  ;;  %vm1324_vm13 = vweird.f32 %v10972_v21  ;;  %8484 = vrsqrt.f32 %v11093_v36 }
 0x306   :  { %vm1326_vm4 = vmor %vm1324_vm13, %vm1325_vm14  ;;  %v1331_v3 = vor.u32 1.1754944e-38, %v1330_v38  ;;  %vm2320_vm6 = vcmp.eq.f32.partialorder %v10651_v51, 0.0  ;;  %v1131_v35 = vmul.f32 %v11002_v46, %v1130_v60  ;;  %8486 = vrsqrt.f32 %v11040_v40 }
 0x307   :  { %2752 = vadd.xlane.f32.xlu0 %v10844_v63  ;;  %v1074_v48 = vsel %vm1073_vm7, %v10956_v39, %v1072_v12  ;;  %v2277_v63 = vmul.f32 %v11084_v53, %v2276_v28  ;;  %v1327_v39 = vsel %vm1326_vm4, %v11052_v17, %v1323_v25  ;;  %vm1329_vm10 = vcmp.eq.f32.partialorder %v1328_v52, 8.507059e+37  ;;  %v16029_v28 = vld [vmem:[#allocation70_spill] sm:$0xff]  ;;  %vm11148_vm7 = vmor %vm1339_vm2, %vm1340_vm5 }
 0x308   :  { %v1077_v8 = vsel %vm1075_vm3, %v1076_v9, %v1074_v48  ;;  %vm2632_vm8 = vweird.f32 %v10939_v1  ;;  %v2298_v21 = vsel %vm2296_vm11, %v2297_v44, %v2295_v6  ;;  %v1332_v59 = vsel %vm1329_vm10, %v1331_v3, %v1327_v39 }
 0x309   :  { %2791 = vadd.xlane.f32.xlu2 %v2790_v61  ;;  %v11125_v55 = vmax.f32 %v1077_v8, 1e-12  ;;  %v11138_v61 = vmax.f32 %v2262_v43, 1e-12  ;;  %v1333_v62 = vmul.f32 %v1332_v59, %v16029_v28  ;;  %v1338_v46 = vadd.f32 %v10995_v26, %v1337_v2 }
 0x30a   :  { %v2630_v17 = vmul.f32 %v11018_v37, %v2629_v13  ;;  %v2278_v25 = vmul.f32 0.5, %v2277_v63  ;;  %v16032_v44 = vand.u32 2147483647, %v10922_v22  ;;  %v2585_v38 = vmul.f32 %v11033_v16, %v2584_v34 }
 0x30b   :  { %v11132_v57 = vpop.xlane.xlu2 %2198  ;;  %8488 = vrcp.f32 %v11125_v55  ;;  %v16035_v2 = vand.u32 2147483648, %v10939_v1  ;;  %v1132_v60 = vmul.f32 %v1131_v35, %v10933_v32  ;;  %8157 = vmatpush.xpose.msk.msra.mxu3 %vm385_vm1, %v1333_v62  ;;  %v16036_v9 = vand.u32 2147483648, %v10922_v22  ;;  %v11175_v43 = vpop.eup %8484 }
 0x30c   :  { %8490 = vrsqrt.f32 %v11132_v57  ;;  %vm11154_vm11 = vcmp.eq.f32.partialorder %v16032_v44, 8.507059e+37  ;;  %v11166_v6 = vmax.f32 %v2298_v21, 1e-12  ;;  %vm2633_vm2 = vweird.f32 %v11018_v37  ;;  %v11184_v22 = vpop.eup %8486 }
 0x30d   :  { %v2639_v13 = vor.u32 1.1754944e-38, %v16035_v2  ;;  %v1346_v52 = vor.u32 1.1754944e-38, %v16036_v9  ;;  %v16037_v48 = vand.u32 2147483647, %v10939_v1  ;;  %vm1133_vm14 = vcmp.eq.f32.partialorder %v10933_v32, inf  ;;  %vm11228_vm4 = vmor %vm2632_vm8, %vm2633_vm2 }
 0x30e   :  { %8492 = vrcp.f32 %v11138_v61  ;;  %vm2587_vm12 = vweird.f32 %v10945_v50  ;;  %v1342_v8 = vsel %vm11148_vm7, %v10995_v26, %v1338_v46  ;;  %vm2588_vm3 = vweird.f32 %v11033_v16  ;;  %v11201_v26 = vpop.xlane.xlu1 %2755 }
 0x30f   :  { %2761 = vadd.xlane.f32.xlu0 %v11044_v56  ;;  %vm11171_vm5 = vcmp.eq.f32.partialorder %v16037_v48, 8.507059e+37  ;;  %v2319_v56 = vsel %vm2318_vm9, %v10651_v51, %v11087_v4  ;;  %v16040_v63 = vand.u32 2147483647, %v10945_v50  ;;  %v16043_v4 = vand.u32 2147483648, %v10945_v50 }
 0x310   :  { %v2631_v39 = vadd.f32 %v11018_v37, %v2630_v17  ;;  %v2279_v59 = vsub.f32 1.5, %v2278_v25  ;;  %vm1135_vm9 = vcmp.eq.f32.partialorder %v10933_v32, 0.0  ;;  %v1136_v62 = vand.u32 2147483648, %v10933_v32 }
 0x311   :  { %vm11192_vm13 = vcmp.eq.f32.partialorder %v16040_v63, 8.507059e+37  ;;  %v2594_v35 = vor.u32 1.1754944e-38, %v16043_v4  ;;  %v8489_v21 = vpop.eup %8488  ;;  %v2586_v46 = vadd.f32 %v11033_v16, %v2585_v38  ;;  %v1134_v44 = vsel %vm1133_vm14, %v10933_v32, %v1132_v60 }
 0x312   :  { %v11204_v7 = vpop.eup %8490  ;;  %v2300_v2 = vmul.f32 %v11175_v43, %v11093_v36  ;;  %v1305_v25 = vmul.f32 %v8489_v21, %v11125_v55  ;;  %8494 = vrcp.f32 %v11166_v6  ;;  %v16044_v9 = vand.u32 2147483648, %v10651_v51 }
 0x313   :  { %v11211_v17 = vpop.xlane.xlu2 %938  ;;  %v2336_v48 = vmul.f32 %v11184_v22, %v11040_v40  ;;  %v2264_v60 = vmul.f32 %v11204_v7, %v11132_v57  ;;  %v2635_v1 = vsel %vm11228_vm4, %v11018_v37, %v2631_v39  ;;  %v1137_v12 = vsel %vm1135_vm9, %v1136_v62, %v1134_v44 }
 0x314   :  { %v2322_v38 = vsel %vm2320_vm6, %v16044_v9, %v2319_v56  ;;  %8496 = vrsqrt.f32 %v11211_v17  ;;  %v1306_v51 = vsub.f32 1.0, %v1305_v25  ;;  %v11235_v56 = vsel %vm11154_vm11, %v1346_v52, %v1342_v8  ;;  %vm11241_vm6 = vmor %vm2587_vm12, %vm2588_vm3  ;;  %v11248_v9 = vpop.eup %8492 }
 0x315   :  { %8498 = vrsqrt.f32 %v11201_v26  ;;  %v2280_v25 = vmul.f32 %v11084_v53, %v2279_v59  ;;  %v2265_v52 = vmul.f32 %v11204_v7, %v2264_v60  ;;  %v2590_v50 = vsel %vm11241_vm6, %v11033_v16, %v2586_v46 }
 0x316   :  { %v2301_v8 = vmul.f32 %v11175_v43, %v2300_v2  ;;  %v1307_v28 = vmul.f32 %v8489_v21, %v1306_v51  ;;  %vm1310_vm10 = vweird.f32 %v8489_v21  ;;  %v1315_v37 = vand.u32 2147483648, %v11125_v55 }
 0x317   :  { %2770 = vadd.xlane.f32.xlu0 %v11058_v42  ;;  %v2337_v39 = vmul.f32 %v11184_v22, %v2336_v48  ;;  %v1313_v53 = vand.u32 2147483647, %v11125_v55  ;;  %v2775_v32 = vsel %vm385_vm1, %v10834_v58, 0.0  ;;  %v11266_v59 = vsel %vm11171_vm5, %v2639_v13, %v2635_v1 }
 0x318   :  { %v11268_v16 = vpop.eup %8494  ;;  %v11270_v62 = vmax.f32 %v1137_v12, 1e-12  ;;  %v1308_v42 = vadd.f32 %v8489_v21, %v1307_v28  ;;  %vm1309_vm8 = vweird.f32 %v11125_v55  ;;  %v2463_v46 = vmul.f32 %v11248_v9, %v11138_v61 }
 0x319   :  { %v2281_v2 = vmul.f32 %v2280_v25, %v10797_v0  ;;  %v2266_v48 = vmul.f32 0.5, %v2265_v52  ;;  %vm11276_vm7 = vmor %vm1309_vm8, %vm1310_vm10  ;;  %v2595_v13 = vsel %vm11192_vm13, %v2594_v35, %v2590_v50  ;;  %v11282_v34 = vmax.f32 %v2322_v38, 1e-12  ;;  %v16051_v50 = vld [vmem:[#allocation69_spill] sm:$0xff] }
 0x31a   :  { %v8497_v44 = vpop.eup %8496  ;;  %v2302_v28 = vmul.f32 0.5, %v2301_v8  ;;  %v1312_v51 = vsel %vm11276_vm7, %v8489_v21, %v1308_v42  ;;  %v1316_v4 = vor.u32 1.1754944e-38, %v1315_v37  ;;  %v2338_v1 = vmul.f32 0.5, %v2337_v39 }
 0x31b   :  { %v11284_v60 = vpop.eup %8498  ;;  %v1103_v55 = vmul.f32 %v8497_v44, %v11211_v17  ;;  %v11287_v63 = vpop.xlane.xlu2 %2234  ;;  %vm1314_vm11 = vcmp.eq.f32.partialorder %v1313_v53, 8.507059e+37  ;;  %v2518_v3 = vand.u32 2147483648, %v11166_v6  ;;  %v2464_v25 = vsub.f32 1.0, %v2463_v46 }
 0x31c   :  { %8500 = vrsqrt.f32 %v11287_v63  ;;  %v1317_v38 = vsel %vm1314_vm11, %v1316_v4, %v1312_v51  ;;  %v2812_v12 = vmul.f32 %v11284_v60, %v11201_v26  ;;  %v2267_v52 = vsub.f32 1.5, %v2266_v48 }
 0x31d   :  { %8502 = vrcp.f32 %v11270_v62  ;;  %v1104_v35 = vmul.f32 %v8497_v44, %v1103_v55  ;;  %v1318_v8 = vmul.f32 %v1317_v38, %v16051_v50  ;;  %v2508_v21 = vmul.f32 %v11268_v16, %v11166_v6 }
 0x31e   :  { %v2303_v37 = vsub.f32 1.5, %v2302_v28  ;;  %v2781_v53 = vsel %vm385_vm1, %v10908_v54, 0.0  ;;  %v11302_v42 = vmul.f32 %v2595_v13, %v16005_v45  ;;  %vm2282_vm2 = vcmp.eq.f32.partialorder %v10797_v0, inf }
 0x31f   :  { %v1105_v39 = vmul.f32 0.5, %v1104_v35  ;;  %2776 = vadd.xlane.f32.xlu0 %v2775_v32  ;;  %v2339_v58 = vsub.f32 1.5, %v2338_v1  ;;  %8158 = vmatpush.xpose.msk.msra.mxu3 %vm385_vm1, %v1318_v8  ;;  %8504 = vrcp.f32 %v11282_v34  ;;  %v11309_v48 = vsel %vm2282_vm2, %v10797_v0, %v2281_v2 }
 0x320   :  { %v2465_v32 = vmul.f32 %v11248_v9, %v2464_v25  ;;  %v11316_v13 = vmul.f32 %v11284_v60, %v2812_v12  ;;  %v2268_v51 = vmul.f32 %v11204_v7, %v2267_v52  ;;  %v2509_v4 = vsub.f32 1.0, %v2508_v21 }
 0x321   :  { %v1106_v28 = vsub.f32 1.5, %v1105_v39  ;;  %v11319_v1 = vor.u32 1.1754944e-38, %v2518_v3  ;;  %v2304_v2 = vmul.f32 %v11175_v43, %v2303_v37  ;;  %vm2467_vm5 = vweird.f32 %v11138_v61 }
 0x322   :  { %v11313_v55 = vpop.eup %8500  ;;  %8159 = vmatmul.msk.f32.vlgmr.msra.gmra.mxu3 %vm385_vm1, %v11022_v18  ;;  %v2340_v7 = vmul.f32 %v11184_v22, %v2339_v58  ;;  %vm2468_vm14 = vweird.f32 %v11248_v9  ;;  %v2471_v3 = vand.u32 2147483647, %v11138_v61  ;;  %v2473_v43 = vand.u32 2147483648, %v11138_v61 }
 0x323   :  { %v11321_v35 = vpop.eup %8502  ;;  %v1107_v38 = vmul.f32 %v8497_v44, %v1106_v28  ;;  %v2408_v25 = vmul.f32 %v11313_v55, %v11287_v63  ;;  %v11328_v8 = vpop.xlane.xlu2 %2225  ;;  %v2466_v18 = vadd.f32 %v11248_v9, %v2465_v32  ;;  %v2269_v22 = vmul.f32 %v2268_v51, %v11132_v57  ;;  %vm11357_vm9 = vmor %vm2467_vm5, %vm2468_vm14 }
 0x324   :  { %v11332_v12 = vpop.xlane.xlu0 %2231  ;;  %vm1109_vm12 = vcmp.eq.f32.partialorder %v11211_v17, inf  ;;  %v1112_v37 = vand.u32 2147483648, %v11211_v17  ;;  %v1380_v39 = vmul.f32 %v11321_v35, %v11270_v62  ;;  %v2305_v58 = vmul.f32 %v2304_v2, %v11093_v36 }
 0x325   :  { %v1108_v44 = vmul.f32 %v1107_v38, %v11211_v17  ;;  %v2409_v52 = vmul.f32 %v11313_v55, %v2408_v25  ;;  %8506 = vrsqrt.f32 %v11332_v12  ;;  %v11341_v21 = vpop.eup %8504  ;;  %vm1111_vm3 = vcmp.eq.f32.partialorder %v11211_v17, 0.0 }
 0x326   :  { %vm2306_vm13 = vcmp.eq.f32.partialorder %v11093_v36, inf  ;;  %v2309_v32 = vand.u32 2147483648, %v11093_v36  ;;  %v2510_v2 = vmul.f32 %v11268_v16, %v2509_v4  ;;  %vm2270_vm4 = vcmp.eq.f32.partialorder %v11132_v57, inf }
 0x327   :  { %v1110_v28 = vsel %vm1109_vm12, %v11211_v17, %v1108_v44  ;;  %v2410_v38 = vmul.f32 0.5, %v2409_v52  ;;  %2782 = vadd.xlane.f32.xlu0 %v2781_v53  ;;  %v2470_v53 = vsel %vm11357_vm9, %v11248_v9, %v2466_v18  ;;  %vm11368_vm6 = vcmp.eq.f32.partialorder %v2471_v3, 8.507059e+37 }
 0x328   :  { %v1113_v51 = vsel %vm1111_vm3, %v1112_v37, %v1110_v28  ;;  %v2341_v61 = vmul.f32 %v2340_v7, %v11040_v40  ;;  %v2271_v52 = vsel %vm2270_vm4, %v11132_v57, %v2269_v22  ;;  %v2474_v28 = vor.u32 1.1754944e-38, %v2473_v43 }
 0x329   :  { %v11363_v17 = vmax.f32 %v1113_v51, 1e-12  ;;  %v2411_v37 = vsub.f32 1.5, %v2410_v38  ;;  %v2307_v4 = vsel %vm2306_vm13, %v11093_v36, %v2305_v58  ;;  %v2273_v51 = vand.u32 2147483648, %v11132_v57 }
 0x32a   :  { %8160 = vmatmul.msk.f32.gmra.mxu3 %vm385_vm1, %v10817_v14  ;;  %v1381_v3 = vsub.f32 1.0, %v1380_v39  ;;  %vm2272_vm10 = vcmp.eq.f32.partialorder %v11132_v57, 0.0  ;;  %v2475_v22 = vsel %vm11368_vm6, %v2474_v28, %v2470_v53  ;;  %vm2342_vm8 = vcmp.eq.f32.partialorder %v11040_v40, inf  ;;  %v16056_v53 = vld [vmem:[#allocation25_spill] sm:$0xff] }
 0x32b   :  { %v8507_v46 = vpop.eup %8506  ;;  %8508 = vrcp.f32 %v11363_v17  ;;  %v2732_v9 = vpop.permute.xlu2 %2731  ;;  %vm2308_vm7 = vcmp.eq.f32.partialorder %v11093_v36, 0.0  ;;  %v2274_v58 = vsel %vm2272_vm10, %v2273_v51, %v2271_v52  ;;  %vm2513_vm11 = vweird.f32 %v11268_v16 }
 0x32c   :  { %v2396_v7 = vmul.f32 %v8507_v46, %v11332_v12  ;;  %v11381_v18 = vpop.xlane.xlu0 %2222  ;;  %v2793_v43 = vsel %vm385_vm1, %v2732_v9, 0.0  ;;  %v2343_v14 = vsel %vm2342_vm8, %v11040_v40, %v2341_v61  ;;  %v2310_v57 = vsel %vm2308_vm7, %v2309_v32, %v2307_v4 }
 0x32d   :  { %2794 = vadd.xlane.f32.xlu2 %v2793_v43  ;;  %v2412_v39 = vmul.f32 %v11313_v55, %v2411_v37  ;;  %vm2512_vm2 = vweird.f32 %v11166_v6  ;;  %vm2344_vm5 = vcmp.eq.f32.partialorder %v11040_v40, 0.0  ;;  %v2345_v25 = vand.u32 2147483648, %v11040_v40 }
 0x32e   :  { %v2397_v38 = vmul.f32 %v8507_v46, %v2396_v7  ;;  %v2476_v44 = vmul.f32 %v2475_v22, %v16056_v53  ;;  %v1382_v36 = vmul.f32 %v11321_v35, %v1381_v3  ;;  %v11397_v52 = vmul.f32 0.5, %v11316_v13  ;;  %vm11434_vm6 = vmor %vm2512_vm2, %vm2513_vm11 }
 0x32f   :  { %v11400_v61 = vadd.f32 %v11268_v16, %v2510_v2  ;;  %v11402_v32 = vmax.f32 %v2274_v58, 1e-12  ;;  %v2346_v37 = vsel %vm2344_vm5, %v2345_v25, %v2343_v14  ;;  %8510 = vrsqrt.f32 %v11328_v8 }
 0x330   :  { %v2398_v28 = vmul.f32 0.5, %v2397_v38  ;;  %vm1384_vm14 = vweird.f32 %v11270_v62  ;;  %v11406_v40 = vmax.f32 %v2310_v57, 1e-12  ;;  %v2413_v4 = vmul.f32 %v2412_v39, %v11287_v63 }
 0x331   :  { %v8509_v55 = vpop.eup %8508  ;;  %vm1385_vm12 = vweird.f32 %v11321_v35  ;;  %v3250_v2 = vmul.f32 %v11047_v10, %v2476_v44  ;;  %v1383_v9 = vadd.f32 %v11321_v35, %v1382_v36  ;;  %v1388_v3 = vand.u32 2147483647, %v11270_v62 }
 0x332   :  { %v2399_v51 = vsub.f32 1.5, %v2398_v28  ;;  %v1350_v13 = vmul.f32 %v8509_v55, %v11363_v17  ;;  %v1390_v7 = vand.u32 2147483648, %v11270_v62  ;;  %vm2414_vm3 = vcmp.eq.f32.partialorder %v11287_v63, inf  ;;  %vm11445_vm7 = vmor %vm1384_vm14, %vm1385_vm12 }
 0x333   :  { %8512 = vrcp.f32 %v11402_v32  ;;  %vm2416_vm13 = vcmp.eq.f32.partialorder %v11287_v63, 0.0  ;;  %v1358_v14 = vand.u32 2147483647, %v11363_v17  ;;  %v1360_v57 = vand.u32 2147483648, %v11363_v17 }
 0x334   :  { %v2400_v43 = vmul.f32 %v8507_v46, %v2399_v51  ;;  %v11416_v22 = vpop.xlane.xlu0 %2213  ;;  %v1351_v58 = vsub.f32 1.0, %v1350_v13  ;;  %8514 = vrcp.f32 %v11406_v40  ;;  %v2415_v39 = vsel %vm2414_vm3, %v11287_v63, %v2413_v4 }
 0x335   :  { %vm1355_vm9 = vweird.f32 %v8509_v55  ;;  %v11425_v46 = vpop.eup %8510  ;;  %v2417_v44 = vand.u32 2147483648, %v11287_v63  ;;  %vm2402_vm4 = vcmp.eq.f32.partialorder %v11332_v12, inf  ;;  %v2405_v36 = vand.u32 2147483648, %v11332_v12 }
 0x336   :  { %v2401_v38 = vmul.f32 %v2400_v43, %v11332_v12  ;;  %v1352_v25 = vmul.f32 %v8509_v55, %v1351_v58  ;;  %v1391_v28 = vor.u32 1.1754944e-38, %v1390_v7  ;;  %vm2404_vm10 = vcmp.eq.f32.partialorder %v11332_v12, 0.0 }
 0x337   :  { %vm1354_vm8 = vweird.f32 %v11363_v17  ;;  %v2418_v43 = vsel %vm2416_vm13, %v2417_v44, %v2415_v39  ;;  %v1361_v54 = vor.u32 1.1754944e-38, %v1360_v57  ;;  %v2372_v62 = vmul.f32 %v11425_v46, %v11328_v8  ;;  %v16061_v57 = vld [vmem:[#allocation82_spill] sm:$0xff] }
 0x338   :  { %v2403_v4 = vsel %vm2402_vm4, %v11332_v12, %v2401_v38  ;;  %v1353_v13 = vadd.f32 %v8509_v55, %v1352_v25  ;;  %vm1356_vm11 = vmor %vm1354_vm8, %vm1355_vm9  ;;  %v2515_v12 = vsel %vm11434_vm6, %v11268_v16, %v11400_v61  ;;  %vm1359_vm2 = vcmp.eq.f32.partialorder %v1358_v14, 8.507059e+37 }
 0x339   :  { %v2406_v58 = vsel %vm2404_vm10, %v2405_v36, %v2403_v4  ;;  %v11455_v17 = vpop.eup %8512  ;;  %8516 = vrsqrt.f32 %v11381_v18  ;;  %v1387_v16 = vsel %vm11445_vm7, %v11321_v35, %v1383_v9  ;;  %vm1389_vm5 = vcmp.eq.f32.partialorder %v1388_v3, 8.507059e+37  ;;  %v16063_v36 = vld [vmem:[#allocation78_spill] sm:$0xff] }
 0x33a   :  { %v1357_v38 = vsel %vm1356_vm11, %v8509_v55, %v1353_v13  ;;  %v11459_v25 = vmax.f32 %v2406_v58, 1e-12  ;;  %v11461_v45 = vpop.eup %8514  ;;  %v16062_v55 = vand.u32 2147483647, %v11166_v6  ;;  %v11474_v14 = vmax.f32 %v2418_v43, 1e-12 }
 0x33b   :  { %3272 = vrot.lane.b32.xlu0 %v3250_v2, %s9159_s3  ;;  %v1362_v63 = vsel %vm1359_vm2, %v1361_v54, %v1357_v38  ;;  %v2478_v2 = vmul.f32 %v11455_v17, %v11402_v32  ;;  %v11480_v35 = vmax.f32 %v2346_v37, 1e-12  ;;  %v2815_v9 = vsub.f32 1.5, %v11397_v52  ;;  %v16064_v37 = vld [vmem:[#allocation45_spill] sm:$0xff]  ;;  %v16067_v58 = vld [vmem:[#allocation86_spill] sm:$0xff] }
 0x33c   :  { %v11468_v61 = vpop.xlane.xlu0 %941  ;;  %v1363_v39 = vmul.f32 %v1362_v63, %v16061_v57  ;;  %vm2517_vm14 = vcmp.eq.f32.partialorder %v16062_v55, 8.507059e+37  ;;  %8518 = vrcp.f32 %v11459_v25  ;;  %v2373_v3 = vmul.f32 %v11425_v46, %v2372_v62 }
 0x33d   :  { %8520 = vrsqrt.f32 %v11468_v61  ;;  %v2520_v54 = vsel %vm2517_vm14, %v11319_v1, %v2515_v12  ;;  %v1392_v6 = vsel %vm1389_vm5, %v1391_v28, %v1387_v16  ;;  %v2523_v44 = vmul.f32 %v11461_v45, %v11406_v40  ;;  %v16066_v28 = vld [vmem:[#allocation11_spill] sm:$0xff] }
 0x33e   :  { %8161 = vmatpush.xpose.msk.msrb.mxu3 %vm385_vm1, %v1363_v39  ;;  %vm2284_vm12 = vcmp.eq.f32.partialorder %v10797_v0, 0.0  ;;  %v1348_v1 = vmul.f32 %v11235_v56, %v16063_v36  ;;  %v3249_v51 = vmul.f32 %v11047_v10, %v11050_v24  ;;  %v11494_v4 = vmul.f32 %v11027_v20, %v16064_v37 }
 0x33f   :  { %v16065_v52 = vand.u32 2147483648, %v10797_v0  ;;  %v2521_v7 = vmul.f32 %v2520_v54, %v16066_v28  ;;  %v11502_v43 = vmul.f32 %v11266_v59, %v16006_v5  ;;  %8522 = vrcp.f32 %v11474_v14  ;;  %v11505_v56 = vpop.eup %8516 }
 0x340   :  { %v1393_v24 = vmul.f32 %v1392_v6, %v16067_v58  ;;  %v3258_v20 = vmul.f32 %v11047_v10, %v11302_v42  ;;  %v2479_v12 = vsub.f32 1.0, %v2478_v2  ;;  %8524 = vrcp.f32 %v11480_v35 }
 0x341   :  { %v2286_v13 = vsel %vm2284_vm12, %v16065_v52, %v11309_v48  ;;  %v11512_v48 = vmul.f32 %v11284_v60, %v2815_v9  ;;  %v2374_v62 = vmul.f32 0.5, %v2373_v3  ;;  %v2524_v59 = vsub.f32 1.0, %v2523_v44 }
 0x342   :  { %v8519_v0 = vpop.eup %8518  ;;  %8162 = vmatpush.xpose.msk.msrb.mxu3 %vm385_vm1, %v1348_v1  ;;  %v11517_v38 = vmul.f32 %v11341_v21, %v11282_v34  ;;  %8526 = vrsqrt.f32 %v11416_v22  ;;  %v2486_v60 = vand.u32 2147483647, %v11402_v32  ;;  %v11524_v16 = vmax.f32 %v2286_v13, 1e-12 }
 0x343   :  { %v8521_v63 = vpop.eup %8520  ;;  %3444 = vrot.lane.b32.xlu0 %v3258_v20, %s9159_s3  ;;  %v2643_v42 = vmul.f32 %v8519_v0, %v11459_v25  ;;  %v2360_v39 = vmul.f32 %v11505_v56, %v11381_v18  ;;  %v3253_v54 = vmul.f32 %v11047_v10, %v2521_v7  ;;  %vm2482_vm3 = vweird.f32 %v11402_v32 }
 0x344   :  { %v1115_v55 = vmul.f32 %v8521_v63, %v11468_v61  ;;  %v2480_v9 = vmul.f32 %v11455_v17, %v2479_v12  ;;  %v2488_v3 = vand.u32 2147483648, %v11402_v32  ;;  %vm2527_vm13 = vweird.f32 %v11406_v40  ;;  %v16075_v32 = vld [vmem:[#allocation20_spill] sm:$0xff] }
 0x345   :  { %3270 = vrot.lane.b32.xlu2 %v3249_v51, %s9159_s3  ;;  %8163 = vmatmul.msk.f32.vlgmr.msrb.gmra.mxu3 %vm385_vm1, %v10810_v11  ;;  %v2644_v2 = vsub.f32 1.0, %v2643_v42  ;;  %v11537_v6 = vpop.eup %8522  ;;  %v2375_v44 = vsub.f32 1.5, %v2374_v62  ;;  %v2653_v52 = vand.u32 2147483648, %v11459_v25  ;;  %v2525_v13 = vmul.f32 %v11461_v45, %v2524_v59 }
 0x346   :  { %8165 = vmatpush.xpose.msk.msra.mxu3 %vm385_vm1, %v1393_v24  ;;  %v1116_v1 = vmul.f32 %v8521_v63, %v1115_v55  ;;  %v11541_v7 = vpop.eup %8524  ;;  %vm2648_vm9 = vweird.f32 %v8519_v0  ;;  %v2651_v11 = vand.u32 2147483647, %v11459_v25  ;;  %vm2483_vm4 = vweird.f32 %v11455_v17 }
 0x347   :  { %v2645_v51 = vmul.f32 %v8519_v0, %v2644_v2  ;;  %vm11545_vm6 = vcmp.eq.f32.partialorder %v2486_v60, 8.507059e+37  ;;  %v2361_v20 = vmul.f32 %v11505_v56, %v2360_v39  ;;  %vm2528_vm10 = vweird.f32 %v11461_v45  ;;  %vm11568_vm2 = vmor %vm2482_vm3, %vm2483_vm4 }
 0x348   :  { %v1117_v12 = vmul.f32 0.5, %v1116_v1  ;;  %8528 = vrcp.f32 %v11524_v16  ;;  %v11552_v62 = vpop.eup %8526  ;;  %vm2647_vm8 = vweird.f32 %v11459_v25  ;;  %v2481_v42 = vadd.f32 %v11455_v17, %v2480_v9  ;;  %vm11585_vm5 = vmor %vm2527_vm13, %vm2528_vm10 }
 0x349   :  { %v2646_v59 = vadd.f32 %v8519_v0, %v2645_v51  ;;  %v2658_v60 = vmul.f32 %v11537_v6, %v11474_v14  ;;  %vm2649_vm7 = vmor %vm2647_vm8, %vm2648_vm9  ;;  %v2654_v2 = vor.u32 1.1754944e-38, %v2653_v52  ;;  %v2526_v39 = vadd.f32 %v11461_v45, %v2525_v13 }
 0x34a   :  { %v1118_v55 = vsub.f32 1.5, %v1117_v12  ;;  %v2568_v1 = vmul.f32 %v11541_v7, %v11480_v35  ;;  %vm2652_vm11 = vcmp.eq.f32.partialorder %v2651_v11, 8.507059e+37  ;;  %v2489_v28 = vor.u32 1.1754944e-38, %v2488_v3 }
 0x34b   :  { %v2650_v5 = vsel %vm2649_vm7, %v8519_v0, %v2646_v59  ;;  %v2531_v51 = vand.u32 2147483647, %v11406_v40  ;;  %v2324_v25 = vmul.f32 %v11552_v62, %v11416_v22  ;;  %v2533_v13 = vand.u32 2147483648, %v11406_v40 }
 0x34c   :  { %v1119_v9 = vmul.f32 %v8521_v63, %v1118_v55  ;;  %v2655_v53 = vsel %vm2652_vm11, %v2654_v2, %v2650_v5  ;;  %v2376_v0 = vmul.f32 %v11425_v46, %v2375_v44  ;;  %v2485_v5 = vsel %vm11568_vm2, %v11455_v17, %v2481_v42 }
 0x34d   :  { %3356 = vrot.lane.b32.xlu2 %v3253_v54, %s9159_s3  ;;  %8164 = vmatmul.msk.f32.gmra.mxu3 %vm385_vm1, %v11025_v31  ;;  %v2656_v63 = vmul.f32 %v2655_v53, %v16025_v41  ;;  %v2659_v46 = vsub.f32 1.0, %v2658_v60  ;;  %v2362_v54 = vmul.f32 0.5, %v2361_v20  ;;  %v2530_v53 = vsel %vm11585_vm5, %v11461_v45, %v2526_v39 }
 0x34e   :  { %v11589_v3 = vpop.eup %8528  ;;  %v1120_v31 = vmul.f32 %v1119_v9, %v11468_v61  ;;  %v2569_v44 = vsub.f32 1.0, %v2568_v1  ;;  %vm1121_vm14 = vcmp.eq.f32.partialorder %v11468_v61, inf  ;;  %vm1123_vm12 = vcmp.eq.f32.partialorder %v11468_v61, 0.0 }
 0x34f   :  { %v1124_v40 = vand.u32 2147483648, %v11468_v61  ;;  %v2734_v17 = vpop.permute.xlu0 %2733  ;;  %v3262_v11 = vmul.f32 %v11047_v10, %v2656_v63  ;;  %v2325_v12 = vmul.f32 %v11552_v62, %v2324_v25  ;;  %v2490_v42 = vsel %vm11545_vm6, %v2489_v28, %v2485_v5  ;;  %v16074_v28 = vld [vmem:[#allocation23_spill] sm:$0xff] }
 0x350   :  { %v1122_v20 = vsel %vm1121_vm14, %v11468_v61, %v1120_v31  ;;  %v2796_v59 = vsel %vm385_vm1, %v2734_v17, 0.0  ;;  %v2534_v60 = vor.u32 1.1754944e-38, %v2533_v13  ;;  %v2660_v55 = vmul.f32 %v11537_v6, %v2659_v46 }
 0x351   :  { %v1125_v45 = vsel %vm1123_vm12, %v1124_v40, %v1122_v20  ;;  %3530 = vrot.lane.b32.xlu0 %v3262_v11, %s9159_s3  ;;  %2797 = vadd.xlane.f32.xlu1 %v2796_v59  ;;  %v2493_v2 = vmul.f32 %v11589_v3, %v11524_v16  ;;  %v3261_v61 = vmul.f32 %v11047_v10, %v11502_v43  ;;  %vm2532_vm3 = vcmp.eq.f32.partialorder %v2531_v51, 8.507059e+37 }
 0x352   :  { %v11608_v39 = vmax.f32 %v1125_v45, 1e-12  ;;  %v2570_v1 = vmul.f32 %v11541_v7, %v2569_v44  ;;  %8530 = vrsqrt.f32 %v10868_v49  ;;  %v2491_v24 = vmul.f32 %v2490_v42, %v16074_v28 }
 0x353   :  { %v2535_v25 = vsel %vm2532_vm3, %v2534_v60, %v2530_v53  ;;  %v2539_v9 = vsub.f32 1.0, %v11517_v38  ;;  %v11618_v52 = vmul.f32 %v11512_v48, %v11201_v26  ;;  %v2377_v13 = vmul.f32 %v2376_v0, %v11328_v8 }
 0x354   :  { %v2326_v63 = vmul.f32 0.5, %v2325_v12  ;;  %8532 = vrcp.f32 %v11608_v39  ;;  %v2363_v43 = vsub.f32 1.5, %v2362_v54  ;;  %v2661_v51 = vadd.f32 %v11537_v6, %v2660_v55 }
 0x355   :  { %3528 = vrot.lane.b32.xlu2 %v3261_v61, %s9159_s3  ;;  %vm2663_vm13 = vweird.f32 %v11537_v6  ;;  %v2494_v5 = vsub.f32 1.0, %v2493_v2  ;;  %v2536_v46 = vmul.f32 %v2535_v25, %v16075_v32  ;;  %v2668_v38 = vand.u32 2147483648, %v11474_v14 }
 0x356   :  { %v2571_v48 = vadd.f32 %v11541_v7, %v2570_v1  ;;  %vm2573_vm9 = vweird.f32 %v11541_v7  ;;  %v3251_v0 = vmul.f32 %v11047_v10, %v2491_v24  ;;  %vm2662_vm4 = vweird.f32 %v11474_v14 }
 0x357   :  { %v2666_v54 = vand.u32 2147483647, %v11474_v14  ;;  %v2578_v31 = vand.u32 2147483648, %v11480_v35  ;;  %vm2378_vm6 = vcmp.eq.f32.partialorder %v11328_v8, inf  ;;  %v2327_v53 = vsub.f32 1.5, %v2326_v63  ;;  %vm11634_vm10 = vmor %vm2662_vm4, %vm2663_vm13 }
 0x358   :  { %vm2572_vm8 = vweird.f32 %v11480_v35  ;;  %v2576_v40 = vand.u32 2147483647, %v11480_v35  ;;  %v11640_v17 = vpop.eup %8530  ;;  %vm2380_vm7 = vcmp.eq.f32.partialorder %v11328_v8, 0.0  ;;  %v2381_v11 = vand.u32 2147483648, %v11328_v8 }
 0x359   :  { %3313 = vrot.lane.b32.xlu0 %v3251_v0, %s9159_s3  ;;  %v2665_v14 = vsel %vm11634_vm10, %v11537_v6, %v2661_v51  ;;  %vm11650_vm11 = vmor %vm2572_vm8, %vm2573_vm9  ;;  %v2495_v35 = vmul.f32 %v11589_v3, %v2494_v5  ;;  %v2379_v59 = vsel %vm2378_vm6, %v11328_v8, %v2377_v13  ;;  %v2364_v42 = vmul.f32 %v11505_v56, %v2363_v43  ;;  %v16080_v0 = vld [vmem:[#allocation15_spill] sm:$0xff] }
 0x35a   :  { %v8533_v20 = vpop.eup %8532  ;;  %v2669_v45 = vor.u32 1.1754944e-38, %v2668_v38  ;;  %v2575_v60 = vsel %vm11650_vm11, %v11541_v7, %v2571_v48  ;;  %v3254_v6 = vmul.f32 %v11047_v10, %v2536_v46  ;;  %vm2667_vm2 = vcmp.eq.f32.partialorder %v2666_v54, 8.507059e+37 }
 0x35b   :  { %v1365_v55 = vmul.f32 %v8533_v20, %v11608_v39  ;;  %v2579_v2 = vor.u32 1.1754944e-38, %v2578_v31  ;;  %v2328_v61 = vmul.f32 %v11552_v62, %v2327_v53  ;;  %vm2577_vm5 = vcmp.eq.f32.partialorder %v2576_v40, 8.507059e+37 }
 0x35c   :  { %v2670_v1 = vsel %vm2667_vm2, %v2669_v45, %v2665_v14  ;;  %v2501_v24 = vand.u32 2147483647, %v11524_v16  ;;  %v2496_v13 = vadd.f32 %v11589_v3, %v2495_v35  ;;  %vm2498_vm14 = vweird.f32 %v11589_v3 }
 0x35d   :  { %3358 = vrot.lane.b32.xlu2 %v3254_v6, %s9159_s3  ;;  %v1366_v56 = vsub.f32 1.0, %v1365_v55  ;;  %v2580_v25 = vsel %vm2577_vm5, %v2579_v2, %v2575_v60  ;;  %v1375_v7 = vand.u32 2147483648, %v11608_v39  ;;  %vm2497_vm12 = vweird.f32 %v11524_v16  ;;  %v16089_v6 = vld [vmem:[#allocation85_spill] sm:$0xff] }
 0x35e   :  { %v2503_v63 = vand.u32 2147483648, %v11524_v16  ;;  %v2540_v62 = vmul.f32 %v11341_v21, %v2539_v9  ;;  %v2671_v43 = vmul.f32 %v2670_v1, %v16064_v37  ;;  %vm1370_vm3 = vweird.f32 %v8533_v20  ;;  %vm11678_vm13 = vmor %vm2497_vm12, %vm2498_vm14  ;;  %v16083_v16 = vld [vmem:[#allocation12_spill] sm:$0xff] }
 0x35f   :  { %v1367_v51 = vmul.f32 %v8533_v20, %v1366_v56  ;;  %v1373_v5 = vand.u32 2147483647, %v11608_v39  ;;  %v2382_v46 = vsel %vm2380_vm7, %v2381_v11, %v2379_v59  ;;  %v2365_v38 = vmul.f32 %v2364_v42, %v11381_v18 }
 0x360   :  { %v2329_v48 = vmul.f32 %v2328_v61, %v11416_v22  ;;  %v2581_v54 = vmul.f32 %v2580_v25, %v16080_v0  ;;  %vm1369_vm9 = vweird.f32 %v11608_v39  ;;  %v2500_v8 = vsel %vm11678_vm13, %v11589_v3, %v2496_v13 }
 0x361   :  { %4085 = vrot.lane.b32.xlu0 %v16083_v16, %s9160_s28  ;;  %v1368_v9 = vadd.f32 %v8533_v20, %v1367_v51  ;;  %vm2502_vm4 = vcmp.eq.f32.partialorder %v2501_v24, 8.507059e+37  ;;  %v16084_v53 = vand.u32 2147483647, %v10777_v33  ;;  %vm1371_vm10 = vmor %vm1369_vm9, %vm1370_vm3  ;;  %v1376_v40 = vor.u32 1.1754944e-38, %v1375_v7  ;;  %v16090_v24 = vld [vmem:[#allocation35_spill] sm:$0xff] }
 0x362   :  { %v2504_v11 = vor.u32 1.1754944e-38, %v2503_v63  ;;  %v2541_v14 = vadd.f32 %v11341_v21, %v2540_v62  ;;  %vm2543_vm8 = vweird.f32 %v11341_v21  ;;  %v3263_v39 = vmul.f32 %v11047_v10, %v2671_v43 }
 0x363   :  { %vm11690_vm6 = vcmp.eq.f32.partialorder %v16084_v53, 8.507059e+37  ;;  %v1372_v12 = vsel %vm1371_vm10, %v8533_v20, %v1368_v9  ;;  %vm1374_vm7 = vcmp.eq.f32.partialorder %v1373_v5, 8.507059e+37  ;;  %v2548_v3 = vand.u32 2147483648, %v11282_v34 }
 0x364   :  { %v11698_v35 = vpop.xlane.xlu2 %2758  ;;  %v1377_v33 = vsel %vm1374_vm7, %v1376_v40, %v1372_v12  ;;  %v2505_v59 = vsel %vm2502_vm4, %v2504_v11, %v2500_v8  ;;  %vm2542_vm11 = vweird.f32 %v11282_v34  ;;  %v2546_v42 = vand.u32 2147483647, %v11282_v34 }
 0x365   :  { %vm2366_vm2 = vcmp.eq.f32.partialorder %v11381_v18, inf  ;;  %v2369_v45 = vand.u32 2147483648, %v11381_v18  ;;  %vm2330_vm5 = vcmp.eq.f32.partialorder %v11416_v22, inf  ;;  %8534 = vrsqrt.f32 %v11698_v35  ;;  %3571 = vrot.lane.b32.xlu2 %v3263_v39, %s9159_s3  ;;  %vm11709_vm14 = vmor %vm2542_vm11, %vm2543_vm8 }
 0x366   :  { %v2331_v60 = vsel %vm2330_vm5, %v11416_v22, %v2329_v48  ;;  %v1378_v34 = vmul.f32 %v1377_v33, %v16089_v6  ;;  %v11715_v55 = vmax.f32 %v2382_v46, 1e-12  ;;  %v2545_v2 = vsel %vm11709_vm14, %v11341_v21, %v2541_v14  ;;  %v16091_v21 = vld [vmem:[#allocation59_spill] sm:$0xff] }
 0x367   :  { %v2367_v61 = vsel %vm2366_vm2, %v11381_v18, %v2365_v38  ;;  %v2333_v1 = vand.u32 2147483648, %v11416_v22  ;;  %v2506_v56 = vmul.f32 %v2505_v59, %v16090_v24  ;;  %v2549_v25 = vor.u32 1.1754944e-38, %v2548_v3 }
 0x368   :  { %vm2332_vm12 = vcmp.eq.f32.partialorder %v11416_v22, 0.0  ;;  %8166 = vmatpush.xpose.msk.msra.mxu3 %vm385_vm1, %v1378_v34  ;;  %v3257_v13 = vmul.f32 %v11047_v10, %v2581_v54  ;;  %8536 = vrcp.f32 %v11715_v55  ;;  %vm2547_vm3 = vcmp.eq.f32.partialorder %v2546_v42, 8.507059e+37 }
 0x369   :  { %vm2368_vm13 = vcmp.eq.f32.partialorder %v11381_v18, 0.0  ;;  %v2334_v7 = vsel %vm2332_vm12, %v2333_v1, %v2331_v60  ;;  %4639 = vrot.lane.b32.xlu0 %v16091_v21, %s9160_s28  ;;  %v1410_v63 = vmul.f32 %v9879_v23, %v11494_v4  ;;  %v2550_v62 = vsel %vm2547_vm3, %v2549_v25, %v2545_v2 }
 0x36a   :  { %v2420_v22 = vmul.f32 %v11640_v17, %v10868_v49  ;;  %vm2818_vm9 = vcmp.eq.f32.partialorder %v11201_v26, inf  ;;  %v2370_v43 = vsel %vm2368_vm13, %v2369_v45, %v2367_v61  ;;  %3442 = vrot.lane.b32.xlu1 %v3257_v13, %s9159_s3  ;;  %v16092_v18 = vsel %vm11010_vm15, %v10839_v27, %v10992_v30  ;;  %v16093_v27 = vld [vmem:[#allocation37_spill] sm:$0xff] }
 0x36b   :  { %v880_v51 = vsel %vm11690_vm6, %v11016_v15, %v16092_v18  ;;  %v11744_v5 = vpop.eup %8534  ;;  %v2819_v4 = vsel %vm2818_vm9, %v11201_v26, %v11618_v52  ;;  %8167 = vmatmul.msk.f32.vlgmr.msra.gmra.mxu3 %vm385_vm1, %v1410_v63  ;;  %v3252_v46 = vmul.f32 %v11047_v10, %v2506_v56  ;;  %v2821_v38 = vand.u32 2147483648, %v11201_v26  ;;  %v16094_v15 = vld [vmem:[#allocation43_spill] sm:$0xff] }
 0x36c   :  { %v2824_v47 = vmul.f32 %v11744_v5, %v11698_v35  ;;  %v11753_v48 = vpop.xlane.xlu2 %2767  ;;  %v2551_v30 = vmul.f32 %v2550_v62, %v16093_v27  ;;  %v11756_v54 = vmax.f32 %v2334_v7, 1e-12  ;;  %vm2820_vm15 = vcmp.eq.f32.partialorder %v11201_v26, 0.0 }
 0x36d   :  { %8538 = vrsqrt.f32 %v11753_v48  ;;  %3315 = vrot.lane.b32.xlu2 %v3252_v46, %s9159_s3  ;;  %v881_v52 = vmul.f32 %v880_v51, %v16094_v15  ;;  %v11762_v31 = vmax.f32 %v2370_v43, 1e-12  ;;  %v2421_v8 = vmul.f32 %v11640_v17, %v2420_v22 }
 0x36e   :  { %v8537_v9 = vpop.eup %8536  ;;  %8540 = vrcp.f32 %v11756_v54  ;;  %v2822_v53 = vsel %vm2820_vm15, %v2821_v38, %v2819_v4  ;;  %v2825_v44 = vmul.f32 %v11744_v5, %v2824_v47  ;;  %v3255_v26 = vmul.f32 %v11047_v10, %v2551_v30 }
 0x36f   :  { %v2613_v40 = vmul.f32 %v8537_v9, %v11715_v55  ;;  %v1411_v11 = vmul.f32 %v9879_v23, %v881_v52  ;;  %v11770_v14 = vmax.f32 %v2822_v53, 1e-12  ;;  %8542 = vrcp.f32 %v11762_v31 }
 0x370   :  { %v2422_v39 = vmul.f32 0.5, %v2421_v8  ;;  %v2621_v33 = vand.u32 2147483647, %v11715_v55  ;;  %v2623_v59 = vand.u32 2147483648, %v11715_v55  ;;  %v2826_v45 = vmul.f32 0.5, %v2825_v44 }
 0x371   :  { %v2614_v12 = vsub.f32 1.0, %v2613_v40  ;;  %8544 = vrcp.f32 %v11770_v14  ;;  %vm2618_vm4 = vweird.f32 %v8537_v9  ;;  %v2561_v60 = vand.u32 2147483647, %v11756_v54 }
 0x372   :  { %3399 = vrot.lane.b32.xlu1 %v3255_v26, %s9159_s3  ;;  %v2423_v34 = vsub.f32 1.5, %v2422_v39  ;;  %vm2617_vm6 = vweird.f32 %v11715_v55  ;;  %vm2622_vm8 = vcmp.eq.f32.partialorder %v2621_v33, 8.507059e+37  ;;  %v2624_v56 = vor.u32 1.1754944e-38, %v2623_v59 }
 0x373   :  { %v8539_v3 = vpop.eup %8538  ;;  %8168 = vmatmul.msk.f32.gmra.mxu3 %vm385_vm1, %v1411_v11  ;;  %v2615_v20 = vmul.f32 %v8537_v9, %v2614_v12  ;;  %vm2619_vm10 = vmor %vm2617_vm6, %vm2618_vm4  ;;  %vm2557_vm7 = vweird.f32 %v11756_v54  ;;  %v2827_v13 = vsub.f32 1.5, %v2826_v45  ;;  %v2563_v62 = vand.u32 2147483648, %v11756_v54 }
 0x374   :  { %v8541_v42 = vpop.eup %8540  ;;  %v2860_v23 = vmul.f32 %v8539_v3, %v11753_v48  ;;  %vm11784_vm11 = vcmp.eq.f32.partialorder %v2561_v60, 8.507059e+37  ;;  %vm2602_vm2 = vweird.f32 %v11762_v31  ;;  %v3031_v40 = vand.u32 2147483647, %v11770_v14 }
 0x375   :  { %v2616_v61 = vadd.f32 %v8537_v9, %v2615_v20  ;;  %v8543_v1 = vpop.eup %8542  ;;  %v2553_v25 = vmul.f32 %v8541_v42, %v11756_v54  ;;  %vm2558_vm5 = vweird.f32 %v8541_v42  ;;  %v2828_v8 = vmul.f32 %v11744_v5, %v2827_v13 }
 0x376   :  { %v2861_v2 = vmul.f32 %v8539_v3, %v2860_v23  ;;  %v2598_v55 = vmul.f32 %v8543_v1, %v11762_v31  ;;  %v2564_v44 = vor.u32 1.1754944e-38, %v2563_v62  ;;  %vm2603_vm14 = vweird.f32 %v8543_v1  ;;  %vm2559_vm12 = vmor %vm2557_vm7, %vm2558_vm5 }
 0x377   :  { %v2620_v63 = vsel %vm2619_vm10, %v8537_v9, %v2616_v61  ;;  %v8545_v22 = vpop.eup %8544  ;;  %v2554_v18 = vsub.f32 1.0, %v2553_v25  ;;  %v2606_v9 = vand.u32 2147483647, %v11762_v31  ;;  %v3033_v33 = vand.u32 2147483648, %v11770_v14  ;;  %vm2604_vm9 = vmor %vm2602_vm2, %vm2603_vm14 }
 0x378   :  { %v2862_v7 = vmul.f32 0.5, %v2861_v2  ;;  %v2625_v43 = vsel %vm2622_vm8, %v2624_v56, %v2620_v63  ;;  %v3023_v38 = vmul.f32 %v8545_v22, %v11770_v14  ;;  %v2599_v52 = vsub.f32 1.0, %v2598_v55 }
 0x379   :  { %v2626_v46 = vmul.f32 %v2625_v43, %v16008_v29  ;;  %v2555_v30 = vmul.f32 %v8541_v42, %v2554_v18  ;;  %vm3028_vm3 = vweird.f32 %v8545_v22  ;;  %v2608_v5 = vand.u32 2147483648, %v11762_v31  ;;  %v16098_v43 = vld [vmem:[#allocation46_spill] sm:$0xff] }
 0x37a   :  { %v2863_v4 = vsub.f32 1.5, %v2862_v7  ;;  %v11792_v47 = vpop.xlane.xlu0 %2752  ;;  %v3024_v11 = vsub.f32 1.0, %v3023_v38  ;;  %v2600_v39 = vmul.f32 %v8543_v1, %v2599_v52  ;;  %v2424_v20 = vmul.f32 %v11640_v17, %v2423_v34  ;;  %v16097_v7 = vld [vmem:[#allocation29_spill] sm:$0xff] }
 0x37b   :  { %v3260_v53 = vmul.f32 %v11047_v10, %v2626_v46  ;;  %v2556_v26 = vadd.f32 %v8541_v42, %v2555_v30  ;;  %8546 = vrsqrt.f32 %v11792_v47  ;;  %vm3027_vm13 = vweird.f32 %v11770_v14 }
 0x37c   :  { %v2864_v12 = vmul.f32 %v8539_v3, %v2863_v4  ;;  %v3025_v45 = vmul.f32 %v8545_v22, %v3024_v11  ;;  %v2601_v23 = vadd.f32 %v8543_v1, %v2600_v39  ;;  %v2609_v61 = vor.u32 1.1754944e-38, %v2608_v5  ;;  %vm3029_vm15 = vmor %vm3027_vm13, %vm3028_vm3 }
 0x37d   :  { %3487 = vrot.lane.b32.xlu0 %v3260_v53, %s9159_s3  ;;  %v2560_v59 = vsel %vm2559_vm12, %v8541_v42, %v2556_v26  ;;  %v11811_v42 = vpop.xlane.xlu1 %2764  ;;  %v2829_v56 = vmul.f32 %v2828_v8, %v11698_v35  ;;  %vm3032_vm4 = vcmp.eq.f32.partialorder %v3031_v40, 8.507059e+37  ;;  %v3034_v17 = vor.u32 1.1754944e-38, %v3033_v33 }
 0x37e   :  { %v2565_v3 = vsel %vm11784_vm11, %v2564_v44, %v2560_v59  ;;  %v3026_v60 = vadd.f32 %v8545_v22, %v3025_v45  ;;  %v2605_v2 = vsel %vm2604_vm9, %v8543_v1, %v2601_v23  ;;  %vm2607_vm6 = vcmp.eq.f32.partialorder %v2606_v9, 8.507059e+37  ;;  %v16100_v45 = vld [vmem:[#allocation65_spill] sm:$0xff] }
 0x37f   :  { %v2566_v54 = vmul.f32 %v2565_v3, %v16007_v19  ;;  %v2865_v34 = vmul.f32 %v2864_v12, %v11753_v48  ;;  %v2610_v25 = vsel %vm2607_vm6, %v2609_v61, %v2605_v2  ;;  %8548 = vrsqrt.f32 %v11811_v42  ;;  %v16099_v12 = vld [vmem:[#allocation48_spill] sm:$0xff] }
 0x380   :  { %v3030_v31 = vsel %vm3029_vm15, %v8545_v22, %v3026_v60  ;;  %v2611_v63 = vmul.f32 %v2610_v25, %v16097_v7  ;;  %vm2830_vm10 = vcmp.eq.f32.partialorder %v11698_v35, inf  ;;  %vm2866_vm8 = vcmp.eq.f32.partialorder %v11753_v48, inf  ;;  %v16102_v25 = vld [vmem:[#allocation26_spill] sm:$0xff] }
 0x381   :  { %v3256_v14 = vmul.f32 %v11047_v10, %v2566_v54  ;;  %v3035_v13 = vsel %vm3032_vm4, %v3034_v17, %v3030_v31  ;;  %v8547_v62 = vpop.eup %8546  ;;  %v2831_v51 = vsel %vm2830_vm10, %v11698_v35, %v2829_v56  ;;  %v2425_v4 = vmul.f32 %v2424_v20, %v10868_v49 }
 0x382   :  { %v11818_v1 = vpop.xlane.xlu0 %2761  ;;  %v3036_v18 = vmul.f32 %v3035_v13, %v16098_v43  ;;  %v3259_v22 = vmul.f32 %v11047_v10, %v2611_v63  ;;  %v2800_v55 = vmul.f32 %v8547_v62, %v11792_v47  ;;  %v2833_v46 = vand.u32 2147483648, %v11698_v35 }
 0x383   :  { %3401 = vrot.lane.b32.xlu2 %v3256_v14, %s9159_s3  ;;  %v2867_v38 = vsel %vm2866_vm8, %v11753_v48, %v2865_v34  ;;  %8550 = vrsqrt.f32 %v11818_v1  ;;  %vm2832_vm7 = vcmp.eq.f32.partialorder %v11698_v35, 0.0  ;;  %v2869_v30 = vand.u32 2147483648, %v11753_v48 }
 0x384   :  { %3485 = vrot.lane.b32.xlu1 %v3259_v22, %s9159_s3  ;;  %v2801_v52 = vmul.f32 %v8547_v62, %v2800_v55  ;;  %vm2868_vm11 = vcmp.eq.f32.partialorder %v11753_v48, 0.0  ;;  %v2834_v9 = vsel %vm2832_vm7, %v2833_v46, %v2831_v51  ;;  %vm2426_vm2 = vcmp.eq.f32.partialorder %v10868_v49, inf  ;;  %v16104_v46 = vld [vmem:[#allocation61_spill] sm:$0xff] }
 0x385   :  { %3278 = vrot.lane.b32.xlu0 %v3036_v18, %s9159_s3  ;;  %v2993_v53 = vmax.f32 %v2834_v9, 1e-12  ;;  %v2870_v44 = vsel %vm2868_vm11, %v2869_v30, %v2867_v38  ;;  %v11838_v40 = vpop.eup %8548  ;;  %v2427_v26 = vsel %vm2426_vm2, %v10868_v49, %v2425_v4  ;;  %v2429_v11 = vand.u32 2147483648, %v10868_v49  ;;  %v11858_v61 = vpop.xlane.xlu1 %2773 }
 0x386   :  { %v2802_v8 = vmul.f32 0.5, %v2801_v52  ;;  %vm2428_vm5 = vcmp.eq.f32.partialorder %v10868_v49, 0.0  ;;  %v11845_v48 = vmax.f32 %v2870_v44, 1e-12  ;;  %v2848_v5 = vmul.f32 %v11838_v40, %v11811_v42  ;;  %v16101_v49 = vld [vmem:[#allocation57_spill] sm:$0xff] }
 0x387   :  { %8552 = vrcp.f32 %v2993_v53  ;;  %v2430_v33 = vsel %vm2428_vm5, %v2429_v11, %v2427_v26  ;;  %vm2806_vm14 = vcmp.eq.f32.partialorder %v11792_v47, inf  ;;  %v3046_v18 = vand.u32 2147483647, %v2993_v53 }
 0x388   :  { %v2803_v35 = vsub.f32 1.5, %v2802_v8  ;;  %8554 = vrcp.f32 %v11845_v48  ;;  %v11855_v3 = vmax.f32 %v2430_v33, 1e-12  ;;  %v2849_v54 = vmul.f32 %v11838_v40, %v2848_v5 }
 0x389   :  { %v8551_v39 = vpop.eup %8550  ;;  %v3048_v51 = vand.u32 2147483648, %v2993_v53  ;;  %v2809_v30 = vand.u32 2147483648, %v11792_v47  ;;  %vm2808_vm3 = vcmp.eq.f32.partialorder %v11792_v47, 0.0  ;;  %vm3042_vm13 = vweird.f32 %v2993_v53 }
 0x38a   :  { %v2836_v59 = vmul.f32 %v8551_v39, %v11818_v1  ;;  %v2804_v23 = vmul.f32 %v8547_v62, %v2803_v35  ;;  %v11861_v34 = vpop.xlane.xlu0 %2770  ;;  %8556 = vrcp.f32 %v11855_v3  ;;  %v2850_v13 = vmul.f32 0.5, %v2849_v54  ;;  %v16103_v62 = vld [vmem:[#allocation80_spill] sm:$0xff]  ;;  %v16105_v54 = vld [vmem:[#allocation50_spill] sm:$0xff] }
 0x38b   :  { %4631 = vrot.lane.b32.xlu2 %v16099_v12, %s9160_s28  ;;  %8558 = vrsqrt.f32 %v11858_v61  ;;  %v3049_v26 = vor.u32 1.1754944e-38, %v3048_v51  ;;  %vm3047_vm4 = vcmp.eq.f32.partialorder %v3046_v18, 8.507059e+37  ;;  %vm3087_vm6 = vweird.f32 %v11845_v48 }
 0x38c   :  { %4629 = vrot.lane.b32.xlu1 %v16101_v49, %s9160_s28  ;;  %v2837_v20 = vmul.f32 %v8551_v39, %v2836_v59  ;;  %v2805_v56 = vmul.f32 %v2804_v23, %v11792_v47  ;;  %8560 = vrsqrt.f32 %v11861_v34  ;;  %v2851_v9 = vsub.f32 1.5, %v2850_v13 }
 0x38d   :  { %4637 = vrot.lane.b32.xlu0 %v16100_v45, %s9160_s28  ;;  %v8553_v2 = vpop.eup %8552  ;;  %v3093_v59 = vand.u32 2147483648, %v11845_v48  ;;  %vm2842_vm8 = vcmp.eq.f32.partialorder %v11818_v1, inf  ;;  %vm2844_vm11 = vcmp.eq.f32.partialorder %v11818_v1, 0.0  ;;  %vm2854_vm2 = vcmp.eq.f32.partialorder %v11811_v42, inf  ;;  %v16124_v45 = vld [vmem:[#allocation66_spill] sm:$0xff] }
 0x38e   :  { %v2838_v60 = vmul.f32 0.5, %v2837_v20  ;;  %v3038_v14 = vmul.f32 %v8553_v2, %v2993_v53  ;;  %v8555_v31 = vpop.eup %8554  ;;  %v2807_v55 = vsel %vm2806_vm14, %v11792_v47, %v2805_v56  ;;  %vm3043_vm12 = vweird.f32 %v8553_v2 }
 0x38f   :  { %v3083_v22 = vmul.f32 %v8555_v31, %v11845_v48  ;;  %vm3044_vm9 = vmor %vm3042_vm13, %vm3043_vm12  ;;  %vm3088_vm15 = vweird.f32 %v8555_v31  ;;  %v2810_v35 = vsel %vm2808_vm3, %v2809_v30, %v2807_v55  ;;  %v3091_v53 = vand.u32 2147483647, %v11845_v48 }
 0x390   :  { %v2839_v17 = vsub.f32 1.5, %v2838_v60  ;;  %v3039_v63 = vsub.f32 1.0, %v3038_v14  ;;  %v11877_v44 = vpop.eup %8556  ;;  %vm11888_vm10 = vmor %vm3087_vm6, %vm3088_vm15  ;;  %v16108_v14 = vld [vmem:[#allocation21_spill] sm:$0xff]  ;;  %v2852_v48 = vmul.f32 %v11838_v40, %v2851_v9  ;;  %v3094_v18 = vor.u32 1.1754944e-38, %v3093_v59  ;;  %v16109_v9 = vld [vmem:[#allocation58_spill] sm:$0xff] }
 0x391   :  { %v3084_v52 = vsub.f32 1.0, %v3083_v22  ;;  %v2845_v22 = vand.u32 2147483648, %v11818_v1  ;;  %vm3092_vm7 = vcmp.eq.f32.partialorder %v3091_v53, 8.507059e+37  ;;  %vm2856_vm5 = vcmp.eq.f32.partialorder %v11811_v42, 0.0 }
 0x392   :  { %v2840_v4 = vmul.f32 %v8551_v39, %v2839_v17  ;;  %v3040_v38 = vmul.f32 %v8553_v2, %v3039_v63  ;;  %v11879_v39 = vpop.eup %8558  ;;  %v2991_v17 = vmax.f32 %v2810_v35, 1e-12  ;;  %v2857_v59 = vand.u32 2147483648, %v11811_v42 }
 0x393   :  { %4087 = vrot.lane.b32.xlu2 %v16102_v25, %s9160_s28  ;;  %v3085_v11 = vmul.f32 %v8555_v31, %v3084_v52  ;;  %v11883_v23 = vpop.eup %8560  ;;  %v2884_v51 = vmul.f32 %v11879_v39, %v11858_v61  ;;  %vm2678_vm14 = vweird.f32 %v11877_v44  ;;  %vm2677_vm3 = vweird.f32 %v11855_v3 }
 0x394   :  { %4635 = vrot.lane.b32.xlu1 %v16104_v46, %s9160_s28  ;;  %v3041_v8 = vadd.f32 %v8553_v2, %v3040_v38  ;;  %v2841_v33 = vmul.f32 %v2840_v4, %v11818_v1  ;;  %8562 = vrcp.f32 %v2991_v17  ;;  %v2872_v55 = vmul.f32 %v11883_v23, %v11861_v34 }
 0x395   :  { %4645 = vrot.lane.b32.xlu0 %v16103_v62, %s9160_s28  ;;  %v3086_v20 = vadd.f32 %v8555_v31, %v3085_v11  ;;  %v2853_v38 = vmul.f32 %v2852_v48, %v11811_v42  ;;  %v2885_v30 = vmul.f32 %v11879_v39, %v2884_v51  ;;  %vm3012_vm13 = vweird.f32 %v2991_v17 }
 0x396   :  { %v3045_v5 = vsel %vm3044_vm9, %v8553_v2, %v3041_v8  ;;  %v2673_v2 = vmul.f32 %v11877_v44, %v11855_v3  ;;  %v2843_v63 = vsel %vm2842_vm8, %v11818_v1, %v2841_v33  ;;  %v2873_v52 = vmul.f32 %v11883_v23, %v2872_v55  ;;  %vm11927_vm9 = vmor %vm2677_vm3, %vm2678_vm14 }
 0x397   :  { %v3050_v47 = vsel %vm3047_vm4, %v3049_v26, %v3045_v5  ;;  %v3090_v13 = vsel %vm11888_vm10, %v8555_v31, %v3086_v20  ;;  %v2846_v40 = vsel %vm2844_vm11, %v2845_v22, %v2843_v63  ;;  %v2855_v33 = vsel %vm2854_vm2, %v11811_v42, %v2853_v38  ;;  %v16110_v5 = vld [vmem:[#allocation67_spill] sm:$0xff] }
 0x398   :  { %v3051_v60 = vmul.f32 %v3050_v47, %v16105_v54  ;;  %v3095_v31 = vsel %vm3092_vm7, %v3094_v18, %v3090_v13  ;;  %v2674_v4 = vsub.f32 1.0, %v2673_v2  ;;  %v11913_v35 = vmax.f32 %v2846_v40, 1e-12 }
 0x399   :  { %v3096_v8 = vmul.f32 %v3095_v31, %v16109_v9  ;;  %v2886_v47 = vmul.f32 0.5, %v2885_v30  ;;  %v2874_v20 = vmul.f32 0.5, %v2873_v52  ;;  %v3016_v13 = vand.u32 2147483647, %v2991_v17 }
 0x39a   :  { %v8563_v26 = vpop.eup %8562  ;;  %v2675_v11 = vmul.f32 %v11877_v44, %v2674_v4  ;;  %8564 = vrcp.f32 %v11913_v35  ;;  %v2858_v48 = vsel %vm2856_vm5, %v2857_v59, %v2855_v33  ;;  %v2683_v63 = vand.u32 2147483648, %v11855_v3 }
 0x39b   :  { %3319 = vrot.lane.b32.xlu2 %v3051_v60, %s9159_s3  ;;  %v3008_v1 = vmul.f32 %v8563_v26, %v2991_v17  ;;  %v3018_v60 = vand.u32 2147483648, %v2991_v17  ;;  %vm3013_vm12 = vweird.f32 %v8563_v26  ;;  %v2875_v18 = vsub.f32 1.5, %v2874_v20 }
 0x39c   :  { %v2676_v56 = vadd.f32 %v11877_v44, %v2675_v11  ;;  %v2681_v22 = vand.u32 2147483647, %v11855_v3  ;;  %v2887_v55 = vsub.f32 1.5, %v2886_v47  ;;  %vm3014_vm15 = vmor %vm3012_vm13, %vm3013_vm12  ;;  %v11932_v4 = vmax.f32 %v2858_v48, 1e-12  ;;  %v16113_v11 = vld [vmem:[#allocation42_spill] sm:$0xff] }
 0x39d   :  { %4095 = vrot.lane.b32.xlu0 %v16108_v14, %s9160_s28  ;;  %v3009_v53 = vsub.f32 1.0, %v3008_v1  ;;  %v3019_v31 = vor.u32 1.1754944e-38, %v3018_v60  ;;  %vm3017_vm4 = vcmp.eq.f32.partialorder %v3016_v13, 8.507059e+37  ;;  %v2684_v17 = vor.u32 1.1754944e-38, %v2683_v63 }
 0x39e   :  { %v2680_v38 = vsel %vm11927_vm9, %v11877_v44, %v2676_v56  ;;  %vm2682_vm6 = vcmp.eq.f32.partialorder %v2681_v22, 8.507059e+37  ;;  %v2888_v3 = vmul.f32 %v11879_v39, %v2887_v55  ;;  %8566 = vrcp.f32 %v11932_v4 }
 0x39f   :  { %v3010_v2 = vmul.f32 %v8563_v26, %v3009_v53  ;;  %v2685_v33 = vsel %vm2682_vm6, %v2684_v17, %v2680_v38  ;;  %vm2878_vm10 = vcmp.eq.f32.partialorder %v11861_v34, inf  ;;  %vm2890_vm8 = vcmp.eq.f32.partialorder %v11858_v61, inf }
 0x3a0   :  { %v8565_v30 = vpop.eup %8564  ;;  %v2686_v44 = vmul.f32 %v2685_v33, %v16094_v15  ;;  %v2889_v47 = vmul.f32 %v2888_v3, %v11858_v61  ;;  %v2881_v56 = vand.u32 2147483648, %v11861_v34  ;;  %vm2880_vm7 = vcmp.eq.f32.partialorder %v11861_v34, 0.0 }
 0x3a1   :  { %v3011_v42 = vadd.f32 %v8563_v26, %v3010_v2  ;;  %v2893_v2 = vand.u32 2147483648, %v11858_v61  ;;  %vm2892_vm11 = vcmp.eq.f32.partialorder %v11858_v61, 0.0  ;;  %vm3058_vm2 = vweird.f32 %v8565_v30 }
 0x3a2   :  { %v3264_v53 = vmul.f32 %v11047_v10, %v2686_v44  ;;  %v2891_v60 = vsel %vm2890_vm8, %v11858_v61, %v2889_v47  ;;  %v1443_v10 = vpop.f32.mrf.mxu3  ;;  %v3063_v55 = vand.u32 2147483648, %v11913_v35  ;;  %vm3057_vm5 = vweird.f32 %v11913_v35  ;;  %v16114_v61 = vld [vmem:[#allocation13_spill] sm:$0xff] }
 0x3a3   :  { %4647 = vrot.lane.b32.xlu2 %v16110_v5, %s9160_s28  ;;  %v3015_v40 = vsel %vm3014_vm15, %v8563_v26, %v3011_v42  ;;  %v3053_v26 = vmul.f32 %v8565_v30, %v11913_v35  ;;  %vm3059_vm14 = vmor %vm3057_vm5, %vm3058_vm2  ;;  %v3078_v3 = vand.u32 2147483648, %v11932_v4  ;;  %vm3072_vm13 = vweird.f32 %v11932_v4 }
 0x3a4   :  { %v3020_v52 = vsel %vm3017_vm4, %v3019_v31, %v3015_v40  ;;  %v3076_v44 = vand.u32 2147483647, %v11932_v4  ;;  %vm1694_vm15 = vcmask 130048  }
 0x3a5   :  { %3364 = vrot.lane.b32.xlu0 %v3096_v8, %s9159_s3  ;;  %v2876_v8 = vmul.f32 %v11883_v23, %v2875_v18  ;;  %v3021_v1 = vmul.f32 %v3020_v52, %v16113_v11  ;;  %v3054_v20 = vsub.f32 1.0, %v3053_v26  ;;  %v8567_v23 = vpop.eup %8566  ;;  %v2894_v18 = vsel %vm2892_vm11, %v2893_v2, %v2891_v60  ;;  %v16115_v26 = vld [vmem:[#allocation54_spill] sm:$0xff] }
 0x3a6   :  { %v3068_v48 = vmul.f32 %v8567_v23, %v11932_v4  ;;  %v11960_v31 = vmax.f32 %v2894_v18, 1e-12  ;;  %v3064_v52 = vor.u32 1.1754944e-38, %v3063_v55  ;;  %vm3073_vm3 = vweird.f32 %v8567_v23 }
 0x3a7   :  { %3276 = vrot.lane.b32.xlu1 %v3021_v1, %s9159_s3  ;;  %v2877_v59 = vmul.f32 %v2876_v8, %v11861_v34  ;;  %v3055_v13 = vmul.f32 %v8565_v30, %v3054_v20  ;;  %vm3074_vm9 = vmor %vm3072_vm13, %vm3073_vm3  ;;  %vm3077_vm4 = vcmp.eq.f32.partialorder %v3076_v44, 8.507059e+37 }
 0x3a8   :  { %v3069_v22 = vsub.f32 1.0, %v3068_v48  ;;  %vm3117_vm11 = vweird.f32 %v11960_v31 }
 0x3a9   :  { %v2879_v39 = vsel %vm2878_vm10, %v11861_v34, %v2877_v59  ;;  %v3056_v51 = vadd.f32 %v8565_v30, %v3055_v13  ;;  %v3061_v34 = vand.u32 2147483647, %v11913_v35  ;;  %v11972_v35 = vld [vmem:[%s15681_s8] sm:$0xff] }
 0x3aa   :  { %v2882_v63 = vsel %vm2880_vm7, %v2881_v56, %v2879_v39  ;;  %v3070_v38 = vmul.f32 %v8567_v23, %v3069_v22  ;;  %v1446_v33 = vpop.f32.mrf.mxu3  ;;  %v3079_v56 = vor.u32 1.1754944e-38, %v3078_v3  ;;  %v3121_v3 = vand.u32 2147483647, %v11960_v31 }
 0x3ab   :  { %v11957_v42 = vmax.f32 %v2882_v63, 1e-12  ;;  %v3060_v40 = vsel %vm3059_vm14, %v8565_v30, %v3056_v51  ;;  %vm3062_vm12 = vcmp.eq.f32.partialorder %v3061_v34, 8.507059e+37  ;;  %v11977_v30 = vld [vmem:[%s15681_s8 + $0x8] sm:$0xff]  ;;  %v16116_v63 = vld [vmem:[#allocation56_spill] sm:$0xff] }
 0x3ac   :  { %v3065_v17 = vsel %vm3062_vm12, %v3064_v52, %v3060_v40  ;;  %v3071_v8 = vadd.f32 %v8567_v23, %v3070_v38  ;;  %v11988_v60 = vadd.f32 %v1446_v33, %v11977_v30  ;;  %v3123_v52 = vand.u32 2147483648, %v11960_v31  ;;  %v2780_v33 = vpop.xlane.xlu1 %2779 }
 0x3ad   :  { %8568 = vrcp.f32 %v11957_v42  ;;  %v3066_v59 = vmul.f32 %v3065_v17, %v16115_v26  ;;  %v3108_v34 = vand.u32 2147483648, %v11957_v42  ;;  %vm3102_vm10 = vweird.f32 %v11957_v42  ;;  %v16117_v17 = vld [vmem:[#allocation24_spill] sm:$0xff] }
 0x3ae   :  { %8570 = vrcp.f32 %v11960_v31  ;;  %v3075_v20 = vsel %vm3074_vm9, %v8567_v23, %v3071_v8  ;;  %v1698_v23 = vsel %vm1694_vm15, %v11988_v60, -inf  ;;  %v3106_v40 = vand.u32 2147483647, %v11957_v42 }
 0x3af   :  { %3573 = vrot.lane.b32.xlu1 %v3264_v53, %s9159_s3  ;;  %v11985_v53 = vadd.f32 %v1443_v10, %v11972_v35  ;;  %v3080_v13 = vsel %vm3077_vm4, %v3079_v56, %v3075_v20  ;;  %8572 = vrsqrt.f32 %v2780_v33  ;;  %vm3122_vm14 = vcmp.eq.f32.partialorder %v3121_v3, 8.507059e+37  ;;  %v16118_v56 = vld [vmem:[#allocation60_spill] sm:$0xff] }
 0x3b0   :  { %v3081_v18 = vmul.f32 %v3080_v13, %v16116_v63  ;;  %vm3107_vm5 = vcmp.eq.f32.partialorder %v3106_v40, 8.507059e+37  ;;  %v2777_v13 = vpop.xlane.xlu0 %2776  ;;  %vm2914_vm12 = vcmp.eq.f32.partialorder %v2780_v33, inf  ;;  %vm2916_vm3 = vcmp.eq.f32.partialorder %v2780_v33, 0.0 }
 0x3b1   :  { %v1695_v48 = vsel %vm1694_vm15, %v11985_v53, -inf  ;;  %8574 = vrsqrt.f32 %v2777_v13  ;;  %vm2902_vm13 = vcmp.eq.f32.partialorder %v2777_v13, inf  ;;  %vm2904_vm9 = vcmp.eq.f32.partialorder %v2777_v13, 0.0 }
 0x3b3   :  { %v8569_v1 = vpop.eup %8568 }
 0x3b4   :  { %v8571_v47 = vpop.eup %8570  ;;  %v3098_v39 = vmul.f32 %v8569_v1, %v11957_v42  ;;  %vm3103_vm6 = vweird.f32 %v8569_v1  ;;  %v3124_v42 = vor.u32 1.1754944e-38, %v3123_v52 }
 0x3b5   :  { %v3113_v2 = vmul.f32 %v8571_v47, %v11960_v31  ;;  %vm3118_vm8 = vweird.f32 %v8571_v47  ;;  %vm3104_vm7 = vmor %vm3102_vm10, %vm3103_vm6 }
 0x3b6   :  { %v3099_v4 = vsub.f32 1.0, %v3098_v39  ;;  %vm3119_vm2 = vmor %vm3117_vm11, %vm3118_vm8 }
 0x3b7   :  { %4093 = vrot.lane.b32.xlu1 %v16114_v61, %s9160_s28  ;;  %v3114_v10 = vsub.f32 1.0, %v3113_v2 }
 0x3b8   :  { %v3100_v51 = vmul.f32 %v8569_v1, %v3099_v4 }
 0x3b9   :  { %v3115_v22 = vmul.f32 %v8571_v47, %v3114_v10  ;;  %v16121_v10 = vld [vmem:[#allocation74_spill] sm:$0xff] }
 0x3ba   :  { %v3101_v55 = vadd.f32 %v8569_v1, %v3100_v51 }
 0x3bb   :  { %v3116_v38 = vadd.f32 %v8571_v47, %v3115_v22 }
 0x3bc   :  { %v3105_v8 = vsel %vm3104_vm7, %v8569_v1, %v3101_v55  ;;  %v16119_v1 = vld [vmem:[#allocation62_spill] sm:$0xff] }
 0x3bd   :  { %v3120_v44 = vsel %vm3119_vm2, %v8571_v47, %v3116_v38  ;;  %v16122_v55 = vld [vmem:[#allocation18_spill] sm:$0xff] }
 0x3be   :  { %v3125_v39 = vsel %vm3122_vm14, %v3124_v42, %v3120_v44  ;;  %v1478_v42 = vpop.f32.mrf.mxu3 }
 0x3bf   :  { %3321 = vrot.lane.b32.xlu1 %v3066_v59, %s9159_s3  ;;  %v3109_v59 = vor.u32 1.1754944e-38, %v3108_v34  ;;  %v3126_v4 = vmul.f32 %v3125_v39, %v16119_v1 }
 0x3c1   :  { %v3110_v20 = vsel %vm3107_vm5, %v3109_v59, %v3105_v8 }
 0x3c2   :  { %v3111_v2 = vmul.f32 %v3110_v20, %v16118_v56 }
 0x3c7   :  { %3362 = vrot.lane.b32.xlu1 %v3081_v18, %s9159_s3  ;;  %v2783_v18 = vpop.xlane.xlu0 %2782 }
 0x3c8   :  { %8576 = vrsqrt.f32 %v2783_v18  ;;  %vm2926_vm4 = vcmp.eq.f32.partialorder %v2783_v18, inf  ;;  %vm2928_vm6 = vcmp.eq.f32.partialorder %v2783_v18, 0.0 }
 0x3cc   :  { %1696 = vmax.xlane.f32.xlu2 %v1695_v48  ;;  %v8573_v48 = vpop.eup %8572 }
 0x3cd   :  { %v2908_v31 = vmul.f32 %v8573_v48, %v2780_v33  ;;  %v8575_v51 = vpop.eup %8574 }
 0x3ce   :  { %v2896_v34 = vmul.f32 %v8575_v51, %v2777_v13  ;;  %v8577_v38 = vpop.eup %8576 }
 0x3cf   :  { %1699 = vmax.xlane.f32.xlu0 %v1698_v23  ;;  %4089 = vrot.lane.b32.xlu1 %v16117_v17, %s9160_s28  ;;  %v16120_v23 = vld [vmem:[#allocation51_spill] sm:$0xff]  ;;  %v2909_v47 = vmul.f32 %v8573_v48, %v2908_v31  ;;  %v2920_v3 = vmul.f32 %v8577_v38, %v2783_v18  ;;  %v2917_v31 = vand.u32 2147483648, %v2780_v33 }
 0x3d0   :  { %v2897_v52 = vmul.f32 %v8575_v51, %v2896_v34  ;;  %v12016_v34 = vadd.f32 %v1478_v42, %v11972_v35 }
 0x3d1   :  { %v2910_v22 = vmul.f32 0.5, %v2909_v47  ;;  %v2921_v20 = vmul.f32 %v8577_v38, %v2920_v3 }
 0x3d2   :  { %v2898_v59 = vmul.f32 0.5, %v2897_v52  ;;  %v2905_v52 = vand.u32 2147483648, %v2777_v13  ;;  %v1701_v3 = vsel %vm1694_vm15, %v12016_v34, -inf }
 0x3d3   :  { %v2911_v40 = vsub.f32 1.5, %v2910_v22  ;;  %v1481_v22 = vpop.f32.mrf.mxu3 }
 0x3d4   :  { %v2899_v39 = vsub.f32 1.5, %v2898_v59  ;;  %v12026_v42 = vadd.f32 %v1481_v22, %v11977_v30 }
 0x3d5   :  { %v2912_v8 = vmul.f32 %v8573_v48, %v2911_v40 }
 0x3d6   :  { %v2900_v47 = vmul.f32 %v8575_v51, %v2899_v39 }
 0x3d7   :  { %3405 = vrot.lane.b32.xlu1 %v3111_v2, %s9159_s3  ;;  %v2913_v44 = vmul.f32 %v2912_v8, %v2780_v33 }
 0x3d9   :  { %v2915_v2 = vsel %vm2914_vm12, %v2780_v33, %v2913_v44 }
 0x3da   :  { %v2918_v62 = vsel %vm2916_vm3, %v2917_v31, %v2915_v2 }
 0x3db   :  { %v1513_v59 = vpop.f32.mrf.mxu3 }
 0x3e3   :  { %3407 = vrot.lane.b32.xlu0 %v3126_v4, %s9159_s3  ;;  %v2922_v4 = vmul.f32 0.5, %v2921_v20  ;;  %v2929_v20 = vand.u32 2147483648, %v2783_v18  ;;  %v1516_v17 = vpop.f32.mrf.mxu3 }
 0x3e4   :  { %4633 = vrot.lane.b32.xlu2 %v16120_v23, %s9160_s28 }
 0x3e5   :  { %v2923_v5 = vsub.f32 1.5, %v2922_v4 }
 0x3e7   :  { %v2924_v48 = vmul.f32 %v8577_v38, %v2923_v5  ;;  %v12021_v5 = vadd.f32 %v1513_v59, %v11972_v35 }
 0x3e9   :  { %v2925_v8 = vmul.f32 %v2924_v48, %v2783_v18  ;;  %v1707_v4 = vsel %vm1694_vm15, %v12021_v5, -inf  ;;  %v1704_v48 = vsel %vm1694_vm15, %v12026_v42, -inf }
 0x3eb   :  { %4643 = vrot.lane.b32.xlu0 %v16121_v10, %s9160_s28  ;;  %v3000_v10 = vmax.f32 %v2918_v62, 1e-12  ;;  %v2927_v44 = vsel %vm2926_vm4, %v2783_v18, %v2925_v8 }
 0x3ec   :  { %4101 = vrot.lane.b32.xlu2 %v16122_v55, %s9160_s28  ;;  %v2901_v55 = vmul.f32 %v2900_v47, %v2777_v13 }
 0x3ed   :  { %8578 = vrcp.f32 %v3000_v10  ;;  %vm3147_vm8 = vweird.f32 %v3000_v10  ;;  %v3151_v59 = vand.u32 2147483647, %v3000_v10 }
 0x3ee   :  { %v2903_v40 = vsel %vm2902_vm13, %v2777_v13, %v2901_v55  ;;  %v12023_v55 = vpop.xlane.xlu2 %2785  ;;  %v2930_v13 = vsel %vm2928_vm6, %v2929_v20, %v2927_v44 }
 0x3ef   :  { %v2906_v33 = vsel %vm2904_vm9, %v2905_v52, %v2903_v40  ;;  %v3001_v2 = vmax.f32 %v2930_v13, 1e-12  ;;  %vm3152_vm5 = vcmp.eq.f32.partialorder %v3151_v59, 8.507059e+37 }
 0x3f0   :  { %v2999_v51 = vmax.f32 %v2906_v33, 1e-12  ;;  %v3153_v33 = vand.u32 2147483648, %v3000_v10 }
 0x3f1   :  { %vm3162_vm13 = vweird.f32 %v3001_v2 }
 0x3f2   :  { %8580 = vrcp.f32 %v2999_v51  ;;  %v3138_v13 = vand.u32 2147483648, %v2999_v51  ;;  %vm3132_vm2 = vweird.f32 %v2999_v51 }
 0x3f3   :  { %v8579_v62 = vpop.eup %8578  ;;  %8582 = vrcp.f32 %v3001_v2 }
 0x3f4   :  { %v3143_v38 = vmul.f32 %v8579_v62, %v3000_v10  ;;  %vm3148_vm10 = vweird.f32 %v8579_v62  ;;  %v3139_v14 = vor.u32 1.1754944e-38, %v3138_v13 }
 0x3f5   :  { %vm3149_vm7 = vmor %vm3147_vm8, %vm3148_vm10  ;;  %vm2938_vm10 = vcmp.eq.f32.partialorder %v12023_v55, inf }
 0x3f6   :  { %v3144_v31 = vsub.f32 1.0, %v3143_v38  ;;  %v12032_v52 = vpop.xlane.xlu2 %2791 }
 0x3f8   :  { %v8581_v39 = vpop.eup %8580  ;;  %v3145_v18 = vmul.f32 %v8579_v62, %v3144_v31  ;;  %v3136_v31 = vand.u32 2147483647, %v2999_v51 }
 0x3f9   :  { %v3128_v47 = vmul.f32 %v8581_v39, %v2999_v51  ;;  %vm3133_vm11 = vweird.f32 %v8581_v39 }
 0x3fa   :  { %v3146_v22 = vadd.f32 %v8579_v62, %v3145_v18  ;;  %vm3134_vm14 = vmor %vm3132_vm2, %vm3133_vm11  ;;  %vm3137_vm12 = vcmp.eq.f32.partialorder %v3136_v31, 8.507059e+37  ;;  %vm2962_vm11 = vcmp.eq.f32.partialorder %v12032_v52, inf  ;;  %vm2964_vm2 = vcmp.eq.f32.partialorder %v12032_v52, 0.0 }
 0x3fb   :  { %v3129_v40 = vsub.f32 1.0, %v3128_v47  ;;  %v16123_v47 = vld [vmem:[#allocation36_spill] sm:$0xff] }
 0x3fc   :  { %v3150_v20 = vsel %vm3149_vm7, %v8579_v62, %v3146_v22  ;;  %vm2940_vm7 = vcmp.eq.f32.partialorder %v12023_v55, 0.0 }
 0x3fd   :  { %v3130_v8 = vmul.f32 %v8581_v39, %v3129_v40 }
 0x3ff   :  { %v3131_v44 = vadd.f32 %v8581_v39, %v3130_v8  ;;  %v2789_v8 = vpop.xlane.xlu1 %2788 }
 0x400   :  { %8584 = vrsqrt.f32 %v2789_v8  ;;  %vm2950_vm6 = vcmp.eq.f32.partialorder %v2789_v8, inf  ;;  %vm2952_vm8 = vcmp.eq.f32.partialorder %v2789_v8, 0.0 }
 0x401   :  { %1702 = vmax.xlane.f32.xlu1 %v1701_v3  ;;  %v8583_v3 = vpop.eup %8582  ;;  %v3135_v18 = vsel %vm3134_vm14, %v8581_v39, %v3131_v44  ;;  %8586 = vrsqrt.f32 %v12023_v55  ;;  %v3168_v44 = vand.u32 2147483648, %v3001_v2 }
 0x402   :  { %v3158_v38 = vmul.f32 %v8583_v3, %v3001_v2  ;;  %v3140_v22 = vsel %vm3137_vm12, %v3139_v14, %v3135_v18  ;;  %vm3163_vm3 = vweird.f32 %v8583_v3  ;;  %v16127_v14 = vld [vmem:[#allocation28_spill] sm:$0xff]  ;;  %8588 = vrsqrt.f32 %v12032_v52 }
 0x403   :  { %vm3164_vm9 = vmor %vm3162_vm13, %vm3163_vm3 }
 0x404   :  { %v3159_v10 = vsub.f32 1.0, %v3158_v38 }
 0x406   :  { %v3160_v23 = vmul.f32 %v8583_v3, %v3159_v10  ;;  %v8585_v13 = vpop.eup %8584 }
 0x407   :  { %v8587_v38 = vpop.eup %8586  ;;  %v2944_v18 = vmul.f32 %v8585_v13, %v2789_v8  ;;  %v2798_v7 = vpop.xlane.xlu1 %2797 }
 0x408   :  { %v3161_v39 = vadd.f32 %v8583_v3, %v3160_v23  ;;  %v2932_v10 = vmul.f32 %v8587_v38, %v12023_v55 }
 0x40a   :  { %v3165_v31 = vsel %vm3164_vm9, %v8583_v3, %v3161_v39  ;;  %v8589_v3 = vpop.eup %8588 }
 0x415   :  { %1708 = vmax.xlane.f32.xlu0 %v1707_v4  ;;  %1705 = vmax.xlane.f32.xlu2 %v1704_v48  ;;  %v12034_v4 = vpop.xlane.xlu2 %2794  ;;  %v3154_v48 = vor.u32 1.1754944e-38, %v3153_v33  ;;  %v16125_v33 = vld [vmem:[#allocation63_spill] sm:$0xff] }
 0x416   :  { %v3141_v51 = vmul.f32 %v3140_v22, %v16125_v33  ;;  %v16149_v33 = vld [vmem:[#allocation9_spill] sm:$0xff] }
 0x417   :  { %v3155_v40 = vsel %vm3152_vm5, %v3154_v48, %v3150_v20  ;;  %v3166_v20 = vand.u32 2147483647, %v3001_v2  ;;  %v16128_v48 = vld [vmem:[#allocation64_spill] sm:$0xff]  ;;  %v2945_v2 = vmul.f32 %v8585_v13, %v2944_v18 }
 0x418   :  { %v3156_v62 = vmul.f32 %v3155_v40, %v16124_v45  ;;  %v3169_v40 = vor.u32 1.1754944e-38, %v3168_v44 }
 0x419   :  { %vm3167_vm4 = vcmp.eq.f32.partialorder %v3166_v20, 8.507059e+37  ;;  %v2946_v39 = vmul.f32 0.5, %v2945_v2  ;;  %v2956_v20 = vmul.f32 %v8589_v3, %v12032_v52 }
 0x41a   :  { %4091 = vrot.lane.b32.xlu1 %v16123_v47, %s9160_s28  ;;  %v3170_v23 = vsel %vm3167_vm4, %v3169_v40, %v3165_v31 }
 0x41b   :  { %v3171_v22 = vmul.f32 %v3170_v23, %v16051_v50  ;;  %v2957_v47 = vmul.f32 %v8589_v3, %v2956_v20 }
 0x41d   :  { %v12042_v59 = vpop.permute.xlu2 %3270  ;;  %v2958_v21 = vmul.f32 0.5, %v2957_v47 }
 0x41e   :  { %16126 = vst [vmem:[#allocation76_spill] sm:$0xff] %v12042_v59 }
 0x422   :  { %3448 = vrot.lane.b32.xlu1 %v3141_v51, %s9159_s3  ;;  %v2933_v51 = vmul.f32 %v8587_v38, %v2932_v10 }
 0x424   :  { %v2934_v44 = vmul.f32 0.5, %v2933_v51  ;;  %v2953_v51 = vand.u32 2147483648, %v2789_v8 }
 0x426   :  { %v2935_v31 = vsub.f32 1.5, %v2934_v44  ;;  %v2941_v44 = vand.u32 2147483648, %v12023_v55 }
 0x428   :  { %v2936_v18 = vmul.f32 %v8587_v38, %v2935_v31  ;;  %v12068_v38 = vadd.f32 %v1516_v17, %v11977_v30  ;;  %v2965_v17 = vand.u32 2147483648, %v12032_v52 }
 0x429   :  { %3450 = vrot.lane.b32.xlu0 %v3156_v62, %s9159_s3  ;;  %v12051_v62 = vpop.permute.xlu2 %3356 }
 0x42a   :  { %16129 = vst [vmem:[#allocation55_spill] sm:$0xff] %v12051_v62  ;;  %v2937_v10 = vmul.f32 %v2936_v18, %v12023_v55 }
 0x42d   :  { %4103 = vrot.lane.b32.xlu2 %v16127_v14, %s9160_s28  ;;  %v16130_v14 = vld [vmem:[#allocation71_spill] sm:$0xff] }
 0x431   :  { %4641 = vrot.lane.b32.xlu0 %v16128_v48, %s9160_s28  ;;  %v2947_v48 = vsub.f32 1.5, %v2946_v39  ;;  %v12058_v40 = vpop.permute.xlu2 %3528  ;;  %v2939_v39 = vsel %vm2938_vm10, %v12023_v55, %v2937_v10 }
 0x432   :  { %16131 = vst [vmem:[#allocation72_spill] sm:$0xff] %v12058_v40  ;;  %v2942_v47 = vsel %vm2940_vm7, %v2941_v44, %v2939_v39 }
 0x433   :  { %v2948_v61 = vmul.f32 %v8585_v13, %v2947_v48  ;;  %v3002_v20 = vmax.f32 %v2942_v47, 1e-12 }
 0x435   :  { %4651 = vrot.lane.b32.xlu2 %v16130_v14, %s9160_s28  ;;  %v2949_v23 = vmul.f32 %v2948_v61, %v2789_v8  ;;  %v2959_v14 = vsub.f32 1.5, %v2958_v21  ;;  %v1548_v21 = vpop.f32.mrf.mxu3  ;;  %v3183_v12 = vand.u32 2147483648, %v3002_v20  ;;  %vm3177_vm3 = vweird.f32 %v3002_v20 }
 0x437   :  { %v2951_v2 = vsel %vm2950_vm6, %v2789_v8, %v2949_v23  ;;  %v2960_v61 = vmul.f32 %v8589_v3, %v2959_v14  ;;  %v1710_v8 = vsel %vm1694_vm15, %v12068_v38, -inf }
 0x438   :  { %v2954_v13 = vsel %vm2952_vm8, %v2953_v51, %v2951_v2  ;;  %v12080_v2 = vadd.f32 %v1548_v21, %v11972_v35 }
 0x439   :  { %3491 = vrot.lane.b32.xlu0 %v3171_v22, %s9159_s3  ;;  %v12061_v22 = vpop.permute.xlu2 %3358  ;;  %v3003_v48 = vmax.f32 %v2954_v13, 1e-12  ;;  %v2961_v31 = vmul.f32 %v2960_v61, %v12032_v52 }
 0x43a   :  { %16132 = vst [vmem:[#allocation52_spill] sm:$0xff] %v12061_v22  ;;  %v1713_v47 = vsel %vm1694_vm15, %v12080_v2, -inf }
 0x43b   :  { %8590 = vrcp.f32 %v3003_v48  ;;  %v2963_v55 = vsel %vm2962_vm11, %v12032_v52, %v2961_v31  ;;  %vm3192_vm12 = vweird.f32 %v3003_v48  ;;  %v3198_v15 = vand.u32 2147483648, %v3003_v48 }
 0x43c   :  { %8592 = vrcp.f32 %v3002_v20  ;;  %v2966_v14 = vsel %vm2964_vm2, %v2965_v17, %v2963_v55  ;;  %v3196_v29 = vand.u32 2147483647, %v3003_v48  ;;  %vm2974_vm2 = vcmp.eq.f32.partialorder %v12034_v4, inf }
 0x43d   :  { %v1551_v23 = vpop.f32.mrf.mxu3  ;;  %v3004_v51 = vmax.f32 %v2966_v14, 1e-12  ;;  %v3199_v46 = vor.u32 1.1754944e-38, %v3198_v15  ;;  %v16138_v15 = vld [vmem:[#allocation38_spill] sm:$0xff] }
 0x43e   :  { %v12083_v39 = vadd.f32 %v1551_v23, %v11977_v30  ;;  %vm3197_vm6 = vcmp.eq.f32.partialorder %v3196_v29, 8.507059e+37 }
 0x43f   :  { %8594 = vrcp.f32 %v3004_v51  ;;  %vm3207_vm8 = vweird.f32 %v3004_v51  ;;  %v3211_v29 = vand.u32 2147483647, %v3004_v51 }
 0x440   :  { %v1716_v52 = vsel %vm1694_vm15, %v12083_v39, -inf  ;;  %8596 = vrsqrt.f32 %v12034_v4 }
 0x441   :  { %v12071_v18 = vpop.permute.xlu2 %3571  ;;  %v8591_v3 = vpop.eup %8590  ;;  %8598 = vrsqrt.f32 %v2798_v7  ;;  %vm3212_vm11 = vcmp.eq.f32.partialorder %v3211_v29, 8.507059e+37 }
 0x442   :  { %16133 = vst [vmem:[#allocation77_spill] sm:$0xff] %v12071_v18  ;;  %v8593_v10 = vpop.eup %8592  ;;  %v3188_v61 = vmul.f32 %v8591_v3, %v3003_v48  ;;  %vm3193_vm5 = vweird.f32 %v8591_v3  ;;  %v16137_v48 = vld [vmem:[#allocation70_spill] sm:$0xff]  ;;  %v16163_v18 = vld [vmem:[#allocation47_spill] sm:$0xff] }
 0x443   :  { %v3173_v13 = vmul.f32 %v8593_v10, %v3002_v20  ;;  %vm3178_vm14 = vweird.f32 %v8593_v10  ;;  %vm3194_vm13 = vmor %vm3192_vm12, %vm3193_vm5  ;;  %vm2986_vm5 = vcmp.eq.f32.partialorder %v2798_v7, inf  ;;  %vm2988_vm12 = vcmp.eq.f32.partialorder %v2798_v7, 0.0 }
 0x444   :  { %v3189_v21 = vsub.f32 1.0, %v3188_v61  ;;  %vm3179_vm9 = vmor %vm3177_vm3, %vm3178_vm14  ;;  %vm2976_vm14 = vcmp.eq.f32.partialorder %v12034_v4, 0.0 }
 0x445   :  { %v3174_v31 = vsub.f32 1.0, %v3173_v13  ;;  %v16136_v13 = vld [vmem:[#allocation83_spill] sm:$0xff] }
 0x446   :  { %v3190_v17 = vmul.f32 %v8591_v3, %v3189_v21  ;;  %v3184_v21 = vor.u32 1.1754944e-38, %v3183_v12 }
 0x447   :  { %v3175_v55 = vmul.f32 %v8593_v10, %v3174_v31 }
 0x448   :  { %v3191_v25 = vadd.f32 %v8591_v3, %v3190_v17 }
 0x449   :  { %v12085_v44 = vpop.permute.xlu2 %3315  ;;  %v3176_v16 = vadd.f32 %v8593_v10, %v3175_v55 }
 0x44a   :  { %16134 = vst [vmem:[#allocation81_spill] sm:$0xff] %v12085_v44  ;;  %v3195_v31 = vsel %vm3194_vm13, %v8591_v3, %v3191_v25 }
 0x44b   :  { %v3180_v61 = vsel %vm3179_vm9, %v8593_v10, %v3176_v16  ;;  %v3200_v37 = vsel %vm3197_vm6, %v3199_v46, %v3195_v31  ;;  %v3213_v16 = vand.u32 2147483648, %v3004_v51 }
 0x44c   :  { %1711 = vmax.xlane.f32.xlu1 %v1710_v8  ;;  %v8595_v8 = vpop.eup %8594 }
 0x44d   :  { %v3203_v23 = vmul.f32 %v8595_v8, %v3004_v51  ;;  %vm3208_vm10 = vweird.f32 %v8595_v8  ;;  %v8597_v25 = vpop.eup %8596  ;;  %v3214_v46 = vor.u32 1.1754944e-38, %v3213_v16  ;;  %v16139_v51 = vld [vmem:[#allocation19_spill] sm:$0xff] }
 0x44e   :  { %vm3209_vm7 = vmor %vm3207_vm8, %vm3208_vm10 }
 0x451   :  { %v12091_v14 = vpop.permute.xlu2 %3401 }
 0x452   :  { %16135 = vst [vmem:[#allocation75_spill] sm:$0xff] %v12091_v14  ;;  %v16164_v14 = vld [vmem:[#allocation53_spill] sm:$0xff] }
 0x459   :  { %v12095_v17 = vpop.permute.xlu2 %4631 }
 0x45e   :  { %1714 = vmax.xlane.f32.xlu2 %v1713_v47  ;;  %v3181_v47 = vand.u32 2147483647, %v3002_v20 }
 0x460   :  { %vm3182_vm4 = vcmp.eq.f32.partialorder %v3181_v47, 8.507059e+37  ;;  %v2968_v47 = vmul.f32 %v8597_v25, %v12034_v4 }
 0x461   :  { %v3185_v49 = vsel %vm3182_vm4, %v3184_v21, %v3180_v61  ;;  %v12104_v3 = vpop.permute.xlu2 %4087 }
 0x462   :  { %v3186_v20 = vmul.f32 %v3185_v49, %v16137_v48  ;;  %v1583_v49 = vpop.f32.mrf.mxu3  ;;  %v2969_v31 = vmul.f32 %v8597_v25, %v2968_v47  ;;  %v8327_v48 = vld [vmem:[%s15677_s4 + $0x8] sm:$0xff] }
 0x463   :  { %1717 = vmax.xlane.f32.xlu0 %v1716_v52  ;;  %v3204_v52 = vsub.f32 1.0, %v3203_v23  ;;  %v3201_v23 = vmul.f32 %v3200_v37, %v16063_v36  ;;  %v8599_v37 = vpop.eup %8598  ;;  %310 = vmatpush.bf16.msrb.mxu2 %v8327_v48 }
 0x464   :  { %v2970_v21 = vmul.f32 0.5, %v2969_v31 }
 0x465   :  { %4655 = vrot.lane.b32.xlu1 %v16136_v13, %s9160_s28  ;;  %v3205_v55 = vmul.f32 %v8595_v8, %v3204_v52  ;;  %v2980_v52 = vmul.f32 %v8599_v37, %v2798_v7  ;;  %v12113_v13 = vpop.permute.xlu0 %3272 }
 0x466   :  { %16140 = vst [vmem:[#allocation88_spill] sm:$0xff] %v12113_v13 }
 0x467   :  { %v3206_v50 = vadd.f32 %v8595_v8, %v3205_v55 }
 0x469   :  { %v3210_v12 = vsel %vm3209_vm7, %v8595_v8, %v3206_v50  ;;  %v2981_v50 = vmul.f32 %v8599_v37, %v2980_v52  ;;  %v12111_v55 = vpop.permute.xlu2 %3319  ;;  %v2977_v52 = vand.u32 2147483648, %v12034_v4 }
 0x46a   :  { %v3215_v10 = vsel %vm3212_vm11, %v3214_v46, %v3210_v12  ;;  %v1586_v8 = vpop.f32.mrf.mxu3 }
 0x46b   :  { %v3216_v61 = vmul.f32 %v3215_v10, %v16061_v57 }
 0x46d   :  { %3493 = vrot.lane.b32.xlu1 %v3186_v20, %s9159_s3  ;;  %v2982_v20 = vmul.f32 0.5, %v2981_v50 }
 0x46f   :  { %v2983_v16 = vsub.f32 1.5, %v2982_v20 }
 0x471   :  { %v2984_v46 = vmul.f32 %v8599_v37, %v2983_v16  ;;  %v12115_v10 = vpop.permute.xlu2 %4647 }
 0x472   :  { %v1618_v29 = vpop.f32.mrf.mxu3 }
 0x476   :  { %4097 = vrot.lane.b32.xlu2 %v16138_v15, %s9160_s28  ;;  %v2985_v15 = vmul.f32 %v2984_v46, %v2798_v7 }
 0x477   :  { %3534 = vrot.lane.b32.xlu0 %v3201_v23, %s9159_s3  ;;  %v2971_v23 = vsub.f32 1.5, %v2970_v21  ;;  %v12124_v21 = vpop.permute.xlu0 %3444 }
 0x478   :  { %v2987_v31 = vsel %vm2986_vm5, %v2798_v7, %v2985_v15  ;;  %16141 = vst [vmem:[#allocation89_spill] sm:$0xff] %v12124_v21 }
 0x479   :  { %v2972_v12 = vmul.f32 %v8597_v25, %v2971_v23  ;;  %v2989_v25 = vand.u32 2147483648, %v2798_v7  ;;  %v1697_v37 = vpop.xlane.xlu2 %1696  ;;  %v12127_v23 = vadd.f32 %v1583_v49, %v11972_v35  ;;  %v12138_v7 = vadd.f32 %v1618_v29, %v11972_v35 }
 0x47a   :  { %v12141_v49 = vadd.f32 %v1586_v8, %v11977_v30  ;;  %v1743_v19 = vsub.f32 %v11985_v53, %v1697_v37 }
 0x47b   :  { %v2990_v20 = vsel %vm2988_vm12, %v2989_v25, %v2987_v31  ;;  %v1719_v15 = vsel %vm1694_vm15, %v12127_v23, -inf  ;;  %v1725_v31 = vsel %vm1694_vm15, %v12138_v7, -inf }
 0x47e   :  { %3536 = vrot.lane.b32.xlu2 %v3216_v61, %s9159_s3  ;;  %v12121_v61 = vpop.f32.mrf.mxu3 }
 0x47f   :  { %4109 = vrot.lane.b32.xlu0 %v16139_v51, %s9160_s28  ;;  %v2973_v51 = vmul.f32 %v2972_v12, %v12034_v4 }
 0x481   :  { %v2975_v47 = vsel %vm2974_vm2, %v12034_v4, %v2973_v51  ;;  %v3006_v51 = vmax.f32 %v2990_v20, 1e-12  ;;  %v12133_v4 = vpop.permute.xlu0 %3530  ;;  %v12135_v46 = vpop.permute.xlu2 %4633 }
 0x482   :  { %v2978_v50 = vsel %vm2976_vm14, %v2977_v52, %v2975_v47  ;;  %16142 = vst [vmem:[#allocation90_spill] sm:$0xff] %v12133_v4 }
 0x483   :  { %v3005_v16 = vmax.f32 %v2978_v50, 1e-12  ;;  %v1722_v50 = vsel %vm1694_vm15, %v12141_v49, -inf  ;;  %vm3237_vm4 = vweird.f32 %v3006_v51 }
 0x485   :  { %8600 = vrcp.f32 %v3005_v16  ;;  %vm3222_vm9 = vweird.f32 %v3005_v16  ;;  %v3228_v0 = vand.u32 2147483648, %v3005_v16  ;;  %v3226_v48 = vand.u32 2147483647, %v3005_v16 }
 0x486   :  { %v12129_v12 = vpop.f32.mrf.mxu3  ;;  %8602 = vrcp.f32 %v3006_v51 }
 0x487   :  { %vm3227_vm7 = vcmp.eq.f32.partialorder %v3226_v48, 8.507059e+37 }
 0x489   :  { %v12147_v41 = vpop.permute.xlu0 %3313  ;;  %v12152_v8 = vpop.permute.xlu2 %4101 }
 0x48a   :  { %16143 = vst [vmem:[#allocation91_spill] sm:$0xff] %v12147_v41 }
 0x48b   :  { %v8601_v47 = vpop.eup %8600 }
 0x48c   :  { %v8603_v52 = vpop.eup %8602  ;;  %vm3223_vm3 = vweird.f32 %v8601_v47 }
 0x48d   :  { %v3233_v20 = vmul.f32 %v8603_v52, %v3006_v51  ;;  %vm3238_vm13 = vweird.f32 %v8603_v52  ;;  %vm12167_vm6 = vmor %vm3222_vm9, %vm3223_vm3 }
 0x48e   :  { %v1656_v25 = vpop.f32.mrf.mxu3  ;;  %vm3239_vm10 = vmor %vm3237_vm4, %vm3238_vm13 }
 0x48f   :  { %v12150_v29 = vadd.f32 %v1656_v25, %v11977_v30  ;;  %v3234_v27 = vsub.f32 1.0, %v3233_v20  ;;  %v12160_v25 = vpop.permute.xlu1 %3442 }
 0x490   :  { %16144 = vst [vmem:[#allocation92_spill] sm:$0xff] %v12160_v25 }
 0x491   :  { %v3235_v36 = vmul.f32 %v8603_v52, %v3234_v27  ;;  %v1706_v32 = vpop.xlane.xlu2 %1705  ;;  %v12162_v57 = vpop.permute.xlu0 %4085  ;;  %v3241_v27 = vand.u32 2147483647, %v3006_v51 }
 0x492   :  { %v1746_v20 = vsub.f32 %v12026_v42, %v1706_v32  ;;  %v16147_v32 = vld [vmem:[#allocation79_spill] sm:$0xff] }
 0x493   :  { %v3236_v53 = vadd.f32 %v8603_v52, %v3235_v36  ;;  %v8326_v36 = vld [vmem:[%s15677_s4] sm:$0xff]  ;;  %vm3242_vm8 = vcmp.eq.f32.partialorder %v3241_v27, 8.507059e+37  ;;  %v16152_v27 = vld [vmem:[#allocation30_spill] sm:$0xff] }
 0x494   :  { %311 = vmatpush.bf16.msrb.mxu2 %v8326_v36 }
 0x496   :  { %v1688_v4 = vpop.f32.mrf.mxu3 }
 0x497   :  { %1720 = vmax.xlane.f32.xlu1 %v1719_v15  ;;  %v3218_v15 = vmul.f32 %v8601_v47, %v3005_v16  ;;  %v12180_v16 = vpop.permute.xlu1 %3399  ;;  %8129 = vmatmul.msk.bf16.vlgmr.msrb.gmra.mxu2 %vm121_vm0, %v16149_v33  ;;  %v12293_v25 = vadd.f32 %v1688_v4, %v11972_v35 }
 0x498   :  { %16148 = vst [vmem:[#allocation93_spill] sm:$0xff] %v12180_v16 }
 0x499   :  { %v3219_v56 = vsub.f32 1.0, %v3218_v15  ;;  %v3243_v15 = vand.u32 2147483648, %v3006_v51 }
 0x49b   :  { %v3220_v24 = vmul.f32 %v8601_v47, %v3219_v56  ;;  %v3244_v51 = vor.u32 1.1754944e-38, %v3243_v15  ;;  %v16153_v56 = vld [vmem:[#allocation22_spill] sm:$0xff] }
 0x49d   :  { %v3221_v37 = vadd.f32 %v8601_v47, %v3220_v24  ;;  %v3240_v24 = vsel %vm3239_vm10, %v8603_v52, %v3236_v53  ;;  %v12184_v52 = vpop.permute.xlu0 %4639 }
 0x49f   :  { %v3225_v42 = vsel %vm12167_vm6, %v8601_v47, %v3221_v37 }
 0x4a5   :  { %v12198_v15 = vpop.permute.xlu0 %3487 }
 0x4a6   :  { %16151 = vst [vmem:[#allocation94_spill] sm:$0xff] %v12198_v15  ;;  %v1691_v15 = vpop.f32.mrf.mxu3 }
 0x4a7   :  { %1723 = vmax.xlane.f32.xlu2 %v1722_v50  ;;  %v1759_v50 = vmul.f32 1.442695, %v1743_v19  ;;  %v4680_v19 = vsel %vm385_vm1, %v12095_v17, 0.0  ;;  %v1765_v17 = vmul.f32 1.442695, %v1746_v20  ;;  %v12194_v20 = vpop.permute.xlu1 %3485  ;;  %8130 = vmatmul.msk.bf16.gmra.mxu2 %vm121_vm0, %v16153_v56  ;;  %v12234_v56 = vadd.f32 %v12129_v12, %v11972_v35  ;;  %v16158_v12 = vld [vmem:[#allocation39_spill] sm:$0xff] }
 0x4a8   :  { %16150 = vst [vmem:[#allocation9_spill] sm:$0xff] %v12194_v20  ;;  %v16167_v20 = vld [vmem:[#allocation68_spill] sm:$0xff]  ;;  %v12288_v21 = vadd.f32 %v1691_v15, %v11977_v30  ;;  %v12318_v15 = vld [vmem:[%s15679_s6] ss:$0 sm:$0xff]  ;;  %s12651_s6 = sld [smem:[#allocation3 + $0x2]] }
 0x4a9   :  { %1726 = vmax.xlane.f32.xlu0 %v1725_v31  ;;  %v1734_v31 = vsel %vm1694_vm15, %v12150_v29, -inf  ;;  %8604 = vpow2.f32 %v1759_v50 }
 0x4aa   :  { %8606 = vpow2.f32 %v1765_v17  ;;  %v16155_v17 = vld [vmem:[#allocation33_spill] sm:$0xff] }
 0x4ad   :  { %v12206_v48 = vpop.permute.xlu0 %3278 }
 0x4af   :  { %v12178_v50 = vpop.eup %8604 }
 0x4b0   :  { %4653 = vrot.lane.b32.xlu1 %v16147_v32, %s9160_s28  ;;  %v12192_v37 = vpop.eup %8606 }
 0x4b1   :  { %1735 = vmax.xlane.f32.xlu0 %v1734_v31  ;;  %v3229_v31 = vor.u32 1.1754944e-38, %v3228_v0  ;;  %v1791_v0 = vsel %vm1694_vm15, %v12178_v50, 0.0  ;;  %v1800_v33 = vsel %vm1694_vm15, %v12192_v37, 0.0 }
 0x4b3   :  { %v3230_v1 = vsel %vm3227_vm7, %v3229_v31, %v3225_v42 }
 0x4b4   :  { %v3231_v53 = vmul.f32 %v3230_v1, %v16089_v6  ;;  %v12204_v1 = vpop.permute.xlu1 %4629 }
 0x4b5   :  { %v12212_v42 = vpop.permute.xlu0 %4637 }
 0x4b7   :  { %8131 = vmatmul.msk.bf16.gmra.mxu2 %vm121_vm0, %v16155_v17  ;;  %v16157_v17 = vld [vmem:[#allocation34_spill] sm:$0xff] }
 0x4b8   :  { %3577 = vrot.lane.b32.xlu1 %v3231_v53, %s9159_s3 }
 0x4b9   :  { %4681 = vadd.xlane.f32.xlu0 %v4680_v19  ;;  %v3245_v19 = vsel %vm3242_vm8, %v3244_v51, %v3240_v24  ;;  %v16154_v24 = vld [vmem:[#allocation87_spill] sm:$0xff]  ;;  %v12216_v51 = vpop.permute.xlu2 %4103 }
 0x4ba   :  { %v3246_v47 = vmul.f32 %v3245_v19, %v16067_v58  ;;  %v12222_v19 = vadd.f32 %v12121_v61, %v11977_v30  ;;  %v1737_v30 = vsel %vm1694_vm15, %v12293_v25, -inf }
 0x4bc   :  { %v12208_v36 = vpop.permute.xlu1 %4635  ;;  %v1728_v53 = vsel %vm1694_vm15, %v12222_v19, -inf }
 0x4bf   :  { %3579 = vrot.lane.b32.xlu2 %v3246_v47, %s9159_s3  ;;  %v12224_v47 = vpop.permute.xlu0 %4645 }
 0x4c1   :  { %1792 = vadd.xlane.f32.xlu0 %v1791_v0  ;;  %v12226_v0 = vpop.permute.xlu2 %4651 }
 0x4c4   :  { %v12218_v31 = vpop.permute.xlu1 %3276 }
 0x4c7   :  { %4105 = vrot.lane.b32.xlu2 %v16152_v27, %s9160_s28  ;;  %8132 = vmatmul.msk.bf16.gmra.mxu2 %vm121_vm0, %v16157_v17  ;;  %v1731_v27 = vsel %vm1694_vm15, %v12234_v56, -inf }
 0x4c9   :  { %1801 = vadd.xlane.f32.xlu0 %v1800_v33 }
 0x4cc   :  { %v12230_v33 = vpop.permute.xlu1 %3573 }
 0x4cd   :  { %16156 = vst [vmem:[#allocation22_spill] sm:$0xff] %v12230_v33  ;;  %v16159_v33 = vld [vmem:[#allocation84_spill] sm:$0xff] }
 0x4d1   :  { %v1715_v61 = vpop.xlane.xlu2 %1714 }
 0x4d2   :  { %v1749_v32 = vsub.f32 %v12080_v2, %v1715_v61 }
 0x4d4   :  { %v12243_v6 = vpop.permute.xlu1 %4093 }
 0x4d7   :  { %8133 = vmatmul.msk.bf16.gmra.mxu2 %vm121_vm0, %v16158_v12  ;;  %v16162_v12 = vld [vmem:[#allocation49_spill] sm:$0xff] }
 0x4d9   :  { %v12273_v63 = vpop.permute.xlu2 %4097 }
 0x4dc   :  { %v12249_v54 = vpop.permute.xlu1 %3321 }
 0x4dd   :  { %4659 = vrot.lane.b32.xlu0 %v16154_v24, %s9160_s28  ;;  %v12238_v24 = vpop.permute.xlu0 %4095 }
 0x4e2   :  { %1729 = vmax.xlane.f32.xlu1 %v1728_v53  ;;  %v1771_v53 = vmul.f32 1.442695, %v1749_v32  ;;  %v16160_v32 = vld [vmem:[#allocation16_spill] sm:$0xff] }
 0x4e4   :  { %8608 = vpow2.f32 %v1771_v53  ;;  %v16161_v53 = vld [vmem:[#allocation32_spill] sm:$0xff] }
 0x4e5   :  { %v12245_v58 = vpop.permute.xlu0 %3364 }
 0x4e7   :  { %8134 = vmatmul.msk.bf16.gmra.mxu2 %vm121_vm0, %v16162_v12  ;;  %v12281_v12 = vpop.permute.xlu2 %3536 }
 0x4e8   :  { %16166 = vst [vmem:[#allocation34_spill] sm:$0xff] %v12281_v12 }
 0x4ea   :  { %v12251_v17 = vpop.eup %8608 }
 0x4eb   :  { %v1809_v2 = vsel %vm1694_vm15, %v12251_v17, 0.0 }
 0x4ed   :  { %v1700_v28 = vpop.xlane.xlu0 %1699 }
 0x4ee   :  { %v1744_v40 = vsub.f32 %v11988_v60, %v1700_v28  ;;  %v1740_v28 = vsel %vm1694_vm15, %v12288_v21, -inf }
 0x4f0   :  { %1732 = vmax.xlane.f32.xlu2 %v1731_v27  ;;  %v12257_v27 = vpop.permute.xlu1 %3362  ;;  %v1761_v44 = vmul.f32 1.442695, %v1744_v40 }
 0x4f5   :  { %v12261_v61 = vpop.permute.xlu0 %3407 }
 0x4f7   :  { %8135 = vmatmul.msk.bf16.gmra.mxu2 %vm121_vm0, %v16164_v14 }
 0x4f8   :  { %v12267_v45 = vpop.permute.xlu1 %4089 }
 0x4fb   :  { %4649 = vrot.lane.b32.xlu1 %v16159_v33, %s9160_s28 }
 0x4fd   :  { %v12269_v33 = vpop.permute.xlu0 %4643 }
 0x503   :  { %4099 = vrot.lane.b32.xlu1 %v16161_v53, %s9160_s28 }
 0x507   :  { %1810 = vadd.xlane.f32.xlu0 %v1809_v2  ;;  %v1709_v2 = vpop.xlane.xlu0 %1708  ;;  %8136 = vmatmul.msk.bf16.gmra.mxu2 %vm121_vm0, %v16167_v20 }
 0x508   :  { %4111 = vrot.lane.b32.xlu2 %v16160_v32, %s9160_s28  ;;  %v12277_v32 = vpop.permute.xlu1 %3405 }
 0x50f   :  { %v12279_v53 = vpop.permute.xlu0 %3450 }
 0x510   :  { %16165 = vst [vmem:[#allocation33_spill] sm:$0xff] %v12279_v53  ;;  %v1703_v16 = vpop.xlane.xlu1 %1702 }
 0x511   :  { %v1745_v26 = vsub.f32 %v12016_v34, %v1703_v16 }
 0x517   :  { %v12290_v14 = vpop.permute.xlu0 %4641 }
 0x51a   :  { %v1724_v22 = vpop.xlane.xlu2 %1723  ;;  %v313_v4 = vpop.f32.mrf.mxu2 }
 0x51b   :  { %4113 = vrot.lane.b32.xlu0 %v16163_v18, %s9160_s28  ;;  %v1763_v18 = vmul.f32 1.442695, %v1745_v26  ;;  %v1752_v34 = vsub.f32 %v12141_v49, %v1724_v22  ;;  %v1747_v26 = vsub.f32 %v12021_v5, %v1709_v2  ;;  %v12313_v49 = vpop.permute.xlu1 %4091 }
 0x51d   :  { %8610 = vpow2.f32 %v1763_v18  ;;  %v1777_v60 = vmul.f32 1.442695, %v1752_v34  ;;  %v1767_v40 = vmul.f32 1.442695, %v1747_v26 }
 0x51e   :  { %8612 = vpow2.f32 %v1761_v44 }
 0x51f   :  { %v12303_v35 = vpop.permute.xlu0 %3491  ;;  %8614 = vpow2.f32 %v1777_v60 }
 0x520   :  { %16168 = vst [vmem:[#allocation39_spill] sm:$0xff] %v12303_v35  ;;  %8616 = vpow2.f32 %v1767_v40 }
 0x523   :  { %v12301_v16 = vpop.eup %8610  ;;  %v12329_v62 = vpop.permute.xlu1 %3448 }
 0x524   :  { %v12305_v18 = vpop.eup %8612  ;;  %v1797_v22 = vsel %vm1694_vm15, %v12301_v16, 0.0  ;;  %16169 = vst [vmem:[#allocation49_spill] sm:$0xff] %v12329_v62 }
 0x525   :  { %v1794_v5 = vsel %vm1694_vm15, %v12305_v18, 0.0  ;;  %v12311_v44 = vpop.eup %8614 }
 0x526   :  { %v12320_v2 = vpop.eup %8616  ;;  %v1818_v34 = vsel %vm1694_vm15, %v12311_v44, 0.0 }
 0x527   :  { %v1718_v20 = vpop.xlane.xlu0 %1717 }
 0x528   :  { %v1750_v26 = vsub.f32 %v12083_v39, %v1718_v20 }
 0x52a   :  { %v1773_v40 = vmul.f32 1.442695, %v1750_v26  ;;  %v12338_v26 = vpop.permute.xlu2 %3579 }
 0x52b   :  { %16171 = vst [vmem:[#allocation68_spill] sm:$0xff] %v12338_v26 }
 0x52c   :  { %8618 = vpow2.f32 %v1773_v40 }
 0x52d   :  { %1738 = vmax.xlane.f32.xlu1 %v1737_v30  ;;  %v1803_v30 = vsel %vm1694_vm15, %v12320_v2, 0.0 }
 0x531   :  { %1741 = vmax.xlane.f32.xlu2 %v1740_v28  ;;  %v314_v28 = vadd.f32 %v12318_v15, %v313_v4  ;;  %v4677_v4 = vsel %vm385_vm1, %v12204_v1, 0.0 }
 0x533   :  { %v353_v60 = vpack.c.bf16 %v314_v28, %v314_v28  ;;  %v1712_v28 = vpop.xlane.xlu1 %1711 }
 0x535   :  { %1795 = vadd.xlane.f32.xlu1 %v1794_v5  ;;  %v1894_v41 = vunpack.c.l.b16 %v353_v60 }
 0x539   :  { %1798 = vadd.xlane.f32.xlu2 %v1797_v22  ;;  %v315_v22 = vpop.f32.mrf.mxu2 }
 0x53a   :  { %v316_v5 = vadd.f32 %v12318_v15, %v315_v22 }
 0x53b   :  { %v12346_v40 = vpop.permute.xlu1 %4655 }
 0x53c   :  { %v354_v13 = vpack.c.bf16 %v316_v5, %v316_v5 }
 0x53d   :  { %1804 = vadd.xlane.f32.xlu1 %v1803_v30  ;;  %v16172_v30 = vld [vmem:[#allocation41_spill] sm:$0xff] }
 0x53e   :  { %v1895_v9 = vunpack.c.l.b16 %v354_v13 }
 0x540   :  { %v12333_v39 = vpack.c.b16 %v1895_v9, %v1894_v41 }
 0x541   :  { %v318_v20 = vpop.f32.mrf.mxu2 }
 0x542   :  { %16170 = vst [vmem:[#allocation53_spill] sm:$0xff] %v12333_v39  ;;  %1908 = vmatpush.bf16.msrb.mxu0 %v12333_v39  ;;  %v319_v60 = vadd.f32 %v12318_v15, %v318_v20 }
 0x543   :  { %v12354_v59 = vpop.permute.xlu1 %3493 }
 0x544   :  { %v355_v13 = vpack.c.bf16 %v319_v60, %v319_v60  ;;  %16174 = vst [vmem:[#allocation96_spill] sm:$0xff] %v12354_v59  ;;  %v16176_v59 = vld [vmem:[#allocation73_spill] sm:$0xff] }
 0x545   :  { %1819 = vadd.xlane.f32.xlu0 %v1818_v34  ;;  %4678 = vadd.xlane.f32.xlu1 %v4677_v4  ;;  %v12336_v34 = vpop.eup %8618  ;;  %v12348_v4 = vpop.permute.xlu2 %4105 }
 0x546   :  { %v1812_v1 = vsel %vm1694_vm15, %v12336_v34, 0.0  ;;  %v1922_v22 = vunpack.c.l.b16 %v355_v13 }
 0x549   :  { %v320_v41 = vpop.f32.mrf.mxu2 }
 0x54a   :  { %v321_v9 = vadd.f32 %v12318_v15, %v320_v41 }
 0x54b   :  { %v1721_v62 = vpop.xlane.xlu1 %1720 }
 0x54c   :  { %v356_v5 = vpack.c.bf16 %v321_v9, %v321_v9  ;;  %v1748_v9 = vsub.f32 %v12068_v38, %v1712_v28 }
 0x54d   :  { %1813 = vadd.xlane.f32.xlu1 %v1812_v1 }
 0x54e   :  { %v1923_v26 = vunpack.c.l.b16 %v356_v5  ;;  %v12359_v5 = vpop.permute.xlu0 %3534 }
 0x54f   :  { %16175 = vst [vmem:[#allocation97_spill] sm:$0xff] %v12359_v5  ;;  %v4145_v5 = vsel %vm385_vm1, %v12243_v6, 0.0 }
 0x550   :  { %v12350_v39 = vpack.c.b16 %v1923_v26, %v1922_v22 }
 0x551   :  { %4107 = vrot.lane.b32.xlu2 %v16172_v30, %s9160_s28  ;;  %v323_v30 = vpop.f32.mrf.mxu2 }
 0x552   :  { %16173 = vst [vmem:[#allocation95_spill] sm:$0xff] %v12350_v39  ;;  %1936 = vmatpush.bf16.msra.mxu1 %v12350_v39  ;;  %v324_v20 = vadd.f32 %v12318_v15, %v323_v30  ;;  %v1769_v30 = vmul.f32 1.442695, %v1748_v9 }
 0x554   :  { %v357_v41 = vpack.c.bf16 %v324_v20, %v324_v20 }
 0x556   :  { %v1950_v26 = vunpack.c.l.b16 %v357_v41  ;;  %v12373_v28 = vpop.permute.xlu0 %4109  ;;  %v4692_v41 = vsel %vm385_vm1, %v12184_v52, 0.0  ;;  %v1751_v52 = vsub.f32 %v12127_v23, %v1721_v62  ;;  %v4136_v23 = vsel %vm385_vm1, %v12104_v3, 0.0 }
 0x559   :  { %v325_v35 = vpop.f32.mrf.mxu2 }
 0x55a   :  { %v326_v13 = vadd.f32 %v12318_v15, %v325_v35 }
 0x55c   :  { %v358_v22 = vpack.c.bf16 %v326_v13, %v326_v13 }
 0x55e   :  { %v1951_v53 = vunpack.c.l.b16 %v358_v22 }
 0x560   :  { %v12363_v11 = vpack.c.b16 %v1951_v53, %v1950_v26 }
 0x561   :  { %v328_v20 = vpop.f32.mrf.mxu2 }
 0x562   :  { %16177 = vst [vmem:[#allocation98_spill] sm:$0xff] %v12363_v11  ;;  %1964 = vmatpush.bf16.msra.mxu2 %v12363_v11  ;;  %v329_v38 = vadd.f32 %v12318_v15, %v328_v20  ;;  %v1727_v20 = vpop.xlane.xlu0 %1726 }
 0x563   :  { %v1733_v60 = vpop.xlane.xlu2 %1732 }
 0x564   :  { %v1755_v1 = vsub.f32 %v12234_v56, %v1733_v60  ;;  %v359_v60 = vpack.c.bf16 %v329_v38, %v329_v38 }
 0x566   :  { %v1783_v12 = vmul.f32 1.442695, %v1755_v1  ;;  %4657 = vrot.lane.b32.xlu1 %v16176_v59, %s9160_s28  ;;  %v1978_v26 = vunpack.c.l.b16 %v359_v60  ;;  %v4133_v60 = vsel %vm385_vm1, %v12162_v57, 0.0 }
 0x568   :  { %8620 = vpow2.f32 %v1783_v12  ;;  %v12371_v12 = vpop.permute.xlu1 %4653 }
 0x569   :  { %8622 = vpow2.f32 %v1769_v30  ;;  %v330_v53 = vpop.f32.mrf.mxu2 }
 0x56a   :  { %v331_v13 = vadd.f32 %v12318_v15, %v330_v53 }
 0x56c   :  { %v360_v22 = vpack.c.bf16 %v331_v13, %v331_v13  ;;  %v1753_v13 = vsub.f32 %v12138_v7, %v1727_v20 }
 0x56e   :  { %v12365_v56 = vpop.eup %8620  ;;  %v1979_v30 = vunpack.c.l.b16 %v360_v22  ;;  %v1736_v22 = vpop.xlane.xlu0 %1735  ;;  %v1779_v62 = vmul.f32 1.442695, %v1753_v13 }
 0x56f   :  { %v1827_v35 = vsel %vm1694_vm15, %v12365_v56, 0.0  ;;  %v12375_v1 = vpop.eup %8622  ;;  %v1756_v7 = vsub.f32 %v12150_v29, %v1736_v22 }
 0x570   :  { %1828 = vadd.xlane.f32.xlu0 %v1827_v35  ;;  %v1806_v9 = vsel %vm1694_vm15, %v12375_v1, 0.0  ;;  %v12382_v35 = vpop.permute.xlu1 %3577  ;;  %v12384_v38 = vpack.c.b16 %v1979_v30, %v1978_v26 }
 0x571   :  { %16178 = vst [vmem:[#allocation99_spill] sm:$0xff] %v12382_v35  ;;  %v333_v59 = vpop.f32.mrf.mxu2 }
 0x572   :  { %16179 = vst [vmem:[#allocation100_spill] sm:$0xff] %v12384_v38  ;;  %1992 = vmatpush.bf16.msrb.mxu3 %v12384_v38  ;;  %v334_v53 = vadd.f32 %v12318_v15, %v333_v59 }
 0x574   :  { %v361_v26 = vpack.c.bf16 %v334_v53, %v334_v53 }
 0x576   :  { %v2006_v57 = vunpack.c.l.b16 %v361_v26  ;;  %v12404_v53 = vpop.xlane.xlu0 %4681 }
 0x577   :  { %vm4744_vm11 = vcmp.eq.f32.partialorder %v12404_v53, inf  ;;  %vm4746_vm2 = vcmp.eq.f32.partialorder %v12404_v53, 0.0 }
 0x578   :  { %4693 = vadd.xlane.f32.xlu0 %v4692_v41  ;;  %v1775_v41 = vmul.f32 1.442695, %v1751_v52 }
 0x579   :  { %v335_v30 = vpop.f32.mrf.mxu2 }
 0x57a   :  { %1807 = vadd.xlane.f32.xlu2 %v1806_v9  ;;  %v1730_v9 = vpop.xlane.xlu1 %1729  ;;  %v336_v6 = vadd.f32 %v12318_v15, %v335_v30  ;;  %8624 = vpow2.f32 %v1775_v41  ;;  %v1785_v41 = vmul.f32 1.442695, %v1756_v7 }
 0x57b   :  { %v1754_v35 = vsub.f32 %v12222_v19, %v1730_v9  ;;  %8626 = vpow2.f32 %v1779_v62 }
 0x57d   :  { %v1781_v52 = vmul.f32 1.442695, %v1754_v35 }
 0x57f   :  { %8628 = vpow2.f32 %v1781_v52 }
 0x580   :  { %4146 = vadd.xlane.f32.xlu0 %v4145_v5  ;;  %v362_v5 = vpack.c.bf16 %v336_v6, %v336_v6  ;;  %8630 = vpow2.f32 %v1785_v41  ;;  %v1793_v6 = vpop.xlane.xlu0 %1792 }
 0x581   :  { %v338_v19 = vpop.f32.mrf.mxu2 }
 0x582   :  { %4134 = vadd.xlane.f32.xlu2 %v4133_v60  ;;  %v2007_v59 = vunpack.c.l.b16 %v362_v5  ;;  %v12401_v60 = vpop.eup %8624  ;;  %v12410_v35 = vpop.permute.xlu1 %4649  ;;  %v339_v29 = vadd.f32 %v12318_v15, %v338_v19 }
 0x583   :  { %v1815_v3 = vsel %vm1694_vm15, %v12401_v60, 0.0  ;;  %v12408_v13 = vpop.eup %8626  ;;  %v12422_v5 = vpop.permute.xlu2 %4111 }
 0x584   :  { %v12399_v20 = vpack.c.b16 %v2007_v59, %v2006_v57  ;;  %v1821_v26 = vsel %vm1694_vm15, %v12408_v13, 0.0  ;;  %v363_v30 = vpack.c.bf16 %v339_v29, %v339_v29 }
 0x585   :  { %v12413_v9 = vpop.eup %8628 }
 0x586   :  { %16180 = vst [vmem:[#allocation101_spill] sm:$0xff] %v12399_v20  ;;  %2020 = vmatpush.bf16.msra.mxu0 %v12399_v20  ;;  %v1824_v22 = vsel %vm1694_vm15, %v12413_v9, 0.0  ;;  %v2034_v59 = vunpack.c.l.b16 %v363_v30 }
 0x589   :  { %v340_v62 = vpop.f32.mrf.mxu2 }
 0x58a   :  { %4137 = vadd.xlane.f32.xlu2 %v4136_v23  ;;  %v12419_v23 = vpop.eup %8630  ;;  %v341_v57 = vadd.f32 %v12318_v15, %v340_v62  ;;  %v12426_v19 = vpop.permute.xlu1 %4099 }
 0x58b   :  { %16181 = vst [vmem:[#allocation102_spill] sm:$0xff] %v12419_v23  ;;  %v1830_v7 = vsel %vm1694_vm15, %v12419_v23, 0.0  ;;  %v4689_v23 = vsel %vm385_vm1, %v12212_v42, 0.0 }
 0x58c   :  { %v364_v52 = vpack.c.bf16 %v341_v57, %v341_v57 }
 0x58e   :  { %v2035_v41 = vunpack.c.l.b16 %v364_v52 }
 0x590   :  { %1822 = vadd.xlane.f32.xlu1 %v1821_v26  ;;  %v12430_v29 = vpack.c.b16 %v2035_v41, %v2034_v59  ;;  %v4704_v59 = vsel %vm385_vm1, %v12115_v10, 0.0 }
 0x591   :  { %v343_v26 = vpop.f32.mrf.mxu2 }
 0x592   :  { %1816 = vadd.xlane.f32.xlu2 %v1815_v3  ;;  %v4686_v3 = vsel %vm385_vm1, %v12208_v36, 0.0  ;;  %16182 = vst [vmem:[#allocation103_spill] sm:$0xff] %v12430_v29  ;;  %2048 = vmatpush.bf16.msrb.mxu1 %v12430_v29  ;;  %v344_v57 = vadd.f32 %v12318_v15, %v343_v26 }
 0x594   :  { %v365_v41 = vpack.c.bf16 %v344_v57, %v344_v57 }
 0x598   :  { %1831 = vadd.xlane.f32.xlu1 %v1830_v7 }
 0x59a   :  { %1825 = vadd.xlane.f32.xlu2 %v1824_v22  ;;  %v1802_v22 = vpop.xlane.xlu0 %1801 }
 0x59b   :  { %8632 = vrcp.f32 %v1802_v22  ;;  %v2062_v22 = vunpack.c.l.b16 %v365_v41 }
 0x5a0   :  { %v1739_v7 = vpop.xlane.xlu1 %1738  ;;  %4690 = vadd.xlane.f32.xlu1 %v4689_v23 }
 0x5a1   :  { %v1757_v36 = vsub.f32 %v12293_v25, %v1739_v7  ;;  %v8633_v42 = vpop.eup %8632  ;;  %v4139_v25 = vsel %vm385_vm1, %v12267_v45, 0.0 }
 0x5a2   :  { %4687 = vadd.xlane.f32.xlu2 %v4686_v3  ;;  %v1858_v57 = vmul.f32 %v8633_v42, %v12192_v37 }
 0x5a3   :  { %v1787_v3 = vmul.f32 1.442695, %v1757_v36 }
 0x5a4   :  { %v1742_v62 = vpop.xlane.xlu2 %1741 }
 0x5a5   :  { %v1758_v30 = vsub.f32 %v12288_v21, %v1742_v62  ;;  %v345_v21 = vpop.f32.mrf.mxu2 }
 0x5a6   :  { %v346_v26 = vadd.f32 %v12318_v15, %v345_v21  ;;  %v1874_v21 = vpack.c.bf16 %v1858_v57, %v1858_v57 }
 0x5a7   :  { %v1789_v52 = vmul.f32 1.442695, %v1758_v30 }
 0x5a8   :  { %v366_v30 = vpack.c.bf16 %v346_v26, %v346_v26  ;;  %4140 = vadd.xlane.f32.xlu1 %v4139_v25 }
 0x5a9   :  { %8634 = vpow2.f32 %v1789_v52  ;;  %v1796_v52 = vpop.xlane.xlu1 %1795 }
 0x5aa   :  { %8636 = vrcp.f32 %v1793_v6  ;;  %4705 = vadd.xlane.f32.xlu2 %v4704_v59  ;;  %v2063_v10 = vunpack.c.l.b16 %v366_v30 }
 0x5ab   :  { %8638 = vpow2.f32 %v1787_v3 }
 0x5ac   :  { %v1799_v62 = vpop.xlane.xlu2 %1798  ;;  %v12448_v36 = vpack.c.b16 %v2063_v10, %v2062_v22  ;;  %v4148_v22 = vsel %vm385_vm1, %v12238_v24, 0.0  ;;  %v1918_v10 = vunpack.c.l.b16 %v1874_v21  ;;  %v4160_v21 = vsel %vm385_vm1, %v12216_v51, 0.0 }
 0x5ad   :  { %8640 = vrcp.f32 %v1799_v62  ;;  %v12457_v62 = vpop.permute.xlu0 %4659 }
 0x5ae   :  { %8642 = vrcp.f32 %v1796_v52  ;;  %16183 = vst [vmem:[#allocation104_spill] sm:$0xff] %v12448_v36  ;;  %2076 = vmatpush.bf16.msrb.mxu2 %v12448_v36  ;;  %v348_v52 = vpop.f32.mrf.mxu2 }
 0x5af   :  { %v12443_v23 = vpop.eup %8634  ;;  %8644 = vrsqrt.f32 %v12404_v53  ;;  %v349_v24 = vadd.f32 %v12318_v15, %v348_v52 }
 0x5b0   :  { %v8637_v6 = vpop.eup %8636  ;;  %v1836_v7 = vsel %vm1694_vm15, %v12443_v23, 0.0  ;;  %4149 = vadd.xlane.f32.xlu1 %v4148_v22 }
 0x5b1   :  { %1837 = vadd.xlane.f32.xlu0 %v1836_v7  ;;  %v12450_v59 = vpop.eup %8638  ;;  %v1855_v45 = vmul.f32 %v8637_v6, %v12178_v50  ;;  %v12462_v50 = vpop.xlane.xlu1 %1804 }
 0x5b2   :  { %v1833_v3 = vsel %vm1694_vm15, %v12450_v59, 0.0 }
 0x5b3   :  { %v8641_v41 = vpop.eup %8640  ;;  %1834 = vadd.xlane.f32.xlu2 %v1833_v3  ;;  %v1871_v30 = vpack.c.bf16 %v1855_v45, %v1855_v45 }
 0x5b4   :  { %v1857_v37 = vmul.f32 %v8641_v41, %v12301_v16  ;;  %v8643_v26 = vpop.eup %8642  ;;  %v4701_v16 = vsel %vm385_vm1, %v12224_v47, 0.0 }
 0x5b5   :  { %v1856_v25 = vmul.f32 %v8643_v26, %v12305_v18  ;;  %v1889_v41 = vunpack.c.l.b16 %v1871_v30  ;;  %v1811_v45 = vpop.xlane.xlu0 %1810  ;;  %v8645_v22 = vpop.eup %8644 }
 0x5b6   :  { %v1873_v42 = vpack.c.bf16 %v1857_v37, %v1857_v37  ;;  %v367_v37 = vpack.c.bf16 %v349_v24, %v349_v24  ;;  %v350_v26 = vpop.f32.mrf.mxu2  ;;  %8646 = vrcp.f32 %v1811_v45  ;;  %v4698_v45 = vsel %vm385_vm1, %v12269_v33, 0.0 }
 0x5b7   :  { %v1872_v57 = vpack.c.bf16 %v1856_v25, %v1856_v25  ;;  %v4738_v25 = vmul.f32 %v8645_v22, %v12404_v53  ;;  %v4710_v33 = vsel %vm385_vm1, %v12226_v0, 0.0 }
 0x5b8   :  { %v1917_v6 = vunpack.c.l.b16 %v1873_v42  ;;  %4161 = vadd.xlane.f32.xlu1 %v4160_v21  ;;  %v4157_v42 = vsel %vm385_vm1, %v12152_v8, 0.0  ;;  %v2090_v51 = vunpack.c.l.b16 %v367_v37  ;;  %v4716_v8 = vsel %vm385_vm1, %v12346_v40, 0.0  ;;  %v16185_v40 = vld [vmem:[#allocation44_spill] sm:$0xff] }
 0x5b9   :  { %4702 = vadd.xlane.f32.xlu0 %v4701_v16  ;;  %v1890_v3 = vunpack.c.l.b16 %v1872_v57  ;;  %v12473_v47 = vpop.xlane.xlu1 %4678 }
 0x5ba   :  { %v1919_v7 = vpack.c.b16 %v1918_v10, %v1917_v6  ;;  %8648 = vrsqrt.f32 %v12473_v47  ;;  %v4142_v6 = vsel %vm385_vm1, %v12313_v49, 0.0  ;;  %vm4732_vm5 = vcmp.eq.f32.partialorder %v12473_v47, inf }
 0x5bb   :  { %v1891_v18 = vpack.c.b16 %v1890_v3, %v1889_v41  ;;  %v4695_v41 = vsel %vm385_vm1, %v12290_v14, 0.0  ;;  %v4707_v14 = vsel %vm385_vm1, %v12410_v35, 0.0  ;;  %vm4734_vm14 = vcmp.eq.f32.partialorder %v12473_v47, 0.0 }
 0x5bc   :  { %8170 = vmatmul.msk.bf16.vlgmr.msra.gmra.mxu1 %vm1694_vm15, %v1919_v7  ;;  %v8647_v10 = vpop.eup %8646 }
 0x5bd   :  { %8184 = vmatpush.xpose.msk.msra.mxu1 %vm385_vm1, %v12249_v54  ;;  %8169 = vmatmul.msk.bf16.vlgmr.msrb.gmra.mxu0 %vm1694_vm15, %v1891_v18  ;;  %v351_v54 = vadd.f32 %v12318_v15, %v350_v26  ;;  %v4739_v15 = vmul.f32 %v8645_v22, %v4738_v25  ;;  %v4114_v37 = vpop.permute.xlu0 %4113 }
 0x5be   :  { %8180 = vmatpush.xpose.msk.msrb.mxu0 %vm385_vm1, %v12206_v48 }
 0x5bf   :  { %v368_v30 = vpack.c.bf16 %v351_v54, %v351_v54  ;;  %v4740_v16 = vmul.f32 0.5, %v4739_v15 }
 0x5c0   :  { %4717 = vadd.xlane.f32.xlu1 %v4716_v8  ;;  %v8649_v57 = vpop.eup %8648  ;;  %v4747_v8 = vand.u32 2147483648, %v12404_v53 }
 0x5c1   :  { %8185 = vmatpush.xpose.msk.msra.mxu1 %vm385_vm1, %v12111_v55  ;;  %4158 = vadd.xlane.f32.xlu0 %v4157_v42  ;;  %v2091_v52 = vunpack.c.l.b16 %v368_v30  ;;  %v1814_v48 = vpop.xlane.xlu1 %1813  ;;  %v4741_v49 = vsub.f32 1.5, %v4740_v16  ;;  %v4726_v18 = vmul.f32 %v8649_v57, %v12473_v47  ;;  %v4735_v16 = vand.u32 2147483648, %v12473_v47 }
 0x5c2   :  { %8181 = vmatpush.xpose.msk.msrb.mxu0 %vm385_vm1, %v12218_v31  ;;  %8650 = vrcp.f32 %v1814_v48  ;;  %v1861_v31 = vmul.f32 %v8647_v10, %v12251_v17  ;;  %v4169_v10 = vsel %vm385_vm1, %v12373_v28, 0.0  ;;  %v4172_v28 = vsel %vm385_vm1, %v12422_v5, 0.0 }
 0x5c3   :  { %v12489_v55 = vpack.c.b16 %v2091_v52, %v2090_v51  ;;  %v4742_v42 = vmul.f32 %v8645_v22, %v4741_v49  ;;  %v4727_v54 = vmul.f32 %v8649_v57, %v4726_v18  ;;  %v4108_v22 = vpop.permute.xlu2 %4107 }
 0x5c4   :  { %v1877_v3 = vpack.c.bf16 %v1861_v31, %v1861_v31  ;;  %v4166_v0 = vsel %vm385_vm1, %v4108_v22, 0.0 }
 0x5c5   :  { %16184 = vst [vmem:[#allocation105_spill] sm:$0xff] %v12489_v55  ;;  %2104 = vmatpush.bf16.msra.mxu3 %v12489_v55  ;;  %v4728_v30 = vmul.f32 0.5, %v4727_v54  ;;  %v1820_v25 = vpop.xlane.xlu0 %1819 }
 0x5c6   :  { %v1973_v21 = vunpack.c.l.b16 %v1877_v3 }
 0x5c7   :  { %v4729_v35 = vsub.f32 1.5, %v4728_v30 }
 0x5c8   :  { %v8651_v7 = vpop.eup %8650  ;;  %4696 = vadd.xlane.f32.xlu1 %v4695_v41 }
 0x5c9   :  { %4143 = vadd.xlane.f32.xlu0 %v4142_v6  ;;  %v1862_v24 = vmul.f32 %v8651_v7, %v12336_v34  ;;  %v4743_v34 = vmul.f32 %v4742_v42, %v12404_v53 }
 0x5cb   :  { %4115 = vrot.lane.b32.xlu2 %v16185_v40, %s9160_s28  ;;  %v1878_v17 = vpack.c.bf16 %v1862_v24, %v1862_v24  ;;  %v4745_v52 = vsel %vm4744_vm11, %v12404_v53, %v4743_v34 }
 0x5cc   :  { %v4748_v48 = vsel %vm4746_vm2, %v4747_v8, %v4745_v52 }
 0x5cd   :  { %v1974_v26 = vunpack.c.l.b16 %v1878_v17  ;;  %v12520_v15 = vmax.f32 %v4748_v48, 1e-12  ;;  %v4713_v48 = vsel %vm385_vm1, %v12371_v12, 0.0 }
 0x5cf   :  { %v1975_v51 = vpack.c.b16 %v1974_v26, %v1973_v21  ;;  %8652 = vrcp.f32 %v12520_v15  ;;  %v4683_v26 = vsel %vm385_vm1, %v12135_v46, 0.0  ;;  %vm4953_vm3 = vweird.f32 %v12520_v15 }
 0x5d0   :  { %4708 = vadd.xlane.f32.xlu1 %v4707_v14  ;;  %8654 = vrcp.f32 %v12462_v50 }
 0x5d1   :  { %4699 = vadd.xlane.f32.xlu0 %v4698_v45  ;;  %8172 = vmatmul.msk.bf16.vlgmr.msrb.gmra.mxu3 %vm1694_vm15, %v1975_v51 }
 0x5d2   :  { %8192 = vmatpush.xpose.msk.msrb.mxu3 %vm385_vm1, %v12261_v61  ;;  %v4730_v61 = vmul.f32 %v8649_v57, %v4729_v35 }
 0x5d4   :  { %v4731_v31 = vmul.f32 %v4730_v61, %v12473_v47  ;;  %v4959_v61 = vand.u32 2147483648, %v12520_v15 }
 0x5d5   :  { %v8653_v41 = vpop.eup %8652 }
 0x5d6   :  { %8193 = vmatpush.xpose.msk.msrb.mxu3 %vm385_vm1, %v12277_v32  ;;  %v4175_v32 = vsel %vm385_vm1, %v4114_v37, 0.0  ;;  %v4733_v53 = vsel %vm4732_vm5, %v12473_v47, %v4731_v31  ;;  %v8655_v49 = vpop.eup %8654  ;;  %v4949_v18 = vmul.f32 %v8653_v41, %v12520_v15  ;;  %vm4954_vm12 = vweird.f32 %v8653_v41 }
 0x5d7   :  { %v4736_v57 = vsel %vm4734_vm14, %v4735_v16, %v4733_v53  ;;  %v1859_v45 = vmul.f32 %v8655_v49, %v12320_v2  ;;  %vm4955_vm13 = vmor %vm4953_vm3, %vm4954_vm12 }
 0x5d8   :  { %4167 = vadd.xlane.f32.xlu1 %v4166_v0  ;;  %v4658_v3 = vpop.permute.xlu1 %4657  ;;  %v12537_v50 = vmax.f32 %v4736_v57, 1e-12  ;;  %v4950_v21 = vsub.f32 1.0, %v4949_v18  ;;  %v4960_v57 = vor.u32 1.1754944e-38, %v4959_v61 }
 0x5d9   :  { %4711 = vadd.xlane.f32.xlu0 %v4710_v33  ;;  %v4719_v5 = vsel %vm385_vm1, %v4658_v3, 0.0  ;;  %v1875_v42 = vpack.c.bf16 %v1859_v45, %v1859_v45 }
 0x5da   :  { %v4951_v30 = vmul.f32 %v8653_v41, %v4950_v21  ;;  %vm4938_vm10 = vweird.f32 %v12537_v50 }
 0x5db   :  { %v1945_v22 = vunpack.c.l.b16 %v1875_v42 }
 0x5dc   :  { %v4952_v8 = vadd.f32 %v8653_v41, %v4951_v30 }
 0x5e0   :  { %4176 = vadd.xlane.f32.xlu1 %v4175_v32 }
 0x5e1   :  { %4170 = vadd.xlane.f32.xlu0 %v4169_v10 }
 0x5e3   :  { %v12522_v6 = vpop.xlane.xlu0 %1828 }
 0x5e9   :  { %4173 = vadd.xlane.f32.xlu0 %v4172_v28  ;;  %v4956_v28 = vsel %vm4955_vm13, %v8653_v41, %v4952_v8  ;;  %v4151_v41 = vsel %vm385_vm1, %v12273_v63, 0.0  ;;  %v4942_v63 = vand.u32 2147483647, %v12537_v50 }
 0x5eb   :  { %v12534_v7 = vpop.xlane.xlu0 %4693  ;;  %vm4943_vm5 = vcmp.eq.f32.partialorder %v4942_v63, 8.507059e+37 }
 0x5ec   :  { %8656 = vrsqrt.f32 %v12534_v7  ;;  %vm4792_vm6 = vcmp.eq.f32.partialorder %v12534_v7, inf  ;;  %vm4794_vm8 = vcmp.eq.f32.partialorder %v12534_v7, 0.0 }
 0x5ed   :  { %v1808_v24 = vpop.xlane.xlu2 %1807 }
 0x5ee   :  { %8658 = vrcp.f32 %v1808_v24 }
 0x5ef   :  { %8660 = vrcp.f32 %v12537_v50 }
 0x5f1   :  { %4720 = vadd.xlane.f32.xlu0 %v4719_v5 }
 0x5f2   :  { %v8657_v47 = vpop.eup %8656 }
 0x5f3   :  { %v4786_v17 = vmul.f32 %v8657_v47, %v12534_v7 }
 0x5f4   :  { %v8659_v37 = vpop.eup %8658  ;;  %4684 = vadd.xlane.f32.xlu2 %v4683_v26 }
 0x5f5   :  { %v4787_v54 = vmul.f32 %v8657_v47, %v4786_v17  ;;  %v1860_v51 = vmul.f32 %v8659_v37, %v12375_v1  ;;  %v12547_v14 = vpop.xlane.xlu2 %4134  ;;  %v12550_v33 = vpop.eup %8660  ;;  %v4944_v37 = vand.u32 2147483648, %v12537_v50 }
 0x5f6   :  { %8662 = vrsqrt.f32 %v12547_v14  ;;  %v4934_v1 = vmul.f32 %v12550_v33, %v12537_v50  ;;  %vm4939_vm4 = vweird.f32 %v12550_v33  ;;  %vm4188_vm11 = vcmp.eq.f32.partialorder %v12547_v14, inf }
 0x5f7   :  { %v4788_v2 = vmul.f32 0.5, %v4787_v54  ;;  %v1876_v34 = vpack.c.bf16 %v1860_v51, %v1860_v51  ;;  %8664 = vrcp.f32 %v1820_v25  ;;  %v4957_v25 = vand.u32 2147483647, %v12520_v15  ;;  %vm12591_vm7 = vmor %vm4938_vm10, %vm4939_vm4 }
 0x5f8   :  { %v4935_v32 = vsub.f32 1.0, %v4934_v1  ;;  %v4795_v51 = vand.u32 2147483648, %v12534_v7  ;;  %vm4190_vm2 = vcmp.eq.f32.partialorder %v12547_v14, 0.0 }
 0x5f9   :  { %v1946_v52 = vunpack.c.l.b16 %v1876_v34  ;;  %v4789_v35 = vsub.f32 1.5, %v4788_v2  ;;  %3834 = vrot.lane.b32.xlu1 %v12350_v39, %s9159_s3  ;;  %vm4958_vm9 = vcmp.eq.f32.partialorder %v4957_v25, 8.507059e+37  ;;  %v4191_v2 = vand.u32 2147483648, %v12547_v14 }
 0x5fa   :  { %v4936_v3 = vmul.f32 %v12550_v33, %v4935_v32  ;;  %v4961_v15 = vsel %vm4958_vm9, %v4960_v57, %v4956_v28 }
 0x5fb   :  { %v1947_v46 = vpack.c.b16 %v1946_v52, %v1945_v22  ;;  %v4790_v12 = vmul.f32 %v8657_v47, %v4789_v35  ;;  %v4945_v22 = vor.u32 1.1754944e-38, %v4944_v37 }
 0x5fc   :  { %v8663_v0 = vpop.eup %8662  ;;  %4714 = vadd.xlane.f32.xlu2 %v4713_v48  ;;  %v4937_v45 = vadd.f32 %v12550_v33, %v4936_v3 }
 0x5fd   :  { %v4182_v10 = vmul.f32 %v8663_v0, %v12547_v14  ;;  %v12558_v31 = vpop.xlane.xlu2 %4137  ;;  %8171 = vmatmul.msk.bf16.vlgmr.msra.gmra.mxu2 %vm1694_vm15, %v1947_v46  ;;  %v8665_v16 = vpop.eup %8664 }
 0x5fe   :  { %8666 = vrsqrt.f32 %v12558_v31  ;;  %8188 = vmatpush.xpose.msk.msra.mxu2 %vm385_vm1, %v12245_v58  ;;  %v4791_v58 = vmul.f32 %v4790_v12, %v12534_v7  ;;  %v1864_v5 = vmul.f32 %v8665_v16, %v12311_v44  ;;  %v4941_v50 = vsel %vm12591_vm7, %v12550_v33, %v4937_v45 }
 0x5ff   :  { %v4183_v53 = vmul.f32 %v8663_v0, %v4182_v10  ;;  %v4946_v1 = vsel %vm4943_vm5, %v4945_v22, %v4941_v50  ;;  %v4163_v33 = vsel %vm385_vm1, %v12348_v4, 0.0  ;;  %vm4200_vm14 = vcmp.eq.f32.partialorder %v12558_v31, inf }
 0x600   :  { %v4793_v44 = vsel %vm4792_vm6, %v12534_v7, %v4791_v58  ;;  %v1880_v48 = vpack.c.bf16 %v1864_v5, %v1864_v5  ;;  %vm4202_vm12 = vcmp.eq.f32.partialorder %v12558_v31, 0.0 }
 0x601   :  { %v4184_v24 = vmul.f32 0.5, %v4183_v53  ;;  %v4796_v52 = vsel %vm4794_vm8, %v4795_v51, %v4793_v44 }
 0x602   :  { %8189 = vmatpush.xpose.msk.msra.mxu2 %vm385_vm1, %v12257_v27  ;;  %v4962_v27 = vmul.f32 %v4961_v15, %v16098_v43  ;;  %v12609_v61 = vmax.f32 %v4796_v52, 1e-12  ;;  %v2002_v28 = vunpack.c.l.b16 %v1880_v48 }
 0x603   :  { %v4185_v49 = vsub.f32 1.5, %v4184_v24  ;;  %v1823_v46 = vpop.xlane.xlu1 %1822 }
 0x604   :  { %v8667_v18 = vpop.eup %8666  ;;  %4152 = vadd.xlane.f32.xlu2 %v4151_v41  ;;  %5204 = vrot.lane.b32.xlu1 %v4962_v27, %s9160_s28  ;;  %vm5013_vm10 = vweird.f32 %v12609_v61 }
 0x605   :  { %v4186_v47 = vmul.f32 %v8663_v0, %v4185_v49  ;;  %v4194_v17 = vmul.f32 %v8667_v18, %v12558_v31  ;;  %v1817_v21 = vpop.xlane.xlu2 %1816  ;;  %3859 = vrot.lane.b32.xlu0 %v12363_v11, %s9159_s3 }
 0x606   :  { %8668 = vrcp.f32 %v1817_v21 }
 0x607   :  { %v4187_v26 = vmul.f32 %v4186_v47, %v12547_v14  ;;  %v4195_v42 = vmul.f32 %v8667_v18, %v4194_v17  ;;  %8670 = vrcp.f32 %v12522_v6  ;;  %v16188_v6 = vld [vmem:[#allocation42_spill] sm:$0xff]  ;;  %v4154_v47 = vsel %vm385_vm1, %v12426_v19, 0.0 }
 0x608   :  { %8672 = vrcp.f32 %v1823_v46  ;;  %v4947_v32 = vmul.f32 %v4946_v1, %v16188_v6  ;;  %v12658_v46 = vpop.xlane.xlu0 %4146 }
 0x609   :  { %v4189_v34 = vsel %vm4188_vm11, %v12547_v14, %v4187_v26  ;;  %v4196_v30 = vmul.f32 0.5, %v4195_v42 }
 0x60a   :  { %v4192_v35 = vsel %vm4190_vm2, %v4191_v2, %v4189_v34  ;;  %v16191_v2 = vld [vmem:[#allocation49_spill] sm:$0xff] }
 0x60b   :  { %v12605_v7 = vmax.f32 %v4192_v35, 1e-12  ;;  %v4197_v8 = vsub.f32 1.5, %v4196_v30 }
 0x60c   :  { %v8669_v0 = vpop.eup %8668  ;;  %4164 = vadd.xlane.f32.xlu2 %v4163_v33  ;;  %5202 = vrot.lane.b32.xlu1 %v4947_v32, %s9160_s28  ;;  %v16192_v32 = vld [vmem:[#allocation96_spill] sm:$0xff] }
 0x60d   :  { %8674 = vrcp.f32 %v12605_v7  ;;  %v4198_v14 = vmul.f32 %v8667_v18, %v4197_v8  ;;  %v1863_v10 = vmul.f32 %v8669_v0, %v12401_v60  ;;  %v1826_v25 = vpop.xlane.xlu2 %1825  ;;  %3909 = vrot.lane.b32.xlu0 %v12399_v20, %s9159_s3  ;;  %v8671_v4 = vpop.eup %8670  ;;  %v4203_v18 = vand.u32 2147483648, %v12558_v31 }
 0x60e   :  { %8676 = vrcp.f32 %v1826_v25  ;;  %v8673_v57 = vpop.eup %8672  ;;  %v1832_v60 = vpop.xlane.xlu1 %1831  ;;  %v1867_v17 = vmul.f32 %v8671_v4, %v12365_v56  ;;  %v16190_v56 = vld [vmem:[#allocation102_spill] sm:$0xff]  ;;  %v4400_v34 = vand.u32 2147483648, %v12605_v7  ;;  %v4398_v52 = vand.u32 2147483647, %v12605_v7 }
 0x60f   :  { %v4199_v12 = vmul.f32 %v4198_v14, %v12558_v31  ;;  %v1879_v53 = vpack.c.bf16 %v1863_v10, %v1863_v10  ;;  %8678 = vrcp.f32 %v12609_v61  ;;  %v1865_v58 = vmul.f32 %v8673_v57, %v12408_v13 }
 0x610   :  { %8680 = vrcp.f32 %v1832_v60  ;;  %v1883_v54 = vpack.c.bf16 %v1867_v17, %v1867_v17  ;;  %v4722_v14 = vsel %vm385_vm1, %v12457_v62, 0.0  ;;  %vm4394_vm13 = vweird.f32 %v12605_v7  ;;  %v16193_v60 = vld [vmem:[#allocation10_spill] sm:$0xff] }
 0x611   :  { %v2001_v16 = vunpack.c.l.b16 %v1879_v53  ;;  %v4201_v24 = vsel %vm4200_vm14, %v12558_v31, %v4199_v12  ;;  %v1881_v41 = vpack.c.bf16 %v1865_v58, %v1865_v58  ;;  %v4401_v12 = vor.u32 1.1754944e-38, %v4400_v34  ;;  %v16195_v17 = vld [vmem:[#allocation34_spill] sm:$0xff] }
 0x612   :  { %v4204_v21 = vsel %vm4202_vm12, %v4203_v18, %v4201_v24  ;;  %v2057_v10 = vunpack.c.l.b16 %v1883_v54  ;;  %vm4399_vm4 = vcmp.eq.f32.partialorder %v4398_v52, 8.507059e+37  ;;  %v12685_v18 = vstv %s12651_s6  ;;  %s8076_s6 = sshll.u32 %s15684_s11, 4  ;;  %s8077_s6 = int_to_ptr.hbm [resolvable:$true] %s8076_s6 }
 0x613   :  { %v12620_v3 = vpop.eup %8674  ;;  %v2003_v15 = vpack.c.b16 %v2002_v28, %v2001_v16  ;;  %v2029_v37 = vunpack.c.l.b16 %v1881_v41  ;;  %v12642_v26 = vmax.f32 %v4204_v21, 1e-12  ;;  %v5017_v21 = vand.u32 2147483647, %v12609_v61 }
 0x614   :  { %v8677_v49 = vpop.eup %8676  ;;  %v4390_v13 = vmul.f32 %v12620_v3, %v12605_v7  ;;  %4155 = vadd.xlane.f32.xlu2 %v4154_v47  ;;  %vm4395_vm3 = vweird.f32 %v12620_v3 }
 0x615   :  { %v1866_v5 = vmul.f32 %v8677_v49, %v12413_v9  ;;  %v12627_v45 = vpop.xlane.xlu2 %4687  ;;  %3884 = vrot.lane.b32.xlu0 %v12384_v38, %s9159_s3  ;;  %8173 = vmatmul.msk.bf16.vlgmr.msra.gmra.mxu0 %vm1694_vm15, %v2003_v15  ;;  %v16189_v9 = vld [vmem:[#allocation33_spill] sm:$0xff]  ;;  %v12640_v31 = vpop.eup %8678  ;;  %vm4396_vm9 = vmor %vm4394_vm13, %vm4395_vm3  ;;  %v16194_v49 = vld [vmem:[#allocation39_spill] sm:$0xff]  ;;  %vm5018_vm11 = vcmp.eq.f32.partialorder %v5017_v21, 8.507059e+37  ;;  %vm4409_vm14 = vweird.f32 %v12642_v26 }
 0x616   :  { %8682 = vrsqrt.f32 %v12627_v45  ;;  %8196 = vmatpush.xpose.msk.msra.mxu0 %vm385_vm1, %v16189_v9  ;;  %v4391_v63 = vsub.f32 1.0, %v4390_v13  ;;  %v8681_v44 = vpop.eup %8680  ;;  %v12648_v50 = vpop.xlane.xlu1 %4690  ;;  %v5009_v30 = vmul.f32 %v12640_v31, %v12609_v61  ;;  %vm5014_vm6 = vweird.f32 %v12640_v31 }
 0x617   :  { %v1882_v27 = vpack.c.bf16 %v1866_v5, %v1866_v5  ;;  %v1868_v51 = vmul.f32 %v8681_v44, %v16190_v56  ;;  %8684 = vrsqrt.f32 %v12648_v50  ;;  %v5019_v5 = vand.u32 2147483648, %v12609_v61  ;;  %vm12701_vm8 = vmor %vm5013_vm10, %vm5014_vm6 }
 0x618   :  { %v4392_v42 = vmul.f32 %v12620_v3, %v4391_v63  ;;  %v5010_v0 = vsub.f32 1.0, %v5009_v30  ;;  %8686 = vrcp.f32 %v12642_v26  ;;  %vm4768_vm7 = vcmp.eq.f32.partialorder %v12627_v45, inf  ;;  %v16199_v30 = vld [vmem:[#allocation97_spill] sm:$0xff] }
 0x619   :  { %v2030_v19 = vunpack.c.l.b16 %v1882_v27  ;;  %v1884_v8 = vpack.c.bf16 %v1868_v51, %v1868_v51  ;;  %v5020_v56 = vor.u32 1.1754944e-38, %v5019_v5  ;;  %v4771_v52 = vand.u32 2147483648, %v12627_v45 }
 0x61a   :  { %8197 = vmatpush.xpose.msk.msra.mxu0 %vm385_vm1, %v16191_v2  ;;  %v4393_v1 = vadd.f32 %v12620_v3, %v4392_v42  ;;  %v5011_v7 = vmul.f32 %v12640_v31, %v5010_v0  ;;  %v16198_v42 = vld [vmem:[#allocation76_spill] sm:$0xff]  ;;  %vm4770_vm2 = vcmp.eq.f32.partialorder %v12627_v45, 0.0  ;;  %v4413_v5 = vand.u32 2147483647, %v12642_v26 }
 0x61b   :  { %v2031_v22 = vpack.c.b16 %v2030_v19, %v2029_v37  ;;  %v2058_v25 = vunpack.c.l.b16 %v1884_v8  ;;  %vm4780_vm12 = vcmp.eq.f32.partialorder %v12648_v50, inf }
 0x61c   :  { %v8683_v35 = vpop.eup %8682  ;;  %4723 = vadd.xlane.f32.xlu2 %v4722_v14  ;;  %v4397_v62 = vsel %vm4396_vm9, %v12620_v3, %v4393_v1  ;;  %v5012_v15 = vadd.f32 %v12640_v31, %v5011_v7  ;;  %vm4414_vm13 = vcmp.eq.f32.partialorder %v4413_v5, 8.507059e+37  ;;  %vm4782_vm9 = vcmp.eq.f32.partialorder %v12648_v50, 0.0 }
 0x61d   :  { %v4762_v48 = vmul.f32 %v8683_v35, %v12627_v45  ;;  %v12663_v33 = vpop.xlane.xlu2 %4705  ;;  %8174 = vmatmul.msk.bf16.vlgmr.msrb.gmra.mxu1 %vm1694_vm15, %v2031_v22  ;;  %3934 = vrot.lane.b32.xlu0 %v12430_v29, %s9159_s3  ;;  %v2059_v4 = vpack.c.b16 %v2058_v25, %v2057_v10  ;;  %v4402_v28 = vsel %vm4399_vm4, %v4401_v12, %v4397_v62  ;;  %v8685_v16 = vpop.eup %8684  ;;  %v16200_v25 = vld [vmem:[#allocation58_spill] sm:$0xff] }
 0x61e   :  { %8688 = vrsqrt.f32 %v12663_v33  ;;  %8200 = vmatpush.xpose.msk.msrb.mxu1 %vm385_vm1, %v16192_v32  ;;  %v4403_v24 = vmul.f32 %v4402_v28, %v16193_v60  ;;  %v4774_v58 = vmul.f32 %v8685_v16, %v12648_v50  ;;  %v12687_v3 = vpop.xlane.xlu1 %4140  ;;  %v12691_v41 = vpop.eup %8686  ;;  %v5016_v61 = vsel %vm12701_vm8, %v12640_v31, %v5012_v15 }
 0x61f   :  { %v4763_v53 = vmul.f32 %v8683_v35, %v4762_v48  ;;  %8175 = vmatmul.msk.bf16.vlgmr.msrb.gmra.mxu2 %vm1694_vm15, %v2059_v4  ;;  %8690 = vrsqrt.f32 %v12687_v3  ;;  %v4405_v51 = vmul.f32 %v12691_v41, %v12642_v26  ;;  %v5021_v31 = vsel %vm5018_vm11, %v5020_v56, %v5016_v61  ;;  %v16201_v4 = vld [vmem:[#allocation88_spill] sm:$0xff]  ;;  %v16204_v56 = vld [vmem:[#allocation25_spill] sm:$0xff] }
 0x620   :  { %v5175_v13 = vmul.f32 %v12685_v18, %v4403_v24  ;;  %8204 = vmatpush.xpose.msk.msrb.mxu2 %vm385_vm1, %v16195_v17  ;;  %v4775_v27 = vmul.f32 %v8685_v16, %v4774_v58  ;;  %v5022_v32 = vmul.f32 %v5021_v31, %v16200_v25  ;;  %v16202_v58 = vld [vmem:[#allocation91_spill] sm:$0xff]  ;;  %vm4410_vm5 = vweird.f32 %v12691_v41 }
 0x621   :  { %v4764_v57 = vmul.f32 0.5, %v4763_v53  ;;  %v4406_v1 = vsub.f32 1.0, %v4405_v51  ;;  %vm4411_vm3 = vmor %vm4409_vm14, %vm4410_vm5  ;;  %vm4840_vm4 = vcmp.eq.f32.partialorder %v12663_v33, inf  ;;  %vm4842_vm6 = vcmp.eq.f32.partialorder %v12663_v33, 0.0 }
 0x622   :  { %8201 = vmatpush.xpose.msk.msrb.mxu1 %vm385_vm1, %v16194_v49  ;;  %5196 = vrot.lane.b32.xlu1 %v5175_v13, %s9160_s28  ;;  %v4776_v54 = vmul.f32 0.5, %v4775_v27  ;;  %vm4212_vm11 = vcmp.eq.f32.partialorder %v12687_v3, inf  ;;  %vm4214_vm5 = vcmp.eq.f32.partialorder %v12687_v3, 0.0 }
 0x623   :  { %v4765_v47 = vsub.f32 1.5, %v4764_v57 }
 0x624   :  { %v8689_v9 = vpop.eup %8688  ;;  %v1838_v37 = vpop.xlane.xlu0 %1837  ;;  %8205 = vmatpush.xpose.msk.msrb.mxu2 %vm385_vm1, %v16199_v30 }
 0x625   :  { %v4766_v44 = vmul.f32 %v8683_v35, %v4765_v47  ;;  %v4834_v19 = vmul.f32 %v8689_v9, %v12663_v33  ;;  %8692 = vrcp.f32 %v1838_v37  ;;  %8182 = vmatmul.msk.f32.vlgmr.msrb.gmra.mxu0 %vm385_vm1, %v16198_v42  ;;  %v4777_v35 = vsub.f32 1.5, %v4776_v54  ;;  %v12721_v0 = vpop.eup %8690  ;;  %v16203_v37 = vld [vmem:[#allocation55_spill] sm:$0xff] }
 0x626   :  { %v1835_v22 = vpop.xlane.xlu2 %1834  ;;  %v4206_v24 = vmul.f32 %v12721_v0, %v12687_v3  ;;  %v12735_v15 = vpop.xlane.xlu1 %4149 }
 0x627   :  { %v4767_v2 = vmul.f32 %v4766_v44, %v12627_v45  ;;  %v4835_v34 = vmul.f32 %v8689_v9, %v4834_v19  ;;  %8694 = vrcp.f32 %v1835_v22  ;;  %v4778_v53 = vmul.f32 %v8685_v16, %v4777_v35  ;;  %v16206_v22 = vld [vmem:[#allocation81_spill] sm:$0xff] }
 0x628   :  { %v4207_v27 = vmul.f32 %v12721_v0, %v4206_v24 }
 0x629   :  { %v4769_v8 = vsel %vm4768_vm7, %v12627_v45, %v4767_v2  ;;  %v4836_v14 = vmul.f32 0.5, %v4835_v34  ;;  %v4407_v45 = vmul.f32 %v12691_v41, %v4406_v1  ;;  %v4779_v47 = vmul.f32 %v4778_v53, %v12648_v50  ;;  %v16205_v2 = vld [vmem:[#allocation92_spill] sm:$0xff] }
 0x62a   :  { %v4772_v48 = vsel %vm4770_vm2, %v4771_v52, %v4769_v8  ;;  %5290 = vrot.lane.b32.xlu1 %v5022_v32, %s9160_s28  ;;  %v16207_v52 = vld [vmem:[#allocation53_spill] sm:$0xff]  ;;  %v16208_v1 = vld [vmem:[#allocation68_spill] sm:$0xff] }
 0x62b   :  { %v8693_v10 = vpop.eup %8692  ;;  %v12724_v12 = vmax.f32 %v4772_v48, 1e-12  ;;  %v4837_v57 = vsub.f32 1.5, %v4836_v14  ;;  %v4408_v17 = vadd.f32 %v12691_v41, %v4407_v45  ;;  %v4781_v42 = vsel %vm4780_vm12, %v12648_v50, %v4779_v47  ;;  %v16209_v53 = vld [vmem:[#allocation52_spill] sm:$0xff] }
 0x62c   :  { %v1870_v62 = vmul.f32 %v8693_v10, %v12443_v23  ;;  %v12727_v7 = vpop.xlane.xlu0 %4702  ;;  %v4415_v23 = vand.u32 2147483648, %v12642_v26  ;;  %v4783_v26 = vand.u32 2147483648, %v12648_v50 }
 0x62d   :  { %8183 = vmatmul.msk.f32.gmra.mxu0 %vm385_vm1, %v16201_v4  ;;  %v8695_v28 = vpop.eup %8694  ;;  %8186 = vmatmul.msk.f32.vlgmr.msra.gmra.mxu1 %vm385_vm1, %v16202_v58  ;;  %8696 = vrcp.f32 %v12724_v12  ;;  %v4838_v21 = vmul.f32 %v8689_v9, %v4837_v57  ;;  %v4412_v19 = vsel %vm4411_vm3, %v12691_v41, %v4408_v17  ;;  %v4208_v41 = vmul.f32 0.5, %v4207_v27  ;;  %v16210_v4 = vld [vmem:[#allocation99_spill] sm:$0xff]  ;;  %v16211_v58 = vld [vmem:[#allocation89_spill] sm:$0xff] }
 0x62e   :  { %v1886_v16 = vpack.c.bf16 %v1870_v62, %v1870_v62  ;;  %v1869_v49 = vmul.f32 %v8695_v28, %v12450_v59  ;;  %v4416_v59 = vor.u32 1.1754944e-38, %v4415_v23  ;;  %v4784_v35 = vsel %vm4782_vm9, %v4783_v26, %v4781_v42  ;;  %v12767_v8 = vpop.xlane.xlu1 %4161  ;;  %v16214_v42 = vld [vmem:[#allocation94_spill] sm:$0xff] }
 0x62f   :  { %8190 = vmatmul.msk.f32.vlgmr.msra.gmra.mxu2 %vm385_vm1, %v16203_v37  ;;  %v4839_v30 = vmul.f32 %v4838_v21, %v12663_v33  ;;  %v12775_v10 = vmax.f32 %v4784_v35, 1e-12  ;;  %v4209_v32 = vsub.f32 1.5, %v4208_v41  ;;  %v4843_v62 = vand.u32 2147483648, %v12663_v33  ;;  %v16215_v26 = vld [vmem:[#allocation54_spill] sm:$0xff] }
 0x630   :  { %v1885_v13 = vpack.c.bf16 %v1869_v49, %v1869_v49  ;;  %v2086_v63 = vunpack.c.l.b16 %v1886_v16  ;;  %v4417_v61 = vsel %vm4414_vm13, %v4416_v59, %v4412_v19  ;;  %v16212_v16 = vld [vmem:[#allocation9_spill] sm:$0xff]  ;;  %v4989_v5 = vand.u32 2147483648, %v12724_v12 }
 0x631   :  { %v4418_v51 = vmul.f32 %v4417_v61, %v16204_v56  ;;  %v4841_v14 = vsel %vm4840_vm4, %v12663_v33, %v4839_v30  ;;  %8698 = vrcp.f32 %v12775_v10  ;;  %v4210_v23 = vmul.f32 %v12721_v0, %v4209_v32  ;;  %v16213_v0 = vld [vmem:[#allocation72_spill] sm:$0xff] }
 0x632   :  { %v2085_v44 = vunpack.c.l.b16 %v1885_v13  ;;  %v4844_v57 = vsel %vm4842_vm6, %v4843_v62, %v4841_v14  ;;  %vm4983_vm8 = vweird.f32 %v12724_v12  ;;  %v4987_v13 = vand.u32 2147483647, %v12724_v12  ;;  %v16218_v62 = vld [vmem:[#allocation75_spill] sm:$0xff] }
 0x633   :  { %v8697_v34 = vpop.eup %8696  ;;  %v5176_v31 = vmul.f32 %v12685_v18, %v4418_v51  ;;  %v12793_v49 = vmax.f32 %v4844_v57, 1e-12  ;;  %v4211_v21 = vmul.f32 %v4210_v23, %v12687_v3  ;;  %v4215_v61 = vand.u32 2147483648, %v12687_v3 }
 0x634   :  { %v12753_v54 = vpop.xlane.xlu0 %4158  ;;  %v2087_v9 = vpack.c.b16 %v2086_v63, %v2085_v44  ;;  %3809 = vrot.lane.b32.xlu2 %v16207_v52, %s9159_s3  ;;  %v4979_v48 = vmul.f32 %v8697_v34, %v12724_v12  ;;  %vm4984_vm10 = vweird.f32 %v8697_v34  ;;  %v4990_v63 = vor.u32 1.1754944e-38, %v4989_v5 }
 0x635   :  { %8198 = vmatmul.msk.f32.vlgmr.msra.gmra.mxu0 %vm385_vm1, %v16205_v2  ;;  %8187 = vmatmul.msk.f32.gmra.mxu1 %vm385_vm1, %v16206_v22  ;;  %vm4985_vm7 = vmor %vm4983_vm8, %vm4984_vm10  ;;  %8700 = vrcp.f32 %v12793_v49  ;;  %vm4988_vm2 = vcmp.eq.f32.partialorder %v4987_v13, 8.507059e+37  ;;  %v4213_v12 = vsel %vm4212_vm11, %v12687_v3, %v4211_v21  ;;  %v16217_v22 = vld [vmem:[#allocation90_spill] sm:$0xff]  ;;  %v5002_v32 = vand.u32 2147483647, %v12775_v10 }
 0x636   :  { %8176 = vmatmul.msk.bf16.vlgmr.msra.gmra.mxu3 %vm1694_vm15, %v2087_v9  ;;  %5198 = vrot.lane.b32.xlu1 %v5176_v31, %s9160_s28  ;;  %v4980_v28 = vsub.f32 1.0, %v4979_v48  ;;  %v12799_v27 = vpop.xlane.xlu1 %4717  ;;  %v4216_v30 = vsel %vm4214_vm5, %v4215_v61, %v4213_v12  ;;  %v5004_v48 = vand.u32 2147483648, %v12775_v10  ;;  %vm4998_vm12 = vweird.f32 %v12775_v10 }
 0x637   :  { %8208 = vmatpush.xpose.msk.msra.mxu3 %vm385_vm1, %v16208_v1  ;;  %8191 = vmatmul.msk.f32.gmra.mxu2 %vm385_vm1, %v16209_v53  ;;  %v8699_v37 = vpop.eup %8698  ;;  %v4375_v31 = vmax.f32 %v4216_v30, 1e-12  ;;  %vm5003_vm13 = vcmp.eq.f32.partialorder %v5002_v32, 8.507059e+37  ;;  %vm5073_vm4 = vweird.f32 %v12793_v49  ;;  %v5079_v5 = vand.u32 2147483648, %v12793_v49  ;;  %v16222_v30 = vld [vmem:[#allocation22_spill] sm:$0xff] }
 0x638   :  { %v4981_v33 = vmul.f32 %v8697_v34, %v4980_v28  ;;  %v4994_v2 = vmul.f32 %v8699_v37, %v12775_v10  ;;  %vm4999_vm14 = vweird.f32 %v8699_v37  ;;  %v5077_v10 = vand.u32 2147483647, %v12793_v49 }
 0x639   :  { %v1938_v50 = vpop.f32.mrf.mxu1  ;;  %8702 = vrcp.f32 %v4375_v31  ;;  %vm5000_vm3 = vmor %vm4998_vm12, %vm4999_vm14  ;;  %v5080_v21 = vor.u32 1.1754944e-38, %v5079_v5  ;;  %vm4828_vm5 = vcmp.eq.f32.partialorder %v12727_v7, inf  ;;  %vm4830_vm14 = vcmp.eq.f32.partialorder %v12727_v7, 0.0 }
 0x63a   :  { %2113 = vst.msk [vmem:[#allocation2 + $0x10] sm:$0xff] %vm385_vm1, %v1938_v50  ;;  %v1910_v45 = vpop.f32.mrf.mxu0  ;;  %v4982_v47 = vadd.f32 %v8697_v34, %v4981_v33  ;;  %v4995_v35 = vsub.f32 1.0, %v4994_v2  ;;  %8704 = vrsqrt.f32 %v12727_v7  ;;  %vm5078_vm10 = vcmp.eq.f32.partialorder %v5077_v10, 8.507059e+37 }
 0x63b   :  { %8209 = vmatpush.xpose.msk.msra.mxu3 %vm385_vm1, %v16210_v4  ;;  %2111 = vst.msk [vmem:[#allocation2] sm:$0xff] %vm385_vm1, %v1910_v45  ;;  %v8701_v41 = vpop.eup %8700  ;;  %v5005_v45 = vor.u32 1.1754944e-38, %v5004_v48  ;;  %8706 = vrsqrt.f32 %v12658_v46 }
 0x63c   :  { %v12784_v24 = vpop.xlane.xlu0 %4143  ;;  %v4986_v59 = vsel %vm4985_vm7, %v8697_v34, %v4982_v47  ;;  %v16216_v34 = vld [vmem:[#allocation93_spill] sm:$0xff]  ;;  %v4996_v50 = vmul.f32 %v8699_v37, %v4995_v35  ;;  %v5069_v14 = vmul.f32 %v8701_v41, %v12793_v49  ;;  %vm5074_vm9 = vweird.f32 %v8701_v41 }
 0x63d   :  { %8199 = vmatmul.msk.f32.gmra.mxu0 %vm385_vm1, %v16211_v58  ;;  %8202 = vmatmul.msk.f32.vlgmr.msrb.gmra.mxu1 %vm385_vm1, %v16212_v16  ;;  %v4991_v19 = vsel %vm4988_vm2, %v4990_v63, %v4986_v59  ;;  %v16219_v16 = vld [vmem:[#allocation56_spill] sm:$0xff]  ;;  %vm5075_vm6 = vmor %vm5073_vm4, %vm5074_vm9  ;;  %v16221_v63 = vld [vmem:[#allocation66_spill] sm:$0xff]  ;;  %vm4424_vm7 = vweird.f32 %v4375_v31  ;;  %vm4238_vm9 = vcmp.eq.f32.partialorder %v12658_v46, 0.0 }
 0x63e   :  { %v4992_v9 = vmul.f32 %v4991_v19, %v16215_v26  ;;  %v12821_v1 = vpop.xlane.xlu1 %4696  ;;  %v4997_v3 = vadd.f32 %v8699_v37, %v4996_v50  ;;  %v5070_v53 = vsub.f32 1.0, %v5069_v14 }
 0x63f   :  { %8206 = vmatmul.msk.f32.vlgmr.msrb.gmra.mxu2 %vm385_vm1, %v16213_v0  ;;  %v8703_v47 = vpop.eup %8702  ;;  %v16220_v0 = vld [vmem:[#allocation77_spill] sm:$0xff] }
 0x640   :  { %5247 = vrot.lane.b32.xlu1 %v4992_v9, %s9160_s28  ;;  %v5001_v4 = vsel %vm5000_vm3, %v8699_v37, %v4997_v3  ;;  %v5071_v28 = vmul.f32 %v8701_v41, %v5070_v53  ;;  %v4420_v37 = vmul.f32 %v8703_v47, %v4375_v31  ;;  %vm4425_vm8 = vweird.f32 %v8703_v47  ;;  %v8705_v2 = vpop.eup %8704  ;;  %v16223_v53 = vld [vmem:[#allocation23_spill] sm:$0xff] }
 0x641   :  { %v1940_v17 = vpop.f32.mrf.mxu1  ;;  %v5006_v58 = vsel %vm5003_vm13, %v5005_v45, %v5001_v4  ;;  %v4428_v9 = vand.u32 2147483647, %v4375_v31  ;;  %vm4426_vm11 = vmor %vm4424_vm7, %vm4425_vm8  ;;  %v4822_v50 = vmul.f32 %v8705_v2, %v12727_v7  ;;  %v8707_v14 = vpop.eup %8706  ;;  %vm4236_vm3 = vcmp.eq.f32.partialorder %v12658_v46, inf }
 0x642   :  { %2114 = vst.msk [vmem:[#allocation2 + $0x18] sm:$0xff] %vm385_vm1, %v1940_v17  ;;  %v1912_v44 = vpop.f32.mrf.mxu0  ;;  %v5072_v23 = vadd.f32 %v8701_v41, %v5071_v28  ;;  %v5007_v33 = vmul.f32 %v5006_v58, %v16219_v16  ;;  %v4421_v19 = vsub.f32 1.0, %v4420_v37  ;;  %v16226_v16 = vld [vmem:[#allocation50_spill] sm:$0xff] }
 0x643   :  { %2112 = vst.msk [vmem:[#allocation2 + $0x8] sm:$0xff] %vm385_vm1, %v1912_v44  ;;  %vm4429_vm2 = vcmp.eq.f32.partialorder %v4428_v9, 8.507059e+37  ;;  %v4823_v4 = vmul.f32 %v8705_v2, %v4822_v50 }
 0x644   :  { %v12812_v51 = vpop.xlane.xlu0 %4699  ;;  %5288 = vrot.lane.b32.xlu0 %v5007_v33, %s9160_s28  ;;  %v5076_v13 = vsel %vm5075_vm6, %v8701_v41, %v5072_v23  ;;  %v4422_v61 = vmul.f32 %v8703_v47, %v4421_v19  ;;  %v4116_v41 = vpop.permute.xlu2 %4115 }
 0x645   :  { %8203 = vmatmul.msk.f32.gmra.mxu1 %vm385_vm1, %v16214_v42  ;;  %v5081_v59 = vsel %vm5078_vm10, %v5080_v21, %v5076_v13  ;;  %v4430_v42 = vand.u32 2147483648, %v4375_v31  ;;  %v4230_v31 = vmul.f32 %v8707_v14, %v12658_v46  ;;  %v4178_v58 = vsel %vm385_vm1, %v4116_v41, 0.0 }
 0x646   :  { %8194 = vmatmul.msk.f32.vlgmr.msrb.gmra.mxu3 %vm385_vm1, %v16216_v34  ;;  %v12836_v17 = vpop.xlane.xlu1 %4708  ;;  %v5082_v44 = vmul.f32 %v5081_v59, %v16221_v63  ;;  %v4423_v34 = vadd.f32 %v8703_v47, %v4422_v61  ;;  %v4824_v10 = vmul.f32 0.5, %v4823_v4 }
 0x647   :  { %8207 = vmatmul.msk.f32.gmra.mxu2 %vm385_vm1, %v16217_v22  ;;  %v4431_v22 = vor.u32 1.1754944e-38, %v4430_v42  ;;  %v4231_v33 = vmul.f32 %v8707_v14, %v4230_v31 }
 0x648   :  { %5376 = vrot.lane.b32.xlu1 %v5082_v44, %s9160_s28  ;;  %v4427_v48 = vsel %vm4426_vm11, %v8703_v47, %v4423_v34  ;;  %v4825_v13 = vsub.f32 1.5, %v4824_v10 }
 0x649   :  { %v4432_v32 = vsel %vm4429_vm2, %v4431_v22, %v4427_v48  ;;  %v4232_v47 = vmul.f32 0.5, %v4231_v33 }
 0x64b   :  { %v4233_v44 = vsub.f32 1.5, %v4232_v47 }
 0x64c   :  { %v12829_v57 = vpop.xlane.xlu0 %4711 }
 0x64d   :  { %v4234_v9 = vmul.f32 %v8707_v14, %v4233_v44 }
 0x64e   :  { %8195 = vmatmul.msk.f32.gmra.mxu3 %vm385_vm1, %v16218_v62  ;;  %v12849_v35 = vpop.xlane.xlu1 %4167  ;;  %v4433_v62 = vmul.f32 %v4432_v32, %v16223_v53 }
 0x64f   :  { %v4235_v48 = vmul.f32 %v4234_v9, %v12658_v46 }
 0x650   :  { %v5177_v45 = vmul.f32 %v12685_v18, %v4433_v62 }
 0x651   :  { %v4237_v4 = vsel %vm4236_vm3, %v12658_v46, %v4235_v48 }
 0x652   :  { %5239 = vrot.lane.b32.xlu0 %v5177_v45, %s9160_s28 }
 0x654   :  { %v1994_v12 = vpop.f32.mrf.mxu3  ;;  %v12842_v49 = vpop.xlane.xlu0 %4170 }
 0x655   :  { %2117 = vst.msk [vmem:[#allocation2 + $0x30] sm:$0xff] %vm385_vm1, %v1994_v12  ;;  %v4826_v12 = vmul.f32 %v8705_v2, %v4825_v13  ;;  %v4831_v2 = vand.u32 2147483648, %v12727_v7 }
 0x656   :  { %8210 = vmatmul.msk.f32.vlgmr.msra.gmra.mxu3 %vm385_vm1, %v16220_v0  ;;  %v12860_v5 = vpop.xlane.xlu1 %4176 }
 0x657   :  { %v4827_v34 = vmul.f32 %v4826_v12, %v12727_v7 }
 0x659   :  { %v4829_v32 = vsel %vm4828_vm5, %v12727_v7, %v4827_v34 }
 0x65a   :  { %v4832_v62 = vsel %vm4830_vm14, %v4831_v2, %v4829_v32 }
 0x65b   :  { %v12880_v47 = vmax.f32 %v4832_v62, 1e-12 }
 0x65c   :  { %v1996_v3 = vpop.f32.mrf.mxu3  ;;  %v12856_v28 = vpop.xlane.xlu0 %4173 }
 0x65d   :  { %2118 = vst.msk [vmem:[#allocation2 + $0x38] sm:$0xff] %vm385_vm1, %v1996_v3  ;;  %4179 = vadd.xlane.f32.xlu2 %v4178_v58  ;;  %v4239_v58 = vand.u32 2147483648, %v12658_v46  ;;  %vm5058_vm11 = vweird.f32 %v12880_v47 }
 0x65e   :  { %8211 = vmatmul.msk.f32.gmra.mxu3 %vm385_vm1, %v16222_v30 }
 0x664   :  { %v12862_v0 = vpop.xlane.xlu0 %4720 }
 0x667   :  { %v4685_v23 = vpop.xlane.xlu2 %4684 }
 0x668   :  { %8708 = vrsqrt.f32 %v4685_v23  ;;  %vm4756_vm12 = vcmp.eq.f32.partialorder %v4685_v23, inf  ;;  %v4759_v3 = vand.u32 2147483648, %v4685_v23  ;;  %vm4758_vm13 = vcmp.eq.f32.partialorder %v4685_v23, 0.0 }
 0x669   :  { %8710 = vrsqrt.f32 %v12767_v8 }
 0x66a   :  { %8712 = vrsqrt.f32 %v12812_v51 }
 0x66b   :  { %v3835_v42 = vpop.permute.xlu1 %3834 }
 0x66c   :  { %3847 = vmatpush.bf16.msra.mxu1 %v3835_v42 }
 0x66e   :  { %v8709_v21 = vpop.eup %8708 }
 0x66f   :  { %v4750_v59 = vmul.f32 %v8709_v21, %v4685_v23  ;;  %v12864_v37 = vpop.xlane.xlu2 %4714  ;;  %v8711_v10 = vpop.eup %8710 }
 0x670   :  { %v8713_v7 = vpop.eup %8712  ;;  %v4290_v44 = vmul.f32 %v8711_v10, %v12767_v8 }
 0x671   :  { %v4751_v19 = vmul.f32 %v8709_v21, %v4750_v59  ;;  %v4810_v46 = vmul.f32 %v8713_v7, %v12812_v51 }
 0x672   :  { %v4291_v42 = vmul.f32 %v8711_v10, %v4290_v44 }
 0x673   :  { %v4752_v61 = vmul.f32 0.5, %v4751_v19 }
 0x674   :  { %v4292_v32 = vmul.f32 0.5, %v4291_v42 }
 0x675   :  { %v4753_v30 = vsub.f32 1.5, %v4752_v61  ;;  %3959 = vrot.lane.b32.xlu2 %v12448_v36, %s9159_s3  ;;  %v4811_v61 = vmul.f32 %v8713_v7, %v4810_v46 }
 0x677   :  { %v3860_v41 = vpop.permute.xlu0 %3859  ;;  %v4754_v22 = vmul.f32 %v8709_v21, %v4753_v30  ;;  %v12868_v50 = vpop.xlane.xlu2 %4152  ;;  %v4240_v21 = vsel %vm4238_vm9, %v4239_v58, %v4237_v4  ;;  %vm4296_vm9 = vcmp.eq.f32.partialorder %v12767_v8, inf }
 0x678   :  { %3872 = vmatpush.bf16.msra.mxu2 %v3860_v41  ;;  %v12890_v12 = vmax.f32 %v4240_v21, 1e-12  ;;  %v4293_v21 = vsub.f32 1.5, %v4292_v32 }
 0x679   :  { %v4755_v14 = vmul.f32 %v4754_v22, %v4685_v23 }
 0x67b   :  { %v4757_v31 = vsel %vm4756_vm12, %v4685_v23, %v4755_v14  ;;  %v4812_v14 = vmul.f32 0.5, %v4811_v61  ;;  %vm4454_vm12 = vweird.f32 %v12890_v12 }
 0x67c   :  { %v4760_v45 = vsel %vm4758_vm13, %v4759_v3, %v4757_v31  ;;  %vm4816_vm13 = vcmp.eq.f32.partialorder %v12812_v51, inf }
 0x67d   :  { %v4919_v33 = vmax.f32 %v4760_v45, 1e-12  ;;  %3984 = vrot.lane.b32.xlu2 %v12489_v55, %s9159_s3  ;;  %v4813_v42 = vsub.f32 1.5, %v4812_v14  ;;  %s9165_s3 = smov [#allocation6]  }
 0x67e   :  { %s8074_s18 = sshll.u32 %s9165_s3, 4  ;;  %s8075_s18 = int_to_ptr.vmem [resolvable:$true] %s8074_s18 }
 0x67f   :  { %v12882_v13 = vpop.permute.xlu0 %3909  ;;  %8714 = vrcp.f32 %v4919_v33  ;;  %v12886_v59 = vpop.xlane.xlu2 %4164  ;;  %v4974_v58 = vand.u32 2147483648, %v4919_v33  ;;  %v4972_v44 = vand.u32 2147483647, %v4919_v33  ;;  %vm4968_vm6 = vweird.f32 %v4919_v33 }
 0x680   :  { %v1966_v23 = vpop.f32.mrf.mxu2  ;;  %8716 = vrcp.f32 %v12880_v47 }
 0x681   :  { %2115 = vst.msk [vmem:[#allocation2 + $0x20] sm:$0xff] %vm385_vm1, %v1966_v23  ;;  %8718 = vrsqrt.f32 %v12753_v54  ;;  %vm4973_vm8 = vcmp.eq.f32.partialorder %v4972_v44, 8.507059e+37 }
 0x682   :  { %8720 = vrsqrt.f32 %v12799_v27 }
 0x683   :  { %8722 = vrcp.f32 %v12890_v12 }
 0x684   :  { %8724 = vrsqrt.f32 %v12735_v15 }
 0x685   :  { %v8715_v19 = vpop.eup %8714 }
 0x686   :  { %v12899_v30 = vpop.eup %8716  ;;  %v4964_v22 = vmul.f32 %v8715_v19, %v4919_v33  ;;  %vm4969_vm4 = vweird.f32 %v8715_v19  ;;  %v4294_v33 = vmul.f32 %v8711_v10, %v4293_v21  ;;  %v5062_v10 = vand.u32 2147483647, %v12880_v47 }
 0x687   :  { %v3885_v9 = vpop.permute.xlu0 %3884  ;;  %v12902_v41 = vpop.xlane.xlu2 %4155  ;;  %v5054_v62 = vmul.f32 %v12899_v30, %v12880_v47  ;;  %vm12916_vm10 = vmor %vm4968_vm6, %vm4969_vm4  ;;  %vm5059_vm7 = vweird.f32 %v12899_v30  ;;  %vm4818_vm6 = vcmp.eq.f32.partialorder %v12812_v51, 0.0 }
 0x688   :  { %v1968_v34 = vpop.f32.mrf.mxu2  ;;  %3897 = vmatpush.bf16.msrb.mxu3 %v3885_v9  ;;  %v12904_v48 = vpop.eup %8718  ;;  %v4965_v3 = vsub.f32 1.0, %v4964_v22  ;;  %vm12936_vm2 = vmor %vm5058_vm11, %vm5059_vm7  ;;  %vm5063_vm14 = vcmp.eq.f32.partialorder %v5062_v10, 8.507059e+37  ;;  %vm4888_vm7 = vcmp.eq.f32.partialorder %v12799_v27, inf  ;;  %vm4286_vm11 = vcmp.eq.f32.partialorder %v12753_v54, 0.0 }
 0x689   :  { %2116 = vst.msk [vmem:[#allocation2 + $0x28] sm:$0xff] %vm385_vm1, %v1968_v34  ;;  %v12906_v2 = vpop.eup %8720  ;;  %v4278_v4 = vmul.f32 %v12904_v48, %v12753_v54  ;;  %v5055_v46 = vsub.f32 1.0, %v5054_v62  ;;  %v4975_v62 = vor.u32 1.1754944e-38, %v4974_v58 }
 0x68a   :  { %v12910_v31 = vpop.eup %8722  ;;  %v4966_v45 = vmul.f32 %v8715_v19, %v4965_v3  ;;  %v4882_v23 = vmul.f32 %v12906_v2, %v12799_v27 }
 0x68b   :  { %v5056_v22 = vmul.f32 %v12899_v30, %v5055_v46  ;;  %v4450_v3 = vmul.f32 %v12910_v31, %v12890_v12  ;;  %v4279_v32 = vmul.f32 %v12904_v48, %v4278_v4  ;;  %v4814_v46 = vmul.f32 %v8713_v7, %v4813_v42 }
 0x68c   :  { %v4967_v61 = vadd.f32 %v8715_v19, %v4966_v45  ;;  %v4883_v45 = vmul.f32 %v12906_v2, %v4882_v23  ;;  %v5064_v4 = vand.u32 2147483648, %v12880_v47  ;;  %v4295_v7 = vmul.f32 %v4294_v33, %v12767_v8 }
 0x68d   :  { %v5057_v55 = vadd.f32 %v12899_v30, %v5056_v22  ;;  %v4280_v58 = vmul.f32 0.5, %v4279_v32  ;;  %vm4455_vm5 = vweird.f32 %v12910_v31  ;;  %v4815_v47 = vmul.f32 %v4814_v46, %v12812_v51 }
 0x68e   :  { %v4971_v14 = vsel %vm12916_vm10, %v8715_v19, %v4967_v61  ;;  %v4451_v19 = vsub.f32 1.0, %v4450_v3  ;;  %v4884_v44 = vmul.f32 0.5, %v4883_v45  ;;  %v5065_v42 = vor.u32 1.1754944e-38, %v5064_v4  ;;  %vm12952_vm3 = vmor %vm4454_vm12, %vm4455_vm5  ;;  %v16231_v4 = vld [vmem:[#allocation63_spill] sm:$0xff] }
 0x68f   :  { %v3935_v9 = vpop.permute.xlu0 %3934  ;;  %v12924_v63 = vpop.xlane.xlu2 %4723  ;;  %v4460_v61 = vand.u32 2147483648, %v12890_v12  ;;  %v4297_v46 = vsel %vm4296_vm9, %v12767_v8, %v4295_v7  ;;  %vm4298_vm10 = vcmp.eq.f32.partialorder %v12767_v8, 0.0 }
 0x690   :  { %3947 = vmatpush.bf16.msrb.mxu1 %v3935_v9  ;;  %v4976_v9 = vsel %vm4973_vm8, %v4975_v62, %v4971_v14  ;;  %v4452_v23 = vmul.f32 %v12910_v31, %v4451_v19  ;;  %v4885_v33 = vsub.f32 1.5, %v4884_v44  ;;  %vm4284_vm8 = vcmp.eq.f32.partialorder %v12753_v54, inf }
 0x691   :  { %v4977_v26 = vmul.f32 %v4976_v9, %v16226_v16  ;;  %v4461_v45 = vor.u32 1.1754944e-38, %v4460_v61  ;;  %v4819_v9 = vand.u32 2147483648, %v12812_v51 }
 0x692   :  { %v2022_v25 = vpop.f32.mrf.mxu0  ;;  %v4453_v34 = vadd.f32 %v12910_v31, %v4452_v23  ;;  %v4886_v7 = vmul.f32 %v12906_v2, %v4885_v33  ;;  %v16232_v23 = vld [vmem:[#allocation11_spill] sm:$0xff] }
 0x693   :  { %2119 = vst.msk [vmem:[#allocation2 + $0x40] sm:$0xff] %vm385_vm1, %v2022_v25  ;;  %5245 = vrot.lane.b32.xlu1 %v4977_v26, %s9160_s28  ;;  %v5061_v25 = vsel %vm12936_vm2, %v12899_v30, %v5057_v55  ;;  %v4458_v26 = vand.u32 2147483647, %v12890_v12  ;;  %v4281_v30 = vsub.f32 1.5, %v4280_v58  ;;  %v4817_v12 = vsel %vm4816_vm13, %v12812_v51, %v4815_v47 }
 0x694   :  { %v5066_v3 = vsel %vm5063_vm14, %v5065_v42, %v5061_v25  ;;  %v4457_v62 = vsel %vm12952_vm3, %v12910_v31, %v4453_v34  ;;  %v4299_v31 = vand.u32 2147483648, %v12767_v8  ;;  %v12978_v25 = vld [vmem:[%s15681_s8 + $0x10] sm:$0xff]  ;;  %v4887_v61 = vmul.f32 %v4886_v7, %v12799_v27 }
 0x695   :  { %v5067_v10 = vmul.f32 %v5066_v3, %v16231_v4  ;;  %vm4459_vm4 = vcmp.eq.f32.partialorder %v4458_v26, 8.507059e+37  ;;  %v4282_v58 = vmul.f32 %v12904_v48, %v4281_v30  ;;  %v12996_v3 = vpop.eup %8724  ;;  %v4287_v30 = vand.u32 2147483648, %v12753_v54 }
 0x696   :  { %v4462_v19 = vsel %vm4459_vm4, %v4461_v45, %v4457_v62  ;;  %v4300_v21 = vsel %vm4298_vm10, %v4299_v31, %v4297_v46  ;;  %v13010_v62 = vld [vmem:[%s15681_s8 + $0x18] sm:$0xff]  ;;  %v4242_v33 = vmul.f32 %v12996_v3, %v12735_v15  ;;  %vm4890_vm2 = vcmp.eq.f32.partialorder %v12799_v27, 0.0 }
 0x697   :  { %v3810_v22 = vpop.permute.xlu2 %3809  ;;  %v4463_v51 = vmul.f32 %v4462_v19, %v16232_v23  ;;  %v4283_v48 = vmul.f32 %v4282_v58, %v12753_v54  ;;  %v12984_v8 = vmax.f32 %v4300_v21, 1e-12 }
 0x698   :  { %3822 = vmatpush.bf16.msrb.mxu0 %v3810_v22  ;;  %v4243_v19 = vmul.f32 %v12996_v3, %v4242_v33 }
 0x699   :  { %v5179_v34 = vmul.f32 %v12685_v18, %v4463_v51  ;;  %v4285_v55 = vsel %vm4284_vm8, %v12753_v54, %v4283_v48  ;;  %vm4529_vm13 = vweird.f32 %v12984_v8 }
 0x69a   :  { %v2024_v32 = vpop.f32.mrf.mxu0  ;;  %v2050_v14 = vpop.f32.mrf.mxu1 }
 0x69b   :  { %2120 = vst.msk [vmem:[#allocation2 + $0x48] sm:$0xff] %vm385_vm1, %v2024_v32  ;;  %5374 = vrot.lane.b32.xlu1 %v5067_v10, %s9160_s28  ;;  %v4889_v32 = vsel %vm4888_vm7, %v12799_v27, %v4887_v61 }
 0x69c   :  { %3922 = vmatpush.bf16.msra.mxu0 %v12882_v13  ;;  %2121 = vst.msk [vmem:[#allocation2 + $0x50] sm:$0xff] %vm385_vm1, %v2050_v14  ;;  %v4820_v13 = vsel %vm4818_vm6, %v4819_v9, %v4817_v12  ;;  %v4891_v14 = vand.u32 2147483648, %v12799_v27  ;;  %v4288_v12 = vsel %vm4286_vm11, %v4287_v30, %v4285_v55  ;;  %v4535_v30 = vand.u32 2147483648, %v12984_v8 }
 0x69d   :  { %v12981_v44 = vmax.f32 %v4820_v13, 1e-12  ;;  %v13019_v31 = vmax.f32 %v4288_v12, 1e-12  ;;  %vm4248_vm11 = vcmp.eq.f32.partialorder %v12735_v15, inf }
 0x69e   :  { %v4892_v45 = vsel %vm4890_vm2, %v4891_v14, %v4889_v32  ;;  %v4533_v14 = vand.u32 2147483647, %v12984_v8 }
 0x69f   :  { %8726 = vrcp.f32 %v12981_v44  ;;  %v13022_v58 = vmax.f32 %v4892_v45, 1e-12  ;;  %vm5043_vm12 = vweird.f32 %v12981_v44  ;;  %vm4514_vm8 = vweird.f32 %v13019_v31 }
 0x6a0   :  { %8728 = vrcp.f32 %v12984_v8  ;;  %vm4534_vm6 = vcmp.eq.f32.partialorder %v4533_v14, 8.507059e+37 }
 0x6a1   :  { %8730 = vrsqrt.f32 %v12784_v24 }
 0x6a2   :  { %v2052_v47 = vpop.f32.mrf.mxu1  ;;  %v3305_v42 = vpop.f32.mrf.mxu0  ;;  %8732 = vrcp.f32 %v13019_v31 }
 0x6a3   :  { %2122 = vst.msk [vmem:[#allocation2 + $0x58] sm:$0xff] %vm385_vm1, %v2052_v47  ;;  %v12989_v2 = vadd.f32 %v12978_v25, %v3305_v42  ;;  %v2078_v22 = vpop.f32.mrf.mxu2  ;;  %5282 = vrot.lane.b32.xlu1 %v5179_v34, %s9160_s28  ;;  %v4244_v47 = vmul.f32 0.5, %v4243_v19  ;;  %8734 = vrcp.f32 %v13022_v58  ;;  %v5049_v42 = vand.u32 2147483648, %v12981_v44 }
 0x6a4   :  { %2123 = vst.msk [vmem:[#allocation2 + $0x60] sm:$0xff] %vm385_vm1, %v2078_v22  ;;  %v5047_v22 = vand.u32 2147483647, %v12981_v44  ;;  %8736 = vrsqrt.f32 %v12864_v37 }
 0x6a5   :  { %v3612_v26 = vsel %vm1694_vm15, %v12989_v2, -inf  ;;  %v8727_v9 = vpop.eup %8726  ;;  %v5050_v33 = vor.u32 1.1754944e-38, %v5049_v42 }
 0x6a6   :  { %3613 = vmax.xlane.f32.xlu0 %v3612_v26  ;;  %v8729_v10 = vpop.eup %8728  ;;  %v5039_v27 = vmul.f32 %v8727_v9, %v12981_v44  ;;  %vm5044_vm5 = vweird.f32 %v8727_v9  ;;  %vm5048_vm9 = vcmp.eq.f32.partialorder %v5047_v22, 8.507059e+37  ;;  %v16233_v44 = vld [vmem:[#allocation62_spill] sm:$0xff] }
 0x6a7   :  { %v13028_v7 = vpop.eup %8730  ;;  %v4525_v51 = vmul.f32 %v8729_v10, %v12984_v8  ;;  %vm4530_vm14 = vweird.f32 %v8729_v10  ;;  %vm5045_vm3 = vmor %vm5043_vm12, %vm5044_vm5  ;;  %vm4250_vm5 = vcmp.eq.f32.partialorder %v12735_v15, 0.0  ;;  %vm5133_vm12 = vweird.f32 %v13022_v58 }
 0x6a8   :  { %v5040_v48 = vsub.f32 1.0, %v5039_v27  ;;  %v4218_v34 = vmul.f32 %v13028_v7, %v12784_v24  ;;  %v8733_v45 = vpop.eup %8732  ;;  %vm4531_vm4 = vmor %vm4529_vm13, %vm4530_vm14  ;;  %vm4224_vm13 = vcmp.eq.f32.partialorder %v12784_v24, inf }
 0x6a9   :  { %v4526_v61 = vsub.f32 1.0, %v4525_v51  ;;  %v4510_v42 = vmul.f32 %v8733_v45, %v13019_v31  ;;  %vm4515_vm10 = vweird.f32 %v8733_v45 }
 0x6aa   :  { %v3308_v46 = vpop.f32.mrf.mxu0  ;;  %v5041_v26 = vmul.f32 %v8727_v9, %v5040_v48  ;;  %v4219_v19 = vmul.f32 %v13028_v7, %v4218_v34  ;;  %v4536_v48 = vor.u32 1.1754944e-38, %v4535_v30  ;;  %v4520_v30 = vand.u32 2147483648, %v13019_v31  ;;  %vm4516_vm7 = vmor %vm4514_vm8, %vm4515_vm10 }
 0x6ab   :  { %v13017_v54 = vadd.f32 %v13010_v62, %v3308_v46  ;;  %v2080_v13 = vpop.f32.mrf.mxu2  ;;  %v4527_v55 = vmul.f32 %v8729_v10, %v4526_v61  ;;  %v4245_v46 = vsub.f32 1.5, %v4244_v47  ;;  %v4511_v34 = vsub.f32 1.0, %v4510_v42 }
 0x6ac   :  { %2124 = vst.msk [vmem:[#allocation2 + $0x68] sm:$0xff] %vm385_vm1, %v2080_v13  ;;  %v5042_v32 = vadd.f32 %v8727_v9, %v5041_v26  ;;  %vm4878_vm10 = vcmp.eq.f32.partialorder %v12864_v37, 0.0 }
 0x6ad   :  { %v3615_v21 = vsel %vm1694_vm15, %v13017_v54, -inf  ;;  %v4528_v12 = vadd.f32 %v8729_v10, %v4527_v55  ;;  %v4246_v8 = vmul.f32 %v12996_v3, %v4245_v46  ;;  %v4220_v55 = vmul.f32 0.5, %v4219_v19 }
 0x6ae   :  { %3616 = vmax.xlane.f32.xlu2 %v3615_v21  ;;  %v5046_v13 = vsel %vm5045_vm3, %v8727_v9, %v5042_v32  ;;  %v13042_v21 = vpop.eup %8734  ;;  %v4512_v32 = vmul.f32 %v8733_v45, %v4511_v34  ;;  %v4518_v3 = vand.u32 2147483647, %v13019_v31  ;;  %v4251_v31 = vand.u32 2147483648, %v12735_v15 }
 0x6af   :  { %v5051_v27 = vsel %vm5048_vm9, %v5050_v33, %v5046_v13  ;;  %v4532_v51 = vsel %vm4531_vm4, %v8729_v10, %v4528_v12  ;;  %v5129_v9 = vmul.f32 %v13042_v21, %v13022_v58  ;;  %v16234_v10 = vld [vmem:[#allocation27_spill] sm:$0xff]  ;;  %v4247_v33 = vmul.f32 %v4246_v8, %v12735_v15 }
 0x6b0   :  { %v5052_v61 = vmul.f32 %v5051_v27, %v16233_v44  ;;  %v4537_v26 = vsel %vm4534_vm6, %v4536_v48, %v4532_v51  ;;  %v4221_v12 = vsub.f32 1.5, %v4220_v55  ;;  %v4513_v46 = vadd.f32 %v8733_v45, %v4512_v32  ;;  %v8737_v48 = vpop.eup %8736  ;;  %v16235_v55 = vld [vmem:[#allocation15_spill] sm:$0xff] }
 0x6b1   :  { %v4538_v22 = vmul.f32 %v4537_v26, %v16234_v10  ;;  %v5130_v14 = vsub.f32 1.0, %v5129_v9  ;;  %v4521_v13 = vor.u32 1.1754944e-38, %v4520_v30  ;;  %vm4519_vm2 = vcmp.eq.f32.partialorder %v4518_v3, 8.507059e+37 }
 0x6b2   :  { %v4517_v27 = vsel %vm4516_vm7, %v8733_v45, %v4513_v46  ;;  %v4222_v26 = vmul.f32 %v13028_v7, %v4221_v12  ;;  %v4870_v9 = vmul.f32 %v8737_v48, %v12864_v37  ;;  %vm5134_vm14 = vweird.f32 %v13042_v21 }
 0x6b3   :  { %v5184_v19 = vmul.f32 %v12685_v18, %v4538_v22  ;;  %v5131_v51 = vmul.f32 %v13042_v21, %v5130_v14  ;;  %v4522_v8 = vsel %vm4519_vm2, %v4521_v13, %v4517_v27  ;;  %v5139_v22 = vand.u32 2147483648, %v13022_v58  ;;  %vm5135_vm3 = vmor %vm5133_vm12, %vm5134_vm14 }
 0x6b4   :  { %v4223_v7 = vmul.f32 %v4222_v26, %v12784_v24  ;;  %v5137_v32 = vand.u32 2147483647, %v13022_v58  ;;  %v4871_v14 = vmul.f32 %v8737_v48, %v4870_v9  ;;  %vm4226_vm4 = vcmp.eq.f32.partialorder %v12784_v24, 0.0 }
 0x6b5   :  { %v5132_v34 = vadd.f32 %v13042_v21, %v5131_v51  ;;  %v5140_v46 = vor.u32 1.1754944e-38, %v5139_v22  ;;  %vm4876_vm6 = vcmp.eq.f32.partialorder %v12864_v37, inf }
 0x6b6   :  { %v4225_v12 = vsel %vm4224_vm13, %v12784_v24, %v4223_v7  ;;  %vm5138_vm9 = vcmp.eq.f32.partialorder %v5137_v32, 8.507059e+37  ;;  %v4872_v51 = vmul.f32 0.5, %v4871_v14 }
 0x6b9   :  { %v2106_v47 = vpop.f32.mrf.mxu3 }
 0x6ba   :  { %5333 = vrot.lane.b32.xlu0 %v5052_v61, %s9160_s28  ;;  %2125 = vst.msk [vmem:[#allocation2 + $0x70] sm:$0xff] %vm385_vm1, %v2106_v47  ;;  %v4249_v61 = vsel %vm4248_vm11, %v12735_v15, %v4247_v33  ;;  %v4523_v47 = vmul.f32 %v4522_v8, %v16235_v55  ;;  %v3348_v15 = vpop.f32.mrf.mxu1  ;;  %v5136_v33 = vsel %vm5135_vm3, %v13042_v21, %v5132_v34  ;;  %v3477_v8 = vpop.f32.mrf.mxu0  ;;  %vm4864_vm3 = vcmp.eq.f32.partialorder %v12829_v57, inf }
 0x6bb   :  { %v4252_v45 = vsel %vm4250_vm5, %v4251_v31, %v4249_v61  ;;  %v13083_v13 = vadd.f32 %v12978_v25, %v3348_v15  ;;  %v5141_v58 = vsel %vm5138_vm9, %v5140_v46, %v5136_v33  ;;  %v16236_v61 = vld [vmem:[#allocation82_spill] sm:$0xff]  ;;  %v4873_v31 = vsub.f32 1.5, %v4872_v51 }
 0x6bc   :  { %v5183_v30 = vmul.f32 %v12685_v18, %v4523_v47  ;;  %v13075_v3 = vmax.f32 %v4252_v45, 1e-12  ;;  %v5142_v21 = vmul.f32 %v5141_v58, %v16236_v61  ;;  %v4879_v58 = vand.u32 2147483648, %v12864_v37 }
 0x6bd   :  { %v3618_v26 = vsel %vm1694_vm15, %v13083_v13, -inf  ;;  %v4874_v9 = vmul.f32 %v8737_v48, %v4873_v31  ;;  %vm4866_vm9 = vcmp.eq.f32.partialorder %v12829_v57, 0.0 }
 0x6be   :  { %8738 = vrcp.f32 %v13075_v3  ;;  %vm4469_vm7 = vweird.f32 %v13075_v3 }
 0x6bf   :  { %8740 = vrsqrt.f32 %v12829_v57 }
 0x6c1   :  { %v2108_v42 = vpop.f32.mrf.mxu3 }
 0x6c2   :  { %5370 = vrot.lane.b32.xlu0 %v5184_v19, %s9160_s28  ;;  %2126 = vst.msk [vmem:[#allocation2 + $0x78] sm:$0xff] %vm385_vm1, %v2108_v42  ;;  %v4227_v19 = vand.u32 2147483648, %v12784_v24  ;;  %v13095_v24 = vadd.f32 %v12978_v25, %v3477_v8  ;;  %v4475_v8 = vand.u32 2147483648, %v13075_v3 }
 0x6c4   :  { %v4228_v27 = vsel %vm4226_vm4, %v4227_v19, %v4225_v12  ;;  %v8739_v47 = vpop.eup %8738  ;;  %v3636_v22 = vsel %vm1694_vm15, %v13095_v24, -inf }
 0x6c5   :  { %v13091_v42 = vmax.f32 %v4228_v27, 1e-12  ;;  %v8741_v45 = vpop.eup %8740  ;;  %v4465_v34 = vmul.f32 %v8739_v47, %v13075_v3  ;;  %vm4470_vm8 = vweird.f32 %v8739_v47 }
 0x6c6   :  { %5368 = vrot.lane.b32.xlu2 %v5183_v30, %s9160_s28  ;;  %v4858_v7 = vmul.f32 %v8741_v45, %v12829_v57  ;;  %v4875_v30 = vmul.f32 %v4874_v9, %v12864_v37  ;;  %vm4471_vm11 = vmor %vm4469_vm7, %vm4470_vm8 }
 0x6c7   :  { %8742 = vrcp.f32 %v13091_v42  ;;  %v4466_v32 = vsub.f32 1.0, %v4465_v34  ;;  %v4473_v34 = vand.u32 2147483647, %v13075_v3  ;;  %v4445_v3 = vand.u32 2147483648, %v13091_v42 }
 0x6c8   :  { %v4859_v14 = vmul.f32 %v8741_v45, %v4858_v7  ;;  %v4877_v12 = vsel %vm4876_vm6, %v12864_v37, %v4875_v30  ;;  %v3351_v7 = vpop.f32.mrf.mxu1  ;;  %vm4439_vm14 = vweird.f32 %v13091_v42 }
 0x6c9   :  { %v4467_v48 = vmul.f32 %v8739_v47, %v4466_v32  ;;  %v4880_v27 = vsel %vm4878_vm10, %v4879_v58, %v4877_v12  ;;  %v4476_v32 = vor.u32 1.1754944e-38, %v4475_v8  ;;  %vm4474_vm2 = vcmp.eq.f32.partialorder %v4473_v34, 8.507059e+37  ;;  %v16237_v58 = vld [vmem:[#allocation20_spill] sm:$0xff] }
 0x6ca   :  { %v4860_v19 = vmul.f32 0.5, %v4859_v14  ;;  %v13111_v31 = vmax.f32 %v4880_v27, 1e-12  ;;  %v13117_v14 = vadd.f32 %v13010_v62, %v3351_v7  ;;  %v4443_v27 = vand.u32 2147483647, %v13091_v42 }
 0x6cb   :  { %v4468_v51 = vadd.f32 %v8739_v47, %v4467_v48  ;;  %v4446_v8 = vor.u32 1.1754944e-38, %v4445_v3 }
 0x6cc   :  { %8744 = vrcp.f32 %v13111_v31  ;;  %vm4444_vm13 = vcmp.eq.f32.partialorder %v4443_v27, 8.507059e+37  ;;  %v3391_v27 = vpop.f32.mrf.mxu2  ;;  %vm5118_vm6 = vweird.f32 %v13111_v31 }
 0x6cd   :  { %3619 = vmax.xlane.f32.xlu1 %v3618_v26  ;;  %v8743_v15 = vpop.eup %8742  ;;  %v4861_v26 = vsub.f32 1.5, %v4860_v19  ;;  %8746 = vrsqrt.f32 %v12821_v1 }
 0x6ce   :  { %5462 = vrot.lane.b32.xlu2 %v5142_v21, %s9160_s28  ;;  %v4435_v46 = vmul.f32 %v8743_v15, %v13091_v42  ;;  %vm4440_vm5 = vweird.f32 %v8743_v15 }
 0x6cf   :  { %v4862_v37 = vmul.f32 %v8741_v45, %v4861_v26  ;;  %vm4441_vm12 = vmor %vm4439_vm14, %vm4440_vm5  ;;  %vm4804_vm14 = vcmp.eq.f32.partialorder %v12821_v1, inf }
 0x6d0   :  { %v13103_v33 = vpop.xlane.xlu2 %4179  ;;  %v4436_v21 = vsub.f32 1.0, %v4435_v46 }
 0x6d1   :  { %v4863_v46 = vmul.f32 %v4862_v37, %v12829_v57  ;;  %v3520_v37 = vpop.f32.mrf.mxu1 }
 0x6d2   :  { %v4437_v30 = vmul.f32 %v8743_v15, %v4436_v21  ;;  %v8745_v21 = vpop.eup %8744 }
 0x6d3   :  { %vm5119_vm4 = vweird.f32 %v8745_v21 }
 0x6d4   :  { %v4438_v48 = vadd.f32 %v8743_v15, %v4437_v30  ;;  %v5114_v30 = vmul.f32 %v8745_v21, %v13111_v31  ;;  %vm5120_vm10 = vmor %vm5118_vm6, %vm5119_vm4  ;;  %vm4334_vm4 = vcmp.eq.f32.partialorder %v12842_v49, 0.0  ;;  %vm4272_vm6 = vcmp.eq.f32.partialorder %v12902_v41, inf }
 0x6d5   :  { %3637 = vmax.xlane.f32.xlu1 %v3636_v22  ;;  %v4472_v22 = vsel %vm4471_vm11, %v8739_v47, %v4468_v51  ;;  %v3621_v47 = vsel %vm1694_vm15, %v13117_v14, -inf  ;;  %v3480_v51 = vpop.f32.mrf.mxu0 }
 0x6d6   :  { %v4477_v12 = vsel %vm4474_vm2, %v4476_v32, %v4472_v22  ;;  %v4442_v26 = vsel %vm4441_vm12, %v8743_v15, %v4438_v48  ;;  %v13129_v34 = vadd.f32 %v13010_v62, %v3480_v51  ;;  %v4867_v22 = vand.u32 2147483648, %v12829_v57  ;;  %v8747_v51 = vpop.eup %8746 }
 0x6d7   :  { %v4478_v45 = vmul.f32 %v4477_v12, %v16237_v58  ;;  %v4447_v42 = vsel %vm4444_vm13, %v4446_v8, %v4442_v26  ;;  %v16238_v12 = vld [vmem:[#allocation35_spill] sm:$0xff]  ;;  %v13152_v8 = vadd.f32 %v12978_v25, %v3391_v27  ;;  %vm4806_vm12 = vcmp.eq.f32.partialorder %v12821_v1, 0.0 }
 0x6d8   :  { %v3960_v9 = vpop.permute.xlu2 %3959  ;;  %v3639_v32 = vsel %vm1694_vm15, %v13129_v34, -inf  ;;  %v4448_v48 = vmul.f32 %v4447_v42, %v16238_v12  ;;  %v4798_v42 = vmul.f32 %v8747_v51, %v12821_v1  ;;  %vm4332_vm13 = vcmp.eq.f32.partialorder %v12842_v49, inf }
 0x6d9   :  { %3972 = vmatpush.bf16.msrb.mxu2 %v3960_v9  ;;  %v4865_v9 = vsel %vm4864_vm3, %v12829_v57, %v4863_v46  ;;  %v5180_v7 = vmul.f32 %v12685_v18, %v4478_v45  ;;  %v5115_v46 = vsub.f32 1.0, %v5114_v30  ;;  %vm4260_vm3 = vcmp.eq.f32.partialorder %v12868_v50, inf }
 0x6da   :  { %v4868_v15 = vsel %vm4866_vm9, %v4867_v22, %v4865_v9  ;;  %v5178_v57 = vmul.f32 %v12685_v18, %v4448_v48  ;;  %v5124_v9 = vand.u32 2147483648, %v13111_v31  ;;  %vm4262_vm9 = vcmp.eq.f32.partialorder %v12868_v50, 0.0 }
 0x6db   :  { %v13139_v3 = vmax.f32 %v4868_v15, 1e-12  ;;  %v3624_v15 = vsel %vm1694_vm15, %v13152_v8, -inf }
 0x6dd   :  { %8748 = vrcp.f32 %v13139_v3  ;;  %vm5103_vm11 = vweird.f32 %v13139_v3 }
 0x6de   :  { %8750 = vrsqrt.f32 %v12868_v50 }
 0x6df   :  { %8752 = vrsqrt.f32 %v12842_v49 }
 0x6e0   :  { %v3985_v19 = vpop.permute.xlu2 %3984  ;;  %8754 = vrsqrt.f32 %v12902_v41 }
 0x6e1   :  { %3997 = vmatpush.bf16.msra.mxu3 %v3985_v19  ;;  %v13142_v19 = vadd.f32 %v12978_v25, %v3520_v37  ;;  %v5125_v37 = vor.u32 1.1754944e-38, %v5124_v9  ;;  %8756 = vrsqrt.f32 %v12856_v28 }
 0x6e2   :  { %8758 = vrsqrt.f32 %v12836_v17 }
 0x6e3   :  { %v3642_v45 = vsel %vm1694_vm15, %v13142_v19, -inf  ;;  %v8749_v22 = vpop.eup %8748  ;;  %8760 = vrsqrt.f32 %v12886_v59 }
 0x6e4   :  { %v5099_v48 = vmul.f32 %v8749_v22, %v13139_v3  ;;  %vm5104_vm7 = vweird.f32 %v8749_v22 }
 0x6e5   :  { %vm5105_vm2 = vmor %vm5103_vm11, %vm5104_vm7  ;;  %vm4346_vm7 = vcmp.eq.f32.partialorder %v12856_v28, 0.0  ;;  %vm4852_vm11 = vcmp.eq.f32.partialorder %v12836_v17, inf }
 0x6e6   :  { %v5100_v27 = vsub.f32 1.0, %v5099_v48 }
 0x6e8   :  { %v5101_v61 = vmul.f32 %v8749_v22, %v5100_v27 }
 0x6ea   :  { %v5102_v44 = vadd.f32 %v8749_v22, %v5101_v61 }
 0x6ec   :  { %3622 = vmax.xlane.f32.xlu0 %v3621_v47  ;;  %v5116_v47 = vmul.f32 %v8745_v21, %v5115_v46  ;;  %v4799_v46 = vmul.f32 %v8747_v51, %v4798_v42  ;;  %v5106_v27 = vsel %vm5105_vm2, %v8749_v22, %v5102_v44  ;;  %v4807_v44 = vand.u32 2147483648, %v12821_v1  ;;  %v16240_v22 = vld [vmem:[#allocation70_spill] sm:$0xff] }
 0x6ed   :  { %vm4854_vm2 = vcmp.eq.f32.partialorder %v12836_v17, 0.0 }
 0x6ee   :  { %5284 = vrot.lane.b32.xlu1 %v5180_v7, %s9160_s28  ;;  %v5117_v26 = vadd.f32 %v8745_v21, %v5116_v47  ;;  %v5122_v7 = vand.u32 2147483647, %v13111_v31 }
 0x6f0   :  { %v5121_v30 = vsel %vm5120_vm10, %v8745_v21, %v5117_v26  ;;  %vm5123_vm8 = vcmp.eq.f32.partialorder %v5122_v7, 8.507059e+37  ;;  %v4800_v26 = vmul.f32 0.5, %v4799_v46  ;;  %v5109_v46 = vand.u32 2147483648, %v13139_v3 }
 0x6f1   :  { %vm4344_vm10 = vcmp.eq.f32.partialorder %v12856_v28, inf }
 0x6f2   :  { %v4801_v42 = vsub.f32 1.5, %v4800_v26 }
 0x6f4   :  { %3640 = vmax.xlane.f32.xlu0 %v3639_v32  ;;  %v8751_v32 = vpop.eup %8750  ;;  %v4802_v10 = vmul.f32 %v8747_v51, %v4801_v42  ;;  %v5110_v51 = vor.u32 1.1754944e-38, %v5109_v46 }
 0x6f5   :  { %v8753_v47 = vpop.eup %8752  ;;  %v4254_v31 = vmul.f32 %v8751_v32, %v12868_v50 }
 0x6f6   :  { %5241 = vrot.lane.b32.xlu1 %v5178_v57, %s9160_s28  ;;  %v5126_v57 = vsel %vm5123_vm8, %v5125_v37, %v5121_v30  ;;  %v4326_v9 = vmul.f32 %v8753_v47, %v12842_v49  ;;  %v4803_v26 = vmul.f32 %v4802_v10, %v12821_v1  ;;  %vm4274_vm8 = vcmp.eq.f32.partialorder %v12902_v41, 0.0 }
 0x6f7   :  { %3643 = vmax.xlane.f32.xlu2 %v3642_v45  ;;  %v16239_v45 = vld [vmem:[#allocation78_spill] sm:$0xff]  ;;  %v4255_v7 = vmul.f32 %v8751_v32, %v4254_v31 }
 0x6f8   :  { %v5127_v21 = vmul.f32 %v5126_v57, %v16239_v45  ;;  %v4327_v30 = vmul.f32 %v8753_v47, %v4326_v9  ;;  %v5107_v57 = vand.u32 2147483647, %v13139_v3  ;;  %v4805_v45 = vsel %vm4804_vm14, %v12821_v1, %v4803_v26 }
 0x6f9   :  { %v4256_v55 = vmul.f32 0.5, %v4255_v7 }
 0x6fa   :  { %v4328_v23 = vmul.f32 0.5, %v4327_v30  ;;  %vm5108_vm5 = vcmp.eq.f32.partialorder %v5107_v57, 8.507059e+37 }
 0x6fb   :  { %v4257_v31 = vsub.f32 1.5, %v4256_v55  ;;  %v5111_v30 = vsel %vm5108_vm5, %v5110_v51, %v5106_v27  ;;  %vm4308_vm5 = vcmp.eq.f32.partialorder %v12886_v59, inf }
 0x6fc   :  { %v4329_v61 = vsub.f32 1.5, %v4328_v23  ;;  %v5112_v10 = vmul.f32 %v5111_v30, %v16240_v22  ;;  %v4335_v30 = vand.u32 2147483648, %v12842_v49 }
 0x6fd   :  { %v4258_v7 = vmul.f32 %v8751_v32, %v4257_v31 }
 0x6fe   :  { %v4330_v55 = vmul.f32 %v8753_v47, %v4329_v61 }
 0x6ff   :  { %3625 = vmax.xlane.f32.xlu2 %v3624_v15  ;;  %v8755_v15 = vpop.eup %8754  ;;  %v4259_v23 = vmul.f32 %v4258_v7, %v12868_v50 }
 0x700   :  { %v8757_v37 = vpop.eup %8756  ;;  %v4266_v4 = vmul.f32 %v8755_v15, %v12902_v41  ;;  %v4331_v57 = vmul.f32 %v4330_v55, %v12842_v49 }
 0x701   :  { %v4338_v48 = vmul.f32 %v8757_v37, %v12856_v28  ;;  %v8759_v3 = vpop.eup %8758  ;;  %v4261_v26 = vsel %vm4260_vm3, %v12868_v50, %v4259_v23 }
 0x702   :  { %v4846_v46 = vmul.f32 %v8759_v3, %v12836_v17  ;;  %v8761_v47 = vpop.eup %8760  ;;  %v4333_v51 = vsel %vm4332_vm13, %v12842_v49, %v4331_v57  ;;  %v4275_v57 = vand.u32 2147483648, %v12902_v41  ;;  %vm4310_vm13 = vcmp.eq.f32.partialorder %v12886_v59, 0.0 }
 0x703   :  { %v4339_v9 = vmul.f32 %v8757_v37, %v4338_v48  ;;  %v4808_v48 = vsel %vm4806_vm12, %v4807_v44, %v4805_v45  ;;  %v4263_v45 = vand.u32 2147483648, %v12868_v50  ;;  %v4336_v44 = vsel %vm4334_vm4, %v4335_v30, %v4333_v51  ;;  %v3434_v30 = vpop.f32.mrf.mxu3 }
 0x704   :  { %v13186_v27 = vmax.f32 %v4808_v48, 1e-12  ;;  %v4847_v61 = vmul.f32 %v8759_v3, %v4846_v46  ;;  %v13207_v48 = vmax.f32 %v4336_v44, 1e-12 }
 0x705   :  { %v4264_v55 = vsel %vm4262_vm9, %v4263_v45, %v4261_v26  ;;  %v4347_v45 = vand.u32 2147483648, %v12856_v28 }
 0x706   :  { %8762 = vrcp.f32 %v13186_v27  ;;  %v13204_v23 = vmax.f32 %v4264_v55, 1e-12  ;;  %vm5028_vm12 = vweird.f32 %v13186_v27 }
 0x707   :  { %8764 = vrsqrt.f32 %v12860_v5 }
 0x708   :  { %5460 = vrot.lane.b32.xlu0 %v5127_v21, %s9160_s28  ;;  %v4267_v21 = vmul.f32 %v8755_v15, %v4266_v4  ;;  %v4340_v4 = vmul.f32 0.5, %v4339_v9  ;;  %8766 = vrsqrt.f32 %v12924_v63 }
 0x709   :  { %8768 = vrcp.f32 %v13204_v23 }
 0x70a   :  { %v4268_v42 = vmul.f32 0.5, %v4267_v21  ;;  %v4341_v31 = vsub.f32 1.5, %v4340_v4  ;;  %v3523_v21 = vpop.f32.mrf.mxu1  ;;  %v4848_v4 = vmul.f32 0.5, %v4847_v61  ;;  %8770 = vrcp.f32 %v13207_v48 }
 0x70b   :  { %v13192_v9 = vadd.f32 %v13010_v62, %v3523_v21 }
 0x70c   :  { %v4269_v32 = vsub.f32 1.5, %v4268_v42  ;;  %v4342_v7 = vmul.f32 %v8757_v37, %v4341_v31  ;;  %v4302_v42 = vmul.f32 %v8761_v47, %v12886_v59  ;;  %v4849_v46 = vsub.f32 1.5, %v4848_v4  ;;  %v13217_v21 = vpop.eup %8762 }
 0x70d   :  { %v13231_v4 = vpop.eup %8764  ;;  %vm5029_vm14 = vweird.f32 %v13217_v21 }
 0x70e   :  { %v4270_v1 = vmul.f32 %v8755_v15, %v4269_v32  ;;  %v4343_v37 = vmul.f32 %v4342_v7, %v12856_v28  ;;  %v4303_v50 = vmul.f32 %v8761_v47, %v4302_v42  ;;  %v3394_v32 = vpop.f32.mrf.mxu2  ;;  %v4850_v7 = vmul.f32 %v8759_v3, %v4849_v46  ;;  %vm13295_vm3 = vmor %vm5028_vm12, %vm5029_vm14 }
 0x70f   :  { %v13215_v31 = vadd.f32 %v13010_v62, %v3394_v32  ;;  %v13242_v3 = vadd.f32 %v12978_v25, %v3434_v30  ;;  %v4350_v46 = vmul.f32 %v13231_v4, %v12860_v5 }
 0x710   :  { %v4271_v15 = vmul.f32 %v4270_v1, %v12902_v41  ;;  %v4345_v26 = vsel %vm4344_vm10, %v12856_v28, %v4343_v37  ;;  %v13221_v1 = vpop.permute.xlu1 %5204  ;;  %v4304_v61 = vmul.f32 0.5, %v4303_v50  ;;  %v4851_v50 = vmul.f32 %v4850_v7, %v12836_v17 }
 0x711   :  { %v4348_v42 = vsel %vm4346_vm7, %v4347_v45, %v4345_v26  ;;  %v3627_v55 = vsel %vm1694_vm15, %v13215_v31, -inf  ;;  %vm4484_vm10 = vweird.f32 %v13204_v23  ;;  %vm4574_vm7 = vweird.f32 %v13207_v48 }
 0x712   :  { %v4273_v49 = vsel %vm4272_vm6, %v12902_v41, %v4271_v15  ;;  %v5024_v15 = vmul.f32 %v13217_v21, %v13186_v27  ;;  %v4305_v44 = vsub.f32 1.5, %v4304_v61  ;;  %v13239_v28 = vmax.f32 %v4348_v42, 1e-12 }
 0x713   :  { %v4276_v51 = vsel %vm4274_vm8, %v4275_v57, %v4273_v49  ;;  %v4853_v7 = vsel %vm4852_vm11, %v12836_v17, %v4851_v50 }
 0x714   :  { %v13233_v41 = vmax.f32 %v4276_v51, 1e-12  ;;  %v5025_v32 = vsub.f32 1.0, %v5024_v15  ;;  %v4306_v57 = vmul.f32 %v8761_v47, %v4305_v44  ;;  %v3630_v51 = vsel %vm1694_vm15, %v13242_v3, -inf }
 0x715   :  { %v4351_v15 = vmul.f32 %v13231_v4, %v4350_v46 }
 0x716   :  { %8772 = vrcp.f32 %v13233_v41  ;;  %v3563_v47 = vpop.f32.mrf.mxu2  ;;  %v5026_v42 = vmul.f32 %v13217_v21, %v5025_v32  ;;  %v4307_v44 = vmul.f32 %v4306_v57, %v12886_v59 }
 0x717   :  { %5419 = vrot.lane.b32.xlu2 %v5112_v10, %s9160_s28  ;;  %v3645_v10 = vsel %vm1694_vm15, %v13192_v9, -inf  ;;  %8774 = vrcp.f32 %v13239_v28  ;;  %v4352_v57 = vmul.f32 0.5, %v4351_v15 }
 0x718   :  { %v13256_v45 = vpop.permute.xlu1 %5202  ;;  %v5027_v32 = vadd.f32 %v13217_v21, %v5026_v42  ;;  %8776 = vrsqrt.f32 %v12849_v35 }
 0x719   :  { %v4353_v53 = vsub.f32 1.5, %v4352_v57 }
 0x720   :  { %3646 = vmax.xlane.f32.xlu1 %v3645_v10  ;;  %v13235_v10 = vpop.eup %8766 }
 0x721   :  { %v13237_v37 = vpop.eup %8768  ;;  %v4906_v26 = vmul.f32 %v13235_v10, %v12924_v63 }
 0x722   :  { %v13245_v49 = vpop.eup %8770  ;;  %v4480_v61 = vmul.f32 %v13237_v37, %v13204_v23  ;;  %vm4485_vm4 = vweird.f32 %v13237_v37 }
 0x723   :  { %v4570_v30 = vmul.f32 %v13245_v49, %v13207_v48  ;;  %v4907_v22 = vmul.f32 %v13235_v10, %v4906_v26  ;;  %v13269_v58 = vpop.eup %8772  ;;  %v4309_v26 = vsel %vm4308_vm5, %v12886_v59, %v4307_v44  ;;  %vm4575_vm6 = vweird.f32 %v13245_v49  ;;  %vm13320_vm8 = vmor %vm4484_vm10, %vm4485_vm4 }
 0x724   :  { %v4481_v12 = vsub.f32 1.0, %v4480_v61  ;;  %v13277_v16 = vpop.eup %8774  ;;  %v5034_v61 = vand.u32 2147483648, %v13186_v27  ;;  %vm13336_vm11 = vmor %vm4574_vm7, %vm4575_vm6  ;;  %vm4912_vm5 = vcmp.eq.f32.partialorder %v12924_v63, inf  ;;  %vm4500_vm12 = vweird.f32 %v13269_v58 }
 0x725   :  { %v4571_v46 = vsub.f32 1.0, %v4570_v30  ;;  %v4311_v30 = vand.u32 2147483648, %v12886_v59  ;;  %vm4589_vm4 = vweird.f32 %v13239_v28  ;;  %vm4356_vm6 = vcmp.eq.f32.partialorder %v12860_v5, inf }
 0x726   :  { %v5035_v36 = vor.u32 1.1754944e-38, %v5034_v61  ;;  %vm4914_vm10 = vcmp.eq.f32.partialorder %v12924_v63, 0.0 }
 0x727   :  { %v4572_v44 = vmul.f32 %v13245_v49, %v4571_v46  ;;  %v4312_v56 = vsel %vm4310_vm13, %v4311_v30, %v4309_v26  ;;  %vm4499_vm13 = vweird.f32 %v13233_v41 }
 0x728   :  { %3628 = vmax.xlane.f32.xlu1 %v3627_v55  ;;  %v4855_v55 = vand.u32 2147483648, %v12836_v17  ;;  %v4908_v17 = vmul.f32 0.5, %v4907_v22  ;;  %v13317_v26 = vmax.f32 %v4312_v56, 1e-12  ;;  %v16245_v56 = vld [vmem:[#allocation60_spill] sm:$0xff] }
 0x729   :  { %v4573_v46 = vadd.f32 %v13245_v49, %v4572_v44 }
 0x72a   :  { %v4856_v50 = vsel %vm4854_vm2, %v4855_v55, %v4853_v7  ;;  %v4482_v7 = vmul.f32 %v13237_v37, %v4481_v12  ;;  %v13289_v55 = vpop.permute.xlu1 %5196  ;;  %v3437_v12 = vpop.f32.mrf.mxu3  ;;  %v4909_v29 = vsub.f32 1.5, %v4908_v17 }
 0x72b   :  { %v13286_v42 = vmax.f32 %v4856_v50, 1e-12  ;;  %v4585_v50 = vmul.f32 %v13277_v16, %v13239_v28 }
 0x72c   :  { %v4483_v38 = vadd.f32 %v13237_v37, %v4482_v7  ;;  %v4910_v17 = vmul.f32 %v13235_v10, %v4909_v29  ;;  %v4354_v29 = vmul.f32 %v13231_v4, %v4353_v53 }
 0x72d   :  { %v4586_v57 = vsub.f32 1.0, %v4585_v50  ;;  %8778 = vrcp.f32 %v13286_v42 }
 0x72e   :  { %v4911_v4 = vmul.f32 %v4910_v17, %v12924_v63  ;;  %8780 = vrcp.f32 %v13317_v26 }
 0x72f   :  { %v4587_v53 = vmul.f32 %v13277_v16, %v4586_v57  ;;  %v4503_v57 = vand.u32 2147483647, %v13233_v41  ;;  %8782 = vrsqrt.f32 %v12862_v0 }
 0x730   :  { %8784 = vrsqrt.f32 %v13103_v33 }
 0x731   :  { %v4588_v17 = vadd.f32 %v13277_v16, %v4587_v53  ;;  %vm4504_vm7 = vcmp.eq.f32.partialorder %v4503_v57, 8.507059e+37 }
 0x732   :  { %3631 = vmax.xlane.f32.xlu0 %v3630_v51  ;;  %v13272_v51 = vadd.f32 %v12978_v25, %v3563_v47  ;;  %v5032_v25 = vand.u32 2147483647, %v13186_v27  ;;  %v4495_v47 = vmul.f32 %v13269_v58, %v13233_v41  ;;  %v5031_v27 = vsel %vm13295_vm3, %v13217_v21, %v5027_v32 }
 0x733   :  { %v4490_v21 = vand.u32 2147483648, %v13204_v23  ;;  %v4488_v32 = vand.u32 2147483647, %v13204_v23  ;;  %v4578_v23 = vand.u32 2147483647, %v13207_v48  ;;  %vm4590_vm3 = vweird.f32 %v13277_v16 }
 0x734   :  { %v3648_v22 = vsel %vm1694_vm15, %v13272_v51, -inf  ;;  %vm5033_vm9 = vcmp.eq.f32.partialorder %v5032_v25, 8.507059e+37  ;;  %v4496_v59 = vsub.f32 1.0, %v4495_v47  ;;  %v4487_v25 = vsel %vm13320_vm8, %v13237_v37, %v4483_v38  ;;  %v3566_v38 = vpop.f32.mrf.mxu2  ;;  %vm13388_vm8 = vmor %vm4589_vm4, %vm4590_vm3 }
 0x735   :  { %v5036_v15 = vsel %vm5033_vm9, %v5035_v36, %v5031_v27  ;;  %v4580_v36 = vand.u32 2147483648, %v13207_v48  ;;  %v4491_v47 = vor.u32 1.1754944e-38, %v4490_v21  ;;  %vm4489_vm2 = vcmp.eq.f32.partialorder %v4488_v32, 8.507059e+37  ;;  %v16248_v32 = vld [vmem:[#allocation37_spill] sm:$0xff]  ;;  %vm13372_vm9 = vmor %vm4499_vm13, %vm4500_vm12 }
 0x736   :  { %v4497_v7 = vmul.f32 %v13269_v58, %v4496_v59  ;;  %v5037_v10 = vmul.f32 %v5036_v15, %v16245_v56  ;;  %v4577_v48 = vsel %vm13336_vm11, %v13245_v49, %v4573_v46  ;;  %vm4579_vm14 = vcmp.eq.f32.partialorder %v4578_v23, 8.507059e+37  ;;  %v13354_v49 = vpop.eup %8776 }
 0x737   :  { %v4492_v27 = vsel %vm4489_vm2, %v4491_v47, %v4487_v25  ;;  %v4581_v44 = vor.u32 1.1754944e-38, %v4580_v36  ;;  %v13357_v59 = vadd.f32 %v13010_v62, %v3566_v38  ;;  %v4505_v21 = vand.u32 2147483648, %v13233_v41  ;;  %v13365_v61 = vpop.eup %8778 }
 0x738   :  { %v4498_v50 = vadd.f32 %v13269_v58, %v4497_v7  ;;  %v4493_v46 = vmul.f32 %v4492_v27, %v16248_v32  ;;  %v4355_v36 = vmul.f32 %v4354_v29, %v12860_v5  ;;  %v4595_v23 = vand.u32 2147483648, %v13239_v28  ;;  %v16251_v7 = vld [vmem:[#allocation17_spill] sm:$0xff] }
 0x739   :  { %v4582_v15 = vsel %vm4579_vm14, %v4581_v44, %v4577_v48  ;;  %v4593_v29 = vand.u32 2147483647, %v13239_v28  ;;  %v4915_v47 = vand.u32 2147483648, %v12924_v63  ;;  %v4506_v30 = vor.u32 1.1754944e-38, %v4505_v21 }
 0x73a   :  { %3649 = vmax.xlane.f32.xlu0 %v3648_v22  ;;  %v13309_v22 = vadd.f32 %v13010_v62, %v3437_v12  ;;  %v13348_v12 = vpop.permute.xlu1 %5290  ;;  %v4913_v62 = vsel %vm4912_vm5, %v12924_v63, %v4911_v4  ;;  %v4583_v41 = vmul.f32 %v4582_v15, %v16251_v7  ;;  %v5181_v28 = vmul.f32 %v12685_v18, %v4493_v46 }
 0x73b   :  { %v4592_v48 = vsel %vm13388_vm8, %v13277_v16, %v4588_v17  ;;  %v4916_v63 = vsel %vm4914_vm10, %v4915_v47, %v4913_v62  ;;  %v4596_v4 = vor.u32 1.1754944e-38, %v4595_v23  ;;  %v5084_v27 = vmul.f32 %v13365_v61, %v13286_v42  ;;  %v16254_v17 = vld [vmem:[#allocation31_spill] sm:$0xff] }
 0x73c   :  { %v3633_v37 = vsel %vm1694_vm15, %v13309_v22, -inf  ;;  %v4357_v44 = vsel %vm4356_vm6, %v12860_v5, %v4355_v36  ;;  %vm4594_vm11 = vcmp.eq.f32.partialorder %v4593_v29, 8.507059e+37  ;;  %v4359_v21 = vand.u32 2147483648, %v12860_v5 }
 0x73d   :  { %v4597_v16 = vsel %vm4594_vm11, %v4596_v4, %v4592_v48  ;;  %vm4358_vm2 = vcmp.eq.f32.partialorder %v12860_v5, 0.0  ;;  %v13409_v57 = vmax.f32 %v4916_v63, 1e-12  ;;  %v5085_v25 = vsub.f32 1.0, %v5084_v27 }
 0x73e   :  { %v4360_v36 = vsel %vm4358_vm2, %v4359_v21, %v4357_v44  ;;  %vm5089_vm5 = vweird.f32 %v13365_v61  ;;  %vm5088_vm14 = vweird.f32 %v13286_v42  ;;  %vm4320_vm10 = vcmp.eq.f32.partialorder %v12849_v35, inf }
 0x73f   :  { %v13420_v47 = vmax.f32 %v4360_v36, 1e-12  ;;  %8786 = vrcp.f32 %v13409_v57  ;;  %v5086_v38 = vmul.f32 %v13365_v61, %v5085_v25  ;;  %v5092_v25 = vand.u32 2147483647, %v13286_v42  ;;  %vm5090_vm12 = vmor %vm5088_vm14, %vm5089_vm5 }
 0x740   :  { %3634 = vmax.xlane.f32.xlu2 %v3633_v37  ;;  %v13392_v37 = vpop.eup %8780  ;;  %vm5163_vm11 = vweird.f32 %v13409_v57  ;;  %vm4322_vm2 = vcmp.eq.f32.partialorder %v12849_v35, 0.0  ;;  %vm4902_vm5 = vcmp.eq.f32.partialorder %v12862_v0, 0.0 }
 0x741   :  { %5331 = vrot.lane.b32.xlu1 %v5037_v10, %s9160_s28  ;;  %v4502_v10 = vsel %vm13372_vm9, %v13269_v58, %v4498_v50  ;;  %v3651_v58 = vsel %vm1694_vm15, %v13357_v59, -inf  ;;  %v5187_v50 = vmul.f32 %v12685_v18, %v4583_v41  ;;  %v8783_v15 = vpop.eup %8782  ;;  %v4540_v23 = vmul.f32 %v13392_v37, %v13317_v26 }
 0x742   :  { %v4507_v53 = vsel %vm4504_vm7, %v4506_v30, %v4502_v10  ;;  %v13406_v46 = vpop.permute.xlu1 %5198  ;;  %v4314_v41 = vmul.f32 %v13354_v49, %v12849_v35  ;;  %v16255_v10 = vld [vmem:[#allocation14_spill] sm:$0xff]  ;;  %v4894_v5 = vmul.f32 %v8783_v15, %v12862_v0  ;;  %v8785_v63 = vpop.eup %8784  ;;  %8788 = vrcp.f32 %v13420_v47 }
 0x743   :  { %v4508_v62 = vmul.f32 %v4507_v53, %v16254_v17  ;;  %v4598_v29 = vmul.f32 %v4597_v16, %v16255_v10  ;;  %v5087_v27 = vadd.f32 %v13365_v61, %v5086_v38  ;;  %v4362_v16 = vmul.f32 %v8785_v63, %v13103_v33 }
 0x744   :  { %v4895_v53 = vmul.f32 %v8783_v15, %v4894_v5  ;;  %vm4545_vm3 = vweird.f32 %v13392_v37  ;;  %vm5093_vm13 = vcmp.eq.f32.partialorder %v5092_v25, 8.507059e+37  ;;  %vm4544_vm9 = vweird.f32 %v13317_v26  ;;  %v16256_v25 = vld [vmem:[#allocation69_spill] sm:$0xff] }
 0x745   :  { %v5182_v30 = vmul.f32 %v12685_v18, %v4508_v62  ;;  %v5188_v48 = vmul.f32 %v12685_v18, %v4598_v29  ;;  %v5094_v62 = vand.u32 2147483648, %v13286_v42  ;;  %v4363_v38 = vmul.f32 %v8785_v63, %v4362_v16  ;;  %vm4546_vm4 = vmor %vm4544_vm9, %vm4545_vm3 }
 0x746   :  { %v4896_v36 = vmul.f32 0.5, %v4895_v53  ;;  %v4548_v42 = vand.u32 2147483647, %v13317_v26  ;;  %vm4900_vm7 = vcmp.eq.f32.partialorder %v12862_v0, inf }
 0x748   :  { %3652 = vmax.xlane.f32.xlu2 %v3651_v58  ;;  %v4541_v58 = vsub.f32 1.0, %v4540_v23  ;;  %v5091_v23 = vsel %vm5090_vm12, %v13365_v61, %v5087_v27  ;;  %vm4549_vm6 = vcmp.eq.f32.partialorder %v4548_v42, 8.507059e+37  ;;  %v5167_v42 = vand.u32 2147483647, %v13409_v57 }
 0x749   :  { %5325 = vrot.lane.b32.xlu1 %v5181_v28, %s9160_s28  ;;  %v4315_v28 = vmul.f32 %v13354_v49, %v4314_v41 }
 0x74a   :  { %v13428_v4 = vpop.permute.xlu1 %5247  ;;  %v4542_v44 = vmul.f32 %v13392_v37, %v4541_v58  ;;  %v5095_v58 = vor.u32 1.1754944e-38, %v5094_v62  ;;  %v4364_v62 = vmul.f32 0.5, %v4363_v38  ;;  %vm5168_vm3 = vcmp.eq.f32.partialorder %v5167_v42, 8.507059e+37 }
 0x74b   :  { %v4316_v21 = vmul.f32 0.5, %v4315_v28  ;;  %v4550_v28 = vand.u32 2147483648, %v13317_v26 }
 0x74c   :  { %v4543_v41 = vadd.f32 %v13392_v37, %v4542_v44  ;;  %v5096_v61 = vsel %vm5093_vm13, %v5095_v58, %v5091_v23  ;;  %v16257_v58 = vld [vmem:[#allocation29_spill] sm:$0xff]  ;;  %vm4604_vm13 = vweird.f32 %v13420_v47 }
 0x74d   :  { %v4551_v10 = vor.u32 1.1754944e-38, %v4550_v28  ;;  %v5097_v7 = vmul.f32 %v5096_v61, %v16256_v25  ;;  %v5169_v28 = vand.u32 2147483648, %v13409_v57  ;;  %v4903_v61 = vand.u32 2147483648, %v12862_v0 }
 0x74e   :  { %5454 = vrot.lane.b32.xlu0 %v5187_v50, %s9160_s28  ;;  %v13435_v50 = vpop.eup %8786  ;;  %v4547_v27 = vsel %vm4546_vm4, %v13392_v37, %v4543_v41  ;;  %v4365_v41 = vsub.f32 1.5, %v4364_v62  ;;  %v4608_v62 = vand.u32 2147483647, %v13420_v47  ;;  %vm4368_vm4 = vcmp.eq.f32.partialorder %v13103_v33, inf }
 0x74f   :  { %v5159_v29 = vmul.f32 %v13435_v50, %v13409_v57  ;;  %v13446_v5 = vpop.eup %8788  ;;  %v4552_v17 = vsel %vm4549_vm6, %v4551_v10, %v4547_v27  ;;  %vm5164_vm8 = vweird.f32 %v13435_v50 }
 0x750   :  { %v4553_v32 = vmul.f32 %v4552_v17, %v16257_v58  ;;  %v4366_v38 = vmul.f32 %v8785_v63, %v4365_v41  ;;  %vm13480_vm14 = vmor %vm5163_vm11, %vm5164_vm8  ;;  %vm4605_vm12 = vweird.f32 %v13446_v5  ;;  %vm4609_vm6 = vcmp.eq.f32.partialorder %v4608_v62, 8.507059e+37 }
 0x751   :  { %5327 = vrot.lane.b32.xlu1 %v5182_v30, %s9160_s28  ;;  %v4317_v30 = vsub.f32 1.5, %v4316_v21  ;;  %v5160_v44 = vsub.f32 1.0, %v5159_v29  ;;  %v4600_v21 = vmul.f32 %v13446_v5, %v13420_v47  ;;  %vm4606_vm9 = vmor %vm4604_vm13, %vm4605_vm12 }
 0x752   :  { %v13451_v53 = vpop.permute.xlu1 %5376  ;;  %v4367_v57 = vmul.f32 %v4366_v38, %v13103_v33 }
 0x753   :  { %v4318_v16 = vmul.f32 %v13354_v49, %v4317_v30  ;;  %v5161_v26 = vmul.f32 %v13435_v50, %v5160_v44  ;;  %v4601_v23 = vsub.f32 1.0, %v4600_v21  ;;  %v4323_v49 = vand.u32 2147483648, %v12849_v35  ;;  %v3606_v21 = vpop.f32.mrf.mxu3 }
 0x755   :  { %v4319_v37 = vmul.f32 %v4318_v16, %v12849_v35  ;;  %v5162_v10 = vadd.f32 %v13435_v50, %v5161_v26  ;;  %v4610_v16 = vand.u32 2147483648, %v13420_v47 }
 0x756   :  { %5456 = vrot.lane.b32.xlu0 %v5188_v48, %s9160_s28  ;;  %v4897_v48 = vsub.f32 1.5, %v4896_v36 }
 0x757   :  { %v4321_v30 = vsel %vm4320_vm10, %v12849_v35, %v4319_v37  ;;  %v4369_v37 = vsel %vm4368_vm4, %v13103_v33, %v4367_v57  ;;  %v4611_v41 = vor.u32 1.1754944e-38, %v4610_v16  ;;  %vm4370_vm10 = vcmp.eq.f32.partialorder %v13103_v33, 0.0 }
 0x758   :  { %v4898_v36 = vmul.f32 %v8783_v15, %v4897_v48  ;;  %v5185_v48 = vmul.f32 %v12685_v18, %v4553_v32  ;;  %v4324_v63 = vsel %vm4322_vm2, %v4323_v49, %v4321_v30  ;;  %v5166_v32 = vsel %vm13480_vm14, %v13435_v50, %v5162_v10  ;;  %v16260_v10 = vld [vmem:[#allocation86_spill] sm:$0xff] }
 0x75a   :  { %v4899_v29 = vmul.f32 %v4898_v36, %v12862_v0  ;;  %v13465_v15 = vpop.permute.xlu1 %5245  ;;  %v13494_v36 = vmax.f32 %v4324_v63, 1e-12  ;;  %v9117_v63 = vld [vmem:[%s15681_s8 + $0x10] sm:$0xff] }
 0x75c   :  { %v4901_v17 = vsel %vm4900_vm7, %v12862_v0, %v4899_v29  ;;  %v5170_v0 = vor.u32 1.1754944e-38, %v5169_v28  ;;  %v4371_v29 = vand.u32 2147483648, %v13103_v33  ;;  %8790 = vrcp.f32 %v13494_v36 }
 0x75d   :  { %v4904_v35 = vsel %vm4902_vm5, %v4903_v61, %v4901_v17  ;;  %v3609_v17 = vpop.f32.mrf.mxu3  ;;  %v9116_v61 = vld [vmem:[%s15681_s8 + $0x18] sm:$0xff]  ;;  %vm4559_vm11 = vweird.f32 %v13494_v36 }
 0x75e   :  { %v5171_v26 = vsel %vm5168_vm3, %v5170_v0, %v5166_v32  ;;  %v13496_v50 = vmax.f32 %v4904_v35, 1e-12  ;;  %v4372_v30 = vsel %vm4370_vm10, %v4371_v29, %v4369_v37  ;;  %v13515_v27 = vadd.f32 %v9116_v61, %v3609_v17 }
 0x75f   :  { %v13510_v28 = vmax.f32 %v4372_v30, 1e-12  ;;  %v13522_v32 = vadd.f32 %v9117_v63, %v3606_v21  ;;  %v4565_v61 = vand.u32 2147483648, %v13494_v36  ;;  %v4563_v63 = vand.u32 2147483647, %v13494_v36 }
 0x760   :  { %5417 = vrot.lane.b32.xlu2 %v5097_v7, %s9160_s28  ;;  %v4602_v7 = vmul.f32 %v13446_v5, %v4601_v23  ;;  %8792 = vrcp.f32 %v13496_v50  ;;  %v3657_v0 = vsel %vm1694_vm15, %v13515_v27, -inf  ;;  %vm5148_vm2 = vweird.f32 %v13496_v50 }
 0x761   :  { %8794 = vrcp.f32 %v13510_v28  ;;  %v3654_v16 = vsel %vm1694_vm15, %v13522_v32, -inf  ;;  %vm4564_vm12 = vcmp.eq.f32.partialorder %v4563_v63, 8.507059e+37 }
 0x762   :  { %v4603_v44 = vadd.f32 %v13446_v5, %v4602_v7  ;;  %v13502_v49 = vpop.permute.xlu1 %5374  ;;  %v5172_v7 = vmul.f32 %v5171_v26, %v16260_v10  ;;  %v16264_v10 = vld [vmem:[#allocation40_spill] sm:$0xff] }
 0x764   :  { %v4607_v23 = vsel %vm4606_vm9, %v13446_v5, %v4603_v44  ;;  %v16261_v5 = vld [vmem:[#allocation45_spill] sm:$0xff]  ;;  %vm4619_vm9 = vweird.f32 %v13510_v28 }
 0x765   :  { %v4612_v47 = vsel %vm4609_vm6, %v4611_v41, %v4607_v23  ;;  %v13533_v23 = vpop.xlane.xlu2 %3616  ;;  %v16262_v41 = vld [vmem:[#allocation57_spill] sm:$0xff] }
 0x766   :  { %v4613_v38 = vmul.f32 %v4612_v47, %v16261_v5 }
 0x768   :  { %5411 = vrot.lane.b32.xlu2 %v5185_v48, %s9160_s28  ;;  %v8791_v48 = vpop.eup %8790  ;;  %v5189_v33 = vmul.f32 %v12685_v18, %v4613_v38 }
 0x769   :  { %v8793_v42 = vpop.eup %8792  ;;  %v4555_v35 = vmul.f32 %v8791_v48, %v13494_v36  ;;  %vm4560_vm8 = vweird.f32 %v8791_v48 }
 0x76a   :  { %v13524_v44 = vpop.permute.xlu1 %5282  ;;  %v5144_v57 = vmul.f32 %v8793_v42, %v13496_v50  ;;  %v8795_v26 = vpop.eup %8794  ;;  %vm5149_vm7 = vweird.f32 %v8793_v42  ;;  %vm4561_vm5 = vmor %vm4559_vm11, %vm4560_vm8 }
 0x76b   :  { %v4556_v62 = vsub.f32 1.0, %v4555_v35  ;;  %v5152_v35 = vand.u32 2147483647, %v13496_v50  ;;  %vm5150_vm14 = vmor %vm5148_vm2, %vm5149_vm7  ;;  %vm4620_vm13 = vweird.f32 %v8795_v26 }
 0x76c   :  { %v5145_v21 = vsub.f32 1.0, %v5144_v57  ;;  %v16263_v57 = vld [vmem:[#allocation61_spill] sm:$0xff]  ;;  %vm4621_vm4 = vmor %vm4619_vm9, %vm4620_vm13 }
 0x76d   :  { %v4557_v29 = vmul.f32 %v8791_v48, %v4556_v62  ;;  %vm5153_vm3 = vcmp.eq.f32.partialorder %v5152_v35, 8.507059e+37 }
 0x76e   :  { %v5146_v47 = vmul.f32 %v8793_v42, %v5145_v21  ;;  %v4566_v21 = vor.u32 1.1754944e-38, %v4565_v61 }
 0x76f   :  { %v4558_v30 = vadd.f32 %v8791_v48, %v4557_v29 }
 0x770   :  { %5505 = vrot.lane.b32.xlu2 %v5172_v7, %s9160_s28  ;;  %v4615_v7 = vmul.f32 %v8795_v26, %v13510_v28  ;;  %v5147_v17 = vadd.f32 %v8793_v42, %v5146_v47 }
 0x772   :  { %v13535_v37 = vpop.xlane.xlu1 %3619  ;;  %v4616_v38 = vsub.f32 1.0, %v4615_v7  ;;  %v5151_v62 = vsel %vm5150_vm14, %v8793_v42, %v5147_v17  ;;  %v4623_v42 = vand.u32 2147483647, %v13510_v28 }
 0x774   :  { %vm4624_vm6 = vcmp.eq.f32.partialorder %v4623_v42, 8.507059e+37 }
 0x778   :  { %5497 = vrot.lane.b32.xlu2 %v5189_v33, %s9160_s28  ;;  %v5154_v33 = vand.u32 2147483648, %v13496_v50  ;;  %v13552_v50 = vpop.permute.xlu0 %5288 }
 0x77a   :  { %v13550_v29 = vpop.xlane.xlu1 %3637  ;;  %v5155_v7 = vor.u32 1.1754944e-38, %v5154_v33 }
 0x77b   :  { %3658 = vmax.xlane.f32.xlu1 %v3657_v0  ;;  %v4562_v0 = vsel %vm4561_vm5, %v8791_v48, %v4558_v30  ;;  %v16265_v30 = vld [vmem:[#allocation85_spill] sm:$0xff] }
 0x77c   :  { %v4567_v36 = vsel %vm4564_vm12, %v4566_v21, %v4562_v0  ;;  %v5156_v47 = vsel %vm5153_vm3, %v5155_v7, %v5151_v62  ;;  %v16267_v21 = vld [vmem:[#allocation48_spill] sm:$0xff] }
 0x77d   :  { %v4568_v48 = vmul.f32 %v4567_v36, %v16264_v10 }
 0x77f   :  { %v5186_v63 = vmul.f32 %v12685_v18, %v4568_v48 }
 0x780   :  { %3655 = vmax.xlane.f32.xlu0 %v3654_v16  ;;  %6555 = vrot.lane.b32.xlu2 %v16262_v41, %s9161_s5  ;;  %v4617_v16 = vmul.f32 %v8795_v26, %v4616_v38  ;;  %v13548_v41 = vpop.permute.xlu2 %5368  ;;  %v5157_v38 = vmul.f32 %v5156_v47, %v16265_v30 }
 0x782   :  { %v4618_v5 = vadd.f32 %v8795_v26, %v4617_v16  ;;  %v13560_v33 = vpop.permute.xlu1 %5284  ;;  %v13566_v16 = vpop.permute.xlu0 %5239 }
 0x784   :  { %v4622_v17 = vsel %vm4621_vm4, %v8795_v26, %v4618_v5 }
 0x788   :  { %6561 = vrot.lane.b32.xlu2 %v16263_v57, %s9161_s5  ;;  %v4625_v57 = vand.u32 2147483648, %v13510_v28  ;;  %v13563_v0 = vpop.permute.xlu2 %5462  ;;  %v16266_v28 = vld [vmem:[#allocation43_spill] sm:$0xff] }
 0x78a   :  { %v4626_v61 = vor.u32 1.1754944e-38, %v4625_v57  ;;  %v13572_v7 = vpop.permute.xlu1 %5241  ;;  %v3614_v36 = vpop.xlane.xlu0 %3613  ;;  %v16268_v57 = vld [vmem:[#allocation26_spill] sm:$0xff] }
 0x78c   :  { %v4627_v35 = vsel %vm4624_vm6, %v4626_v61, %v4622_v17 }
 0x78d   :  { %v4628_v62 = vmul.f32 %v4627_v35, %v16266_v28 }
 0x78f   :  { %v5190_v5 = vmul.f32 %v12685_v18, %v4628_v62 }
 0x790   :  { %v3644_v26 = vpop.xlane.xlu2 %3643 }
 0x791   :  { %v3670_v47 = vsub.f32 %v13142_v19, %v3644_v26  ;;  %v3660_v26 = vsub.f32 %v12989_v2, %v3614_v36  ;;  %v3668_v2 = vsub.f32 %v13095_v24, %v13550_v29 }
 0x792   :  { %v13580_v17 = vpop.permute.xlu0 %5333 }
 0x793   :  { %v3696_v48 = vmul.f32 1.442695, %v3670_v47  ;;  %v3647_v42 = vpop.xlane.xlu1 %3646  ;;  %v3676_v47 = vmul.f32 1.442695, %v3660_v26 }
 0x794   :  { %5503 = vrot.lane.b32.xlu0 %v5157_v38, %s9160_s28  ;;  %5413 = vrot.lane.b32.xlu1 %v5186_v63, %s9160_s28  ;;  %v16269_v38 = vld [vmem:[#allocation12_spill] sm:$0xff]  ;;  %v3671_v18 = vsub.f32 %v13192_v9, %v3647_v42  ;;  %v3661_v9 = vsub.f32 %v13017_v54, %v13533_v23 }
 0x795   :  { %8796 = vpow2.f32 %v3696_v48  ;;  %v3662_v48 = vsub.f32 %v13083_v13, %v13535_v37 }
 0x796   :  { %v3698_v61 = vmul.f32 1.442695, %v3671_v18 }
 0x797   :  { %v3680_v18 = vmul.f32 1.442695, %v3662_v48 }
 0x798   :  { %8798 = vpow2.f32 %v3698_v61 }
 0x799   :  { %8800 = vpow2.f32 %v3676_v47  ;;  %v16270_v47 = vld [vmem:[#allocation24_spill] sm:$0xff] }
 0x79a   :  { %v13585_v35 = vpop.permute.xlu0 %5370 }
 0x79b   :  { %v13583_v63 = vpop.eup %8796  ;;  %v3629_v26 = vpop.xlane.xlu1 %3628 }
 0x79c   :  { %6557 = vrot.lane.b32.xlu0 %v16267_v21, %s9161_s5  ;;  %5499 = vrot.lane.b32.xlu1 %v5190_v5, %s9160_s28  ;;  %v3738_v19 = vsel %vm1694_vm15, %v13583_v63, 0.0  ;;  %v3665_v48 = vsub.f32 %v13215_v31, %v3629_v26 }
 0x79e   :  { %v13589_v62 = vpop.eup %8798 }
 0x79f   :  { %v3741_v5 = vsel %vm1694_vm15, %v13589_v62, 0.0  ;;  %v13599_v61 = vpop.eup %8800 }
 0x7a0   :  { %v3708_v23 = vsel %vm1694_vm15, %v13599_v61, 0.0 }
 0x7a2   :  { %v3623_v21 = vpop.xlane.xlu0 %3622 }
 0x7a4   :  { %6013 = vrot.lane.b32.xlu0 %v16268_v57, %s9161_s5  ;;  %6011 = vrot.lane.b32.xlu1 %v16269_v38, %s9161_s5  ;;  %v3678_v57 = vmul.f32 1.442695, %v3661_v9  ;;  %v3663_v38 = vsub.f32 %v13117_v14, %v3623_v21  ;;  %v3692_v14 = vmul.f32 1.442695, %v3668_v2  ;;  %v3626_v21 = vpop.xlane.xlu2 %3625 }
 0x7a5   :  { %v3664_v29 = vsub.f32 %v13152_v8, %v3626_v21 }
 0x7a6   :  { %8802 = vpow2.f32 %v3678_v57 }
 0x7a7   :  { %8804 = vpow2.f32 %v3680_v18  ;;  %v3686_v18 = vmul.f32 1.442695, %v3665_v48 }
 0x7aa   :  { %v3641_v42 = vpop.xlane.xlu0 %3640 }
 0x7ab   :  { %v3669_v13 = vsub.f32 %v13129_v34, %v3641_v42  ;;  %v3684_v42 = vmul.f32 1.442695, %v3664_v29 }
 0x7ac   :  { %v13605_v54 = vpop.eup %8802 }
 0x7ad   :  { %v3711_v37 = vsel %vm1694_vm15, %v13605_v54, 0.0  ;;  %v3694_v24 = vmul.f32 1.442695, %v3669_v13 }
 0x7b1   :  { %3739 = vadd.xlane.f32.xlu2 %v3738_v19  ;;  %v3682_v19 = vmul.f32 1.442695, %v3663_v38 }
 0x7b2   :  { %v13603_v36 = vpop.permute.xlu0 %5460 }
 0x7b3   :  { %8806 = vpow2.f32 %v3682_v19 }
 0x7b4   :  { %8808 = vpow2.f32 %v3692_v14 }
 0x7b5   :  { %8810 = vpow2.f32 %v3694_v24 }
 0x7b6   :  { %8812 = vpow2.f32 %v3684_v42 }
 0x7b7   :  { %8814 = vpow2.f32 %v3686_v18 }
 0x7b9   :  { %3742 = vadd.xlane.f32.xlu2 %v3741_v5  ;;  %v13612_v5 = vpop.eup %8804 }
 0x7ba   :  { %v3632_v9 = vpop.xlane.xlu0 %3631  ;;  %v13617_v57 = vpop.eup %8806  ;;  %v3714_v34 = vsel %vm1694_vm15, %v13612_v5, 0.0 }
 0x7bb   :  { %v3717_v38 = vsel %vm1694_vm15, %v13617_v57, 0.0  ;;  %v13624_v8 = vpop.eup %8808  ;;  %v3666_v31 = vsub.f32 %v13242_v3, %v3632_v9 }
 0x7bc   :  { %v13626_v19 = vpop.eup %8810  ;;  %v3732_v2 = vsel %vm1694_vm15, %v13624_v8, 0.0 }
 0x7bd   :  { %v3735_v14 = vsel %vm1694_vm15, %v13626_v19, 0.0  ;;  %v3688_v21 = vmul.f32 1.442695, %v3666_v31 }
 0x7bf   :  { %8816 = vpow2.f32 %v3688_v21 }
 0x7c2   :  { %v3650_v13 = vpop.xlane.xlu0 %3649 }
 0x7c3   :  { %v3672_v9 = vsub.f32 %v13272_v51, %v3650_v13 }
 0x7c5   :  { %v3700_v48 = vmul.f32 1.442695, %v3672_v9 }
 0x7c7   :  { %8818 = vpow2.f32 %v3700_v48  ;;  %v16272_v48 = vld [vmem:[#allocation13_spill] sm:$0xff] }
 0x7ce   :  { %3709 = vadd.xlane.f32.xlu0 %v3708_v23  ;;  %3712 = vadd.xlane.f32.xlu1 %v3711_v37  ;;  %v13630_v23 = vpop.permute.xlu2 %5419  ;;  %v13635_v37 = vpop.eup %8812 }
 0x7cf   :  { %v13637_v24 = vpop.eup %8814  ;;  %v3720_v29 = vsel %vm1694_vm15, %v13635_v37, 0.0 }
 0x7d0   :  { %v3723_v3 = vsel %vm1694_vm15, %v13637_v24, 0.0 }
 0x7d1   :  { %6015 = vrot.lane.b32.xlu2 %v16270_v47, %s9161_s5  ;;  %v13641_v47 = vpop.permute.xlu0 %5454 }
 0x7d6   :  { %3715 = vadd.xlane.f32.xlu0 %v3714_v34  ;;  %3718 = vadd.xlane.f32.xlu1 %v3717_v38  ;;  %v3635_v26 = vpop.xlane.xlu2 %3634  ;;  %v13646_v34 = vpop.eup %8816 }
 0x7d7   :  { %v3726_v18 = vsel %vm1694_vm15, %v13646_v34, 0.0  ;;  %v13653_v21 = vpop.eup %8818 }
 0x7d8   :  { %v3744_v13 = vsel %vm1694_vm15, %v13653_v21, 0.0 }
 0x7d9   :  { %v13648_v38 = vpop.permute.xlu0 %5456 }
 0x7de   :  { %3733 = vadd.xlane.f32.xlu0 %v3732_v2  ;;  %3736 = vadd.xlane.f32.xlu1 %v3735_v14  ;;  %v3653_v42 = vpop.xlane.xlu2 %3652 }
 0x7df   :  { %v3673_v2 = vsub.f32 %v13357_v59, %v3653_v42  ;;  %v13664_v59 = vpop.permute.xlu1 %5331 }
 0x7e1   :  { %v3702_v31 = vmul.f32 1.442695, %v3673_v2  ;;  %v16273_v2 = vld [vmem:[#allocation36_spill] sm:$0xff] }
 0x7e3   :  { %8820 = vpow2.f32 %v3702_v31  ;;  %v16274_v31 = vld [vmem:[#allocation51_spill] sm:$0xff] }
 0x7e6   :  { %3721 = vadd.xlane.f32.xlu0 %v3720_v29  ;;  %3724 = vadd.xlane.f32.xlu1 %v3723_v3  ;;  %v16271_v29 = vld [vmem:[#allocation59_spill] sm:$0xff] }
 0x7e9   :  { %v13660_v9 = vpop.eup %8820 }
 0x7ea   :  { %v3747_v42 = vsel %vm1694_vm15, %v13660_v9, 0.0 }
 0x7ee   :  { %3727 = vadd.xlane.f32.xlu1 %v3726_v18 }
 0x7f3   :  { %v3656_v14 = vpop.xlane.xlu0 %3655 }
 0x7f4   :  { %v3674_v51 = vsub.f32 %v13522_v32, %v3656_v14  ;;  %v13670_v32 = vpop.permute.xlu2 %5417 }
 0x7f6   :  { %v3704_v3 = vmul.f32 1.442695, %v3674_v51  ;;  %v16275_v51 = vld [vmem:[#allocation65_spill] sm:$0xff] }
 0x7f8   :  { %8822 = vpow2.f32 %v3704_v3 }
 0x7fa   :  { %6565 = vrot.lane.b32.xlu0 %v16271_v29, %s9161_s5  ;;  %3745 = vadd.xlane.f32.xlu2 %v3744_v13  ;;  %v13678_v29 = vpop.permute.xlu1 %5325 }
 0x7fc   :  { %v13682_v13 = vpop.permute.xlu2 %5411 }
 0x7fe   :  { %v13668_v18 = vpop.eup %8822 }
 0x7ff   :  { %v3750_v14 = vsel %vm1694_vm15, %v13668_v18, 0.0 }
 0x802   :  { %6019 = vrot.lane.b32.xlu0 %v16272_v48, %s9161_s5  ;;  %3748 = vadd.xlane.f32.xlu2 %v3747_v42  ;;  %v13684_v3 = vpop.permute.xlu1 %5327 }
 0x804   :  { %v13686_v48 = vpop.permute.xlu2 %5505 }
 0x806   :  { %v13689_v28 = vpop.permute.xlu0 %5503 }
 0x807   :  { %6559 = vrot.lane.b32.xlu1 %v16274_v31, %s9161_s5  ;;  %v16276_v31 = vld [vmem:[#allocation38_spill] sm:$0xff] }
 0x80a   :  { %6017 = vrot.lane.b32.xlu0 %v16273_v2, %s9161_s5  ;;  %3751 = vadd.xlane.f32.xlu2 %v3750_v14  ;;  %v3659_v42 = vpop.xlane.xlu1 %3658  ;;  %v3667_v2 = vsub.f32 %v13309_v22, %v3635_v26 }
 0x80c   :  { %v3690_v14 = vmul.f32 1.442695, %v3667_v2  ;;  %v13693_v30 = vpop.permute.xlu2 %5497 }
 0x80d   :  { %16277 = vst [vmem:[#allocation33_spill] sm:$0xff] %v13693_v30 }
 0x80e   :  { %8824 = vpow2.f32 %v3690_v14  ;;  %v13698_v25 = vpop.permute.xlu0 %6557 }
 0x80f   :  { %6563 = vrot.lane.b32.xlu1 %v16275_v51, %s9161_s5  ;;  %v3675_v51 = vsub.f32 %v13515_v27, %v3659_v42 }
 0x811   :  { %v3706_v58 = vmul.f32 1.442695, %v3675_v51 }
 0x812   :  { %v13695_v10 = vpop.permute.xlu1 %5413 }
 0x813   :  { %8826 = vpow2.f32 %v3706_v58 }
 0x814   :  { %v13700_v56 = vpop.eup %8824  ;;  %v6556_v43 = vpop.permute.xlu2 %6555 }
 0x815   :  { %v3729_v26 = vsel %vm1694_vm15, %v13700_v56, 0.0  ;;  %v6603_v27 = vsel %vm385_vm1, %v6556_v43, 0.0 }
 0x819   :  { %v13706_v2 = vpop.eup %8826 }
 0x81a   :  { %v13702_v22 = vpop.permute.xlu1 %5499  ;;  %v3753_v14 = vsel %vm1694_vm15, %v13706_v2, 0.0 }
 0x81b   :  { %16278 = vst [vmem:[#allocation102_spill] sm:$0xff] %v13702_v22 }
 0x81c   :  { %v6562_v42 = vpop.permute.xlu2 %6561 }
 0x822   :  { %6023 = vrot.lane.b32.xlu2 %v16276_v31, %s9161_s5  ;;  %v6014_v31 = vpop.permute.xlu0 %6013  ;;  %v6012_v51 = vpop.permute.xlu1 %6011 }
 0x823   :  { %v6059_v58 = vsel %vm385_vm1, %v6012_v51, 0.0  ;;  %v6062_v43 = vsel %vm385_vm1, %v6014_v31, 0.0 }
 0x824   :  { %v3740_v6 = vpop.xlane.xlu2 %3739 }
 0x834   :  { %3730 = vadd.xlane.f32.xlu0 %v3729_v26 }
 0x839   :  { %6604 = vadd.xlane.f32.xlu1 %v6603_v27 }
 0x83c   :  { %3754 = vadd.xlane.f32.xlu0 %v3753_v14 }
 0x841   :  { %v3710_v60 = vpop.xlane.xlu0 %3709  ;;  %v3713_v40 = vpop.xlane.xlu1 %3712  ;;  %6060 = vadd.xlane.f32.xlu1 %v6059_v58 }
 0x842   :  { %8828 = vrcp.f32 %v3710_v60  ;;  %v3743_v60 = vpop.xlane.xlu2 %3742 }
 0x843   :  { %8830 = vrcp.f32 %v3713_v40  ;;  %v16279_v40 = vld [vmem:[#allocation21_spill] sm:$0xff] }
 0x848   :  { %v8829_v26 = vpop.eup %8828 }
 0x849   :  { %v3772_v11 = vmul.f32 %v8829_v26, %v13599_v61  ;;  %v3716_v20 = vpop.xlane.xlu0 %3715  ;;  %v8831_v39 = vpop.eup %8830  ;;  %6063 = vadd.xlane.f32.xlu1 %v6062_v43 }
 0x84a   :  { %8832 = vrcp.f32 %v3716_v20  ;;  %v3773_v14 = vmul.f32 %v8831_v39, %v13605_v54  ;;  %v3719_v27 = vpop.xlane.xlu1 %3718 }
 0x84b   :  { %v3788_v52 = vpack.c.bf16 %v3772_v11, %v3772_v11  ;;  %8834 = vrcp.f32 %v3719_v27  ;;  %v6612_v11 = vsel %vm385_vm1, %v6562_v42, 0.0  ;;  %v16280_v42 = vld [vmem:[#allocation74_spill] sm:$0xff] }
 0x84c   :  { %v3789_v51 = vpack.c.bf16 %v3773_v14, %v3773_v14 }
 0x84d   :  { %v3806_v30 = vunpack.c.l.b16 %v3788_v52 }
 0x84e   :  { %v3807_v58 = vunpack.c.l.b16 %v3789_v51 }
 0x850   :  { %v8833_v22 = vpop.eup %8832  ;;  %6021 = vrot.lane.b32.xlu0 %v16279_v40, %s9161_s5  ;;  %v3808_v26 = vpack.c.b16 %v3807_v58, %v3806_v30  ;;  %v6016_v30 = vpop.permute.xlu2 %6015 }
 0x851   :  { %v3774_v61 = vmul.f32 %v8833_v22, %v13612_v5  ;;  %v3734_v20 = vpop.xlane.xlu0 %3733  ;;  %v8835_v31 = vpop.eup %8834  ;;  %6613 = vadd.xlane.f32.xlu1 %v6612_v11 }
 0x852   :  { %8836 = vrcp.f32 %v3734_v20  ;;  %v3775_v54 = vmul.f32 %v8835_v31, %v13617_v57  ;;  %v3737_v43 = vpop.xlane.xlu1 %3736  ;;  %8212 = vmatmul.msk.bf16.vlgmr.msrb.gmra.mxu0 %vm1694_vm15, %v3808_v26 }
 0x853   :  { %8838 = vrcp.f32 %v3743_v60  ;;  %v3790_v39 = vpack.c.bf16 %v3774_v61, %v3774_v61  ;;  %8223 = vmatpush.xpose.msk.msrb.mxu0 %vm385_vm1, %v13221_v1  ;;  %v6065_v1 = vsel %vm385_vm1, %v6016_v30, 0.0 }
 0x854   :  { %8840 = vrcp.f32 %v3737_v43  ;;  %v3791_v52 = vpack.c.bf16 %v3775_v54, %v3775_v54  ;;  %v16281_v54 = vld [vmem:[#allocation64_spill] sm:$0xff] }
 0x855   :  { %8842 = vrcp.f32 %v3740_v6  ;;  %v3831_v22 = vunpack.c.l.b16 %v3790_v39 }
 0x856   :  { %v3832_v14 = vunpack.c.l.b16 %v3791_v52 }
 0x857   :  { %8224 = vmatpush.xpose.msk.msrb.mxu0 %vm385_vm1, %v13256_v45 }
 0x858   :  { %v8837_v5 = vpop.eup %8836  ;;  %6569 = vrot.lane.b32.xlu0 %v16280_v42, %s9161_s5  ;;  %v3833_v51 = vpack.c.b16 %v3832_v14, %v3831_v22 }
 0x859   :  { %v3780_v27 = vmul.f32 %v8837_v5, %v13624_v8  ;;  %v3722_v57 = vpop.xlane.xlu0 %3721  ;;  %v8839_v60 = vpop.eup %8838  ;;  %6066 = vadd.xlane.f32.xlu1 %v6065_v1 }
 0x85a   :  { %8844 = vrcp.f32 %v3722_v57  ;;  %v8841_v58 = vpop.eup %8840  ;;  %v3725_v61 = vpop.xlane.xlu1 %3724  ;;  %8213 = vmatmul.msk.bf16.vlgmr.msra.gmra.mxu1 %vm1694_vm15, %v3833_v51  ;;  %v3783_v45 = vmul.f32 %v8839_v60, %v13589_v62 }
 0x85b   :  { %v3796_v6 = vpack.c.bf16 %v3780_v27, %v3780_v27  ;;  %v3781_v40 = vmul.f32 %v8841_v58, %v13626_v19  ;;  %v8843_v20 = vpop.eup %8842  ;;  %8846 = vrcp.f32 %v3725_v61  ;;  %8227 = vmatpush.xpose.msk.msra.mxu1 %vm385_vm1, %v13428_v4 }
 0x85c   :  { %v3782_v31 = vmul.f32 %v8843_v20, %v13583_v63  ;;  %v3799_v43 = vpack.c.bf16 %v3783_v45, %v3783_v45 }
 0x85d   :  { %v3797_v8 = vpack.c.bf16 %v3781_v40, %v3781_v40  ;;  %v3906_v11 = vunpack.c.l.b16 %v3796_v6 }
 0x85e   :  { %v3798_v4 = vpack.c.bf16 %v3782_v31, %v3782_v31  ;;  %v3932_v63 = vunpack.c.l.b16 %v3799_v43 }
 0x85f   :  { %v3907_v39 = vunpack.c.l.b16 %v3797_v8  ;;  %8228 = vmatpush.xpose.msk.msra.mxu1 %vm385_vm1, %v13465_v15 }
 0x860   :  { %v8845_v26 = vpop.eup %8844  ;;  %6567 = vrot.lane.b32.xlu0 %v16281_v54, %s9161_s5  ;;  %v3931_v14 = vunpack.c.l.b16 %v3798_v4 }
 0x861   :  { %v3776_v19 = vmul.f32 %v8845_v26, %v13635_v37  ;;  %v3908_v52 = vpack.c.b16 %v3907_v39, %v3906_v11  ;;  %v8847_v5 = vpop.eup %8846 }
 0x862   :  { %v3777_v62 = vmul.f32 %v8847_v5, %v13637_v24  ;;  %v3933_v15 = vpack.c.b16 %v3932_v63, %v3931_v14  ;;  %v16290_v63 = vld [vmem:[#allocation28_spill] sm:$0xff]  ;;  %v16293_v14 = vld [vmem:[#allocation79_spill] sm:$0xff] }
 0x863   :  { %v3792_v30 = vpack.c.bf16 %v3776_v19, %v3776_v19  ;;  %8216 = vmatmul.msk.bf16.vlgmr.msra.gmra.mxu0 %vm1694_vm15, %v3908_v52 }
 0x864   :  { %8239 = vmatpush.xpose.msk.msra.mxu0 %vm385_vm1, %v13451_v53  ;;  %v3793_v22 = vpack.c.bf16 %v3777_v62, %v3777_v62 }
 0x865   :  { %v3856_v42 = vunpack.c.l.b16 %v3792_v30  ;;  %v16287_v30 = vld [vmem:[#allocation84_spill] sm:$0xff] }
 0x866   :  { %v3857_v37 = vunpack.c.l.b16 %v3793_v22  ;;  %v16291_v22 = vld [vmem:[#allocation33_spill] sm:$0xff] }
 0x868   :  { %8240 = vmatpush.xpose.msk.msra.mxu0 %vm385_vm1, %v13502_v49  ;;  %v3858_v27 = vpack.c.b16 %v3857_v37, %v3856_v42  ;;  %v3728_v49 = vpop.xlane.xlu1 %3727  ;;  %v16296_v37 = vld [vmem:[#allocation102_spill] sm:$0xff] }
 0x86a   :  { %8214 = vmatmul.msk.bf16.vlgmr.msra.gmra.mxu2 %vm1694_vm15, %v3858_v27  ;;  %8217 = vmatmul.msk.bf16.vlgmr.msrb.gmra.mxu1 %vm1694_vm15, %v3933_v15  ;;  %v16298_v27 = vld [vmem:[#allocation19_spill] sm:$0xff] }
 0x86b   :  { %8231 = vmatpush.xpose.msk.msra.mxu2 %vm385_vm1, %v13348_v12  ;;  %8243 = vmatpush.xpose.msk.msrb.mxu1 %vm385_vm1, %v13630_v23 }
 0x86d   :  { %v3746_v53 = vpop.xlane.xlu2 %3745 }
 0x86e   :  { %8848 = vrcp.f32 %v3746_v53 }
 0x86f   :  { %8232 = vmatpush.xpose.msk.msra.mxu2 %vm385_vm1, %v13552_v50  ;;  %8244 = vmatpush.xpose.msk.msrb.mxu1 %vm385_vm1, %v13670_v32 }
 0x873   :  { %8225 = vmatmul.msk.f32.vlgmr.msrb.gmra.mxu0 %vm385_vm1, %v13289_v55 }
 0x874   :  { %v8849_v57 = vpop.eup %8848 }
 0x875   :  { %v3749_v24 = vpop.xlane.xlu2 %3748  ;;  %v3784_v12 = vmul.f32 %v8849_v57, %v13653_v21  ;;  %v6606_v21 = vsel %vm385_vm1, %v13698_v25, 0.0  ;;  %v16283_v25 = vld [vmem:[#allocation32_spill] sm:$0xff] }
 0x876   :  { %8850 = vrcp.f32 %v3749_v24 }
 0x877   :  { %v3800_v32 = vpack.c.bf16 %v3784_v12, %v3784_v12  ;;  %8852 = vrcp.f32 %v3728_v49  ;;  %v13856_v12 = vld [vmem:[%s15681_s8 + $0x28] sm:$0xff] }
 0x879   :  { %v6560_v60 = vpop.permute.xlu1 %6559  ;;  %v3956_v58 = vunpack.c.l.b16 %v3800_v32 }
 0x87a   :  { %8229 = vmatmul.msk.f32.vlgmr.msra.gmra.mxu1 %vm385_vm1, %v13566_v16  ;;  %v6609_v50 = vsel %vm385_vm1, %v6560_v60, 0.0 }
 0x87b   :  { %8226 = vmatmul.msk.f32.gmra.mxu0 %vm385_vm1, %v13406_v46  ;;  %6610 = vadd.xlane.f32.xlu2 %v6609_v50 }
 0x87c   :  { %v8851_v23 = vpop.eup %8850 }
 0x87d   :  { %v3785_v51 = vmul.f32 %v8851_v23, %v13660_v9  ;;  %v6566_v9 = vpop.permute.xlu0 %6565  ;;  %v3752_v61 = vpop.xlane.xlu2 %3751 }
 0x87e   :  { %v6618_v5 = vsel %vm385_vm1, %v6566_v9, 0.0 }
 0x87f   :  { %v3801_v55 = vpack.c.bf16 %v3785_v51, %v3785_v51 }
 0x881   :  { %v3957_v1 = vunpack.c.l.b16 %v3801_v55  ;;  %v6564_v6 = vpop.permute.xlu1 %6563 }
 0x882   :  { %8230 = vmatmul.msk.f32.gmra.mxu1 %vm385_vm1, %v13572_v7  ;;  %v6615_v46 = vsel %vm385_vm1, %v6564_v6, 0.0 }
 0x883   :  { %8241 = vmatmul.msk.f32.vlgmr.msra.gmra.mxu0 %vm385_vm1, %v13548_v41  ;;  %v3958_v16 = vpack.c.b16 %v3957_v1, %v3956_v58  ;;  %6616 = vadd.xlane.f32.xlu1 %v6615_v46  ;;  %v13868_v58 = vld [vmem:[%s15681_s8 + $0x20] sm:$0xff] }
 0x885   :  { %8218 = vmatmul.msk.bf16.vlgmr.msrb.gmra.mxu2 %vm1694_vm15, %v3958_v16  ;;  %v6020_v41 = vpop.permute.xlu0 %6019  ;;  %v6024_v16 = vpop.permute.xlu2 %6023 }
 0x886   :  { %8247 = vmatpush.xpose.msk.msrb.mxu2 %vm385_vm1, %v13563_v0  ;;  %v16282_v0 = vld [vmem:[#allocation67_spill] sm:$0xff] }
 0x88a   :  { %6607 = vadd.xlane.f32.xlu0 %v6606_v21  ;;  %8245 = vmatmul.msk.f32.vlgmr.msrb.gmra.mxu1 %vm385_vm1, %v13682_v13 }
 0x88b   :  { %8242 = vmatmul.msk.f32.gmra.mxu0 %vm385_vm1, %v13585_v35  ;;  %8248 = vmatpush.xpose.msk.msrb.mxu2 %vm385_vm1, %v13603_v36  ;;  %v16284_v35 = vld [vmem:[#allocation80_spill] sm:$0xff]  ;;  %v8853_v36 = vpop.eup %8852 }
 0x88d   :  { %v13789_v7 = vpop.permute.xlu0 %6017 }
 0x88e   :  { %v6068_v50 = vsel %vm385_vm1, %v13789_v7, 0.0 }
 0x892   :  { %8246 = vmatmul.msk.f32.gmra.mxu1 %vm385_vm1, %v13695_v10 }
 0x893   :  { %6573 = vrot.lane.b32.xlu2 %v16282_v0, %s9161_s5 }
 0x895   :  { %8233 = vmatmul.msk.f32.vlgmr.msra.gmra.mxu2 %vm385_vm1, %v13524_v44  ;;  %v3778_v44 = vmul.f32 %v8853_v36, %v13646_v34 }
 0x897   :  { %v3794_v40 = vpack.c.bf16 %v3778_v44, %v3778_v44 }
 0x89c   :  { %6571 = vrot.lane.b32.xlu1 %v16284_v35, %s9161_s5 }
 0x89d   :  { %8234 = vmatmul.msk.f32.gmra.mxu2 %vm385_vm1, %v13560_v33  ;;  %v3881_v33 = vunpack.c.l.b16 %v3794_v40 }
 0x89e   :  { %6025 = vrot.lane.b32.xlu0 %v16283_v25, %s9161_s5  ;;  %v6077_v25 = vsel %vm385_vm1, %v6024_v16, 0.0 }
 0x8a5   :  { %8249 = vmatmul.msk.f32.vlgmr.msrb.gmra.mxu2 %vm385_vm1, %v13641_v47 }
 0x8a7   :  { %v3731_v10 = vpop.xlane.xlu0 %3730 }
 0x8a8   :  { %8854 = vrcp.f32 %v3731_v10 }
 0x8ad   :  { %8250 = vmatmul.msk.f32.gmra.mxu2 %vm385_vm1, %v13648_v38 }
 0x8ae   :  { %v8855_v13 = vpop.eup %8854 }
 0x8af   :  { %v3779_v20 = vmul.f32 %v8855_v13, %v13700_v56  ;;  %v3755_v45 = vpop.xlane.xlu0 %3754 }
 0x8b0   :  { %8856 = vrcp.f32 %v3755_v45 }
 0x8b1   :  { %v3795_v8 = vpack.c.bf16 %v3779_v20, %v3779_v20  ;;  %8858 = vrcp.f32 %v3752_v61 }
 0x8b3   :  { %v3882_v26 = vunpack.c.l.b16 %v3795_v8 }
 0x8b5   :  { %v3883_v31 = vpack.c.b16 %v3882_v26, %v3881_v33  ;;  %v13904_v33 = vpop.xlane.xlu1 %6604 }
 0x8b6   :  { %v8857_v11 = vpop.eup %8856  ;;  %vm6658_vm10 = vcmp.eq.f32.partialorder %v13904_v33, inf  ;;  %vm6660_vm8 = vcmp.eq.f32.partialorder %v13904_v33, 0.0 }
 0x8b7   :  { %8215 = vmatmul.msk.bf16.vlgmr.msrb.gmra.mxu3 %vm1694_vm15, %v3883_v31  ;;  %v8859_v47 = vpop.eup %8858  ;;  %v3787_v34 = vmul.f32 %v8857_v11, %v13706_v2  ;;  %v6071_v2 = vsel %vm385_vm1, %v6020_v41, 0.0  ;;  %v16302_v31 = vld [vmem:[#allocation83_spill] sm:$0xff] }
 0x8b8   :  { %8235 = vmatpush.xpose.msk.msrb.mxu3 %vm385_vm1, %v13580_v17  ;;  %v3786_v56 = vmul.f32 %v8859_v47, %v13668_v18 }
 0x8b9   :  { %v3803_v38 = vpack.c.bf16 %v3787_v34, %v3787_v34 }
 0x8ba   :  { %v3802_v39 = vpack.c.bf16 %v3786_v56, %v3786_v56 }
 0x8bb   :  { %v3982_v54 = vunpack.c.l.b16 %v3803_v38  ;;  %v16305_v38 = vld [vmem:[#allocation30_spill] sm:$0xff] }
 0x8bc   :  { %8236 = vmatpush.xpose.msk.msrb.mxu3 %vm385_vm1, %v13664_v59  ;;  %v3981_v43 = vunpack.c.l.b16 %v3802_v39 }
 0x8bd   :  { %v13915_v34 = vpop.xlane.xlu1 %6060 }
 0x8be   :  { %v3983_v52 = vpack.c.b16 %v3982_v54, %v3981_v43  ;;  %v16308_v43 = vld [vmem:[#allocation73_spill] sm:$0xff]  ;;  %vm6114_vm7 = vcmp.eq.f32.partialorder %v13915_v34, inf  ;;  %vm6116_vm11 = vcmp.eq.f32.partialorder %v13915_v34, 0.0 }
 0x8c2   :  { %v6022_v19 = vpop.permute.xlu0 %6021 }
 0x8c3   :  { %v6074_v17 = vsel %vm385_vm1, %v6022_v19, 0.0 }
 0x8c5   :  { %v13923_v54 = vpop.xlane.xlu1 %6063 }
 0x8c6   :  { %6075 = vadd.xlane.f32.xlu1 %v6074_v17 }
 0x8c7   :  { %8219 = vmatmul.msk.bf16.vlgmr.msra.gmra.mxu3 %vm1694_vm15, %v3983_v52 }
 0x8c8   :  { %8251 = vmatpush.xpose.msk.msra.mxu3 %vm385_vm1, %v13686_v48  ;;  %6619 = vadd.xlane.f32.xlu0 %v6618_v5 }
 0x8ca   :  { %v6570_v18 = vpop.permute.xlu0 %6569 }
 0x8cb   :  { %v6624_v59 = vsel %vm385_vm1, %v6570_v18, 0.0  ;;  %v16311_v18 = vld [vmem:[#allocation41_spill] sm:$0xff] }
 0x8cc   :  { %8252 = vmatpush.xpose.msk.msra.mxu3 %vm385_vm1, %v13689_v28  ;;  %6625 = vadd.xlane.f32.xlu2 %v6624_v59  ;;  %v16289_v28 = vld [vmem:[#allocation18_spill] sm:$0xff] }
 0x8cd   :  { %v13933_v17 = vpop.xlane.xlu1 %6613 }
 0x8cf   :  { %v13819_v4 = vpop.f32.mrf.mxu0 }
 0x8d0   :  { %6072 = vadd.xlane.f32.xlu0 %v6071_v2  ;;  %16285 = vst [vmem:[#allocation49_spill] sm:$0xff] %v13819_v4 }
 0x8d2   :  { %v6568_v51 = vpop.permute.xlu0 %6567 }
 0x8d3   :  { %v6621_v1 = vsel %vm385_vm1, %v6568_v51, 0.0 }
 0x8d7   :  { %8237 = vmatmul.msk.f32.vlgmr.msrb.gmra.mxu3 %vm385_vm1, %v13678_v29  ;;  %v13821_v48 = vpop.f32.mrf.mxu1  ;;  %v13827_v62 = vpop.f32.mrf.mxu0 }
 0x8d8   :  { %16286 = vst [vmem:[#allocation96_spill] sm:$0xff] %v13821_v48  ;;  %v16319_v48 = vld [vmem:[#allocation98_spill] sm:$0xff] }
 0x8d9   :  { %16288 = vst [vmem:[#allocation39_spill] sm:$0xff] %v13827_v62 }
 0x8df   :  { %8238 = vmatmul.msk.f32.gmra.mxu3 %vm385_vm1, %v13684_v3  ;;  %6575 = vrot.lane.b32.xlu1 %v16287_v30, %s9161_s5  ;;  %v13835_v29 = vpop.f32.mrf.mxu1  ;;  %v16294_v3 = vld [vmem:[#allocation71_spill] sm:$0xff]  ;;  %v13939_v30 = vpop.xlane.xlu1 %6066 }
 0x8e0   :  { %16292 = vst [vmem:[#allocation34_spill] sm:$0xff] %v13835_v29  ;;  %v13841_v42 = vpop.f32.mrf.mxu0 }
 0x8e1   :  { %16295 = vst [vmem:[#allocation76_spill] sm:$0xff] %v13841_v42 }
 0x8e4   :  { %6027 = vrot.lane.b32.xlu0 %v16289_v28, %s9161_s5  ;;  %6029 = vrot.lane.b32.xlu2 %v16290_v63, %s9161_s5  ;;  %v16313_v28 = vld [vmem:[#allocation53_spill] sm:$0xff] }
 0x8e7   :  { %8253 = vmatmul.msk.f32.vlgmr.msra.gmra.mxu3 %vm385_vm1, %v16291_v22  ;;  %6579 = vrot.lane.b32.xlu1 %v16293_v14, %s9161_s5  ;;  %v13845_v15 = vpop.f32.mrf.mxu1 }
 0x8e8   :  { %16297 = vst [vmem:[#allocation97_spill] sm:$0xff] %v13845_v15  ;;  %v13849_v53 = vpop.f32.mrf.mxu0 }
 0x8e9   :  { %16299 = vst [vmem:[#allocation88_spill] sm:$0xff] %v13849_v53 }
 0x8ec   :  { %6577 = vrot.lane.b32.xlu2 %v16294_v3, %s9161_s5 }
 0x8ed   :  { %v13900_v45 = vpop.f32.mrf.mxu2 }
 0x8ee   :  { %16301 = vst [vmem:[#allocation55_spill] sm:$0xff] %v13900_v45  ;;  %v13943_v22 = vpop.xlane.xlu2 %6610 }
 0x8ef   :  { %8254 = vmatmul.msk.f32.gmra.mxu3 %vm385_vm1, %v16296_v37  ;;  %v13851_v49 = vpop.f32.mrf.mxu1  ;;  %v16314_v37 = vld [vmem:[#allocation87_spill] sm:$0xff] }
 0x8f0   :  { %16300 = vst [vmem:[#allocation91_spill] sm:$0xff] %v13851_v49  ;;  %v5231_v24 = vpop.f32.mrf.mxu0 }
 0x8f1   :  { %v13875_v46 = vadd.f32 %v13868_v58, %v5231_v24 }
 0x8f3   :  { %v5538_v0 = vsel %vm1694_vm15, %v13875_v46, -inf }
 0x8f4   :  { %6035 = vrot.lane.b32.xlu2 %v16298_v27, %s9161_s5 }
 0x8f5   :  { %v13913_v47 = vpop.f32.mrf.mxu2 }
 0x8f6   :  { %16303 = vst [vmem:[#allocation92_spill] sm:$0xff] %v13913_v47  ;;  %v13945_v3 = vpop.xlane.xlu1 %6616 }
 0x8f7   :  { %v5274_v57 = vpop.f32.mrf.mxu1 }
 0x8f8   :  { %v5234_v60 = vpop.f32.mrf.mxu0  ;;  %v13872_v6 = vadd.f32 %v13868_v58, %v5274_v57 }
 0x8f9   :  { %v13861_v23 = vadd.f32 %v13856_v12, %v5234_v60 }
 0x8fa   :  { %v5544_v41 = vsel %vm1694_vm15, %v13872_v6, -inf }
 0x8fb   :  { %v5541_v55 = vsel %vm1694_vm15, %v13861_v23, -inf }
 0x8fd   :  { %v13952_v24 = vpop.xlane.xlu0 %6607 }
 0x8fe   :  { %vm6670_vm2 = vcmp.eq.f32.partialorder %v13952_v24, inf  ;;  %vm6672_vm5 = vcmp.eq.f32.partialorder %v13952_v24, 0.0 }
 0x8ff   :  { %v5277_v32 = vpop.f32.mrf.mxu1 }
 0x900   :  { %v5403_v21 = vpop.f32.mrf.mxu0  ;;  %v13883_v7 = vadd.f32 %v13856_v12, %v5277_v32 }
 0x901   :  { %v13886_v35 = vadd.f32 %v13868_v58, %v5403_v21 }
 0x902   :  { %v5547_v10 = vsel %vm1694_vm15, %v13883_v7, -inf }
 0x903   :  { %v5562_v44 = vsel %vm1694_vm15, %v13886_v35, -inf }
 0x907   :  { %v5446_v9 = vpop.f32.mrf.mxu1 }
 0x908   :  { %v5406_v36 = vpop.f32.mrf.mxu0  ;;  %v13907_v26 = vadd.f32 %v13868_v58, %v5446_v9  ;;  %v13921_v39 = vpop.f32.mrf.mxu2 }
 0x909   :  { %v13893_v40 = vadd.f32 %v13856_v12, %v5406_v36  ;;  %16306 = vst [vmem:[#allocation68_spill] sm:$0xff] %v13921_v39 }
 0x90a   :  { %v5568_v11 = vsel %vm1694_vm15, %v13907_v26, -inf }
 0x90b   :  { %v5565_v20 = vsel %vm1694_vm15, %v13893_v40, -inf }
 0x90e   :  { %6069 = vadd.xlane.f32.xlu0 %v6068_v50  ;;  %v13956_v50 = vpop.permute.xlu2 %6573  ;;  %v13958_v32 = vpop.permute.xlu1 %6571 }
 0x90f   :  { %v5449_v13 = vpop.f32.mrf.mxu1 }
 0x910   :  { %v13896_v61 = vadd.f32 %v13856_v12, %v5449_v13  ;;  %v13929_v52 = vpop.f32.mrf.mxu2 }
 0x911   :  { %5542 = vmax.xlane.f32.xlu1 %v5541_v55  ;;  %16309 = vst [vmem:[#allocation99_spill] sm:$0xff] %v13929_v52  ;;  %v6026_v55 = vpop.permute.xlu0 %6025 }
 0x912   :  { %v5571_v8 = vsel %vm1694_vm15, %v13896_v61, -inf  ;;  %v6080_v21 = vsel %vm385_vm1, %v6026_v55, 0.0 }
 0x916   :  { %6622 = vadd.xlane.f32.xlu0 %v6621_v1 }
 0x918   :  { %v5317_v59 = vpop.f32.mrf.mxu2 }
 0x919   :  { %5545 = vmax.xlane.f32.xlu1 %v5544_v41  ;;  %v13950_v27 = vadd.f32 %v13868_v58, %v5317_v59 }
 0x91b   :  { %v5550_v60 = vsel %vm1694_vm15, %v13950_v27, -inf }
 0x91d   :  { %5539 = vmax.xlane.f32.xlu2 %v5538_v0 }
 0x91e   :  { %6078 = vadd.xlane.f32.xlu0 %v6077_v25 }
 0x920   :  { %v5320_v14 = vpop.f32.mrf.mxu2 }
 0x921   :  { %5548 = vmax.xlane.f32.xlu1 %v5547_v10 }
 0x925   :  { %5563 = vmax.xlane.f32.xlu2 %v5562_v44 }
 0x928   :  { %v5489_v51 = vpop.f32.mrf.mxu2 }
 0x929   :  { %5566 = vmax.xlane.f32.xlu1 %v5565_v20  ;;  %v13961_v1 = vadd.f32 %v13868_v58, %v5489_v51 }
 0x92b   :  { %v5574_v0 = vsel %vm1694_vm15, %v13961_v1, -inf }
 0x92d   :  { %5572 = vmax.xlane.f32.xlu2 %v5571_v8  ;;  %v16315_v8 = vld [vmem:[#allocation16_spill] sm:$0xff] }
 0x931   :  { %5569 = vmax.xlane.f32.xlu1 %v5568_v11  ;;  %v13986_v11 = vadd.f32 %v13856_v12, %v5320_v14 }
 0x932   :  { %6581 = vrot.lane.b32.xlu0 %v16302_v31, %s9161_s5 }
 0x939   :  { %v13964_v9 = vpop.xlane.xlu1 %6075 }
 0x93a   :  { %v13917_v56 = vpop.f32.mrf.mxu3  ;;  %6031 = vrot.lane.b32.xlu0 %v16305_v38, %s9161_s5  ;;  %v5553_v38 = vsel %vm1694_vm15, %v13986_v11, -inf }
 0x93b   :  { %16304 = vst [vmem:[#allocation81_spill] sm:$0xff] %v13917_v56 }
 0x93f   :  { %v13966_v41 = vpop.xlane.xlu2 %6625 }
 0x942   :  { %v13925_v19 = vpop.f32.mrf.mxu3 }
 0x943   :  { %16307 = vst [vmem:[#allocation52_spill] sm:$0xff] %v13925_v19 }
 0x945   :  { %6583 = vrot.lane.b32.xlu2 %v16308_v43, %s9161_s5 }
 0x947   :  { %v13977_v13 = vpop.permute.xlu2 %6029 }
 0x94a   :  { %v13931_v5 = vpop.f32.mrf.mxu3  ;;  %6033 = vrot.lane.b32.xlu1 %v16311_v18, %s9161_s5 }
 0x94b   :  { %16310 = vst [vmem:[#allocation89_spill] sm:$0xff] %v13931_v5 }
 0x94f   :  { %v13983_v31 = vpop.permute.xlu2 %6577 }
 0x951   :  { %v13973_v36 = vpop.permute.xlu1 %6575 }
 0x952   :  { %v13937_v2 = vpop.f32.mrf.mxu3  ;;  %5735 = vrot.lane.b32.xlu1 %v16313_v28, %s9160_s28 }
 0x953   :  { %16312 = vst [vmem:[#allocation9_spill] sm:$0xff] %v13937_v2 }
 0x957   :  { %v13993_v59 = vpop.permute.xlu2 %6035 }
 0x959   :  { %v13979_v20 = vpop.permute.xlu1 %6579 }
 0x95a   :  { %v5360_v63 = vpop.f32.mrf.mxu3  ;;  %6585 = vrot.lane.b32.xlu1 %v16314_v37, %s9161_s5 }
 0x95b   :  { %v13991_v18 = vadd.f32 %v13868_v58, %v5360_v63 }
 0x95d   :  { %v5556_v37 = vsel %vm1694_vm15, %v13991_v18, -inf }
 0x962   :  { %v5363_v57 = vpop.f32.mrf.mxu3 }
 0x963   :  { %v14000_v14 = vadd.f32 %v13856_v12, %v5363_v57 }
 0x964   :  { %5551 = vmax.xlane.f32.xlu0 %v5550_v60  ;;  %v13997_v60 = vpop.xlane.xlu0 %6619 }
 0x96a   :  { %v5532_v16 = vpop.f32.mrf.mxu3 }
 0x96c   :  { %6081 = vadd.xlane.f32.xlu0 %v6080_v21  ;;  %v5559_v21 = vsel %vm1694_vm15, %v14000_v14, -inf }
 0x96e   :  { %5575 = vmax.xlane.f32.xlu2 %v5574_v0  ;;  %v5492_v0 = vpop.f32.mrf.mxu2 }
 0x972   :  { %v5535_v25 = vpop.f32.mrf.mxu3 }
 0x973   :  { %v13971_v10 = vadd.f32 %v13856_v12, %v5535_v25 }
 0x975   :  { %v5583_v44 = vsel %vm1694_vm15, %v13971_v10, -inf }
 0x976   :  { %5584 = vmax.xlane.f32.xlu2 %v5583_v44 }
 0x980   :  { %6037 = vrot.lane.b32.xlu0 %v16315_v8, %s9161_s5  ;;  %v14006_v8 = vpop.xlane.xlu0 %6072 }
 0x984   :  { %5554 = vmax.xlane.f32.xlu1 %v5553_v38  ;;  %v5543_v43 = vpop.xlane.xlu1 %5542  ;;  %v14009_v38 = vadd.f32 %v13856_v12, %v5492_v0  ;;  %v14018_v12 = vadd.f32 %v13868_v58, %v5532_v16 }
 0x985   :  { %v5587_v57 = vsub.f32 %v13861_v23, %v5543_v43 }
 0x986   :  { %v5577_v49 = vsel %vm1694_vm15, %v14009_v38, -inf }
 0x98c   :  { %5557 = vmax.xlane.f32.xlu1 %v5556_v37  ;;  %v5546_v51 = vpop.xlane.xlu1 %5545 }
 0x98d   :  { %v5588_v23 = vsub.f32 %v13872_v6, %v5546_v51 }
 0x990   :  { %v5540_v55 = vpop.xlane.xlu2 %5539 }
 0x991   :  { %v5586_v25 = vsub.f32 %v13875_v46, %v5540_v55  ;;  %v6028_v55 = vpop.permute.xlu0 %6027 }
 0x992   :  { %v6083_v6 = vsel %vm385_vm1, %v6028_v55, 0.0 }
 0x993   :  { %v5602_v2 = vmul.f32 1.442695, %v5586_v25 }
 0x994   :  { %5560 = vmax.xlane.f32.xlu1 %v5559_v21  ;;  %v5549_v63 = vpop.xlane.xlu1 %5548 }
 0x995   :  { %v5589_v44 = vsub.f32 %v13883_v7, %v5549_v63  ;;  %v5604_v7 = vmul.f32 1.442695, %v5587_v57 }
 0x997   :  { %v5608_v37 = vmul.f32 1.442695, %v5589_v44 }
 0x998   :  { %v5564_v52 = vpop.xlane.xlu2 %5563 }
 0x999   :  { %8860 = vpow2.f32 %v5608_v37  ;;  %v5594_v46 = vsub.f32 %v13886_v35, %v5564_v52  ;;  %v5580_v35 = vsel %vm1694_vm15, %v14018_v12, -inf  ;;  %v14028_v58 = vpop.xlane.xlu0 %6069 }
 0x99a   :  { %8862 = vpow2.f32 %v5602_v2  ;;  %v5606_v2 = vmul.f32 1.442695, %v5588_v23 }
 0x99b   :  { %v5618_v63 = vmul.f32 1.442695, %v5594_v46  ;;  %8864 = vpow2.f32 %v5604_v7 }
 0x99c   :  { %5578 = vmax.xlane.f32.xlu1 %v5577_v49  ;;  %v5567_v43 = vpop.xlane.xlu1 %5566 }
 0x99d   :  { %8866 = vpow2.f32 %v5618_v63  ;;  %v5595_v52 = vsub.f32 %v13893_v40, %v5567_v43 }
 0x99e   :  { %8868 = vpow2.f32 %v5606_v2 }
 0x99f   :  { %v14015_v21 = vpop.eup %8860  ;;  %v5620_v51 = vmul.f32 1.442695, %v5595_v52 }
 0x9a0   :  { %v5643_v0 = vsel %vm1694_vm15, %v14015_v21, 0.0  ;;  %v14023_v49 = vpop.eup %8862 }
 0x9a1   :  { %5644 = vadd.xlane.f32.xlu2 %v5643_v0  ;;  %v5634_v16 = vsel %vm1694_vm15, %v14023_v49, 0.0  ;;  %v14032_v25 = vpop.eup %8864  ;;  %8870 = vpow2.f32 %v5620_v51  ;;  %v14043_v46 = vpop.xlane.xlu0 %6622  ;;  %v16317_v51 = vld [vmem:[#allocation95_spill] sm:$0xff] }
 0x9a2   :  { %v5637_v37 = vsel %vm1694_vm15, %v14032_v25, 0.0 }
 0x9a3   :  { %v14035_v44 = vpop.eup %8866 }
 0x9a4   :  { %5581 = vmax.xlane.f32.xlu1 %v5580_v35  ;;  %v5658_v40 = vsel %vm1694_vm15, %v14035_v44, 0.0  ;;  %v14041_v57 = vpop.eup %8868  ;;  %v5570_v0 = vpop.xlane.xlu1 %5569  ;;  %v6630_v35 = vsel %vm385_vm1, %v13956_v50, 0.0 }
 0x9a5   :  { %v5640_v55 = vsel %vm1694_vm15, %v14041_v57, 0.0  ;;  %v5596_v53 = vsub.f32 %v13907_v26, %v5570_v0 }
 0x9a7   :  { %v14045_v7 = vpop.eup %8870 }
 0x9a8   :  { %v5661_v63 = vsel %vm1694_vm15, %v14045_v7, 0.0 }
 0x9a9   :  { %6084 = vadd.xlane.f32.xlu2 %v6083_v6  ;;  %v14051_v23 = vpop.xlane.xlu0 %6078  ;;  %v16316_v6 = vld [vmem:[#allocation47_spill] sm:$0xff] }
 0x9aa   :  { %5635 = vadd.xlane.f32.xlu0 %v5634_v16 }
 0x9ac   :  { %5638 = vadd.xlane.f32.xlu1 %v5637_v37 }
 0x9b1   :  { %v14057_v52 = vpop.permute.xlu0 %6581 }
 0x9b2   :  { %5659 = vadd.xlane.f32.xlu0 %v5658_v40 }
 0x9b4   :  { %5641 = vadd.xlane.f32.xlu1 %v5640_v55 }
 0x9b9   :  { %v14059_v16 = vpop.permute.xlu0 %6031 }
 0x9ba   :  { %5662 = vadd.xlane.f32.xlu0 %v5661_v63  ;;  %v5573_v63 = vpop.xlane.xlu2 %5572 }
 0x9bb   :  { %v5597_v39 = vsub.f32 %v13896_v61, %v5573_v63 }
 0x9bc   :  { %v14053_v43 = vpop.permute.xlu1 %6033 }
 0x9c2   :  { %6631 = vadd.xlane.f32.xlu0 %v6630_v35 }
 0x9c4   :  { %v5736_v2 = vpop.permute.xlu1 %5735 }
 0x9c5   :  { %5748 = vmatpush.bf16.msrb.mxu0 %v5736_v2  ;;  %v14070_v2 = vpop.permute.xlu2 %6583 }
 0x9cc   :  { %v14073_v19 = vpop.permute.xlu1 %6585 }
 0x9cd   :  { %6039 = vrot.lane.b32.xlu1 %v16316_v6, %s9161_s5  ;;  %v5622_v6 = vmul.f32 1.442695, %v5596_v53 }
 0x9d6   :  { %5760 = vrot.lane.b32.xlu0 %v16317_v51, %s9160_s28 }
 0x9d7   :  { %v5552_v37 = vpop.xlane.xlu0 %5551 }
 0x9d8   :  { %v5590_v40 = vsub.f32 %v13950_v27, %v5552_v37  ;;  %v6627_v37 = vsel %vm385_vm1, %v13958_v32, 0.0 }
 0x9da   :  { %v5610_v55 = vmul.f32 1.442695, %v5590_v40 }
 0x9dc   :  { %8872 = vpow2.f32 %v5610_v55 }
 0x9dd   :  { %8874 = vpow2.f32 %v5622_v6 }
 0x9df   :  { %v14100_v6 = vpop.xlane.xlu0 %6081 }
 0x9e1   :  { %v5576_v5 = vpop.xlane.xlu2 %5575 }
 0x9e2   :  { %v14066_v50 = vpop.eup %8872  ;;  %v5598_v27 = vsub.f32 %v13961_v1, %v5576_v5  ;;  %v5624_v5 = vmul.f32 1.442695, %v5597_v39 }
 0x9e3   :  { %v5646_v35 = vsel %vm1694_vm15, %v14066_v50, 0.0 }
 0x9e4   :  { %5647 = vadd.xlane.f32.xlu2 %v5646_v35  ;;  %v5626_v40 = vmul.f32 1.442695, %v5598_v27  ;;  %v14079_v35 = vpop.eup %8874 }
 0x9e5   :  { %v5664_v53 = vsel %vm1694_vm15, %v14079_v35, 0.0 }
 0x9e6   :  { %8876 = vpow2.f32 %v5626_v40 }
 0x9ec   :  { %v14086_v32 = vpop.eup %8876 }
 0x9ed   :  { %v5670_v61 = vsel %vm1694_vm15, %v14086_v32, 0.0 }
 0x9f7   :  { %6628 = vadd.xlane.f32.xlu1 %v6627_v37  ;;  %v5555_v55 = vpop.xlane.xlu1 %5554 }
 0x9f8   :  { %v5591_v47 = vsub.f32 %v13986_v11, %v5555_v55 }
 0x9fa   :  { %v5612_v26 = vmul.f32 1.442695, %v5591_v47 }
 0x9fc   :  { %8878 = vpow2.f32 %v5612_v26 }
 0x9fd   :  { %8880 = vpow2.f32 %v5624_v5 }
 0x9fe   :  { %8882 = vrsqrt.f32 %v13904_v33 }
 0x9ff   :  { %v14084_v1 = vpop.xlane.xlu1 %5557  ;;  %8884 = vrsqrt.f32 %v13915_v34 }
 0xa00   :  { %5665 = vadd.xlane.f32.xlu0 %v5664_v53  ;;  %8886 = vrsqrt.f32 %v13952_v24  ;;  %v16318_v53 = vld [vmem:[#allocation101_spill] sm:$0xff] }
 0xa02   :  { %v14088_v0 = vpop.eup %8878 }
 0xa03   :  { %v5649_v11 = vsel %vm1694_vm15, %v14088_v0, 0.0  ;;  %v14097_v39 = vpop.eup %8880 }
 0xa04   :  { %5650 = vadd.xlane.f32.xlu2 %v5649_v11  ;;  %v8883_v63 = vpop.eup %8882  ;;  %v5667_v27 = vsel %vm1694_vm15, %v14097_v39, 0.0 }
 0xa05   :  { %v6652_v37 = vmul.f32 %v8883_v63, %v13904_v33  ;;  %v8885_v40 = vpop.eup %8884 }
 0xa06   :  { %v6108_v11 = vmul.f32 %v8885_v40, %v13915_v34  ;;  %v8887_v42 = vpop.eup %8886 }
 0xa07   :  { %v14095_v47 = vpop.xlane.xlu1 %5560  ;;  %v6653_v5 = vmul.f32 %v8883_v63, %v6652_v37  ;;  %v6664_v29 = vmul.f32 %v8887_v42, %v13952_v24 }
 0xa08   :  { %5671 = vadd.xlane.f32.xlu0 %v5670_v61  ;;  %v14110_v61 = vpop.permute.xlu0 %6037  ;;  %v6109_v56 = vmul.f32 %v8885_v40, %v6108_v11 }
 0xa0c   :  { %5668 = vadd.xlane.f32.xlu2 %v5667_v27  ;;  %v6654_v27 = vmul.f32 0.5, %v6653_v5 }
 0xa0f   :  { %v5579_v55 = vpop.xlane.xlu1 %5578 }
 0xa10   :  { %v5599_v26 = vsub.f32 %v14009_v38, %v5579_v55  ;;  %5835 = vrot.lane.b32.xlu1 %v16318_v53, %s9160_s28  ;;  %v6655_v38 = vsub.f32 1.5, %v6654_v27  ;;  %v6110_v55 = vmul.f32 0.5, %v6109_v56  ;;  %v6086_v27 = vsel %vm385_vm1, %v13977_v13, 0.0 }
 0xa12   :  { %v5628_v15 = vmul.f32 1.442695, %v5599_v26  ;;  %v6656_v5 = vmul.f32 %v8883_v63, %v6655_v38  ;;  %v6111_v11 = vsub.f32 1.5, %v6110_v55  ;;  %v6661_v55 = vand.u32 2147483648, %v13904_v33 }
 0xa14   :  { %8888 = vpow2.f32 %v5628_v15  ;;  %v6665_v15 = vmul.f32 %v8887_v42, %v6664_v29  ;;  %v6657_v28 = vmul.f32 %v6656_v5, %v13904_v33  ;;  %v16320_v29 = vld [vmem:[#allocation44_spill] sm:$0xff] }
 0xa16   :  { %v6666_v53 = vmul.f32 0.5, %v6665_v15  ;;  %v6659_v63 = vsel %vm6658_vm10, %v13904_v33, %v6657_v28 }
 0xa17   :  { %v14112_v45 = vpop.xlane.xlu1 %5581  ;;  %v6662_v13 = vsel %vm6660_vm8, %v6661_v55, %v6659_v63  ;;  %v5592_v63 = vsub.f32 %v13991_v18, %v14084_v1 }
 0xa18   :  { %5785 = vrot.lane.b32.xlu1 %v16319_v48, %s9160_s28  ;;  %v6112_v48 = vmul.f32 %v8885_v40, %v6111_v11  ;;  %v14141_v5 = vmax.f32 %v6662_v13, 1e-12 }
 0xa1a   :  { %v14117_v4 = vpop.eup %8888  ;;  %vm6864_vm12 = vweird.f32 %v14141_v5 }
 0xa1b   :  { %v5673_v26 = vsel %vm1694_vm15, %v14117_v4, 0.0 }
 0xa1c   :  { %5674 = vadd.xlane.f32.xlu0 %v5673_v26  ;;  %v14135_v26 = vpop.xlane.xlu2 %5584 }
 0xa1d   :  { %v5636_v37 = vpop.xlane.xlu0 %5635 }
 0xa1e   :  { %8890 = vrcp.f32 %v5636_v37  ;;  %v6667_v37 = vsub.f32 1.5, %v6666_v53 }
 0xa1f   :  { %v5639_v62 = vpop.xlane.xlu1 %5638 }
 0xa20   :  { %8892 = vrcp.f32 %v5639_v62  ;;  %v6113_v62 = vmul.f32 %v6112_v48, %v13915_v34  ;;  %v6668_v40 = vmul.f32 %v8887_v42, %v6667_v37  ;;  %v6117_v48 = vand.u32 2147483648, %v13915_v34 }
 0xa21   :  { %8894 = vrcp.f32 %v14141_v5 }
 0xa22   :  { %v6115_v53 = vsel %vm6114_vm7, %v13915_v34, %v6113_v62  ;;  %v6669_v42 = vmul.f32 %v6668_v40, %v13952_v24 }
 0xa24   :  { %v8891_v51 = vpop.eup %8890  ;;  %6087 = vadd.xlane.f32.xlu0 %v6086_v27  ;;  %6041 = vrot.lane.b32.xlu2 %v16320_v29, %s9161_s5  ;;  %v6671_v34 = vsel %vm6670_vm2, %v13952_v24, %v6669_v42  ;;  %v5645_v62 = vpop.xlane.xlu2 %5644 }
 0xa25   :  { %v5698_v56 = vmul.f32 %v8891_v51, %v14023_v49  ;;  %v14137_v28 = vpop.xlane.xlu0 %5659 }
 0xa26   :  { %v8893_v38 = vpop.eup %8892 }
 0xa27   :  { %v5714_v49 = vpack.c.bf16 %v5698_v56, %v5698_v56  ;;  %v5699_v51 = vmul.f32 %v8893_v38, %v14032_v25  ;;  %v6636_v25 = vsel %vm385_vm1, %v13983_v31, 0.0  ;;  %v6118_v56 = vsel %vm6116_vm11, %v6117_v48, %v6115_v53  ;;  %v5642_v29 = vpop.xlane.xlu1 %5641  ;;  %v8895_v13 = vpop.eup %8894 }
 0xa28   :  { %v14147_v37 = vmax.f32 %v6118_v56, 1e-12  ;;  %v6673_v31 = vand.u32 2147483648, %v13952_v24  ;;  %8896 = vrcp.f32 %v5642_v29  ;;  %v6860_v1 = vmul.f32 %v8895_v13, %v14141_v5 }
 0xa29   :  { %v5715_v15 = vpack.c.bf16 %v5699_v51, %v5699_v51  ;;  %v5732_v33 = vunpack.c.l.b16 %v5714_v49  ;;  %v6633_v49 = vsel %vm385_vm1, %v13973_v36, 0.0  ;;  %v5614_v51 = vmul.f32 1.442695, %v5592_v63 }
 0xa2a   :  { %8898 = vrcp.f32 %v14147_v37  ;;  %v6674_v38 = vsel %vm6672_vm5, %v6673_v31, %v6671_v34  ;;  %v6089_v48 = vsel %vm385_vm1, %v14059_v16, 0.0  ;;  %vm6865_vm14 = vweird.f32 %v8895_v13 }
 0xa2b   :  { %v5733_v11 = vunpack.c.l.b16 %v5715_v15  ;;  %8900 = vrcp.f32 %v5645_v62  ;;  %v14161_v40 = vmax.f32 %v6674_v38, 1e-12  ;;  %v5593_v15 = vsub.f32 %v14000_v14, %v14095_v47  ;;  %vm6866_vm3 = vmor %vm6864_vm12, %vm6865_vm14 }
 0xa2c   :  { %6637 = vadd.xlane.f32.xlu0 %v6636_v25  ;;  %8902 = vpow2.f32 %v5614_v51  ;;  %v6870_v51 = vand.u32 2147483648, %v14141_v5  ;;  %vm6320_vm4 = vweird.f32 %v14147_v37  ;;  %vm6126_vm5 = vcmp.eq.f32.partialorder %v13923_v54, inf }
 0xa2d   :  { %v5734_v27 = vpack.c.b16 %v5733_v11, %v5732_v33  ;;  %v14157_v55 = vpop.xlane.xlu0 %5662  ;;  %8904 = vrcp.f32 %v14161_v40  ;;  %v6861_v33 = vsub.f32 1.0, %v6860_v1  ;;  %vm6879_vm7 = vweird.f32 %v14161_v40 }
 0xa2e   :  { %v8897_v18 = vpop.eup %8896  ;;  %vm6694_vm14 = vcmp.eq.f32.partialorder %v13933_v17, inf  ;;  %vm6138_vm12 = vcmp.eq.f32.partialorder %v13939_v30, inf }
 0xa2f   :  { %8255 = vmatmul.msk.bf16.vlgmr.msrb.gmra.mxu0 %vm1694_vm15, %v5734_v27  ;;  %v5700_v36 = vmul.f32 %v8897_v18, %v14041_v57  ;;  %v5616_v27 = vmul.f32 1.442695, %v5593_v15  ;;  %v6862_v14 = vmul.f32 %v8895_v13, %v6861_v33  ;;  %v6868_v18 = vand.u32 2147483647, %v14141_v5 }
 0xa30   :  { %v14164_v24 = vpop.eup %8898  ;;  %v6871_v33 = vor.u32 1.1754944e-38, %v6870_v51  ;;  %v6326_v5 = vand.u32 2147483648, %v14147_v37 }
 0xa31   :  { %v8901_v53 = vpop.eup %8900  ;;  %v6316_v11 = vmul.f32 %v14164_v24, %v14147_v37  ;;  %v5716_v29 = vpack.c.bf16 %v5700_v36, %v5700_v36  ;;  %8906 = vpow2.f32 %v5616_v27  ;;  %v6863_v31 = vadd.f32 %v8895_v13, %v6862_v14 }
 0xa32   :  { %v5701_v25 = vmul.f32 %v8901_v53, %v14015_v21  ;;  %v14177_v42 = vpop.eup %8902  ;;  %8908 = vrsqrt.f32 %v13923_v54  ;;  %vm6321_vm13 = vweird.f32 %v14164_v24  ;;  %vm6869_vm9 = vcmp.eq.f32.partialorder %v6868_v18, 8.507059e+37  ;;  %v16322_v18 = vld [vmem:[#allocation10_spill] sm:$0xff] }
 0xa33   :  { %v14179_v34 = vpop.eup %8904  ;;  %v6317_v57 = vsub.f32 1.0, %v6316_v11  ;;  %v5652_v16 = vsel %vm1694_vm15, %v14177_v42, 0.0  ;;  %v5757_v63 = vunpack.c.l.b16 %v5716_v29  ;;  %8910 = vrsqrt.f32 %v13933_v17  ;;  %vm6322_vm6 = vmor %vm6320_vm4, %vm6321_vm13 }
 0xa34   :  { %6634 = vadd.xlane.f32.xlu0 %v6633_v49  ;;  %v5717_v47 = vpack.c.bf16 %v5701_v25, %v5701_v25  ;;  %v6875_v21 = vmul.f32 %v14179_v34, %v14161_v40  ;;  %v6867_v15 = vsel %vm6866_vm3, %v8895_v13, %v6863_v31  ;;  %8912 = vrsqrt.f32 %v13939_v30 }
 0xa35   :  { %v14175_v56 = vpop.xlane.xlu0 %6631  ;;  %v6318_v62 = vmul.f32 %v14164_v24, %v6317_v57  ;;  %v6324_v11 = vand.u32 2147483647, %v14147_v37  ;;  %v6872_v25 = vsel %vm6869_vm9, %v6871_v33, %v6867_v15  ;;  %v6327_v57 = vor.u32 1.1754944e-38, %v6326_v5 }
 0xa36   :  { %v5758_v38 = vunpack.c.l.b16 %v5717_v47  ;;  %v6876_v53 = vsub.f32 1.0, %v6875_v21  ;;  %8914 = vrsqrt.f32 %v13943_v22  ;;  %vm6880_vm8 = vweird.f32 %v14179_v34 }
 0xa37   :  { %v6319_v36 = vadd.f32 %v14164_v24, %v6318_v62  ;;  %vm6325_vm10 = vcmp.eq.f32.partialorder %v6324_v11, 8.507059e+37  ;;  %v6885_v62 = vand.u32 2147483648, %v14161_v40  ;;  %8916 = vrsqrt.f32 %v13945_v3  ;;  %vm6881_vm11 = vmor %vm6879_vm7, %vm6880_vm8 }
 0xa38   :  { %v5759_v1 = vpack.c.b16 %v5758_v38, %v5757_v63  ;;  %v6877_v13 = vmul.f32 %v14179_v34, %v6876_v53  ;;  %v6883_v38 = vand.u32 2147483647, %v14161_v40  ;;  %v14217_v53 = vstv %s8263_s1 }
 0xa39   :  { %v6323_v29 = vsel %vm6322_vm6, %v14164_v24, %v6319_v36  ;;  %v6642_v36 = vsel %vm385_vm1, %v14057_v52, 0.0  ;;  %v6886_v33 = vor.u32 1.1754944e-38, %v6885_v62  ;;  %8918 = vrsqrt.f32 %v13997_v60 }
 0xa3a   :  { %v6328_v37 = vsel %vm6325_vm10, %v6327_v57, %v6323_v29  ;;  %v6878_v31 = vadd.f32 %v14179_v34, %v6877_v13  ;;  %vm6884_vm2 = vcmp.eq.f32.partialorder %v6883_v38, 8.507059e+37  ;;  %8920 = vrsqrt.f32 %v13964_v9 }
 0xa3b   :  { %8922 = vrsqrt.f32 %v14006_v8  ;;  %vm6128_vm3 = vcmp.eq.f32.partialorder %v13923_v54, 0.0  ;;  %vm6696_vm13 = vcmp.eq.f32.partialorder %v13933_v17, 0.0  ;;  %vm6140_vm9 = vcmp.eq.f32.partialorder %v13939_v30, 0.0 }
 0xa3c   :  { %6090 = vadd.xlane.f32.xlu0 %v6089_v48  ;;  %v14193_v48 = vpop.eup %8906  ;;  %v6882_v15 = vsel %vm6881_vm11, %v14179_v34, %v6878_v31  ;;  %v16323_v34 = vld [vmem:[#allocation46_spill] sm:$0xff]  ;;  %8924 = vrsqrt.f32 %v13966_v41  ;;  %vm6682_vm4 = vcmp.eq.f32.partialorder %v13943_v22, inf  ;;  %vm6706_vm6 = vcmp.eq.f32.partialorder %v13945_v3, inf }
 0xa3d   :  { %v5655_v27 = vsel %vm1694_vm15, %v14193_v48, 0.0  ;;  %v8909_v14 = vpop.eup %8908  ;;  %8926 = vrsqrt.f32 %v14028_v58  ;;  %vm6684_vm10 = vcmp.eq.f32.partialorder %v13943_v22, 0.0  ;;  %vm6708_vm8 = vcmp.eq.f32.partialorder %v13945_v3, 0.0 }
 0xa3e   :  { %v8911_v47 = vpop.eup %8910  ;;  %v6120_v24 = vmul.f32 %v8909_v14, %v13923_v54  ;;  %8928 = vrcp.f32 %v14157_v55  ;;  %vm6718_vm7 = vcmp.eq.f32.partialorder %v13997_v60, inf  ;;  %vm6720_vm11 = vcmp.eq.f32.partialorder %v13997_v60, 0.0 }
 0xa3f   :  { %v8913_v21 = vpop.eup %8912  ;;  %8930 = vrcp.f32 %v14137_v28 }
 0xa40   :  { %v6132_v51 = vmul.f32 %v8913_v21, %v13939_v30  ;;  %v8915_v5 = vpop.eup %8914  ;;  %v6121_v11 = vmul.f32 %v8909_v14, %v6120_v24 }
 0xa41   :  { %v8917_v29 = vpop.eup %8916  ;;  %v6676_v57 = vmul.f32 %v8915_v5, %v13943_v22 }
 0xa42   :  { %5653 = vadd.xlane.f32.xlu1 %v5652_v16  ;;  %v16321_v16 = vld [vmem:[#allocation42_spill] sm:$0xff]  ;;  %v6700_v31 = vmul.f32 %v8917_v29, %v13945_v3 }
 0xa43   :  { %v6873_v63 = vmul.f32 %v6872_v25, %v16321_v16  ;;  %v6133_v25 = vmul.f32 %v8913_v21, %v6132_v51  ;;  %v6122_v16 = vmul.f32 0.5, %v6121_v11  ;;  %v6677_v62 = vmul.f32 %v8915_v5, %v6676_v57 }
 0xa44   :  { %v6701_v51 = vmul.f32 %v8917_v29, %v6700_v31 }
 0xa45   :  { %v6134_v52 = vmul.f32 0.5, %v6133_v25  ;;  %v6123_v24 = vsub.f32 1.5, %v6122_v16 }
 0xa46   :  { %v6702_v11 = vmul.f32 0.5, %v6701_v51 }
 0xa48   :  { %v5761_v49 = vpop.permute.xlu0 %5760 }
 0xa49   :  { %5773 = vmatpush.bf16.msra.mxu1 %v5761_v49  ;;  %v6688_v49 = vmul.f32 %v8911_v47, %v13933_v17 }
 0xa4b   :  { %v6689_v40 = vmul.f32 %v8911_v47, %v6688_v49  ;;  %v6135_v49 = vsub.f32 1.5, %v6134_v52  ;;  %v16325_v52 = vld [vmem:[#allocation104_spill] sm:$0xff] }
 0xa4c   :  { %8256 = vmatmul.msk.bf16.vlgmr.msra.gmra.mxu1 %vm1694_vm15, %v5759_v1  ;;  %v6329_v1 = vmul.f32 %v6328_v37, %v16322_v18  ;;  %v6678_v18 = vmul.f32 0.5, %v6677_v62  ;;  %v6129_v62 = vand.u32 2147483648, %v13923_v54 }
 0xa4d   :  { %5656 = vadd.xlane.f32.xlu2 %v5655_v27  ;;  %v6887_v27 = vsel %vm6884_vm2, %v6886_v33, %v6882_v15  ;;  %v6690_v37 = vmul.f32 0.5, %v6689_v40  ;;  %v6124_v15 = vmul.f32 %v8909_v14, %v6123_v24  ;;  %v6136_v33 = vmul.f32 %v8913_v21, %v6135_v49  ;;  %v14233_v40 = vpop.eup %8918  ;;  %v14245_v21 = vpop.xlane.xlu2 %6084 }
 0xa4e   :  { %v7101_v13 = vmul.f32 %v14217_v53, %v6329_v1  ;;  %v16324_v1 = vld [vmem:[#allocation100_spill] sm:$0xff]  ;;  %v14235_v25 = vpop.eup %8920  ;;  %v6712_v14 = vmul.f32 %v14233_v40, %v13997_v60  ;;  %vm6174_vm2 = vcmp.eq.f32.partialorder %v13964_v9, inf }
 0xa4f   :  { %v6691_v38 = vsub.f32 1.5, %v6690_v37  ;;  %v6137_v16 = vmul.f32 %v6136_v33, %v13939_v30 }
 0xa50   :  { %7128 = vrot.lane.b32.xlu0 %v6873_v63, %s9161_s5  ;;  %v6888_v63 = vmul.f32 %v6887_v27, %v16323_v34  ;;  %v6125_v27 = vmul.f32 %v6124_v15, %v13923_v54  ;;  %v6703_v34 = vsub.f32 1.5, %v6702_v11  ;;  %v6713_v51 = vmul.f32 %v14233_v40, %v6712_v14 }
 0xa51   :  { %v6141_v15 = vand.u32 2147483648, %v13939_v30 }
 0xa52   :  { %v6127_v31 = vsel %vm6126_vm5, %v13923_v54, %v6125_v27  ;;  %v6704_v49 = vmul.f32 %v8917_v29, %v6703_v34  ;;  %v6714_v34 = vmul.f32 0.5, %v6713_v51  ;;  %v14292_v51 = vpop.permute.xlu1 %6039  ;;  %vm6176_vm5 = vcmp.eq.f32.partialorder %v13964_v9, 0.0 }
 0xa53   :  { %v6130_v11 = vsel %vm6128_vm3, %v6129_v62, %v6127_v31  ;;  %vm6164_vm3 = vcmp.eq.f32.partialorder %v14006_v8, 0.0 }
 0xa54   :  { %v6715_v55 = vsub.f32 1.5, %v6714_v34 }
 0xa55   :  { %6643 = vadd.xlane.f32.xlu2 %v6642_v36  ;;  %v6692_v36 = vmul.f32 %v8911_v47, %v6691_v38  ;;  %v6168_v47 = vmul.f32 %v14235_v25, %v13964_v9  ;;  %v6139_v38 = vsel %vm6138_vm12, %v13939_v30, %v6137_v16  ;;  %v6705_v16 = vmul.f32 %v6704_v49, %v13945_v3 }
 0xa56   :  { %v6142_v27 = vsel %vm6140_vm9, %v6141_v15, %v6139_v38  ;;  %v6709_v15 = vand.u32 2147483648, %v13945_v3  ;;  %vm6162_vm12 = vcmp.eq.f32.partialorder %v14006_v8, inf  ;;  %vm6150_vm9 = vcmp.eq.f32.partialorder %v14028_v58, inf }
 0xa57   :  { %v6693_v57 = vmul.f32 %v6692_v36, %v13933_v17  ;;  %v6169_v36 = vmul.f32 %v14235_v25, %v6168_v47  ;;  %v5648_v30 = vpop.xlane.xlu2 %5647  ;;  %v14279_v47 = vmax.f32 %v6130_v11, 1e-12  ;;  %v14284_v62 = vmax.f32 %v6142_v27, 1e-12 }
 0xa58   :  { %7122 = vrot.lane.b32.xlu0 %v7101_v13, %s9161_s5  ;;  %v6679_v13 = vsub.f32 1.5, %v6678_v18  ;;  %v6707_v38 = vsel %vm6706_vm6, %v13945_v3, %v6705_v16 }
 0xa59   :  { %v6695_v24 = vsel %vm6694_vm14, %v13933_v17, %v6693_v57  ;;  %v16326_v57 = vld [vmem:[#allocation103_spill] sm:$0xff]  ;;  %v6170_v54 = vmul.f32 0.5, %v6169_v36  ;;  %8932 = vrcp.f32 %v14279_v47  ;;  %vm6742_vm14 = vcmp.eq.f32.partialorder %v13966_v41, inf }
 0xa5a   :  { %v6680_v37 = vmul.f32 %v8915_v5, %v6679_v13  ;;  %v6697_v5 = vand.u32 2147483648, %v13933_v17 }
 0xa5b   :  { %7130 = vrot.lane.b32.xlu1 %v6888_v63, %s9161_s5  ;;  %v14247_v63 = vpop.eup %8922  ;;  %v6171_v36 = vsub.f32 1.5, %v6170_v54 }
 0xa5c   :  { %v14259_v18 = vpop.eup %8924  ;;  %v6156_v33 = vmul.f32 %v14247_v63, %v14006_v8  ;;  %v6681_v29 = vmul.f32 %v6680_v37, %v13943_v22  ;;  %v6698_v13 = vsel %vm6696_vm13, %v6697_v5, %v6695_v24  ;;  %v6685_v24 = vand.u32 2147483648, %v13943_v22 }
 0xa5d   :  { %v6736_v14 = vmul.f32 %v14259_v18, %v13966_v41  ;;  %v14281_v37 = vmax.f32 %v6698_v13, 1e-12  ;;  %v6716_v13 = vmul.f32 %v14233_v40, %v6715_v55  ;;  %v6172_v34 = vmul.f32 %v14235_v25, %v6171_v36 }
 0xa5e   :  { %v6157_v17 = vmul.f32 %v14247_v63, %v6156_v33  ;;  %v6683_v31 = vsel %vm6682_vm4, %v13943_v22, %v6681_v29  ;;  %v14295_v29 = vpop.eup %8926  ;;  %v6710_v22 = vsel %vm6708_vm8, %v6709_v15, %v6707_v38  ;;  %vm6744_vm13 = vcmp.eq.f32.partialorder %v13966_v41, 0.0 }
 0xa5f   :  { %v6737_v49 = vmul.f32 %v14259_v18, %v6736_v14  ;;  %v6686_v5 = vsel %vm6684_vm10, %v6685_v24, %v6683_v31  ;;  %v8929_v28 = vpop.eup %8928  ;;  %8934 = vrcp.f32 %v14281_v37  ;;  %v6144_v54 = vmul.f32 %v14295_v29, %v14028_v58 }
 0xa60   :  { %5810 = vrot.lane.b32.xlu0 %v16324_v1, %s9160_s28  ;;  %v6158_v33 = vmul.f32 0.5, %v6157_v17  ;;  %8936 = vrcp.f32 %v14284_v62  ;;  %v14301_v11 = vmax.f32 %v6686_v5, 1e-12  ;;  %v8931_v16 = vpop.eup %8930  ;;  %v14308_v17 = vmax.f32 %v6710_v22, 1e-12 }
 0xa61   :  { %v6738_v27 = vmul.f32 0.5, %v6737_v49  ;;  %8938 = vrsqrt.f32 %v14043_v46  ;;  %v5707_v31 = vmul.f32 %v8929_v28, %v14045_v7  ;;  %v14311_v24 = vpop.eup %8932  ;;  %v6717_v40 = vmul.f32 %v6716_v13, %v13997_v60 }
 0xa62   :  { %v6159_v14 = vsub.f32 1.5, %v6158_v33  ;;  %v5706_v38 = vmul.f32 %v8931_v16, %v14035_v44  ;;  %v6173_v5 = vmul.f32 %v6172_v34, %v13964_v9  ;;  %v6145_v7 = vmul.f32 %v14295_v29, %v6144_v54 }
 0xa63   :  { %v6739_v25 = vsub.f32 1.5, %v6738_v27  ;;  %v5723_v44 = vpack.c.bf16 %v5707_v31, %v5707_v31  ;;  %v6721_v28 = vand.u32 2147483648, %v13997_v60  ;;  %v6177_v31 = vand.u32 2147483648, %v13964_v9 }
 0xa64   :  { %v6160_v15 = vmul.f32 %v14247_v63, %v6159_v14  ;;  %v5722_v13 = vpack.c.bf16 %v5706_v38, %v5706_v38  ;;  %v6175_v16 = vsel %vm6174_vm2, %v13964_v9, %v6173_v5  ;;  %v6146_v14 = vmul.f32 0.5, %v6145_v7 }
 0xa65   :  { %v14318_v49 = vpop.eup %8934  ;;  %v6740_v22 = vmul.f32 %v14259_v18, %v6739_v25  ;;  %v6178_v5 = vsel %vm6176_vm5, %v6177_v31, %v6175_v16  ;;  %vm6335_vm4 = vweird.f32 %v14279_v47  ;;  %vm6336_vm6 = vweird.f32 %v14311_v24 }
 0xa66   :  { %v14325_v36 = vpop.eup %8936  ;;  %v6161_v34 = vmul.f32 %v6160_v15, %v14006_v8  ;;  %v14372_v16 = vmax.f32 %v6178_v5, 1e-12  ;;  %vm6152_vm8 = vcmp.eq.f32.partialorder %v14028_v58, 0.0  ;;  %vm6910_vm2 = vweird.f32 %v14318_v49 }
 0xa67   :  { %v14329_v33 = vpop.eup %8938  ;;  %vm6351_vm5 = vweird.f32 %v14325_v36 }
 0xa68   :  { %5885 = vrot.lane.b32.xlu0 %v16325_v52, %s9160_s28  ;;  %v5600_v52 = vsub.f32 %v14018_v12, %v14112_v45  ;;  %v6724_v25 = vmul.f32 %v14329_v33, %v14043_v46  ;;  %v6741_v45 = vmul.f32 %v6740_v22, %v13966_v41  ;;  %v5832_v12 = vunpack.c.l.b16 %v5722_v13 }
 0xa69   :  { %v6163_v7 = vsel %vm6162_vm12, %v14006_v8, %v6161_v34  ;;  %v6165_v13 = vand.u32 2147483648, %v14006_v8  ;;  %v6905_v8 = vmul.f32 %v14318_v49, %v14281_v37  ;;  %vm6350_vm12 = vweird.f32 %v14284_v62 }
 0xa6a   :  { %v14316_v55 = vpop.xlane.xlu1 %6628 }
 0xa6b   :  { %v6166_v34 = vsel %vm6164_vm3, %v6165_v13, %v6163_v7  ;;  %vm14479_vm3 = vmor %vm6350_vm12, %vm6351_vm5  ;;  %vm6924_vm12 = vweird.f32 %v14308_v17 }
 0xa6d   :  { %5860 = vrot.lane.b32.xlu2 %v16326_v57, %s9160_s28 }
 0xa73   :  { %v14335_v63 = vpop.xlane.xlu0 %5665 }
 0xa77   :  { %v5651_v3 = vpop.xlane.xlu2 %5650 }
 0xa78   :  { %8940 = vrcp.f32 %v5651_v3 }
 0xa79   :  { %8942 = vrcp.f32 %v5648_v30  ;;  %v5601_v30 = vsub.f32 %v13971_v10, %v14135_v26  ;;  %v6719_v26 = vsel %vm6718_vm7, %v13997_v60, %v6717_v40  ;;  %v5833_v40 = vunpack.c.l.b16 %v5723_v44  ;;  %vm14433_vm7 = vmor %vm6335_vm4, %vm6336_vm6 }
 0xa7a   :  { %8944 = vrcp.f32 %v14301_v11  ;;  %v6722_v18 = vsel %vm6720_vm11, %v6721_v28, %v6719_v26  ;;  %v6331_v44 = vmul.f32 %v14311_v24, %v14279_v47  ;;  %v5630_v28 = vmul.f32 1.442695, %v5600_v52 }
 0xa7b   :  { %8946 = vrcp.f32 %v14308_v17  ;;  %v5632_v54 = vmul.f32 1.442695, %v5601_v30  ;;  %v6147_v30 = vsub.f32 1.5, %v6146_v14  ;;  %v6639_v26 = vsel %vm385_vm1, %v13979_v20, 0.0 }
 0xa7c   :  { %8948 = vrsqrt.f32 %v14051_v23  ;;  %v14367_v22 = vmax.f32 %v6722_v18, 1e-12  ;;  %v6743_v20 = vsel %vm6742_vm14, %v13966_v41, %v6741_v45  ;;  %v6332_v31 = vsub.f32 1.0, %v6331_v44 }
 0xa7d   :  { %8950 = vpow2.f32 %v5632_v54  ;;  %v6148_v14 = vmul.f32 %v14295_v29, %v6147_v30  ;;  %v14382_v54 = vpop.xlane.xlu0 %5671  ;;  %v6346_v18 = vmul.f32 %v14325_v36, %v14284_v62  ;;  %v14392_v29 = vmax.f32 %v6166_v34, 1e-12 }
 0xa7e   :  { %v8941_v10 = vpop.eup %8940  ;;  %8952 = vpow2.f32 %v5630_v28  ;;  %v6333_v30 = vmul.f32 %v14311_v24, %v6332_v31  ;;  %v6339_v44 = vand.u32 2147483647, %v14279_v47  ;;  %v6153_v31 = vand.u32 2147483648, %v14028_v58 }
 0xa7f   :  { %v8943_v27 = vpop.eup %8942  ;;  %v5703_v57 = vmul.f32 %v8941_v10, %v14088_v0  ;;  %v5834_v10 = vpack.c.b16 %v5833_v40, %v5832_v12  ;;  %8954 = vrcp.f32 %v14367_v22  ;;  %v6149_v7 = vmul.f32 %v6148_v14, %v14028_v58 }
 0xa80   :  { %v14342_v3 = vpop.eup %8944  ;;  %v5702_v0 = vmul.f32 %v8943_v27, %v14066_v50  ;;  %v6745_v50 = vand.u32 2147483648, %v13966_v41  ;;  %v6725_v27 = vmul.f32 %v14329_v33, %v6724_v25  ;;  %8956 = vrcp.f32 %v14372_v16 }
 0xa81   :  { %v14354_v38 = vpop.eup %8946  ;;  %v5719_v9 = vpack.c.bf16 %v5703_v57, %v5703_v57  ;;  %8958 = vrsqrt.f32 %v14100_v6  ;;  %v6334_v14 = vadd.f32 %v14311_v24, %v6333_v30  ;;  %vm14419_vm10 = vcmp.eq.f32.partialorder %v6339_v44, 8.507059e+37 }
 0xa82   :  { %v5836_v15 = vpop.permute.xlu1 %5835  ;;  %v14360_v60 = vpop.eup %8948  ;;  %v5718_v57 = vpack.c.bf16 %v5702_v0, %v5702_v0  ;;  %v6726_v5 = vmul.f32 0.5, %v6725_v27  ;;  %v6746_v45 = vsel %vm6744_vm13, %v6745_v50, %v6743_v20  ;;  %8960 = vrcp.f32 %v14392_v29 }
 0xa83   :  { %5848 = vmatpush.bf16.msra.mxu0 %v5836_v15  ;;  %v6180_v52 = vmul.f32 %v14360_v60, %v14051_v23  ;;  %v5783_v40 = vunpack.c.l.b16 %v5719_v9  ;;  %v14388_v25 = vpop.eup %8950  ;;  %v6347_v9 = vsub.f32 1.0, %v6346_v18  ;;  %v6151_v20 = vsel %vm6150_vm9, %v14028_v58, %v6149_v7 }
 0xa84   :  { %v5782_v0 = vunpack.c.l.b16 %v5718_v57  ;;  %v5679_v41 = vsel %vm1694_vm15, %v14388_v25, 0.0  ;;  %v6727_v50 = vsub.f32 1.5, %v6726_v5  ;;  %v14404_v13 = vpop.eup %8952  ;;  %vm6909_vm11 = vweird.f32 %v14281_v37 }
 0xa85   :  { %6640 = vadd.xlane.f32.xlu1 %v6639_v26  ;;  %v6181_v12 = vmul.f32 %v14360_v60, %v6180_v52  ;;  %v14401_v26 = vmax.f32 %v6746_v45, 1e-12  ;;  %v6341_v52 = vand.u32 2147483648, %v14279_v47  ;;  %v14410_v57 = vpop.eup %8954  ;;  %v6348_v18 = vmul.f32 %v14325_v36, %v6347_v9  ;;  %vm14465_vm14 = vmor %vm6909_vm11, %vm6910_vm2 }
 0xa86   :  { %8259 = vmatmul.msk.bf16.vlgmr.msra.gmra.mxu0 %vm1694_vm15, %v5834_v10  ;;  %v5784_v28 = vpack.c.b16 %v5783_v40, %v5782_v0  ;;  %v6906_v10 = vsub.f32 1.0, %v6905_v8  ;;  %v14425_v5 = vpop.eup %8956  ;;  %v6728_v45 = vmul.f32 %v14329_v33, %v6727_v50  ;;  %v5676_v47 = vsel %vm1694_vm15, %v14404_v13, 0.0 }
 0xa87   :  { %v6182_v27 = vmul.f32 0.5, %v6181_v12  ;;  %v6890_v12 = vmul.f32 %v14342_v3, %v14301_v11  ;;  %v6154_v0 = vsel %vm6152_vm8, %v6153_v31, %v6151_v20  ;;  %v6342_v30 = vor.u32 1.1754944e-38, %v6341_v52  ;;  %v14438_v44 = vpop.eup %8958 }
 0xa88   :  { %v6907_v8 = vmul.f32 %v14318_v49, %v6906_v10  ;;  %v6338_v58 = vsel %vm14433_vm7, %v14311_v24, %v6334_v14  ;;  %v6915_v33 = vand.u32 2147483648, %v14281_v37  ;;  %v6092_v10 = vsel %vm385_vm1, %v14053_v43, 0.0 }
 0xa89   :  { %v6349_v50 = vadd.f32 %v14325_v36, %v6348_v18  ;;  %v6729_v24 = vmul.f32 %v6728_v45, %v14043_v46  ;;  %v6095_v52 = vsel %vm385_vm1, %v13993_v59, 0.0  ;;  %v6891_v20 = vsub.f32 1.0, %v6890_v12 }
 0xa8a   :  { %v5786_v15 = vpop.permute.xlu1 %5785  ;;  %v6908_v9 = vadd.f32 %v14318_v49, %v6907_v8  ;;  %v6192_v43 = vmul.f32 %v14438_v44, %v14100_v6  ;;  %v6920_v59 = vmul.f32 %v14354_v38, %v14308_v17  ;;  %v6913_v18 = vand.u32 2147483647, %v14281_v37 }
 0xa8b   :  { %5798 = vmatpush.bf16.msra.mxu2 %v5786_v15  ;;  %v6183_v15 = vsub.f32 1.5, %v6182_v27  ;;  %v14453_v27 = vmax.f32 %v6154_v0, 1e-12  ;;  %v6916_v45 = vor.u32 1.1754944e-38, %v6915_v33  ;;  %v6354_v12 = vand.u32 2147483647, %v14284_v62 }
 0xa8c   :  { %vm6730_vm13 = vcmp.eq.f32.partialorder %v14043_v46, inf  ;;  %v6912_v0 = vsel %vm14465_vm14, %v14318_v49, %v6908_v9  ;;  %v6353_v40 = vsel %vm14479_vm3, %v14325_v36, %v6349_v50  ;;  %v6648_v7 = vsel %vm385_vm1, %v14073_v19, 0.0  ;;  %v16335_v33 = vld [vmem:[#allocation25_spill] sm:$0xff] }
 0xa8d   :  { %5680 = vadd.xlane.f32.xlu1 %v5679_v41  ;;  %v14446_v41 = vpop.eup %8960  ;;  %v6184_v14 = vmul.f32 %v14360_v60, %v6183_v15  ;;  %v6343_v60 = vsel %vm14419_vm10, %v6342_v30, %v6338_v58  ;;  %8962 = vrcp.f32 %v14453_v27  ;;  %v6731_v15 = vsel %vm6730_vm13, %v14043_v46, %v6729_v24 }
 0xa8e   :  { %8257 = vmatmul.msk.bf16.vlgmr.msra.gmra.mxu2 %vm1694_vm15, %v5784_v28  ;;  %v6356_v28 = vand.u32 2147483648, %v14284_v62  ;;  %v6892_v62 = vmul.f32 %v14342_v3, %v6891_v20  ;;  %v6193_v58 = vmul.f32 %v14438_v44, %v6192_v43  ;;  %8964 = vrsqrt.f32 %v14175_v56 }
 0xa8f   :  { %v14413_v34 = vpop.xlane.xlu0 %5674  ;;  %v6185_v30 = vmul.f32 %v6184_v14, %v14051_v23  ;;  %v6921_v49 = vsub.f32 1.0, %v6920_v59  ;;  %v6733_v36 = vand.u32 2147483648, %v14043_v46  ;;  %vm6914_vm9 = vcmp.eq.f32.partialorder %v6913_v18, 8.507059e+37 }
 0xa90   :  { %v6357_v37 = vor.u32 1.1754944e-38, %v6356_v28  ;;  %v6344_v28 = vmul.f32 %v6343_v60, %v16335_v33  ;;  %vm6355_vm4 = vcmp.eq.f32.partialorder %v6354_v12, 8.507059e+37  ;;  %vm6732_vm6 = vcmp.eq.f32.partialorder %v14043_v46, 0.0  ;;  %v16336_v60 = vld [vmem:[#allocation23_spill] sm:$0xff] }
 0xa91   :  { %vm6186_vm10 = vcmp.eq.f32.partialorder %v14051_v23, inf  ;;  %v6917_v19 = vsel %vm6914_vm9, %v6916_v45, %v6912_v0  ;;  %v6734_v9 = vsel %vm6732_vm6, %v6733_v36, %v6731_v15  ;;  %v6098_v50 = vsel %vm385_vm1, %v14110_v61, 0.0 }
 0xa92   :  { %5677 = vadd.xlane.f32.xlu0 %v5676_v47  ;;  %v6893_v24 = vadd.f32 %v14342_v3, %v6892_v62  ;;  %vm6895_vm8 = vweird.f32 %v14342_v3  ;;  %v6194_v20 = vmul.f32 0.5, %v6193_v58  ;;  %v6922_v46 = vmul.f32 %v14354_v38, %v6921_v49 }
 0xa93   :  { %v14510_v14 = vpop.eup %8962  ;;  %v6189_v43 = vand.u32 2147483648, %v14051_v23  ;;  %v6900_v61 = vand.u32 2147483648, %v14301_v11  ;;  %v6391_v59 = vmul.f32 %v14425_v5, %v14372_v16  ;;  %v14521_v47 = vmax.f32 %v6734_v9, 1e-12 }
 0xa94   :  { %v14519_v45 = vpop.eup %8964  ;;  %vm6188_vm7 = vcmp.eq.f32.partialorder %v14051_v23, 0.0  ;;  %vm6894_vm11 = vweird.f32 %v14301_v11  ;;  %v6898_v12 = vand.u32 2147483647, %v14301_v11  ;;  %v6935_v15 = vmul.f32 %v14410_v57, %v14367_v22 }
 0xa95   :  { %6093 = vadd.xlane.f32.xlu1 %v6092_v10  ;;  %v6358_v10 = vsel %vm6355_vm4, %v6357_v37, %v6353_v40  ;;  %v6645_v40 = vsel %vm385_vm1, %v14070_v2, 0.0  ;;  %vm14530_vm2 = vmor %vm6894_vm11, %vm6895_vm8  ;;  %vm6925_vm5 = vweird.f32 %v14354_v38  ;;  %v6361_v2 = vmul.f32 %v14510_v14, %v14453_v27 }
 0xa96   :  { %6096 = vadd.xlane.f32.xlu2 %v6095_v52  ;;  %v6187_v52 = vsel %vm6186_vm10, %v14051_v23, %v6185_v30  ;;  %v6359_v18 = vmul.f32 %v6358_v10, %v16336_v60  ;;  %v6195_v23 = vsub.f32 1.5, %v6194_v20  ;;  %v6897_v11 = vsel %vm14530_vm2, %v14342_v3, %v6893_v24  ;;  %vm14558_vm3 = vmor %vm6924_vm12, %vm6925_vm5  ;;  %v14605_v20 = vpop.xlane.xlu2 %5668 }
 0xa97   :  { %v14472_v8 = vpop.xlane.xlu0 %6087  ;;  %v6190_v0 = vsel %vm6188_vm7, %v6189_v43, %v6187_v52  ;;  %v6760_v62 = vmul.f32 %v14519_v45, %v14175_v56  ;;  %v6901_v30 = vor.u32 1.1754944e-38, %v6900_v61  ;;  %v6392_v58 = vsub.f32 1.0, %v6391_v59 }
 0xa98   :  { %8966 = vrsqrt.f32 %v14472_v8  ;;  %v6930_v49 = vand.u32 2147483648, %v14308_v17  ;;  %v14548_v33 = vmax.f32 %v6190_v0, 1e-12  ;;  %vm6899_vm14 = vcmp.eq.f32.partialorder %v6898_v12, 8.507059e+37  ;;  %v16342_v12 = vld [vmem:[#allocation50_spill] sm:$0xff] }
 0xa99   :  { %v6928_v3 = vand.u32 2147483647, %v14308_v17  ;;  %v7102_v10 = vmul.f32 %v14217_v53, %v6344_v28  ;;  %v6902_v9 = vsel %vm6899_vm14, %v6901_v30, %v6897_v11  ;;  %v6936_v52 = vsub.f32 1.0, %v6935_v15 }
 0xa9a   :  { %6649 = vadd.xlane.f32.xlu0 %v6648_v7  ;;  %v6923_v7 = vadd.f32 %v14354_v38, %v6922_v46  ;;  %8968 = vrcp.f32 %v14521_v47  ;;  %v6196_v46 = vmul.f32 %v14438_v44, %v6195_v23  ;;  %v6362_v43 = vsub.f32 1.0, %v6361_v2 }
 0xa9b   :  { %v6761_v28 = vmul.f32 %v14519_v45, %v6760_v62  ;;  %v6393_v59 = vmul.f32 %v14425_v5, %v6392_v58  ;;  %v6931_v60 = vor.u32 1.1754944e-38, %v6930_v49  ;;  %8970 = vrcp.f32 %v14548_v33 }
 0xa9c   :  { %v6927_v17 = vsel %vm14558_vm3, %v14354_v38, %v6923_v7  ;;  %v14575_v0 = vmul.f32 %v6902_v9, %v16342_v12  ;;  %v14578_v44 = vmul.f32 %v14217_v53, %v6359_v18  ;;  %vm6929_vm13 = vcmp.eq.f32.partialorder %v6928_v3, 8.507059e+37 }
 0xa9d   :  { %v6937_v38 = vmul.f32 %v14410_v57, %v6936_v52  ;;  %vm6939_vm9 = vweird.f32 %v14367_v22  ;;  %v6197_v37 = vmul.f32 %v6196_v46, %v14100_v6  ;;  %v6363_v15 = vmul.f32 %v14510_v14, %v6362_v43  ;;  %v16350_v46 = vld [vmem:[#allocation105_spill] sm:$0xff] }
 0xa9e   :  { %6099 = vadd.xlane.f32.xlu2 %v6098_v50  ;;  %v14546_v36 = vpop.eup %8966  ;;  %v16339_v50 = vld [vmem:[#allocation54_spill] sm:$0xff]  ;;  %v6943_v23 = vand.u32 2147483647, %v14367_v22  ;;  %v6945_v11 = vand.u32 2147483648, %v14367_v22  ;;  %v6762_v2 = vmul.f32 0.5, %v6761_v28  ;;  %v6394_v7 = vadd.f32 %v14425_v5, %v6393_v59 }
 0xa9f   :  { %v14513_v31 = vpop.xlane.xlu0 %6637  ;;  %v14554_v24 = vmul.f32 %v6917_v19, %v16339_v50  ;;  %v6216_v19 = vmul.f32 %v14546_v36, %v14472_v8  ;;  %vm6396_vm4 = vweird.f32 %v14425_v5  ;;  %vm6198_vm6 = vcmp.eq.f32.partialorder %v14100_v6, inf }
 0xaa0   :  { %v14590_v62 = vpop.eup %8968  ;;  %vm6395_vm10 = vweird.f32 %v14372_v16  ;;  %v6399_v30 = vand.u32 2147483647, %v14372_v16  ;;  %v6401_v58 = vand.u32 2147483648, %v14372_v16  ;;  %v6201_v49 = vand.u32 2147483648, %v14100_v6 }
 0xaa1   :  { %v6217_v18 = vmul.f32 %v14546_v36, %v6216_v19  ;;  %v6938_v3 = vadd.f32 %v14410_v57, %v6937_v38  ;;  %vm6940_vm8 = vweird.f32 %v14410_v57  ;;  %v6376_v9 = vmul.f32 %v14446_v41, %v14392_v29  ;;  %v14601_v50 = vpop.eup %8970  ;;  %vm14612_vm11 = vmor %vm6395_vm10, %vm6396_vm4 }
 0xaa2   :  { %6646 = vadd.xlane.f32.xlu0 %v6645_v40  ;;  %v6932_v40 = vsel %vm6929_vm13, %v6931_v60, %v6927_v17  ;;  %v6199_v52 = vsel %vm6198_vm6, %v14100_v6, %v6197_v37  ;;  %v6364_v16 = vadd.f32 %v14510_v14, %v6363_v15  ;;  %vm6366_vm7 = vweird.f32 %v14510_v14  ;;  %vm14629_vm14 = vmor %vm6939_vm9, %vm6940_vm8  ;;  %v16352_v60 = vld [vmem:[#allocation35_spill] sm:$0xff] }
 0xaa3   :  { %v6763_v17 = vsub.f32 1.5, %v6762_v2  ;;  %v6218_v28 = vmul.f32 0.5, %v6217_v18  ;;  %v6371_v19 = vand.u32 2147483648, %v14453_v27  ;;  %vm6200_vm2 = vcmp.eq.f32.partialorder %v14100_v6, 0.0  ;;  %v16349_v6 = vld [vmem:[#allocation56_spill] sm:$0xff] }
 0xaa4   :  { %vm6365_vm5 = vweird.f32 %v14453_v27  ;;  %v6369_v59 = vand.u32 2147483647, %v14453_v27  ;;  %v6402_v12 = vor.u32 1.1754944e-38, %v6401_v58  ;;  %v6202_v38 = vsel %vm6200_vm2, %v6201_v49, %v6199_v52 }
 0xaa5   :  { %vm14633_vm12 = vmor %vm6365_vm5, %vm6366_vm7  ;;  %vm6400_vm3 = vcmp.eq.f32.partialorder %v6399_v30, 8.507059e+37  ;;  %v6377_v15 = vsub.f32 1.0, %v6376_v9  ;;  %v6942_v2 = vsel %vm14629_vm14, %v14410_v57, %v6938_v3  ;;  %v6219_v58 = vsub.f32 1.5, %v6218_v28 }
 0xaa6   :  { %v6368_v22 = vsel %vm14633_vm12, %v14510_v14, %v6364_v16  ;;  %v6372_v30 = vor.u32 1.1754944e-38, %v6371_v19  ;;  %v14653_v9 = vmax.f32 %v6202_v38, 1e-12  ;;  %vm6370_vm13 = vcmp.eq.f32.partialorder %v6369_v59, 8.507059e+37 }
 0xaa7   :  { %v14570_v61 = vpop.xlane.xlu0 %6634  ;;  %vm6944_vm9 = vcmp.eq.f32.partialorder %v6943_v23, 8.507059e+37  ;;  %v6946_v52 = vor.u32 1.1754944e-38, %v6945_v11  ;;  %v6378_v16 = vmul.f32 %v14446_v41, %v6377_v15  ;;  %v6384_v57 = vand.u32 2147483647, %v14392_v29  ;;  %v16351_v23 = vld [vmem:[#allocation20_spill] sm:$0xff] }
 0xaa8   :  { %8972 = vrsqrt.f32 %v14570_v61  ;;  %v6373_v14 = vsel %vm6370_vm13, %v6372_v30, %v6368_v22  ;;  %v6386_v3 = vand.u32 2147483648, %v14392_v29  ;;  %v6406_v38 = vmul.f32 %v14601_v50, %v14548_v33 }
 0xaa9   :  { %8974 = vrsqrt.f32 %v14245_v21  ;;  %vm6380_vm4 = vweird.f32 %v14392_v29  ;;  %vm6381_vm6 = vweird.f32 %v14446_v41  ;;  %vm14683_vm10 = vcmp.eq.f32.partialorder %v6384_v57, 8.507059e+37 }
 0xaaa   :  { %8976 = vrcp.f32 %v14401_v26  ;;  %vm6766_vm8 = vcmp.eq.f32.partialorder %v14175_v56, inf  ;;  %vm14703_vm7 = vmor %vm6380_vm4, %vm6381_vm6  ;;  %vm6222_vm2 = vcmp.eq.f32.partialorder %v14472_v8, inf  ;;  %vm6955_vm5 = vweird.f32 %v14590_v62 }
 0xaab   :  { %8978 = vrcp.f32 %v14653_v9  ;;  %vm6224_vm14 = vcmp.eq.f32.partialorder %v14472_v8, 0.0  ;;  %vm6954_vm12 = vweird.f32 %v14521_v47  ;;  %vm6410_vm4 = vweird.f32 %v14548_v33 }
 0xaac   :  { %8980 = vrsqrt.f32 %v14316_v55 }
 0xaae   :  { %7124 = vrot.lane.b32.xlu1 %v7102_v10, %s9161_s5  ;;  %v14616_v43 = vpop.eup %8972  ;;  %v6398_v10 = vsel %vm14612_vm11, %v14425_v5, %v6394_v7  ;;  %v14638_v5 = vmul.f32 %v6932_v40, %v16349_v6  ;;  %v6764_v7 = vmul.f32 %v14519_v45, %v6763_v17  ;;  %v6950_v40 = vmul.f32 %v14590_v62, %v14521_v47  ;;  %v16353_v6 = vld [vmem:[#allocation58_spill] sm:$0xff] }
 0xaaf   :  { %v6772_v27 = vmul.f32 %v14616_v43, %v14570_v61  ;;  %v6403_v18 = vsel %vm6400_vm3, %v6402_v12, %v6398_v10  ;;  %v14651_v49 = vpop.eup %8974  ;;  %v6947_v17 = vsel %vm6944_vm9, %v6946_v52, %v6942_v2  ;;  %v6220_v10 = vmul.f32 %v14546_v36, %v6219_v58  ;;  %v14678_v37 = vpop.xlane.xlu0 %6090  ;;  %vm14748_vm3 = vmor %vm6954_vm12, %vm6955_vm5 }
 0xab0   :  { %v6404_v11 = vmul.f32 %v6403_v18, %v16351_v23  ;;  %v6204_v28 = vmul.f32 %v14651_v49, %v14245_v21  ;;  %v6765_v19 = vmul.f32 %v6764_v7, %v14175_v56  ;;  %v6951_v59 = vsub.f32 1.0, %v6950_v40  ;;  %v14694_v40 = vpop.eup %8976 }
 0xab1   :  { %v6773_v45 = vmul.f32 %v14616_v43, %v6772_v27  ;;  %v6374_v12 = vmul.f32 %v6373_v14, %v16352_v60  ;;  %v6948_v15 = vmul.f32 %v6947_v17, %v16353_v6  ;;  %v6379_v36 = vadd.f32 %v14446_v41, %v6378_v16  ;;  %v14713_v23 = vpop.eup %8978 }
 0xab2   :  { %v6387_v27 = vor.u32 1.1754944e-38, %v6386_v3  ;;  %v7106_v2 = vmul.f32 %v14217_v53, %v6404_v11  ;;  %v6205_v18 = vmul.f32 %v14651_v49, %v6204_v28  ;;  %v6767_v7 = vsel %vm6766_vm8, %v14175_v56, %v6765_v19  ;;  %v14724_v28 = vpop.eup %8980 }
 0xab3   :  { %v6774_v22 = vmul.f32 0.5, %v6773_v45  ;;  %v6221_v58 = vmul.f32 %v6220_v10, %v14472_v8  ;;  %v6952_v30 = vmul.f32 %v14590_v62, %v6951_v59  ;;  %v6769_v52 = vand.u32 2147483648, %v14175_v56 }
 0xab4   :  { %8982 = vrsqrt.f32 %v14678_v37  ;;  %v7104_v14 = vmul.f32 %v14217_v53, %v6374_v12  ;;  %v6407_v16 = vsub.f32 1.0, %v6406_v38  ;;  %vm6768_vm11 = vcmp.eq.f32.partialorder %v14175_v56, 0.0 }
 0xab5   :  { %8984 = vrcp.f32 %v14605_v20  ;;  %v5654_v3 = vpop.xlane.xlu1 %5653  ;;  %v6958_v45 = vand.u32 2147483647, %v14521_v47  ;;  %v6383_v17 = vsel %vm14703_vm7, %v14446_v41, %v6379_v36  ;;  %v6770_v11 = vsel %vm6768_vm11, %v6769_v52, %v6767_v7 }
 0xab6   :  { %7171 = vrot.lane.b32.xlu1 %v14575_v0, %s9161_s5  ;;  %5910 = vrot.lane.b32.xlu0 %v16350_v46, %s9160_s28  ;;  %v14672_v0 = vpop.permute.xlu2 %6041  ;;  %8986 = vrcp.f32 %v14335_v63  ;;  %v6775_v29 = vsub.f32 1.5, %v6774_v22  ;;  %v14718_v56 = vmul.f32 0.5, %v6205_v18  ;;  %v6223_v20 = vsel %vm6222_vm2, %v14472_v8, %v6221_v58 }
 0xab7   :  { %7173 = vrot.lane.b32.xlu2 %v14554_v24, %s9161_s5  ;;  %v6960_v41 = vand.u32 2147483648, %v14521_v47  ;;  %v6225_v19 = vand.u32 2147483648, %v14472_v8  ;;  %8988 = vrcp.f32 %v5654_v3  ;;  %v6953_v10 = vadd.f32 %v14590_v62, %v6952_v30 }
 0xab8   :  { %v6408_v59 = vmul.f32 %v14601_v50, %v6407_v16  ;;  %v14729_v60 = vmax.f32 %v6770_v11, 1e-12  ;;  %v6421_v12 = vmul.f32 %v14713_v23, %v14653_v9  ;;  %v14742_v22 = vsel %vm14683_vm10, %v6387_v27, %v6383_v17 }
 0xab9   :  { %v6226_v6 = vsel %vm6224_vm14, %v6225_v19, %v6223_v20  ;;  %v6748_v8 = vmul.f32 %v14724_v28, %v14316_v55  ;;  %vm14752_vm13 = vcmp.eq.f32.partialorder %v6958_v45, 8.507059e+37  ;;  %v6961_v58 = vor.u32 1.1754944e-38, %v6960_v41 }
 0xaba   :  { %v14734_v38 = vpop.eup %8982  ;;  %v6416_v47 = vand.u32 2147483648, %v14548_v33  ;;  %v6207_v27 = vsub.f32 1.5, %v14718_v56  ;;  %v6957_v30 = vsel %vm14748_vm3, %v14590_v62, %v6953_v10  ;;  %v6409_v52 = vadd.f32 %v14601_v50, %v6408_v59 }
 0xabb   :  { %v8985_v18 = vpop.eup %8984  ;;  %vm6411_vm9 = vweird.f32 %v14601_v50  ;;  %v6228_v16 = vmul.f32 %v14734_v38, %v14678_v37  ;;  %v6422_v57 = vsub.f32 1.0, %v6421_v12  ;;  %v6414_v62 = vand.u32 2147483647, %v14548_v33 }
 0xabc   :  { %v8987_v24 = vpop.eup %8986  ;;  %v5709_v45 = vmul.f32 %v8985_v18, %v14097_v39  ;;  %vm14780_vm6 = vmor %vm6410_vm4, %vm6411_vm9  ;;  %vm6778_vm10 = vcmp.eq.f32.partialorder %v14570_v61, inf  ;;  %vm6780_vm7 = vcmp.eq.f32.partialorder %v14570_v61, 0.0  ;;  %vm6426_vm11 = vweird.f32 %v14713_v23 }
 0xabd   :  { %v8989_v3 = vpop.eup %8988  ;;  %v5708_v20 = vmul.f32 %v8987_v24, %v14079_v35  ;;  %v6962_v35 = vsel %vm14752_vm13, %v6961_v58, %v6957_v30  ;;  %v6423_v19 = vmul.f32 %v14713_v23, %v6422_v57  ;;  %vm6415_vm8 = vcmp.eq.f32.partialorder %v6414_v62, 8.507059e+37  ;;  %v16365_v57 = vld [vmem:[#allocation37_spill] sm:$0xff] }
 0xabe   :  { %7167 = vrot.lane.b32.xlu0 %v7104_v14, %s9161_s5  ;;  %v14764_v14 = vmax.f32 %v6226_v6, 1e-12  ;;  %vm6425_vm2 = vweird.f32 %v14653_v9  ;;  %vm6210_vm12 = vcmp.eq.f32.partialorder %v14245_v21, inf  ;;  %vm6754_vm3 = vcmp.eq.f32.partialorder %v14316_v55, inf }
 0xabf   :  { %7216 = vrot.lane.b32.xlu2 %v6948_v15, %s9161_s5  ;;  %v6776_v15 = vmul.f32 %v14616_v43, %v6775_v29  ;;  %v6749_v29 = vmul.f32 %v14724_v28, %v6748_v8  ;;  %v5724_v6 = vpack.c.bf16 %v5708_v20, %v5708_v20  ;;  %v16364_v8 = vld [vmem:[#allocation60_spill] sm:$0xff]  ;;  %v6424_v24 = vadd.f32 %v14713_v23, %v6423_v19  ;;  %vm14823_vm5 = vmor %vm6425_vm2, %vm6426_vm11 }
 0xac0   :  { %v5657_v63 = vpop.xlane.xlu2 %5656  ;;  %v6963_v7 = vmul.f32 %v6962_v35, %v16364_v8  ;;  %v6429_v35 = vand.u32 2147483647, %v14653_v9  ;;  %vm6756_vm13 = vcmp.eq.f32.partialorder %v14316_v55, 0.0  ;;  %vm6234_vm4 = vcmp.eq.f32.partialorder %v14678_v37, inf }
 0xac1   :  { %8990 = vrcp.f32 %v5657_v63  ;;  %v6777_v17 = vmul.f32 %v6776_v15, %v14570_v61  ;;  %v5704_v63 = vmul.f32 %v8989_v3, %v14177_v42  ;;  %v6750_v12 = vmul.f32 0.5, %v6749_v29 }
 0xac2   :  { %v14737_v36 = vpop.permute.xlu0 %7128  ;;  %8992 = vrcp.f32 %v14729_v60  ;;  %v5857_v62 = vunpack.c.l.b16 %v5724_v6  ;;  %vm6430_vm14 = vcmp.eq.f32.partialorder %v6429_v35, 8.507059e+37  ;;  %vm6455_vm2 = vweird.f32 %v14764_v14 }
 0xac3   :  { %8994 = vrcp.f32 %v14413_v34  ;;  %v6413_v34 = vsel %vm14780_vm6, %v14601_v50, %v6409_v52  ;;  %v6781_v50 = vand.u32 2147483648, %v14570_v61  ;;  %vm6999_vm6 = vweird.f32 %v14729_v60 }
 0xac4   :  { %8996 = vrcp.f32 %v14382_v54  ;;  %v5725_v54 = vpack.c.bf16 %v5709_v45, %v5709_v45 }
 0xac5   :  { %8998 = vrcp.f32 %v14764_v14 }
 0xac6   :  { %7210 = vrot.lane.b32.xlu0 %v7106_v2, %s9161_s5  ;;  %v6417_v2 = vor.u32 1.1754944e-38, %v6416_v47  ;;  %9000 = vrsqrt.f32 %v14513_v31  ;;  %v5858_v52 = vunpack.c.l.b16 %v5725_v54 }
 0xac7   :  { %v8991_v11 = vpop.eup %8990  ;;  %7165 = vrot.lane.b32.xlu2 %v14578_v44, %s9161_s5  ;;  %v6229_v44 = vmul.f32 %v14734_v38, %v6228_v16  ;;  %v5720_v16 = vpack.c.bf16 %v5704_v63, %v5704_v63 }
 0xac8   :  { %v5705_v33 = vmul.f32 %v8991_v11, %v14193_v48  ;;  %v14786_v41 = vpop.xlane.xlu2 %6643  ;;  %v6779_v48 = vsel %vm6778_vm10, %v14570_v61, %v6777_v17  ;;  %v14799_v59 = vpop.eup %8992  ;;  %v6418_v15 = vsel %vm6415_vm8, %v6417_v2, %v6413_v34  ;;  %v6751_v17 = vsub.f32 1.5, %v6750_v12 }
 0xac9   :  { %v8995_v43 = vpop.eup %8994  ;;  %v6782_v58 = vsel %vm6780_vm7, %v6781_v50, %v6779_v48  ;;  %v6230_v47 = vmul.f32 0.5, %v6229_v44  ;;  %v6419_v61 = vmul.f32 %v6418_v15, %v16365_v57  ;;  %v6995_v3 = vmul.f32 %v14799_v59, %v14729_v60  ;;  %v16368_v44 = vld [vmem:[#allocation11_spill] sm:$0xff] }
 0xaca   :  { %v7123_v10 = vpop.permute.xlu0 %7122  ;;  %v5721_v18 = vpack.c.bf16 %v5705_v33, %v5705_v33  ;;  %v8997_v30 = vpop.eup %8996  ;;  %v6431_v11 = vand.u32 2147483648, %v14653_v9  ;;  %v5711_v29 = vmul.f32 %v8995_v43, %v14117_v4  ;;  %v14819_v20 = vmax.f32 %v6782_v58, 1e-12  ;;  %v16369_v58 = vld [vmem:[#allocation31_spill] sm:$0xff] }
 0xacb   :  { %v14812_v45 = vpop.eup %8998  ;;  %v6231_v34 = vsub.f32 1.5, %v6230_v47  ;;  %v6389_v19 = vmul.f32 %v14742_v22, %v16368_v44  ;;  %v6428_v4 = vsel %vm14823_vm5, %v14713_v23, %v6424_v24  ;;  %v5859_v48 = vpack.c.b16 %v5858_v52, %v5857_v62 }
 0xacc   :  { %v5808_v39 = vunpack.c.l.b16 %v5721_v18  ;;  %v14834_v54 = vpop.eup %9000  ;;  %v5807_v63 = vunpack.c.l.b16 %v5720_v16  ;;  %v6996_v9 = vsub.f32 1.0, %v6995_v3  ;;  %v6208_v22 = vmul.f32 %v14651_v49, %v6207_v27 }
 0xacd   :  { %v7131_v42 = vpop.permute.xlu1 %7130  ;;  %v6752_v6 = vmul.f32 %v14724_v28, %v6751_v17  ;;  %v7107_v23 = vmul.f32 %v14217_v53, %v6419_v61  ;;  %v6432_v50 = vor.u32 1.1754944e-38, %v6431_v11  ;;  %v5727_v15 = vpack.c.bf16 %v5711_v29, %v5711_v29 }
 0xace   :  { %7257 = vrot.lane.b32.xlu0 %v6963_v7, %s9161_s5  ;;  %8266 = vmatpush.xpose.msk.msrb.mxu0 %vm385_vm1, %v7131_v42  ;;  %9002 = vrcp.f32 %v14819_v20  ;;  %v5809_v18 = vpack.c.b16 %v5808_v39, %v5807_v63  ;;  %v6232_v56 = vmul.f32 %v14734_v38, %v6231_v34  ;;  %v7105_v49 = vmul.f32 %v14217_v53, %v6389_v19 }
 0xacf   :  { %7214 = vrot.lane.b32.xlu2 %v14638_v5, %s9161_s5  ;;  %v5710_v5 = vmul.f32 %v8997_v30, %v14086_v32  ;;  %v6451_v32 = vmul.f32 %v14812_v45, %v14764_v14  ;;  %v6433_v28 = vsel %vm6430_vm14, %v6432_v50, %v6428_v4  ;;  %v6997_v8 = vmul.f32 %v14799_v59, %v6996_v9 }
 0xad0   :  { %v5861_v2 = vpop.permute.xlu2 %5860  ;;  %v6753_v43 = vmul.f32 %v6752_v6, %v14316_v55  ;;  %9004 = vrsqrt.f32 %v14786_v41  ;;  %v6209_v38 = vmul.f32 %v6208_v22, %v14245_v21  ;;  %v6434_v47 = vmul.f32 %v6433_v28, %v16369_v58  ;;  %v16374_v28 = vld [vmem:[#allocation66_spill] sm:$0xff]  ;;  %v16375_v58 = vld [vmem:[#allocation27_spill] sm:$0xff] }
 0xad1   :  { %5873 = vmatpush.bf16.msrb.mxu1 %v5861_v2  ;;  %v5726_v27 = vpack.c.bf16 %v5710_v5, %v5710_v5  ;;  %v6452_v7 = vsub.f32 1.0, %v6451_v32  ;;  %v14862_v42 = vmul.f32 %v14694_v40, %v14401_v26  ;;  %v6233_v30 = vmul.f32 %v6232_v56, %v14678_v37 }
 0xad2   :  { %8267 = vmatpush.xpose.msk.msrb.mxu0 %vm385_vm1, %v14737_v36  ;;  %v5811_v12 = vpop.permute.xlu0 %5810  ;;  %v6784_v36 = vmul.f32 %v14834_v54, %v14513_v31  ;;  %v6998_v61 = vadd.f32 %v14799_v59, %v6997_v8  ;;  %vm7000_vm9 = vweird.f32 %v14799_v59  ;;  %v6755_v17 = vsel %vm6754_vm3, %v14316_v55, %v6753_v43 }
 0xad3   :  { %5823 = vmatpush.bf16.msrb.mxu3 %v5811_v12  ;;  %v5882_v16 = vunpack.c.l.b16 %v5726_v27  ;;  %v6453_v3 = vmul.f32 %v14812_v45, %v6452_v7  ;;  %v6757_v62 = vand.u32 2147483648, %v14316_v55  ;;  %v7003_v11 = vand.u32 2147483647, %v14729_v60  ;;  %vm14887_vm8 = vmor %vm6999_vm6, %vm7000_vm9 }
 0xad4   :  { %8260 = vmatmul.msk.bf16.vlgmr.msrb.gmra.mxu1 %vm1694_vm15, %v5859_v48  ;;  %v6785_v24 = vmul.f32 %v14834_v54, %v6784_v36  ;;  %v14869_v52 = vpop.eup %9002  ;;  %v7005_v29 = vand.u32 2147483648, %v14729_v60  ;;  %v7108_v2 = vmul.f32 %v14217_v53, %v6434_v47  ;;  %v6235_v5 = vsel %vm6234_vm4, %v14678_v37, %v6233_v30 }
 0xad5   :  { %8268 = vmatmul.msk.f32.vlgmr.msrb.gmra.mxu0 %vm385_vm1, %v7123_v10  ;;  %v5883_v10 = vunpack.c.l.b16 %v5727_v15  ;;  %vm6236_vm10 = vcmp.eq.f32.partialorder %v14678_v37, 0.0  ;;  %v7010_v44 = vmul.f32 %v14869_v52, %v14819_v20  ;;  %v6237_v19 = vand.u32 2147483648, %v14678_v37 }
 0xad6   :  { %7251 = vrot.lane.b32.xlu0 %v7107_v23, %s9161_s5  ;;  %8258 = vmatmul.msk.bf16.vlgmr.msrb.gmra.mxu3 %vm1694_vm15, %v5809_v18  ;;  %v14881_v33 = vpop.eup %9004  ;;  %v6786_v35 = vmul.f32 0.5, %v6785_v24  ;;  %v7002_v60 = vsel %vm14887_vm8, %v14799_v59, %v6998_v61  ;;  %v6454_v4 = vadd.f32 %v14812_v45, %v6453_v3  ;;  %vm6456_vm7 = vweird.f32 %v14812_v45 }
 0xad7   :  { %7208 = vrot.lane.b32.xlu2 %v7105_v49, %s9161_s5  ;;  %v5884_v39 = vpack.c.b16 %v5883_v10, %v5882_v16  ;;  %v6101_v48 = vsel %vm385_vm1, %v14292_v51, 0.0  ;;  %vm7004_vm11 = vcmp.eq.f32.partialorder %v7003_v11, 8.507059e+37  ;;  %v7006_v63 = vor.u32 1.1754944e-38, %v7005_v29  ;;  %vm14910_vm5 = vmor %vm6455_vm2, %vm6456_vm7 }
 0xad8   :  { %v6461_v12 = vand.u32 2147483648, %v14764_v14  ;;  %v6238_v37 = vsel %vm6236_vm10, %v6237_v19, %v6235_v5  ;;  %v6808_v9 = vmul.f32 %v14881_v33, %v14786_v41  ;;  %v6459_v59 = vand.u32 2147483647, %v14764_v14 }
 0xad9   :  { %v6758_v32 = vsel %vm6756_vm13, %v6757_v62, %v6755_v17  ;;  %v6787_v22 = vsub.f32 1.5, %v6786_v35  ;;  %v7007_v6 = vsel %vm7004_vm11, %v7006_v63, %v7002_v60  ;;  %v7011_v23 = vsub.f32 1.0, %v7010_v44 }
 0xada   :  { %v5886_v57 = vpop.permute.xlu0 %5885  ;;  %v6211_v50 = vsel %vm6210_vm12, %v14245_v21, %v6209_v38  ;;  %v6458_v15 = vsel %vm14910_vm5, %v14812_v45, %v6454_v4  ;;  %v6966_v14 = vsub.f32 1.0, %v14862_v42  ;;  %vm6212_vm14 = vcmp.eq.f32.partialorder %v14245_v21, 0.0 }
 0xadb   :  { %5898 = vmatpush.bf16.msrb.mxu2 %v5886_v57  ;;  %v6213_v55 = vand.u32 2147483648, %v14245_v21  ;;  %v14923_v18 = vmax.f32 %v6238_v37, 1e-12  ;;  %v6462_v36 = vor.u32 1.1754944e-38, %v6461_v12  ;;  %v14925_v56 = vmax.f32 %v6758_v32, 1e-12 }
 0xadc   :  { %v6809_v49 = vmul.f32 %v14881_v33, %v6808_v9  ;;  %v7008_v27 = vmul.f32 %v7007_v6, %v16374_v28  ;;  %vm6460_vm12 = vcmp.eq.f32.partialorder %v6459_v59, 8.507059e+37  ;;  %v6788_v7 = vmul.f32 %v14834_v54, %v6787_v22  ;;  %v16379_v32 = vld [vmem:[#allocation62_spill] sm:$0xff] }
 0xadd   :  { %v6214_v8 = vsel %vm6212_vm14, %v6213_v55, %v6211_v50  ;;  %v6463_v45 = vsel %vm6460_vm12, %v6462_v36, %v6458_v15  ;;  %v7012_v43 = vmul.f32 %v14869_v52, %v7011_v23  ;;  %9006 = vrcp.f32 %v14923_v18 }
 0xade   :  { %7253 = vrot.lane.b32.xlu0 %v7108_v2, %s9161_s5  ;;  %8261 = vmatmul.msk.bf16.vlgmr.msrb.gmra.mxu2 %vm1694_vm15, %v5884_v39  ;;  %v6967_v21 = vmul.f32 %v14694_v40, %v6966_v14  ;;  %v14934_v38 = vmax.f32 %v6214_v8, 1e-12  ;;  %9008 = vrcp.f32 %v14925_v56  ;;  %v6810_v10 = vmul.f32 0.5, %v6809_v49 }
 0xadf   :  { %v6464_v47 = vmul.f32 %v6463_v45, %v16375_v58  ;;  %v6789_v42 = vmul.f32 %v6788_v7, %v14513_v31  ;;  %v7013_v54 = vadd.f32 %v14869_v52, %v7012_v43  ;;  %vm7015_vm3 = vweird.f32 %v14869_v52  ;;  %v16382_v58 = vld [vmem:[#allocation29_spill] sm:$0xff] }
 0xae0   :  { %6102 = vadd.xlane.f32.xlu1 %v6101_v48  ;;  %v7020_v24 = vand.u32 2147483648, %v14819_v20  ;;  %v6975_v30 = vand.u32 2147483648, %v14401_v26  ;;  %vm7014_vm13 = vweird.f32 %v14819_v20  ;;  %v7018_v16 = vand.u32 2147483647, %v14819_v20 }
 0xae1   :  { %v6968_v57 = vadd.f32 %v14694_v40, %v6967_v21  ;;  %vm6970_vm9 = vweird.f32 %v14694_v40  ;;  %9010 = vrcp.f32 %v14934_v38  ;;  %vm6790_vm4 = vcmp.eq.f32.partialorder %v14513_v31, inf  ;;  %vm14950_vm6 = vmor %vm7014_vm13, %vm7015_vm3 }
 0xae2   :  { %v6811_v61 = vsub.f32 1.5, %v6810_v10  ;;  %v7110_v3 = vmul.f32 %v14217_v53, %v6464_v47  ;;  %v6791_v11 = vsel %vm6790_vm4, %v14513_v31, %v6789_v42  ;;  %v7017_v20 = vsel %vm14950_vm6, %v14869_v52, %v7013_v54 }
 0xae3   :  { %v9007_v62 = vpop.eup %9006  ;;  %vm6969_vm10 = vweird.f32 %v14401_v26  ;;  %v6973_v29 = vand.u32 2147483647, %v14401_v26  ;;  %v6793_v2 = vand.u32 2147483648, %v14513_v31  ;;  %v7021_v35 = vor.u32 1.1754944e-38, %v7020_v24 }
 0xae4   :  { %v9009_v39 = vpop.eup %9008  ;;  %vm6971_vm8 = vmor %vm6969_vm10, %vm6970_vm9  ;;  %vm6792_vm7 = vcmp.eq.f32.partialorder %v14513_v31, 0.0  ;;  %vm7019_vm11 = vcmp.eq.f32.partialorder %v7018_v16, 8.507059e+37  ;;  %v6976_v34 = vor.u32 1.1754944e-38, %v6975_v30  ;;  %v6812_v44 = vmul.f32 %v14881_v33, %v6811_v61  ;;  %v16378_v31 = vld [vmem:[#allocation69_spill] sm:$0xff] }
 0xae5   :  { %v6972_v5 = vsel %vm6971_vm8, %v14694_v40, %v6968_v57  ;;  %v6794_v52 = vsel %vm6792_vm7, %v6793_v2, %v6791_v11  ;;  %v7022_v19 = vsel %vm7019_vm11, %v7021_v35, %v7017_v20  ;;  %v6466_v26 = vmul.f32 %v9007_v62, %v14923_v18 }
 0xae6   :  { %7302 = vrot.lane.b32.xlu0 %v7008_v27, %s9161_s5  ;;  %vm6974_vm2 = vcmp.eq.f32.partialorder %v6973_v29, 8.507059e+37  ;;  %v6980_v60 = vmul.f32 %v9009_v39, %v14925_v56  ;;  %v14971_v12 = vmax.f32 %v6794_v52, 1e-12  ;;  %v7023_v37 = vmul.f32 %v7022_v19, %v16378_v31 }
 0xae7   :  { %v14969_v4 = vpop.eup %9010  ;;  %v6977_v48 = vsel %vm6974_vm2, %v6976_v34, %v6972_v5  ;;  %v6467_v63 = vsub.f32 1.0, %v6466_v26  ;;  %v6813_v40 = vmul.f32 %v6812_v44, %v14786_v41  ;;  %vm6471_vm5 = vweird.f32 %v9007_v62 }
 0xae8   :  { %v6981_v9 = vsub.f32 1.0, %v6980_v60  ;;  %v6476_v33 = vand.u32 2147483648, %v14923_v18  ;;  %v6978_v22 = vmul.f32 %v6977_v48, %v16379_v32  ;;  %v6474_v6 = vand.u32 2147483647, %v14923_v18 }
 0xae9   :  { %v6468_v59 = vmul.f32 %v9007_v62, %v6467_v63  ;;  %v6436_v23 = vmul.f32 %v14969_v4, %v14934_v38  ;;  %vm6470_vm14 = vweird.f32 %v14923_v18  ;;  %vm6985_vm12 = vweird.f32 %v9009_v39 }
 0xaea   :  { %v6982_v51 = vmul.f32 %v9009_v39, %v6981_v9  ;;  %v6990_v15 = vand.u32 2147483648, %v14925_v56  ;;  %9012 = vrcp.f32 %v14971_v12  ;;  %vm6814_vm3 = vcmp.eq.f32.partialorder %v14786_v41, inf  ;;  %vm14985_vm13 = vmor %vm6470_vm14, %vm6471_vm5 }
 0xaeb   :  { %v6469_v50 = vadd.f32 %v9007_v62, %v6468_v59  ;;  %v6988_v36 = vand.u32 2147483647, %v14925_v56  ;;  %v6815_v49 = vsel %vm6814_vm3, %v14786_v41, %v6813_v40  ;;  %v6477_v27 = vor.u32 1.1754944e-38, %v6476_v33 }
 0xaec   :  { %v6983_v55 = vadd.f32 %v9009_v39, %v6982_v51  ;;  %vm6984_vm9 = vweird.f32 %v14925_v56  ;;  %v6817_v8 = vand.u32 2147483648, %v14786_v41  ;;  %vm6475_vm4 = vcmp.eq.f32.partialorder %v6474_v6, 8.507059e+37 }
 0xaed   :  { %v6473_v18 = vsel %vm14985_vm13, %v9007_v62, %v6469_v50  ;;  %vm6986_vm6 = vmor %vm6984_vm9, %vm6985_vm12  ;;  %v6437_v7 = vsub.f32 1.0, %v6436_v23  ;;  %vm6816_vm10 = vcmp.eq.f32.partialorder %v14786_v41, 0.0  ;;  %v6991_v21 = vor.u32 1.1754944e-38, %v6990_v15  ;;  %v16383_v41 = vld [vmem:[#allocation63_spill] sm:$0xff]  ;;  %v16386_v23 = vld [vmem:[#allocation70_spill] sm:$0xff] }
 0xaee   :  { %7296 = vrot.lane.b32.xlu0 %v7110_v3, %s9161_s5  ;;  %v6478_v45 = vsel %vm6475_vm4, %v6477_v27, %v6473_v18  ;;  %v6987_v43 = vsel %vm6986_vm6, %v9009_v39, %v6983_v55  ;;  %v6818_v10 = vsel %vm6816_vm10, %v6817_v8, %v6815_v49  ;;  %vm6989_vm8 = vcmp.eq.f32.partialorder %v6988_v36, 8.507059e+37 }
 0xaef   :  { %v6479_v47 = vmul.f32 %v6478_v45, %v16382_v58  ;;  %v6992_v56 = vsel %vm6989_vm8, %v6991_v21, %v6987_v43  ;;  %v15003_v24 = vmax.f32 %v6818_v10, 1e-12  ;;  %v6438_v30 = vmul.f32 %v14969_v4, %v6437_v7 }
 0xaf0   :  { %v9013_v42 = vpop.eup %9012  ;;  %v6104_v57 = vsel %vm385_vm1, %v14672_v0, 0.0  ;;  %v6993_v61 = vmul.f32 %v6992_v56, %v16383_v41  ;;  %v6446_v11 = vand.u32 2147483648, %v14934_v38  ;;  %vm6441_vm7 = vweird.f32 %v14969_v4 }
 0xaf1   :  { %v7111_v54 = vmul.f32 %v14217_v53, %v6479_v47  ;;  %v7025_v62 = vmul.f32 %v9013_v42, %v14971_v12  ;;  %v6439_v29 = vadd.f32 %v14969_v4, %v6438_v30  ;;  %vm6440_vm11 = vweird.f32 %v14934_v38 }
 0xaf2   :  { %v6444_v2 = vand.u32 2147483647, %v14934_v38  ;;  %vm15019_vm2 = vmor %vm6440_vm11, %vm6441_vm7  ;;  %v7035_v44 = vand.u32 2147483648, %v14971_v12  ;;  %v6447_v26 = vor.u32 1.1754944e-38, %v6446_v11  ;;  %vm7030_vm5 = vweird.f32 %v9013_v42 }
 0xaf3   :  { %v7026_v0 = vsub.f32 1.0, %v7025_v62  ;;  %v6443_v19 = vsel %vm15019_vm2, %v14969_v4, %v6439_v29  ;;  %v7033_v48 = vand.u32 2147483647, %v14971_v12  ;;  %vm7029_vm12 = vweird.f32 %v14971_v12 }
 0xaf4   :  { %vm6445_vm14 = vcmp.eq.f32.partialorder %v6444_v2, 8.507059e+37  ;;  %vm7031_vm13 = vmor %vm7029_vm12, %vm7030_vm5  ;;  %v7036_v40 = vor.u32 1.1754944e-38, %v7035_v44  ;;  %v7065_v45 = vand.u32 2147483648, %v15003_v24  ;;  %vm7059_vm10 = vweird.f32 %v15003_v24 }
 0xaf5   :  { %v7027_v5 = vmul.f32 %v9013_v42, %v7026_v0  ;;  %v6448_v9 = vsel %vm6445_vm14, %v6447_v26, %v6443_v19  ;;  %vm7034_vm9 = vcmp.eq.f32.partialorder %v7033_v48, 8.507059e+37  ;;  %v7063_v58 = vand.u32 2147483647, %v15003_v24 }
 0xaf6   :  { %7343 = vrot.lane.b32.xlu0 %v7023_v37, %s9161_s5 }
 0xaf7   :  { %v7028_v60 = vadd.f32 %v9013_v42, %v7027_v5  ;;  %vm7064_vm2 = vcmp.eq.f32.partialorder %v7063_v58, 8.507059e+37 }
 0xaf8   :  { %v14991_v28 = vpop.xlane.xlu1 %6640 }
 0xaf9   :  { %9014 = vrsqrt.f32 %v14991_v28  ;;  %7259 = vrot.lane.b32.xlu1 %v6978_v22, %s9161_s5  ;;  %vm6802_vm3 = vcmp.eq.f32.partialorder %v14991_v28, inf  ;;  %v6805_v59 = vand.u32 2147483648, %v14991_v28  ;;  %v7032_v33 = vsel %vm7031_vm13, %v9013_v42, %v7028_v60 }
 0xafa   :  { %9016 = vrcp.f32 %v15003_v24  ;;  %vm6804_vm4 = vcmp.eq.f32.partialorder %v14991_v28, 0.0  ;;  %v7037_v12 = vsel %vm7034_vm9, %v7036_v40, %v7032_v33 }
 0xafb   :  { %v7038_v50 = vmul.f32 %v7037_v12, %v16386_v23 }
 0xafe   :  { %7337 = vrot.lane.b32.xlu0 %v7111_v54, %s9161_s5 }
 0xaff   :  { %v9015_v16 = vpop.eup %9014 }
 0xb00   :  { %v6796_v3 = vmul.f32 %v9015_v16, %v14991_v28  ;;  %6105 = vadd.xlane.f32.xlu2 %v6104_v57  ;;  %v5681_v17 = vpop.xlane.xlu1 %5680  ;;  %v15028_v38 = vpop.eup %9016 }
 0xb01   :  { %7300 = vrot.lane.b32.xlu1 %v6993_v61, %s9161_s5  ;;  %9018 = vrcp.f32 %v5681_v17  ;;  %v7055_v32 = vmul.f32 %v15028_v38, %v15003_v24  ;;  %vm7060_vm6 = vweird.f32 %v15028_v38  ;;  %v7066_v61 = vor.u32 1.1754944e-38, %v7065_v45 }
 0xb02   :  { %v6797_v20 = vmul.f32 %v9015_v16, %v6796_v3  ;;  %vm15069_vm8 = vmor %vm7059_vm10, %vm7060_vm6 }
 0xb03   :  { %v7056_v14 = vsub.f32 1.0, %v7055_v32 }
 0xb04   :  { %v6798_v39 = vmul.f32 0.5, %v6797_v20 }
 0xb05   :  { %v5678_v35 = vpop.xlane.xlu0 %5677  ;;  %v7057_v49 = vmul.f32 %v15028_v38, %v7056_v14 }
 0xb06   :  { %v6799_v52 = vsub.f32 1.5, %v6798_v39 }
 0xb07   :  { %v9019_v6 = vpop.eup %9018  ;;  %v7058_v10 = vadd.f32 %v15028_v38, %v7057_v49 }
 0xb08   :  { %v6800_v63 = vmul.f32 %v9015_v16, %v6799_v52  ;;  %v15030_v31 = vpop.xlane.xlu1 %6093  ;;  %v15056_v8 = vmul.f32 %v9019_v6, %v14388_v25 }
 0xb09   :  { %9020 = vrsqrt.f32 %v15030_v31  ;;  %v15033_v37 = vpop.xlane.xlu2 %6096  ;;  %7345 = vrot.lane.b32.xlu1 %v7038_v50, %s9161_s5  ;;  %vm6246_vm7 = vcmp.eq.f32.partialorder %v15030_v31, inf  ;;  %v7062_v54 = vsel %vm15069_vm8, %v15028_v38, %v7058_v10  ;;  %vm6248_vm11 = vcmp.eq.f32.partialorder %v15030_v31, 0.0 }
 0xb0a   :  { %v6801_v4 = vmul.f32 %v6800_v63, %v14991_v28  ;;  %9022 = vrsqrt.f32 %v15033_v37  ;;  %v5729_v16 = vpack.c.bf16 %v15056_v8, %v15056_v8  ;;  %v6249_v41 = vand.u32 2147483648, %v15030_v31 }
 0xb0b   :  { %9024 = vrcp.f32 %v5678_v35  ;;  %vm6258_vm5 = vcmp.eq.f32.partialorder %v15033_v37, inf  ;;  %v7067_v0 = vsel %vm7064_vm2, %v7066_v61, %v7062_v54  ;;  %vm6260_vm14 = vcmp.eq.f32.partialorder %v15033_v37, 0.0  ;;  %v16390_v35 = vld [vmem:[#allocation82_spill] sm:$0xff] }
 0xb0c   :  { %v6803_v22 = vsel %vm6802_vm3, %v14991_v28, %v6801_v4  ;;  %v16387_v28 = vld [vmem:[#allocation15_spill] sm:$0xff]  ;;  %v6261_v52 = vand.u32 2147483648, %v15033_v37 }
 0xb0d   :  { %v6806_v51 = vsel %vm6804_vm4, %v6805_v59, %v6803_v22  ;;  %v15045_v15 = vpop.xlane.xlu0 %6649  ;;  %v6449_v18 = vmul.f32 %v6448_v9, %v16387_v28 }
 0xb0e   :  { %v15047_v55 = vmax.f32 %v6806_v51, 1e-12  ;;  %9026 = vrsqrt.f32 %v15045_v15  ;;  %vm6838_vm12 = vcmp.eq.f32.partialorder %v15045_v15, inf  ;;  %vm6840_vm3 = vcmp.eq.f32.partialorder %v15045_v15, 0.0 }
 0xb0f   :  { %v9021_v36 = vpop.eup %9020  ;;  %v7109_v30 = vmul.f32 %v14217_v53, %v6449_v18  ;;  %v6841_v9 = vand.u32 2147483648, %v15045_v15 }
 0xb10   :  { %v9023_v27 = vpop.eup %9022  ;;  %9028 = vrcp.f32 %v15047_v55  ;;  %v6240_v7 = vmul.f32 %v9021_v36, %v15030_v31  ;;  %vm7044_vm13 = vweird.f32 %v15047_v55  ;;  %v7050_v32 = vand.u32 2147483648, %v15047_v55 }
 0xb11   :  { %v6252_v43 = vmul.f32 %v9023_v27, %v15033_v37  ;;  %v15061_v21 = vpop.xlane.xlu2 %6099  ;;  %v9025_v47 = vpop.eup %9024  ;;  %v7048_v51 = vand.u32 2147483647, %v15047_v55 }
 0xb12   :  { %v6241_v56 = vmul.f32 %v9021_v36, %v6240_v7  ;;  %9030 = vrsqrt.f32 %v15061_v21  ;;  %v15083_v3 = vmul.f32 %v9025_v47, %v14404_v13  ;;  %v7068_v13 = vmul.f32 %v7067_v0, %v16390_v35 }
 0xb13   :  { %v6253_v42 = vmul.f32 %v9023_v27, %v6252_v43  ;;  %v7051_v43 = vor.u32 1.1754944e-38, %v7050_v32  ;;  %vm7049_vm6 = vcmp.eq.f32.partialorder %v7048_v51, 8.507059e+37  ;;  %vm6270_vm10 = vcmp.eq.f32.partialorder %v15061_v21, inf }
 0xb14   :  { %v9027_v24 = vpop.eup %9026  ;;  %v6242_v57 = vmul.f32 0.5, %v6241_v56  ;;  %v5728_v19 = vpack.c.bf16 %v15083_v3, %v15083_v3  ;;  %7388 = vrot.lane.b32.xlu1 %v7068_v13, %s9161_s5  ;;  %v6273_v3 = vand.u32 2147483648, %v15061_v21  ;;  %vm6272_vm8 = vcmp.eq.f32.partialorder %v15061_v21, 0.0 }
 0xb15   :  { %v6254_v17 = vmul.f32 0.5, %v6253_v42  ;;  %v6832_v62 = vmul.f32 %v9027_v24, %v15045_v15  ;;  %v15086_v11 = vpop.xlane.xlu0 %6646 }
 0xb16   :  { %v9029_v20 = vpop.eup %9028  ;;  %v6243_v29 = vsub.f32 1.5, %v6242_v57  ;;  %9032 = vrsqrt.f32 %v15086_v11  ;;  %v5907_v57 = vunpack.c.l.b16 %v5728_v19 }
 0xb17   :  { %v6255_v39 = vsub.f32 1.5, %v6254_v17  ;;  %v6833_v2 = vmul.f32 %v9027_v24, %v6832_v62  ;;  %v7040_v44 = vmul.f32 %v9029_v20, %v15047_v55  ;;  %vm7045_vm9 = vweird.f32 %v9029_v20 }
 0xb18   :  { %v9031_v5 = vpop.eup %9030  ;;  %v6244_v34 = vmul.f32 %v9021_v36, %v6243_v29  ;;  %7294 = vrot.lane.b32.xlu2 %v7109_v30, %s9161_s5  ;;  %vm7046_vm4 = vmor %vm7044_vm13, %vm7045_vm9  ;;  %v16391_v30 = vld [vmem:[#allocation78_spill] sm:$0xff] }
 0xb19   :  { %v6256_v26 = vmul.f32 %v9023_v27, %v6255_v39  ;;  %v6834_v60 = vmul.f32 0.5, %v6833_v2  ;;  %v6264_v48 = vmul.f32 %v9031_v5, %v15061_v21  ;;  %v7174_v38 = vpop.permute.xlu2 %7173  ;;  %v7041_v4 = vsub.f32 1.0, %v7040_v44 }
 0xb1a   :  { %v6245_v63 = vmul.f32 %v6244_v34, %v15030_v31  ;;  %8270 = vmatpush.xpose.msk.msra.mxu1 %vm385_vm1, %v7174_v38 }
 0xb1b   :  { %v6257_v40 = vmul.f32 %v6256_v26, %v15033_v37  ;;  %v6835_v59 = vsub.f32 1.5, %v6834_v60  ;;  %v6265_v33 = vmul.f32 %v9031_v5, %v6264_v48  ;;  %v7042_v6 = vmul.f32 %v9029_v20, %v7041_v4 }
 0xb1c   :  { %v9033_v22 = vpop.eup %9032  ;;  %v6247_v12 = vsel %vm6246_vm7, %v15030_v31, %v6245_v63  ;;  %vm6826_vm7 = vcmp.eq.f32.partialorder %v15086_v11, inf }
 0xb1d   :  { %v6250_v23 = vsel %vm6248_vm11, %v6249_v41, %v6247_v12  ;;  %v6259_v50 = vsel %vm6258_vm5, %v15033_v37, %v6257_v40  ;;  %v6836_v14 = vmul.f32 %v9027_v24, %v6835_v59  ;;  %v6266_v36 = vmul.f32 0.5, %v6265_v33 }
 0xb1e   :  { %v15116_v49 = vmax.f32 %v6250_v23, 1e-12  ;;  %v6262_v28 = vsel %vm6260_vm14, %v6261_v52, %v6259_v50  ;;  %v6820_v18 = vmul.f32 %v9033_v22, %v15086_v11  ;;  %v7043_v27 = vadd.f32 %v9029_v20, %v7042_v6 }
 0xb1f   :  { %v15121_v7 = vmax.f32 %v6262_v28, 1e-12  ;;  %v6837_v45 = vmul.f32 %v6836_v14, %v15045_v15  ;;  %v6267_v31 = vsub.f32 1.5, %v6266_v36  ;;  %vm6828_vm11 = vcmp.eq.f32.partialorder %v15086_v11, 0.0 }
 0xb20   :  { %9034 = vrcp.f32 %v15116_v49  ;;  %v6821_v10 = vmul.f32 %v9033_v22, %v6820_v18  ;;  %v7125_v58 = vpop.permute.xlu1 %7124  ;;  %v7047_v47 = vsel %vm7046_vm4, %v9029_v20, %v7043_v27  ;;  %v6489_v19 = vand.u32 2147483647, %v15116_v49  ;;  %v16392_v27 = vld [vmem:[#allocation40_spill] sm:$0xff] }
 0xb21   :  { %9036 = vrcp.f32 %v15121_v7  ;;  %v6839_v37 = vsel %vm6838_vm12, %v15045_v15, %v6837_v45  ;;  %v6268_v56 = vmul.f32 %v9031_v5, %v6267_v31  ;;  %v7217_v25 = vpop.permute.xlu2 %7216  ;;  %8269 = vmatmul.msk.f32.gmra.mxu0 %vm385_vm1, %v7125_v58  ;;  %v7052_v42 = vsel %vm7049_vm6, %v7051_v43, %v7047_v47  ;;  %v16393_v43 = vld [vmem:[#allocation17_spill] sm:$0xff] }
 0xb22   :  { %v6842_v55 = vsel %vm6840_vm3, %v6841_v9, %v6839_v37  ;;  %v6822_v54 = vmul.f32 0.5, %v6821_v10  ;;  %8274 = vmatpush.xpose.msk.msra.mxu2 %vm385_vm1, %v7217_v25  ;;  %v7053_v24 = vmul.f32 %v7052_v42, %v16391_v30  ;;  %v5908_v15 = vunpack.c.l.b16 %v5729_v16 }
 0xb23   :  { %v15136_v41 = vmax.f32 %v6842_v55, 1e-12  ;;  %v6269_v61 = vmul.f32 %v6268_v56, %v15061_v21  ;;  %v6491_v60 = vand.u32 2147483648, %v15116_v49  ;;  %v6504_v38 = vand.u32 2147483647, %v15121_v7 }
 0xb24   :  { %v6823_v17 = vsub.f32 1.5, %v6822_v54  ;;  %7386 = vrot.lane.b32.xlu1 %v7053_v24, %s9161_s5  ;;  %v5909_v2 = vpack.c.b16 %v5908_v15, %v5907_v57  ;;  %v6506_v40 = vand.u32 2147483648, %v15121_v7  ;;  %vm6485_vm14 = vweird.f32 %v15116_v49 }
 0xb25   :  { %9038 = vrcp.f32 %v15136_v41  ;;  %v6271_v62 = vsel %vm6270_vm10, %v15061_v21, %v6269_v61  ;;  %v6829_v21 = vand.u32 2147483648, %v15086_v11  ;;  %vm6500_vm12 = vweird.f32 %v15121_v7 }
 0xb26   :  { %v9035_v20 = vpop.eup %9034  ;;  %v6274_v29 = vsel %vm6272_vm8, %v6273_v3, %v6271_v62  ;;  %v6824_v0 = vmul.f32 %v9033_v22, %v6823_v17  ;;  %vm6490_vm13 = vcmp.eq.f32.partialorder %v6489_v19, 8.507059e+37  ;;  %v6507_v50 = vor.u32 1.1754944e-38, %v6506_v40 }
 0xb27   :  { %v9037_v39 = vpop.eup %9036  ;;  %v15148_v35 = vmax.f32 %v6274_v29, 1e-12  ;;  %v6481_v13 = vmul.f32 %v9035_v20, %v15116_v49  ;;  %vm6486_vm2 = vweird.f32 %v9035_v20  ;;  %vm6505_vm4 = vcmp.eq.f32.partialorder %v6504_v38, 8.507059e+37  ;;  %v16398_v38 = vld [vmem:[#allocation85_spill] sm:$0xff] }
 0xb28   :  { %v6825_v5 = vmul.f32 %v6824_v0, %v15086_v11  ;;  %v7172_v8 = vpop.permute.xlu1 %7171  ;;  %v5911_v16 = vpop.permute.xlu0 %5910  ;;  %v6496_v34 = vmul.f32 %v9037_v39, %v15121_v7  ;;  %vm6501_vm5 = vweird.f32 %v9037_v39  ;;  %vm6487_vm3 = vmor %vm6485_vm14, %vm6486_vm2  ;;  %vm7089_vm6 = vweird.f32 %v15136_v41 }
 0xb29   :  { %9040 = vrcp.f32 %v15148_v35  ;;  %v7166_v52 = vpop.permute.xlu2 %7165  ;;  %5923 = vmatpush.bf16.msra.mxu3 %v5911_v16  ;;  %8271 = vmatpush.xpose.msk.msra.mxu1 %vm385_vm1, %v7172_v8  ;;  %v6482_v44 = vsub.f32 1.0, %v6481_v13  ;;  %vm6502_vm9 = vmor %vm6500_vm12, %vm6501_vm5  ;;  %v7093_v47 = vand.u32 2147483647, %v15136_v41  ;;  %v6521_v56 = vand.u32 2147483648, %v15148_v35  ;;  %v16396_v8 = vld [vmem:[#allocation14_spill] sm:$0xff] }
 0xb2a   :  { %v6827_v26 = vsel %vm6826_vm7, %v15086_v11, %v6825_v5  ;;  %v6497_v48 = vsub.f32 1.0, %v6496_v34  ;;  %v6492_v11 = vor.u32 1.1754944e-38, %v6491_v60  ;;  %v7095_v42 = vand.u32 2147483648, %v15136_v41 }
 0xb2b   :  { %v15162_v63 = vpop.eup %9038  ;;  %v6830_v9 = vsel %vm6828_vm11, %v6829_v21, %v6827_v26  ;;  %v6483_v4 = vmul.f32 %v9035_v20, %v6482_v44  ;;  %v6519_v24 = vand.u32 2147483647, %v15148_v35  ;;  %vm6515_vm11 = vweird.f32 %v15148_v35 }
 0xb2c   :  { %v15167_v59 = vmax.f32 %v6830_v9, 1e-12  ;;  %8262 = vmatmul.msk.bf16.vlgmr.msra.gmra.mxu3 %vm1694_vm15, %v5909_v2  ;;  %8272 = vmatmul.msk.f32.vlgmr.msra.gmra.mxu1 %vm385_vm1, %v7166_v52  ;;  %v6498_v33 = vmul.f32 %v9037_v39, %v6497_v48  ;;  %v7085_v32 = vmul.f32 %v15162_v63, %v15136_v41  ;;  %vm7090_vm10 = vweird.f32 %v15162_v63  ;;  %v16397_v52 = vld [vmem:[#allocation86_spill] sm:$0xff]  ;;  %v15213_v48 = vpop.f32.mrf.mxu0 }
 0xb2d   :  { %v6484_v22 = vadd.f32 %v9035_v20, %v6483_v4  ;;  %vm15194_vm7 = vmor %vm7089_vm6, %vm7090_vm10  ;;  %v6522_v15 = vor.u32 1.1754944e-38, %v6521_v56  ;;  %vm7094_vm5 = vcmp.eq.f32.partialorder %v7093_v47, 8.507059e+37  ;;  %v7096_v62 = vor.u32 1.1754944e-38, %v7095_v42 }
 0xb2e   :  { %9042 = vrcp.f32 %v15167_v59  ;;  %v6499_v12 = vadd.f32 %v9037_v39, %v6498_v33  ;;  %v7086_v6 = vsub.f32 1.0, %v7085_v32  ;;  %vm6520_vm14 = vcmp.eq.f32.partialorder %v6519_v24, 8.507059e+37 }
 0xb2f   :  { %v9041_v51 = vpop.eup %9040  ;;  %v6488_v23 = vsel %vm6487_vm3, %v9035_v20, %v6484_v22  ;;  %v7078_v0 = vand.u32 2147483647, %v15167_v59  ;;  %vm7074_vm3 = vweird.f32 %v15167_v59 }
 0xb30   :  { %v7168_v14 = vpop.permute.xlu0 %7167  ;;  %v6493_v36 = vsel %vm6490_vm13, %v6492_v11, %v6488_v23  ;;  %v6503_v28 = vsel %vm6502_vm9, %v9037_v39, %v6499_v12  ;;  %v6511_v18 = vmul.f32 %v9041_v51, %v15148_v35  ;;  %v7087_v31 = vmul.f32 %v15162_v63, %v7086_v6 }
 0xb31   :  { %v7215_v49 = vpop.permute.xlu2 %7214  ;;  %v6494_v7 = vmul.f32 %v6493_v36, %v16392_v27  ;;  %v6508_v45 = vsel %vm6505_vm4, %v6507_v50, %v6503_v28  ;;  %vm6516_vm8 = vweird.f32 %v9041_v51  ;;  %v7080_v39 = vand.u32 2147483648, %v15167_v59 }
 0xb32   :  { %8275 = vmatpush.xpose.msk.msra.mxu2 %vm385_vm1, %v7215_v49  ;;  %v6509_v10 = vmul.f32 %v6508_v45, %v16393_v43  ;;  %v6512_v58 = vsub.f32 1.0, %v6511_v18  ;;  %v7088_v25 = vadd.f32 %v15162_v63, %v7087_v31  ;;  %vm6517_vm2 = vmor %vm6515_vm11, %vm6516_vm8  ;;  %vm7079_vm9 = vcmp.eq.f32.partialorder %v7078_v0, 8.507059e+37 }
 0xb33   :  { %v7112_v37 = vmul.f32 %v14217_v53, %v6494_v7  ;;  %v7081_v19 = vor.u32 1.1754944e-38, %v7080_v39 }
 0xb34   :  { %v9043_v55 = vpop.eup %9042  ;;  %8273 = vmatmul.msk.f32.gmra.mxu1 %vm385_vm1, %v7168_v14  ;;  %v7113_v54 = vmul.f32 %v14217_v53, %v6509_v10  ;;  %v6513_v30 = vmul.f32 %v9041_v51, %v6512_v58  ;;  %v7092_v17 = vsel %vm15194_vm7, %v15162_v63, %v7088_v25  ;;  %v15218_v40 = vpop.f32.mrf.mxu0  ;;  %v15228_v14 = vld [vmem:[%s15681_s8 + $0x30] sm:$0xff] }
 0xb35   :  { %7339 = vrot.lane.b32.xlu0 %v7112_v37, %s9161_s5  ;;  %v7070_v61 = vmul.f32 %v9043_v55, %v15167_v59  ;;  %v7097_v5 = vsel %vm7094_vm5, %v7096_v62, %v7092_v17  ;;  %vm7075_vm12 = vweird.f32 %v9043_v55 }
 0xb36   :  { %7380 = vrot.lane.b32.xlu2 %v7113_v54, %s9161_s5  ;;  %v6514_v3 = vadd.f32 %v9041_v51, %v6513_v30  ;;  %v7098_v44 = vmul.f32 %v7097_v5, %v16397_v52  ;;  %vm7076_vm13 = vmor %vm7074_vm3, %vm7075_vm12 }
 0xb37   :  { %v7071_v41 = vsub.f32 1.0, %v7070_v61 }
 0xb38   :  { %v7211_v20 = vpop.permute.xlu0 %7210  ;;  %v6518_v29 = vsel %vm6517_vm2, %v9041_v51, %v6514_v3 }
 0xb39   :  { %v7209_v2 = vpop.permute.xlu2 %7208  ;;  %v6523_v13 = vsel %vm6520_vm14, %v6522_v15, %v6518_v29  ;;  %v7072_v35 = vmul.f32 %v9043_v55, %v7071_v41 }
 0xb3a   :  { %8276 = vmatmul.msk.f32.vlgmr.msra.gmra.mxu2 %vm385_vm1, %v7209_v2  ;;  %v6524_v16 = vmul.f32 %v6523_v13, %v16396_v8 }
 0xb3b   :  { %v7073_v34 = vadd.f32 %v9043_v55, %v7072_v35 }
 0xb3c   :  { %v7114_v21 = vmul.f32 %v14217_v53, %v6524_v16  ;;  %v15220_v33 = vpop.f32.mrf.mxu0 }
 0xb3d   :  { %v7077_v26 = vsel %vm7076_vm13, %v9043_v55, %v7073_v34 }
 0xb3e   :  { %7382 = vrot.lane.b32.xlu1 %v7114_v21, %s9161_s5  ;;  %7431 = vrot.lane.b32.xlu2 %v7098_v44, %s9161_s5  ;;  %v7082_v60 = vsel %vm7079_vm9, %v7081_v19, %v7077_v26  ;;  %vm5994_vm9 = vcmask 195712  }
 0xb3f   :  { %v7083_v63 = vmul.f32 %v7082_v60, %v16398_v38 }
 0xb40   :  { %v7258_v9 = vpop.permute.xlu0 %7257 }
 0xb41   :  { %7429 = vrot.lane.b32.xlu0 %v7083_v63, %s9161_s5 }
 0xb42   :  { %8277 = vmatmul.msk.f32.gmra.mxu2 %vm385_vm1, %v7211_v20  ;;  %v16399_v20 = vld [vmem:[#allocation45_spill] sm:$0xff] }
 0xb44   :  { %v15223_v12 = vpop.f32.mrf.mxu0 }
 0xb48   :  { %v7252_v4 = vpop.permute.xlu0 %7251 }
 0xb50   :  { %v7254_v59 = vpop.permute.xlu0 %7253 }
 0xb52   :  { %v7157_v36 = vpop.f32.mrf.mxu0 }
 0xb53   :  { %v6103_v32 = vpop.xlane.xlu1 %6102  ;;  %v15231_v49 = vadd.f32 %v15228_v14, %v7157_v36 }
 0xb54   :  { %9044 = vrsqrt.f32 %v6103_v32  ;;  %vm6282_vm4 = vcmp.eq.f32.partialorder %v6103_v32, inf  ;;  %v6285_v27 = vand.u32 2147483648, %v6103_v32  ;;  %vm6284_vm6 = vcmp.eq.f32.partialorder %v6103_v32, 0.0 }
 0xb55   :  { %v7464_v43 = vsel %vm1694_vm15, %v15231_v49, -inf }
 0xb58   :  { %v7303_v22 = vpop.permute.xlu0 %7302 }
 0xb59   :  { %8282 = vmatpush.xpose.msk.msra.mxu0 %vm385_vm1, %v7303_v22 }
 0xb5a   :  { %v9045_v11 = vpop.eup %9044 }
 0xb5b   :  { %v6276_v6 = vmul.f32 %v9045_v11, %v6103_v32 }
 0xb5d   :  { %v6277_v51 = vmul.f32 %v9045_v11, %v6276_v6  ;;  %v15250_v6 = vpop.f32.mrf.mxu2 }
 0xb5f   :  { %v6278_v23 = vmul.f32 0.5, %v6277_v51 }
 0xb60   :  { %v7297_v25 = vpop.permute.xlu0 %7296 }
 0xb61   :  { %v6279_v50 = vsub.f32 1.5, %v6278_v23 }
 0xb63   :  { %v6280_v28 = vmul.f32 %v9045_v11, %v6279_v50  ;;  %v15254_v50 = vpop.f32.mrf.mxu1 }
 0xb65   :  { %v6281_v18 = vmul.f32 %v6280_v28, %v6103_v32  ;;  %v16400_v28 = vld [vmem:[#allocation43_spill] sm:$0xff] }
 0xb67   :  { %v6283_v7 = vsel %vm6282_vm4, %v6103_v32, %v6281_v18 }
 0xb68   :  { %v6286_v45 = vsel %vm6284_vm6, %v6285_v27, %v6283_v7  ;;  %v7344_v0 = vpop.permute.xlu0 %7343  ;;  %v15259_v7 = vpop.f32.mrf.mxu2 }
 0xb69   :  { %v6313_v31 = vmax.f32 %v6286_v45, 1e-12  ;;  %v15264_v45 = vld [vmem:[%s15681_s8 + $0x38] sm:$0xff]  ;;  %s9162_s8 = smov 8  }
 0xb6b   :  { %9046 = vrcp.f32 %v6313_v31  ;;  %7465 = vmax.xlane.f32.xlu0 %v7464_v43  ;;  %v7260_v10 = vpop.permute.xlu1 %7259  ;;  %v6536_v55 = vand.u32 2147483648, %v6313_v31  ;;  %v6534_v30 = vand.u32 2147483647, %v6313_v31  ;;  %vm6530_vm8 = vweird.f32 %v6313_v31  ;;  %v15266_v43 = vpop.f32.mrf.mxu1 }
 0xb6c   :  { %8278 = vmatpush.xpose.msk.msrb.mxu3 %vm385_vm1, %v7260_v10 }
 0xb6d   :  { %v6537_v61 = vor.u32 1.1754944e-38, %v6536_v55  ;;  %vm6535_vm11 = vcmp.eq.f32.partialorder %v6534_v30, 8.507059e+37 }
 0xb70   :  { %8279 = vmatpush.xpose.msk.msrb.mxu3 %vm385_vm1, %v7258_v9  ;;  %v7338_v21 = vpop.permute.xlu0 %7337 }
 0xb71   :  { %v9047_v58 = vpop.eup %9046 }
 0xb72   :  { %v6526_v47 = vmul.f32 %v9047_v58, %v6313_v31  ;;  %vm6531_vm10 = vweird.f32 %v9047_v58 }
 0xb73   :  { %v6106_v37 = vpop.xlane.xlu2 %6105  ;;  %v7301_v56 = vpop.permute.xlu1 %7300  ;;  %8280 = vmatmul.msk.f32.vlgmr.msrb.gmra.mxu3 %vm385_vm1, %v7252_v4  ;;  %vm6532_vm7 = vmor %vm6530_vm8, %vm6531_vm10 }
 0xb74   :  { %9048 = vrsqrt.f32 %v6106_v37  ;;  %8283 = vmatpush.xpose.msk.msra.mxu0 %vm385_vm1, %v7301_v56  ;;  %v6527_v42 = vsub.f32 1.0, %v6526_v47  ;;  %vm6294_vm2 = vcmp.eq.f32.partialorder %v6106_v37, inf  ;;  %v6297_v16 = vand.u32 2147483648, %v6106_v37  ;;  %v15274_v47 = vpop.f32.mrf.mxu2 }
 0xb75   :  { %vm6296_vm5 = vcmp.eq.f32.partialorder %v6106_v37, 0.0 }
 0xb76   :  { %v6528_v54 = vmul.f32 %v9047_v58, %v6527_v42 }
 0xb78   :  { %v6529_v24 = vadd.f32 %v9047_v58, %v6528_v54 }
 0xb7a   :  { %v9049_v57 = vpop.eup %9048  ;;  %v6533_v15 = vsel %vm6532_vm7, %v9047_v58, %v6529_v24 }
 0xb7b   :  { %v6288_v3 = vmul.f32 %v9049_v57, %v6106_v37  ;;  %v7295_v17 = vpop.permute.xlu2 %7294  ;;  %8281 = vmatmul.msk.f32.gmra.mxu3 %vm385_vm1, %v7254_v59  ;;  %v6538_v62 = vsel %vm6535_vm11, %v6537_v61, %v6533_v15  ;;  %v7346_v5 = vpop.permute.xlu1 %7345 }
 0xb7c   :  { %8284 = vmatmul.msk.f32.vlgmr.msra.gmra.mxu0 %vm385_vm1, %v7295_v17  ;;  %v6539_v29 = vmul.f32 %v6538_v62, %v16399_v20  ;;  %8286 = vmatpush.xpose.msk.msrb.mxu1 %vm385_vm1, %v7346_v5  ;;  %v15280_v42 = vpop.f32.mrf.mxu2 }
 0xb7d   :  { %v6289_v41 = vmul.f32 %v9049_v57, %v6288_v3 }
 0xb7e   :  { %v7115_v2 = vmul.f32 %v14217_v53, %v6539_v29 }
 0xb7f   :  { %v6290_v39 = vmul.f32 0.5, %v6289_v41 }
 0xb80   :  { %7423 = vrot.lane.b32.xlu1 %v7115_v2, %s9161_s5  ;;  %8287 = vmatpush.xpose.msk.msrb.mxu1 %vm385_vm1, %v7344_v0  ;;  %v15304_v0 = vpop.f32.mrf.mxu3 }
 0xb81   :  { %v6291_v13 = vsub.f32 1.5, %v6290_v39 }
 0xb83   :  { %v6292_v35 = vmul.f32 %v9049_v57, %v6291_v13  ;;  %8288 = vmatmul.msk.f32.vlgmr.msrb.gmra.mxu1 %vm385_vm1, %v7338_v21 }
 0xb84   :  { %8285 = vmatmul.msk.f32.gmra.mxu0 %vm385_vm1, %v7297_v25 }
 0xb85   :  { %v6293_v8 = vmul.f32 %v6292_v35, %v6106_v37 }
 0xb86   :  { %v7389_v19 = vpop.permute.xlu1 %7388 }
 0xb87   :  { %v6295_v34 = vsel %vm6294_vm2, %v6106_v37, %v6293_v8  ;;  %8290 = vmatpush.xpose.msk.msrb.mxu2 %vm385_vm1, %v7389_v19  ;;  %v15276_v37 = vpop.f32.mrf.mxu1 }
 0xb88   :  { %v6298_v52 = vsel %vm6296_vm5, %v6297_v16, %v6295_v34  ;;  %v15306_v39 = vpop.f32.mrf.mxu3 }
 0xb89   :  { %v6314_v44 = vmax.f32 %v6298_v52, 1e-12 }
 0xb8b   :  { %9050 = vrcp.f32 %v6314_v44  ;;  %v6551_v9 = vand.u32 2147483648, %v6314_v44  ;;  %v6549_v32 = vand.u32 2147483647, %v6314_v44  ;;  %vm6545_vm12 = vweird.f32 %v6314_v44 }
 0xb8d   :  { %v6552_v51 = vor.u32 1.1754944e-38, %v6551_v9  ;;  %vm6550_vm13 = vcmp.eq.f32.partialorder %v6549_v32, 8.507059e+37 }
 0xb8f   :  { %v15282_v55 = vpop.f32.mrf.mxu1 }
 0xb90   :  { %v7381_v26 = vpop.permute.xlu2 %7380 }
 0xb91   :  { %v9051_v60 = vpop.eup %9050 }
 0xb92   :  { %v6541_v38 = vmul.f32 %v9051_v60, %v6314_v44  ;;  %vm6546_vm14 = vweird.f32 %v9051_v60 }
 0xb93   :  { %vm6547_vm3 = vmor %vm6545_vm12, %vm6546_vm14 }
 0xb94   :  { %v6542_v63 = vsub.f32 1.0, %v6541_v38 }
 0xb96   :  { %v7387_v4 = vpop.permute.xlu1 %7386  ;;  %v6543_v59 = vmul.f32 %v9051_v60, %v6542_v63 }
 0xb97   :  { %8291 = vmatpush.xpose.msk.msrb.mxu2 %vm385_vm1, %v7387_v4 }
 0xb98   :  { %v7432_v22 = vpop.permute.xlu2 %7431  ;;  %v6544_v11 = vadd.f32 %v9051_v60, %v6543_v59 }
 0xb99   :  { %8294 = vmatpush.xpose.msk.msra.mxu3 %vm385_vm1, %v7432_v22  ;;  %v16401_v22 = vld [vmem:[#allocation53_spill] sm:$0xff] }
 0xb9a   :  { %8292 = vmatmul.msk.f32.vlgmr.msrb.gmra.mxu2 %vm385_vm1, %v7381_v26  ;;  %v6548_v23 = vsel %vm6547_vm3, %v9051_v60, %v6544_v11 }
 0xb9b   :  { %v6553_v36 = vsel %vm6550_vm13, %v6552_v51, %v6548_v23 }
 0xb9c   :  { %v6554_v18 = vmul.f32 %v6553_v36, %v16400_v28 }
 0xb9e   :  { %v7116_v27 = vmul.f32 %v14217_v53, %v6554_v18  ;;  %v7160_v31 = vpop.f32.mrf.mxu0 }
 0xb9f   :  { %v15269_v10 = vadd.f32 %v15264_v45, %v7160_v31 }
 0xba0   :  { %7425 = vrot.lane.b32.xlu2 %v7116_v27, %s9161_s5 }
 0xba1   :  { %v7467_v53 = vsel %vm1694_vm15, %v15269_v10, -inf }
 0xba7   :  { %v7340_v58 = vpop.permute.xlu0 %7339 }
 0xba8   :  { %8289 = vmatmul.msk.f32.gmra.mxu1 %vm385_vm1, %v7340_v58 }
 0xba9   :  { %v7200_v24 = vpop.f32.mrf.mxu1 }
 0xbaa   :  { %7468 = vmax.xlane.f32.xlu1 %v7467_v53  ;;  %v15290_v61 = vadd.f32 %v15228_v14, %v7200_v24 }
 0xbac   :  { %v7470_v15 = vsel %vm1694_vm15, %v15290_v61, -inf }
 0xbaf   :  { %v15308_v2 = vpop.f32.mrf.mxu3 }
 0xbb0   :  { %v7383_v56 = vpop.permute.xlu1 %7382 }
 0xbb1   :  { %8293 = vmatmul.msk.f32.gmra.mxu2 %vm385_vm1, %v7383_v56  ;;  %v7203_v41 = vpop.f32.mrf.mxu1 }
 0xbb2   :  { %v15300_v20 = vadd.f32 %v15264_v45, %v7203_v41 }
 0xbb3   :  { %v7430_v25 = vpop.permute.xlu0 %7429 }
 0xbb4   :  { %8295 = vmatpush.xpose.msk.msra.mxu3 %vm385_vm1, %v7430_v25  ;;  %v7473_v29 = vsel %vm1694_vm15, %v15300_v20, -inf }
 0xbb7   :  { %v15310_v13 = vpop.f32.mrf.mxu3 }
 0xbbd   :  { %v7243_v54 = vpop.f32.mrf.mxu2 }
 0xbbe   :  { %v15285_v30 = vadd.f32 %v15228_v14, %v7243_v54 }
 0xbc0   :  { %v7476_v57 = vsel %vm1694_vm15, %v15285_v30, -inf }
 0xbc1   :  { %7477 = vmax.xlane.f32.xlu0 %v7476_v57 }
 0xbc5   :  { %v7246_v3 = vpop.f32.mrf.mxu2 }
 0xbc6   :  { %v15293_v17 = vadd.f32 %v15264_v45, %v7246_v3 }
 0xbc8   :  { %v7479_v62 = vsel %vm1694_vm15, %v15293_v17, -inf }
 0xbc9   :  { %7471 = vmax.xlane.f32.xlu2 %v7470_v15  ;;  %7480 = vmax.xlane.f32.xlu1 %v7479_v62 }
 0xbd1   :  { %7474 = vmax.xlane.f32.xlu2 %v7473_v29 }
 0xbde   :  { %v7466_v11 = vpop.xlane.xlu0 %7465 }
 0xbdf   :  { %v7512_v36 = vsub.f32 %v15231_v49, %v7466_v11 }
 0xbe1   :  { %v7528_v18 = vmul.f32 1.442695, %v7512_v36 }
 0xbe3   :  { %9052 = vpow2.f32 %v7528_v18 }
 0xbe9   :  { %v15353_v25 = vpop.eup %9052 }
 0xbea   :  { %v7560_v54 = vsel %vm1694_vm15, %v15353_v25, 0.0 }
 0xbf2   :  { %v7424_v5 = vpop.permute.xlu1 %7423 }
 0xbf3   :  { %8296 = vmatmul.msk.f32.vlgmr.msra.gmra.mxu3 %vm385_vm1, %v7424_v5 }
 0xbf6   :  { %v7286_v35 = vpop.f32.mrf.mxu3 }
 0xbf7   :  { %v15314_v8 = vadd.f32 %v15228_v14, %v7286_v35 }
 0xbf9   :  { %v7329_v16 = vpop.f32.mrf.mxu0  ;;  %v7482_v34 = vsel %vm1694_vm15, %v15314_v8, -inf }
 0xbfa   :  { %v7426_v21 = vpop.permute.xlu2 %7425  ;;  %7483 = vmax.xlane.f32.xlu2 %v7482_v34  ;;  %v15330_v63 = vadd.f32 %v15228_v14, %v7329_v16 }
 0xbfb   :  { %8297 = vmatmul.msk.f32.gmra.mxu3 %vm385_vm1, %v7426_v21  ;;  %vm4068_vm1 = vcmask 130112  }
 0xbfc   :  { %v7488_v9 = vsel %vm1694_vm15, %v15330_v63, -inf }
 0xbfe   :  { %v7289_v52 = vpop.f32.mrf.mxu3 }
 0xbff   :  { %v15320_v44 = vadd.f32 %v15264_v45, %v7289_v52 }
 0xc00   :  { %v7372_v4 = vpop.f32.mrf.mxu1 }
 0xc01   :  { %v7332_v19 = vpop.f32.mrf.mxu0  ;;  %v7485_v26 = vsel %vm1694_vm15, %v15320_v44, -inf  ;;  %v15335_v59 = vadd.f32 %v15228_v14, %v7372_v4 }
 0xc02   :  { %v15325_v60 = vadd.f32 %v15264_v45, %v7332_v19  ;;  %7486 = vmax.xlane.f32.xlu0 %v7485_v26  ;;  %v16402_v19 = vld [vmem:[#allocation95_spill] sm:$0xff] }
 0xc03   :  { %v7494_v32 = vsel %vm1694_vm15, %v15335_v59, -inf }
 0xc04   :  { %v7491_v38 = vsel %vm1694_vm15, %v15325_v60, -inf }
 0xc05   :  { %7492 = vmax.xlane.f32.xlu1 %v7491_v38 }
 0xc0a   :  { %7489 = vmax.xlane.f32.xlu0 %v7488_v9 }
 0xc12   :  { %7661 = vrot.lane.b32.xlu2 %v16401_v22, %s9161_s5  ;;  %7495 = vmax.xlane.f32.xlu0 %v7494_v32 }
 0xc1d   :  { %v7415_v51 = vpop.f32.mrf.mxu2  ;;  %v7469_v31 = vpop.xlane.xlu1 %7468 }
 0xc1e   :  { %v15342_v23 = vadd.f32 %v15228_v14, %v7415_v51  ;;  %v7513_v56 = vsub.f32 %v15269_v10, %v7469_v31 }
 0xc20   :  { %v7500_v28 = vsel %vm1694_vm15, %v15342_v23, -inf  ;;  %v7530_v49 = vmul.f32 1.442695, %v7513_v56 }
 0xc21   :  { %7501 = vmax.xlane.f32.xlu0 %v7500_v28 }
 0xc22   :  { %9054 = vpow2.f32 %v7530_v49 }
 0xc25   :  { %v7375_v27 = vpop.f32.mrf.mxu1 }
 0xc26   :  { %v15348_v58 = vadd.f32 %v15264_v45, %v7375_v27 }
 0xc28   :  { %v7497_v53 = vsel %vm1694_vm15, %v15348_v58, -inf  ;;  %v15360_v3 = vpop.eup %9054 }
 0xc29   :  { %7498 = vmax.xlane.f32.xlu1 %v7497_v53  ;;  %v7563_v10 = vsel %vm1694_vm15, %v15360_v3, 0.0 }
 0xc31   :  { %7561 = vadd.xlane.f32.xlu1 %v7560_v54 }
 0xc34   :  { %v7418_v24 = vpop.f32.mrf.mxu2  ;;  %v7478_v38 = vpop.xlane.xlu0 %7477 }
 0xc35   :  { %v15358_v57 = vadd.f32 %v15264_v45, %v7418_v24  ;;  %v7516_v56 = vsub.f32 %v15285_v30, %v7478_v38 }
 0xc37   :  { %v7503_v15 = vsel %vm1694_vm15, %v15358_v57, -inf  ;;  %v7536_v49 = vmul.f32 1.442695, %v7516_v56 }
 0xc39   :  { %7504 = vmax.xlane.f32.xlu1 %v7503_v15 }
 0xc3b   :  { %7564 = vadd.xlane.f32.xlu2 %v7563_v10 }
 0xc3c   :  { %v7472_v62 = vpop.xlane.xlu2 %7471  ;;  %v7481_v41 = vpop.xlane.xlu1 %7480 }
 0xc3d   :  { %v7517_v35 = vsub.f32 %v15293_v17, %v7481_v41  ;;  %v16403_v17 = vld [vmem:[#allocation98_spill] sm:$0xff]  ;;  %v7514_v36 = vsub.f32 %v15290_v61, %v7472_v62 }
 0xc3f   :  { %v7538_v34 = vmul.f32 1.442695, %v7517_v35  ;;  %v7532_v28 = vmul.f32 1.442695, %v7514_v36 }
 0xc44   :  { %v7475_v29 = vpop.xlane.xlu2 %7474 }
 0xc45   :  { %v7515_v5 = vsub.f32 %v15300_v20, %v7475_v29 }
 0xc47   :  { %v7534_v16 = vmul.f32 1.442695, %v7515_v5 }
 0xc49   :  { %9056 = vpow2.f32 %v7534_v16 }
 0xc4a   :  { %9058 = vpow2.f32 %v7538_v34 }
 0xc4f   :  { %v15368_v21 = vpop.eup %9056 }
 0xc50   :  { %v7569_v52 = vsel %vm1694_vm15, %v15368_v21, 0.0  ;;  %v15374_v26 = vpop.eup %9058 }
 0xc51   :  { %7570 = vadd.xlane.f32.xlu1 %v7569_v52  ;;  %v7575_v20 = vsel %vm1694_vm15, %v15374_v26, 0.0 }
 0xc53   :  { %7686 = vrot.lane.b32.xlu2 %v16402_v19, %s9161_s5 }
 0xc59   :  { %7576 = vadd.xlane.f32.xlu1 %v7575_v20 }
 0xc5b   :  { %7711 = vrot.lane.b32.xlu2 %v16403_v17, %s9161_s5 }
 0xc6d   :  { %v7484_v9 = vpop.xlane.xlu2 %7483 }
 0xc75   :  { %v7662_v4 = vpop.permute.xlu2 %7661  ;;  %v7487_v32 = vpop.xlane.xlu0 %7486 }
 0xc76   :  { %v7519_v22 = vsub.f32 %v15320_v44, %v7487_v32  ;;  %7674 = vmatpush.bf16.msrb.mxu0 %v7662_v4  ;;  %v7458_v11 = vpop.f32.mrf.mxu3 }
 0xc77   :  { %v15383_v18 = vadd.f32 %v15228_v14, %v7458_v11 }
 0xc78   :  { %v7542_v51 = vmul.f32 1.442695, %v7519_v22  ;;  %v7493_v29 = vpop.xlane.xlu1 %7492 }
 0xc79   :  { %v7506_v14 = vsel %vm1694_vm15, %v15383_v18, -inf }
 0xc7a   :  { %9060 = vpow2.f32 %v7542_v51 }
 0xc7b   :  { %9062 = vpow2.f32 %v7532_v28 }
 0xc7c   :  { %9064 = vpow2.f32 %v7536_v49 }
 0xc7d   :  { %v7490_v15 = vpop.xlane.xlu0 %7489 }
 0xc7e   :  { %v7461_v27 = vpop.f32.mrf.mxu3  ;;  %v7520_v62 = vsub.f32 %v15330_v63, %v7490_v15 }
 0xc7f   :  { %v15388_v53 = vadd.f32 %v15264_v45, %v7461_v27  ;;  %v7518_v45 = vsub.f32 %v15314_v8, %v7484_v9  ;;  %v7521_v8 = vsub.f32 %v15325_v60, %v7493_v29  ;;  %v16405_v29 = vld [vmem:[#allocation103_spill] sm:$0xff] }
 0xc80   :  { %v15385_v31 = vpop.eup %9060  ;;  %v7544_v5 = vmul.f32 1.442695, %v7520_v62 }
 0xc81   :  { %v7581_v44 = vsel %vm1694_vm15, %v15385_v31, 0.0  ;;  %v7509_v61 = vsel %vm1694_vm15, %v15388_v53, -inf  ;;  %v15397_v54 = vpop.eup %9062  ;;  %v7540_v24 = vmul.f32 1.442695, %v7518_v45  ;;  %v7546_v34 = vmul.f32 1.442695, %v7521_v8 }
 0xc82   :  { %7582 = vadd.xlane.f32.xlu1 %v7581_v44  ;;  %7510 = vmax.xlane.f32.xlu0 %v7509_v61  ;;  %v7566_v30 = vsel %vm1694_vm15, %v15397_v54, 0.0  ;;  %v15402_v10 = vpop.eup %9064 }
 0xc83   :  { %9066 = vpow2.f32 %v7540_v24  ;;  %v7572_v41 = vsel %vm1694_vm15, %v15402_v10, 0.0 }
 0xc84   :  { %7507 = vmax.xlane.f32.xlu2 %v7506_v14  ;;  %9068 = vpow2.f32 %v7544_v5 }
 0xc85   :  { %9070 = vpow2.f32 %v7546_v34  ;;  %v7496_v36 = vpop.xlane.xlu0 %7495  ;;  %v16406_v34 = vld [vmem:[#allocation104_spill] sm:$0xff] }
 0xc86   :  { %v7522_v27 = vsub.f32 %v15335_v59, %v7496_v36  ;;  %v16404_v59 = vld [vmem:[#allocation101_spill] sm:$0xff] }
 0xc88   :  { %v7548_v45 = vmul.f32 1.442695, %v7522_v27 }
 0xc89   :  { %v15407_v35 = vpop.eup %9066 }
 0xc8a   :  { %7567 = vadd.xlane.f32.xlu0 %v7566_v30  ;;  %v7578_v16 = vsel %vm1694_vm15, %v15407_v35, 0.0  ;;  %v15415_v19 = vpop.eup %9068 }
 0xc8b   :  { %v7584_v60 = vsel %vm1694_vm15, %v15415_v19, 0.0  ;;  %v15419_v38 = vpop.eup %9070 }
 0xc92   :  { %7573 = vadd.xlane.f32.xlu0 %v7572_v41 }
 0xc94   :  { %v7502_v5 = vpop.xlane.xlu0 %7501 }
 0xc95   :  { %v7524_v8 = vsub.f32 %v15342_v23, %v7502_v5 }
 0xc9a   :  { %7579 = vadd.xlane.f32.xlu0 %v7578_v16  ;;  %v7552_v16 = vmul.f32 1.442695, %v7524_v8 }
 0xc9b   :  { %7736 = vrot.lane.b32.xlu1 %v16324_v1, %s9161_s5 }
 0xc9c   :  { %v7499_v63 = vpop.xlane.xlu1 %7498 }
 0xc9d   :  { %v7523_v52 = vsub.f32 %v15348_v58, %v7499_v63  ;;  %v7587_v58 = vsel %vm1694_vm15, %v15419_v38, 0.0 }
 0xc9f   :  { %v7550_v20 = vmul.f32 1.442695, %v7523_v52 }
 0xca1   :  { %9072 = vpow2.f32 %v7550_v20  ;;  %v16407_v20 = vld [vmem:[#allocation39_spill] sm:$0xff] }
 0xca2   :  { %7585 = vadd.xlane.f32.xlu0 %v7584_v60 }
 0xca4   :  { %v7562_v17 = vpop.xlane.xlu1 %7561 }
 0xca5   :  { %9074 = vrcp.f32 %v7562_v17 }
 0xca7   :  { %v15421_v9 = vpop.eup %9072 }
 0xca8   :  { %v7593_v1 = vsel %vm1694_vm15, %v15421_v9, 0.0 }
 0xca9   :  { %7594 = vadd.xlane.f32.xlu2 %v7593_v1 }
 0xcaa   :  { %7588 = vadd.xlane.f32.xlu0 %v7587_v58 }
 0xcab   :  { %v9075_v11 = vpop.eup %9074 }
 0xcac   :  { %v7505_v4 = vpop.xlane.xlu1 %7504  ;;  %v7624_v28 = vmul.f32 %v9075_v11, %v15353_v25 }
 0xcad   :  { %v7525_v32 = vsub.f32 %v15358_v57, %v7505_v4 }
 0xcae   :  { %v7565_v22 = vpop.xlane.xlu2 %7564  ;;  %v7640_v44 = vpack.c.bf16 %v7624_v28, %v7624_v28 }
 0xcaf   :  { %v7554_v51 = vmul.f32 1.442695, %v7525_v32  ;;  %9076 = vrcp.f32 %v7565_v22 }
 0xcb0   :  { %v7658_v24 = vunpack.c.l.b16 %v7640_v44 }
 0xcb1   :  { %9078 = vpow2.f32 %v7554_v51 }
 0xcb2   :  { %9080 = vpow2.f32 %v7548_v45 }
 0xcb3   :  { %9082 = vpow2.f32 %v7552_v16 }
 0xcb5   :  { %v9077_v56 = vpop.eup %9076 }
 0xcb6   :  { %v7625_v61 = vmul.f32 %v9077_v56, %v15360_v3  ;;  %v7687_v14 = vpop.permute.xlu2 %7686 }
 0xcb7   :  { %v15431_v49 = vpop.eup %9078  ;;  %7699 = vmatpush.bf16.msra.mxu1 %v7687_v14 }
 0xcb8   :  { %v7641_v57 = vpack.c.bf16 %v7625_v61, %v7625_v61  ;;  %v7599_v30 = vsel %vm1694_vm15, %v15431_v49, 0.0  ;;  %v15438_v3 = vpop.eup %9080 }
 0xcb9   :  { %7600 = vadd.xlane.f32.xlu2 %v7599_v30  ;;  %v7590_v41 = vsel %vm1694_vm15, %v15438_v3, 0.0  ;;  %v15447_v63 = vpop.eup %9082 }
 0xcba   :  { %v7659_v15 = vunpack.c.l.b16 %v7641_v57  ;;  %v7596_v52 = vsel %vm1694_vm15, %v15447_v63, 0.0 }
 0xcbc   :  { %v7660_v25 = vpack.c.b16 %v7659_v15, %v7658_v24 }
 0xcbe   :  { %v7712_v62 = vpop.permute.xlu2 %7711  ;;  %8298 = vmatmul.msk.bf16.vlgmr.msrb.gmra.mxu0 %vm1694_vm15, %v7660_v25  ;;  %7761 = vrot.lane.b32.xlu0 %v16404_v59, %s9161_s5 }
 0xcbf   :  { %7724 = vmatpush.bf16.msra.mxu2 %v7712_v62 }
 0xcc4   :  { %v7571_v60 = vpop.xlane.xlu1 %7570 }
 0xcc5   :  { %7591 = vadd.xlane.f32.xlu1 %v7590_v41  ;;  %9084 = vrcp.f32 %v7571_v60 }
 0xccb   :  { %v9085_v11 = vpop.eup %9084 }
 0xccc   :  { %v7577_v32 = vpop.xlane.xlu1 %7576 }
 0xcd1   :  { %7786 = vrot.lane.b32.xlu2 %v16405_v29, %s9161_s5 }
 0xcde   :  { %7811 = vrot.lane.b32.xlu1 %v16406_v34, %s9161_s5 }
 0xce6   :  { %7836 = vrot.lane.b32.xlu1 %v16350_v46, %s9161_s5 }
 0xce8   :  { %7597 = vadd.xlane.f32.xlu0 %v7596_v52 }
 0xcee   :  { %4022 = vrot.lane.b32.xlu1 %v16407_v20, %s9162_s8 }
 0xcf5   :  { %v7511_v23 = vpop.xlane.xlu0 %7510  ;;  %v7583_v27 = vpop.xlane.xlu1 %7582 }
 0xcf6   :  { %5946 = vrot.lane.b32.xlu1 %v15213_v48, %s9163_s12  ;;  %v7527_v17 = vsub.f32 %v15388_v53, %v7511_v23  ;;  %v7627_v48 = vmul.f32 %v9085_v11, %v15368_v21 }
 0xcf7   :  { %v7508_v1 = vpop.xlane.xlu2 %7507 }
 0xcf8   :  { %v7526_v58 = vsub.f32 %v15383_v18, %v7508_v1  ;;  %v7558_v46 = vmul.f32 1.442695, %v7527_v17  ;;  %v7643_v56 = vpack.c.bf16 %v7627_v48, %v7627_v48 }
 0xcfa   :  { %v7556_v4 = vmul.f32 1.442695, %v7526_v58  ;;  %9086 = vpow2.f32 %v7558_v46  ;;  %v7684_v57 = vunpack.c.l.b16 %v7643_v56 }
 0xcfc   :  { %9088 = vpow2.f32 %v7556_v4 }
 0xcfd   :  { %v7568_v22 = vpop.xlane.xlu0 %7567 }
 0xcfe   :  { %9090 = vrcp.f32 %v7568_v22  ;;  %v16409_v22 = vld [vmem:[#allocation96_spill] sm:$0xff] }
 0xcff   :  { %9092 = vrcp.f32 %v7577_v32 }
 0xd00   :  { %v15459_v51 = vpop.eup %9086 }
 0xd01   :  { %v7605_v53 = vsel %vm1694_vm15, %v15459_v51, 0.0 }
 0xd02   :  { %v15461_v36 = vpop.eup %9088  ;;  %7606 = vadd.xlane.f32.xlu0 %v7605_v53 }
 0xd03   :  { %v7602_v18 = vsel %vm1694_vm15, %v15461_v36, 0.0 }
 0xd04   :  { %7603 = vadd.xlane.f32.xlu2 %v7602_v18  ;;  %v9091_v28 = vpop.eup %9090 }
 0xd05   :  { %v7626_v44 = vmul.f32 %v9091_v28, %v15397_v54  ;;  %v7574_v61 = vpop.xlane.xlu0 %7573  ;;  %v9093_v14 = vpop.eup %9092 }
 0xd06   :  { %9094 = vrcp.f32 %v7574_v61  ;;  %v7629_v21 = vmul.f32 %v9093_v14, %v15374_v26 }
 0xd07   :  { %v7642_v45 = vpack.c.bf16 %v7626_v44, %v7626_v44  ;;  %9096 = vrcp.f32 %v7583_v27 }
 0xd08   :  { %v7645_v62 = vpack.c.bf16 %v7629_v21, %v7629_v21 }
 0xd09   :  { %v7683_v30 = vunpack.c.l.b16 %v7642_v45 }
 0xd0a   :  { %v7709_v5 = vunpack.c.l.b16 %v7645_v62 }
 0xd0b   :  { %v7685_v24 = vpack.c.b16 %v7684_v57, %v7683_v30 }
 0xd0c   :  { %v9095_v15 = vpop.eup %9094 }
 0xd0d   :  { %v7737_v25 = vpop.permute.xlu1 %7736  ;;  %v7628_v59 = vmul.f32 %v9095_v15, %v15402_v10  ;;  %8299 = vmatmul.msk.bf16.vlgmr.msra.gmra.mxu1 %vm1694_vm15, %v7685_v24  ;;  %v7580_v41 = vpop.xlane.xlu0 %7579  ;;  %v16408_v10 = vld [vmem:[#allocation49_spill] sm:$0xff] }
 0xd0e   :  { %7749 = vmatpush.bf16.msrb.mxu3 %v7737_v25  ;;  %v9097_v54 = vpop.eup %9096  ;;  %9098 = vrcp.f32 %v7580_v41  ;;  %v16410_v25 = vld [vmem:[#allocation34_spill] sm:$0xff] }
 0xd0f   :  { %v7644_v29 = vpack.c.bf16 %v7628_v59, %v7628_v59  ;;  %v7631_v8 = vmul.f32 %v9097_v54, %v15385_v31  ;;  %v16412_v54 = vld [vmem:[#allocation81_spill] sm:$0xff] }
 0xd11   :  { %v7708_v16 = vunpack.c.l.b16 %v7644_v29  ;;  %v7647_v52 = vpack.c.bf16 %v7631_v8, %v7631_v8 }
 0xd13   :  { %v7710_v34 = vpack.c.b16 %v7709_v5, %v7708_v16  ;;  %v7734_v17 = vunpack.c.l.b16 %v7647_v52 }
 0xd14   :  { %v9099_v26 = vpop.eup %9098 }
 0xd15   :  { %v7630_v20 = vmul.f32 %v9099_v26, %v15407_v35  ;;  %8300 = vmatmul.msk.bf16.vlgmr.msra.gmra.mxu2 %vm1694_vm15, %v7710_v34  ;;  %v7586_v60 = vpop.xlane.xlu0 %7585 }
 0xd16   :  { %4020 = vrot.lane.b32.xlu0 %v16408_v10, %s9162_s8 }
 0xd17   :  { %v7646_v23 = vpack.c.bf16 %v7630_v20, %v7630_v20 }
 0xd19   :  { %v7733_v1 = vunpack.c.l.b16 %v7646_v23 }
 0xd1b   :  { %v7735_v58 = vpack.c.b16 %v7734_v17, %v7733_v1 }
 0xd1c   :  { %v7595_v31 = vpop.xlane.xlu2 %7594 }
 0xd1d   :  { %8301 = vmatmul.msk.bf16.vlgmr.msrb.gmra.mxu3 %vm1694_vm15, %v7735_v58  ;;  %v7589_v46 = vpop.xlane.xlu0 %7588 }
 0xd1e   :  { %9100 = vrcp.f32 %v7589_v46  ;;  %5948 = vrot.lane.b32.xlu0 %v15218_v40, %s9163_s12 }
 0xd1f   :  { %9102 = vrcp.f32 %v7586_v60  ;;  %v16413_v60 = vld [vmem:[#allocation76_spill] sm:$0xff] }
 0xd20   :  { %9104 = vrcp.f32 %v7595_v31 }
 0xd24   :  { %v9101_v35 = vpop.eup %9100 }
 0xd25   :  { %v9103_v4 = vpop.eup %9102  ;;  %v7633_v32 = vmul.f32 %v9101_v35, %v15419_v38 }
 0xd26   :  { %4024 = vrot.lane.b32.xlu0 %v16409_v22, %s9162_s8  ;;  %v7632_v11 = vmul.f32 %v9103_v4, %v15415_v19  ;;  %v9105_v61 = vpop.eup %9104 }
 0xd27   :  { %v7649_v48 = vpack.c.bf16 %v7633_v32, %v7633_v32  ;;  %v7635_v14 = vmul.f32 %v9105_v61, %v15421_v9  ;;  %v16411_v9 = vld [vmem:[#allocation55_spill] sm:$0xff] }
 0xd28   :  { %v7648_v18 = vpack.c.bf16 %v7632_v11, %v7632_v11 }
 0xd29   :  { %v7759_v28 = vunpack.c.l.b16 %v7649_v48  ;;  %v16416_v48 = vld [vmem:[#allocation92_spill] sm:$0xff] }
 0xd2a   :  { %v7758_v27 = vunpack.c.l.b16 %v7648_v18 }
 0xd2c   :  { %v7601_v53 = vpop.xlane.xlu2 %7600  ;;  %v7760_v56 = vpack.c.b16 %v7759_v28, %v7758_v27  ;;  %v16417_v27 = vld [vmem:[#allocation89_spill] sm:$0xff] }
 0xd2e   :  { %5950 = vrot.lane.b32.xlu0 %v15254_v50, %s9163_s12  ;;  %v7651_v50 = vpack.c.bf16 %v7635_v14, %v7635_v14 }
 0xd30   :  { %v7762_v40 = vpop.permute.xlu0 %7761  ;;  %v7784_v24 = vunpack.c.l.b16 %v7651_v50 }
 0xd31   :  { %7774 = vmatpush.bf16.msra.mxu0 %v7762_v40 }
 0xd34   :  { %v7787_v44 = vpop.permute.xlu2 %7786  ;;  %8302 = vmatmul.msk.bf16.vlgmr.msra.gmra.mxu0 %vm1694_vm15, %v7760_v56 }
 0xd35   :  { %7799 = vmatpush.bf16.msrb.mxu1 %v7787_v44  ;;  %v16418_v44 = vld [vmem:[#allocation52_spill] sm:$0xff] }
 0xd38   :  { %v7592_v38 = vpop.xlane.xlu1 %7591 }
 0xd39   :  { %9106 = vrcp.f32 %v7592_v38 }
 0xd3a   :  { %9108 = vrcp.f32 %v7601_v53  ;;  %v8328_v53 = vld [vmem:[%s15682_s9] sm:$0xff] }
 0xd3b   :  { %v7676_v19 = vpop.f32.mrf.mxu0 }
 0xd3c   :  { %7872 = vrot.lane.b32.xlu1 %v7676_v19, %s9164_s13 }
 0xd3f   :  { %v9107_v45 = vpop.eup %9106 }
 0xd40   :  { %v7634_v57 = vmul.f32 %v9107_v45, %v15438_v3  ;;  %v9109_v29 = vpop.eup %9108  ;;  %v16419_v45 = vld [vmem:[#allocation88_spill] sm:$0xff] }
 0xd41   :  { %v7637_v5 = vmul.f32 %v9109_v29, %v15431_v49 }
 0xd42   :  { %v7650_v21 = vpack.c.bf16 %v7634_v57, %v7634_v57 }
 0xd43   :  { %v7678_v30 = vpop.f32.mrf.mxu0  ;;  %v7653_v16 = vpack.c.bf16 %v7637_v5, %v7637_v5 }
 0xd44   :  { %v7783_v15 = vunpack.c.l.b16 %v7650_v21  ;;  %7874 = vrot.lane.b32.xlu2 %v7678_v30, %s9164_s13  ;;  %4026 = vrot.lane.b32.xlu1 %v16410_v25, %s9162_s8 }
 0xd45   :  { %v7809_v26 = vunpack.c.l.b16 %v7653_v16 }
 0xd46   :  { %v7785_v62 = vpack.c.b16 %v7784_v24, %v7783_v15 }
 0xd48   :  { %8303 = vmatmul.msk.bf16.vlgmr.msrb.gmra.mxu1 %vm1694_vm15, %v7785_v62  ;;  %v16420_v62 = vld [vmem:[#allocation91_spill] sm:$0xff] }
 0xd4c   :  { %4028 = vrot.lane.b32.xlu2 %v16411_v9, %s9162_s8  ;;  %5952 = vrot.lane.b32.xlu1 %v15266_v43, %s9163_s12 }
 0xd50   :  { %v7812_v59 = vpop.permute.xlu1 %7811 }
 0xd51   :  { %7824 = vmatpush.bf16.msrb.mxu2 %v7812_v59 }
 0xd54   :  { %5956 = vrot.lane.b32.xlu2 %v15259_v7, %s9163_s12 }
 0xd58   :  { %v7837_v3 = vpop.permute.xlu1 %7836 }
 0xd59   :  { %7849 = vmatpush.bf16.msra.mxu3 %v7837_v3 }
 0xd5b   :  { %v7598_v41 = vpop.xlane.xlu0 %7597 }
 0xd5c   :  { %4032 = vrot.lane.b32.xlu2 %v16412_v54, %s9162_s8  ;;  %9110 = vrcp.f32 %v7598_v41  ;;  %v16421_v41 = vld [vmem:[#allocation99_spill] sm:$0xff] }
 0xd60   :  { %v4023_v8 = vpop.permute.xlu1 %4022 }
 0xd61   :  { %4070 = vst.msk [vmem:[#allocation2 + $0x8] sm:$0xff] %vm4068_vm1, %v4023_v8 }
 0xd62   :  { %v9111_v43 = vpop.eup %9110 }
 0xd63   :  { %v7636_v34 = vmul.f32 %v9111_v43, %v15447_v63  ;;  %v16414_v63 = vld [vmem:[#allocation97_spill] sm:$0xff] }
 0xd64   :  { %5960 = vrot.lane.b32.xlu2 %v15306_v39, %s9163_s12 }
 0xd65   :  { %v7652_v7 = vpack.c.bf16 %v7636_v34, %v7636_v34  ;;  %v16422_v34 = vld [vmem:[#allocation9_spill] sm:$0xff] }
 0xd67   :  { %v7808_v52 = vunpack.c.l.b16 %v7652_v7 }
 0xd68   :  { %v5947_v32 = vpop.permute.xlu1 %5946 }
 0xd69   :  { %v7810_v20 = vpack.c.b16 %v7809_v26, %v7808_v52 }
 0xd6b   :  { %8304 = vmatmul.msk.bf16.vlgmr.msrb.gmra.mxu2 %vm1694_vm15, %v7810_v20 }
 0xd6c   :  { %4036 = vrot.lane.b32.xlu2 %v16413_v60, %s9162_s8 }
 0xd74   :  { %5964 = vrot.lane.b32.xlu2 %v15223_v12, %s9163_s12 }
 0xd75   :  { %v7607_v49 = vpop.xlane.xlu0 %7606 }
 0xd76   :  { %9112 = vrcp.f32 %v7607_v49 }
 0xd77   :  { %v7604_v10 = vpop.xlane.xlu2 %7603 }
 0xd78   :  { %9114 = vrcp.f32 %v7604_v10 }
 0xd7c   :  { %4040 = vrot.lane.b32.xlu2 %v16414_v63, %s9162_s8  ;;  %v9113_v39 = vpop.eup %9112 }
 0xd7d   :  { %v7639_v17 = vmul.f32 %v9113_v39, %v15459_v51  ;;  %v16415_v51 = vld [vmem:[#allocation68_spill] sm:$0xff] }
 0xd7e   :  { %v9115_v23 = vpop.eup %9114 }
 0xd7f   :  { %v7638_v1 = vmul.f32 %v9115_v23, %v15461_v36  ;;  %v7655_v58 = vpack.c.bf16 %v7639_v17, %v7639_v17 }
 0xd81   :  { %v7654_v46 = vpack.c.bf16 %v7638_v1, %v7638_v1  ;;  %v7834_v31 = vunpack.c.l.b16 %v7655_v58 }
 0xd83   :  { %v7833_v35 = vunpack.c.l.b16 %v7654_v46 }
 0xd84   :  { %5968 = vrot.lane.b32.xlu2 %v15282_v55, %s9163_s12  ;;  %v8329_v55 = vld [vmem:[%s15682_s9 + $0x8] sm:$0xff] }
 0xd85   :  { %v7835_v12 = vpack.c.b16 %v7834_v31, %v7833_v35  ;;  %8011 = vmatpush.bf16.msrb.mxu0 %v8329_v55  ;;  %v15613_v55 = vld [vmem:[%s15683_s10] ss:$0 sm:$0xff] }
 0xd87   :  { %8305 = vmatmul.msk.bf16.vlgmr.msra.gmra.mxu3 %vm1694_vm15, %v7835_v12  ;;  %vm7920_vm15 = vcmask 261312  }
 0xd88   :  { %v4021_v4 = vpop.permute.xlu0 %4020 }
 0xd89   :  { %4069 = vst.msk [vmem:[#allocation2] sm:$0xff] %vm4068_vm1, %v4021_v4  ;;  %8012 = vmatpush.bf16.msrb.mxu0 %v8328_v53 }
 0xd8a   :  { %v7701_v22 = vpop.f32.mrf.mxu1  ;;  %5995 = vst.msk [vmem:[#allocation2] sm:$0xff] %vm5994_vm9, %v5947_v32 }
 0xd8b   :  { %7876 = vrot.lane.b32.xlu0 %v7701_v22, %s9164_s13 }
 0xd8c   :  { %4044 = vrot.lane.b32.xlu2 %v16415_v51, %s9162_s8 }
 0xd90   :  { %v5949_v36 = vpop.permute.xlu0 %5948 }
 0xd91   :  { %5996 = vst.msk [vmem:[#allocation2 + $0x8] sm:$0xff] %vm5994_vm9, %v5949_v36 }
 0xd92   :  { %v7703_v11 = vpop.f32.mrf.mxu1 }
 0xd93   :  { %4030 = vrot.lane.b32.xlu0 %v16416_v48, %s9162_s8  ;;  %7878 = vrot.lane.b32.xlu1 %v7703_v11, %s9164_s13 }
 0xd94   :  { %5972 = vrot.lane.b32.xlu2 %v15280_v42, %s9163_s12 }
 0xd98   :  { %v7726_v18 = vpop.f32.mrf.mxu2  ;;  %v4025_v28 = vpop.permute.xlu0 %4024 }
 0xd99   :  { %4071 = vst.msk [vmem:[#allocation2 + $0x10] sm:$0xff] %vm4068_vm1, %v4025_v28 }
 0xd9b   :  { %5954 = vrot.lane.b32.xlu1 %v15250_v6, %s9163_s12  ;;  %7880 = vrot.lane.b32.xlu0 %v7726_v18, %s9164_s13 }
 0xd9c   :  { %4048 = vrot.lane.b32.xlu2 %v16417_v27, %s9162_s8 }
 0xd9e   :  { %v7875_v42 = vpop.permute.xlu2 %7874 }
 0xd9f   :  { %7922 = vst.msk [vmem:[#allocation2 + $0x8] sm:$0xff] %vm7920_vm15, %v7875_v42 }
 0xda0   :  { %v5951_v40 = vpop.permute.xlu0 %5950  ;;  %v7728_v56 = vpop.f32.mrf.mxu2 }
 0xda1   :  { %5997 = vst.msk [vmem:[#allocation2 + $0x10] sm:$0xff] %vm5994_vm9, %v5951_v40  ;;  %v7751_v38 = vpop.f32.mrf.mxu3 }
 0xda3   :  { %4034 = vrot.lane.b32.xlu0 %v16418_v44, %s9162_s8  ;;  %7882 = vrot.lane.b32.xlu1 %v7728_v56, %s9164_s13 }
 0xda4   :  { %5976 = vrot.lane.b32.xlu2 %v15310_v13, %s9163_s12 }
 0xda6   :  { %v4029_v6 = vpop.permute.xlu2 %4028  ;;  %v7938_v21 = vld [vmem:[#allocation2 + $0x8] sm:$0xff] }
 0xda7   :  { %4073 = vst.msk [vmem:[#allocation2 + $0x20] sm:$0xff] %vm4068_vm1, %v4029_v6 }
 0xda9   :  { %v7753_v14 = vpop.f32.mrf.mxu3 }
 0xdab   :  { %5958 = vrot.lane.b32.xlu1 %v15304_v0, %s9163_s12  ;;  %7884 = vrot.lane.b32.xlu0 %v7751_v38, %s9164_s13 }
 0xdae   :  { %v5957_v61 = vpop.permute.xlu2 %5956  ;;  %v7873_v19 = vpop.permute.xlu1 %7872 }
 0xdaf   :  { %7921 = vst.msk [vmem:[#allocation2] sm:$0xff] %vm7920_vm15, %v7873_v19 }
 0xdb1   :  { %v7776_v0 = vpop.f32.mrf.mxu0 }
 0xdb3   :  { %4038 = vrot.lane.b32.xlu0 %v16419_v45, %s9162_s8  ;;  %7886 = vrot.lane.b32.xlu1 %v7753_v14, %s9164_s13 }
 0xdb6   :  { %v4033_v13 = vpop.permute.xlu2 %4032  ;;  %v4027_v50 = vpop.permute.xlu1 %4026  ;;  %v7937_v57 = vld [vmem:[#allocation2] sm:$0xff] }
 0xdb7   :  { %4075 = vst.msk [vmem:[#allocation2 + $0x30] sm:$0xff] %vm4068_vm1, %v4033_v13  ;;  %v7953_v30 = vpack.c.bf16 %v7938_v21, %v7937_v57 }
 0xdb8   :  { %4072 = vst.msk [vmem:[#allocation2 + $0x18] sm:$0xff] %vm4068_vm1, %v4027_v50 }
 0xdb9   :  { %8314 = vmatmul.msk.bf16.vlgmr.msrb.gmra.mxu0 %vm121_vm0, %v7953_v30  ;;  %v7778_v25 = vpop.f32.mrf.mxu0 }
 0xdbb   :  { %5962 = vrot.lane.b32.xlu1 %v15220_v33, %s9163_s12  ;;  %7888 = vrot.lane.b32.xlu0 %v7776_v0, %s9164_s13 }
 0xdbe   :  { %v5961_v24 = vpop.permute.xlu2 %5960  ;;  %v5953_v15 = vpop.permute.xlu1 %5952 }
 0xdbf   :  { %5998 = vst.msk [vmem:[#allocation2 + $0x18] sm:$0xff] %vm5994_vm9, %v5953_v15 }
 0xdc3   :  { %4042 = vrot.lane.b32.xlu0 %v16420_v62, %s9162_s8  ;;  %7890 = vrot.lane.b32.xlu1 %v7778_v25, %s9164_s13 }
 0xdc5   :  { %v7801_v59 = vpop.f32.mrf.mxu1 }
 0xdc6   :  { %v4037_v9 = vpop.permute.xlu2 %4036 }
 0xdc7   :  { %4077 = vst.msk [vmem:[#allocation2 + $0x40] sm:$0xff] %vm4068_vm1, %v4037_v9 }
 0xdcb   :  { %7892 = vrot.lane.b32.xlu0 %v7801_v59, %s9164_s13  ;;  %5966 = vrot.lane.b32.xlu1 %v15276_v37, %s9163_s12 }
 0xdcd   :  { %v7803_v3 = vpop.f32.mrf.mxu1 }
 0xdce   :  { %v5965_v33 = vpop.permute.xlu2 %5964 }
 0xdd3   :  { %4046 = vrot.lane.b32.xlu0 %v16421_v41, %s9162_s8  ;;  %7894 = vrot.lane.b32.xlu1 %v7803_v3, %s9164_s13 }
 0xdd6   :  { %v4041_v54 = vpop.permute.xlu2 %4040 }
 0xdd7   :  { %4079 = vst.msk [vmem:[#allocation2 + $0x50] sm:$0xff] %vm4068_vm1, %v4041_v54 }
 0xddb   :  { %5970 = vrot.lane.b32.xlu1 %v15274_v47, %s9163_s12 }
 0xdde   :  { %v15577_v29 = vpop.permute.xlu2 %5968 }
 0xde6   :  { %v4045_v5 = vpop.permute.xlu2 %4044 }
 0xde7   :  { %4081 = vst.msk [vmem:[#allocation2 + $0x60] sm:$0xff] %vm4068_vm1, %v4045_v5 }
 0xdee   :  { %v15580_v8 = vpop.permute.xlu2 %5972  ;;  %v7826_v37 = vpop.f32.mrf.mxu2 }
 0xdef   :  { %7896 = vrot.lane.b32.xlu0 %v7826_v37, %s9164_s13 }
 0xdf6   :  { %v4049_v43 = vpop.permute.xlu2 %4048  ;;  %v7828_v16 = vpop.f32.mrf.mxu2 }
 0xdf7   :  { %4083 = vst.msk [vmem:[#allocation2 + $0x70] sm:$0xff] %vm4068_vm1, %v4049_v43  ;;  %4050 = vrot.lane.b32.xlu0 %v16422_v34, %s9162_s8  ;;  %7898 = vrot.lane.b32.xlu1 %v7828_v16, %s9164_s13 }
 0xdfd   :  { %v7877_v47 = vpop.permute.xlu0 %7876 }
 0xdfe   :  { %7923 = vst.msk [vmem:[#allocation2 + $0x10] sm:$0xff] %vm7920_vm15, %v7877_v47  ;;  %v5977_v30 = vpop.permute.xlu2 %5976 }
 0xdff   :  { %5974 = vrot.lane.b32.xlu1 %v15308_v2, %s9163_s12 }
 0xe05   :  { %v7879_v7 = vpop.permute.xlu1 %7878  ;;  %v4031_v26 = vpop.permute.xlu0 %4030  ;;  %v7939_v49 = vld [vmem:[#allocation2 + $0x10] sm:$0xff] }
 0xe06   :  { %7924 = vst.msk [vmem:[#allocation2 + $0x18] sm:$0xff] %vm7920_vm15, %v7879_v7 }
 0xe07   :  { %4074 = vst.msk [vmem:[#allocation2 + $0x28] sm:$0xff] %vm4068_vm1, %v4031_v26 }
 0xe08   :  { %6000 = vst.msk [vmem:[#allocation2 + $0x28] sm:$0xff] %vm5994_vm9, %v5957_v61 }
 0xe0a   :  { %v7851_v52 = vpop.f32.mrf.mxu3 }
 0xe0b   :  { %7900 = vrot.lane.b32.xlu0 %v7851_v52, %s9164_s13 }
 0xe0d   :  { %v5955_v20 = vpop.permute.xlu1 %5954  ;;  %v7881_v60 = vpop.permute.xlu0 %7880  ;;  %v7940_v10 = vld [vmem:[#allocation2 + $0x18] sm:$0xff] }
 0xe0e   :  { %5999 = vst.msk [vmem:[#allocation2 + $0x20] sm:$0xff] %vm5994_vm9, %v5955_v20  ;;  %v7954_v63 = vpack.c.bf16 %v7940_v10, %v7939_v49 }
 0xe0f   :  { %7925 = vst.msk [vmem:[#allocation2 + $0x20] sm:$0xff] %vm7920_vm15, %v7881_v60 }
 0xe10   :  { %8315 = vmatmul.msk.bf16.gmra.mxu0 %vm121_vm0, %v7954_v63 }
 0xe12   :  { %v7853_v2 = vpop.f32.mrf.mxu3 }
 0xe13   :  { %7902 = vrot.lane.b32.xlu1 %v7853_v2, %s9164_s13 }
 0xe15   :  { %v7883_v39 = vpop.permute.xlu1 %7882  ;;  %v4035_v23 = vpop.permute.xlu0 %4034 }
 0xe16   :  { %7926 = vst.msk [vmem:[#allocation2 + $0x28] sm:$0xff] %vm7920_vm15, %v7883_v39  ;;  %v7941_v58 = vld [vmem:[#allocation2 + $0x20] sm:$0xff] }
 0xe17   :  { %4076 = vst.msk [vmem:[#allocation2 + $0x38] sm:$0xff] %vm4068_vm1, %v4035_v23 }
 0xe18   :  { %6002 = vst.msk [vmem:[#allocation2 + $0x38] sm:$0xff] %vm5994_vm9, %v5961_v24 }
 0xe1d   :  { %v5959_v17 = vpop.permute.xlu1 %5958  ;;  %v7885_v1 = vpop.permute.xlu0 %7884  ;;  %v7942_v46 = vld [vmem:[#allocation2 + $0x28] sm:$0xff] }
 0xe1e   :  { %6001 = vst.msk [vmem:[#allocation2 + $0x30] sm:$0xff] %vm5994_vm9, %v5959_v17  ;;  %v7955_v31 = vpack.c.bf16 %v7942_v46, %v7941_v58 }
 0xe1f   :  { %7927 = vst.msk [vmem:[#allocation2 + $0x30] sm:$0xff] %vm7920_vm15, %v7885_v1 }
 0xe20   :  { %8316 = vmatmul.msk.bf16.gmra.mxu0 %vm121_vm0, %v7955_v31 }
 0xe25   :  { %v7887_v35 = vpop.permute.xlu1 %7886  ;;  %v4039_v12 = vpop.permute.xlu0 %4038 }
 0xe26   :  { %7928 = vst.msk [vmem:[#allocation2 + $0x38] sm:$0xff] %vm7920_vm15, %v7887_v35  ;;  %v7943_v22 = vld [vmem:[#allocation2 + $0x30] sm:$0xff] }
 0xe27   :  { %4078 = vst.msk [vmem:[#allocation2 + $0x48] sm:$0xff] %vm4068_vm1, %v4039_v12 }
 0xe28   :  { %6004 = vst.msk [vmem:[#allocation2 + $0x48] sm:$0xff] %vm5994_vm9, %v5965_v33 }
 0xe2d   :  { %v5963_v4 = vpop.permute.xlu1 %5962  ;;  %v7889_v32 = vpop.permute.xlu0 %7888  ;;  %v7944_v51 = vld [vmem:[#allocation2 + $0x38] sm:$0xff] }
 0xe2e   :  { %6003 = vst.msk [vmem:[#allocation2 + $0x40] sm:$0xff] %vm5994_vm9, %v5963_v4  ;;  %v7956_v36 = vpack.c.bf16 %v7944_v51, %v7943_v22 }
 0xe2f   :  { %7929 = vst.msk [vmem:[#allocation2 + $0x40] sm:$0xff] %vm7920_vm15, %v7889_v32 }
 0xe30   :  { %8317 = vmatmul.msk.bf16.gmra.mxu0 %vm121_vm0, %v7956_v36 }
 0xe35   :  { %v7891_v11 = vpop.permute.xlu1 %7890  ;;  %v4043_v48 = vpop.permute.xlu0 %4042 }
 0xe36   :  { %7930 = vst.msk [vmem:[#allocation2 + $0x48] sm:$0xff] %vm7920_vm15, %v7891_v11  ;;  %v8014_v53 = vpop.f32.mrf.mxu0  ;;  %v7945_v42 = vld [vmem:[#allocation2 + $0x40] sm:$0xff] }
 0xe37   :  { %4080 = vst.msk [vmem:[#allocation2 + $0x58] sm:$0xff] %vm4068_vm1, %v4043_v48  ;;  %v8015_v18 = vadd.f32 %v15613_v55, %v8014_v53 }
 0xe38   :  { %6006 = vst.msk [vmem:[#allocation2 + $0x58] sm:$0xff] %vm5994_vm9, %v15577_v29 }
 0xe39   :  { %8054 = vst.msk [vmem:[#allocation6] sm:$0xff] %vm121_vm0, %v8015_v18 }
 0xe3d   :  { %v5967_v28 = vpop.permute.xlu1 %5966  ;;  %v7893_v27 = vpop.permute.xlu0 %7892  ;;  %v7946_v40 = vld [vmem:[#allocation2 + $0x48] sm:$0xff] }
 0xe3e   :  { %6005 = vst.msk [vmem:[#allocation2 + $0x50] sm:$0xff] %vm5994_vm9, %v5967_v28  ;;  %v8016_v56 = vpop.f32.mrf.mxu0  ;;  %v7957_v44 = vpack.c.bf16 %v7946_v40, %v7945_v42 }
 0xe3f   :  { %7931 = vst.msk [vmem:[#allocation2 + $0x50] sm:$0xff] %vm7920_vm15, %v7893_v27  ;;  %v8017_v6 = vadd.f32 %v15613_v55, %v8016_v56 }
 0xe40   :  { %8318 = vmatmul.msk.bf16.gmra.mxu0 %vm121_vm0, %v7957_v44 }
 0xe41   :  { %8055 = vst.msk [vmem:[#allocation6 + $0x8] sm:$0xff] %vm121_vm0, %v8017_v6 }
 0xe45   :  { %v7895_v38 = vpop.permute.xlu1 %7894  ;;  %v4047_v61 = vpop.permute.xlu0 %4046 }
 0xe46   :  { %7932 = vst.msk [vmem:[#allocation2 + $0x58] sm:$0xff] %vm7920_vm15, %v7895_v38  ;;  %v7947_v14 = vld [vmem:[#allocation2 + $0x50] sm:$0xff] }
 0xe47   :  { %4082 = vst.msk [vmem:[#allocation2 + $0x68] sm:$0xff] %vm4068_vm1, %v4047_v61 }
 0xe48   :  { %6008 = vst.msk [vmem:[#allocation2 + $0x68] sm:$0xff] %vm5994_vm9, %v15580_v8 }
 0xe4d   :  { %v5971_v19 = vpop.permute.xlu1 %5970  ;;  %v7948_v45 = vld [vmem:[#allocation2 + $0x58] sm:$0xff] }
 0xe4e   :  { %6007 = vst.msk [vmem:[#allocation2 + $0x60] sm:$0xff] %vm5994_vm9, %v5971_v19  ;;  %v7958_v13 = vpack.c.bf16 %v7948_v45, %v7947_v14 }
 0xe50   :  { %8319 = vmatmul.msk.bf16.gmra.mxu0 %vm121_vm0, %v7958_v13 }
 0xe61   :  { %v7897_v50 = vpop.permute.xlu0 %7896 }
 0xe62   :  { %7933 = vst.msk [vmem:[#allocation2 + $0x60] sm:$0xff] %vm7920_vm15, %v7897_v50 }
 0xe69   :  { %v7899_v57 = vpop.permute.xlu1 %7898  ;;  %v4051_v21 = vpop.permute.xlu0 %4050  ;;  %v7949_v24 = vld [vmem:[#allocation2 + $0x60] sm:$0xff] }
 0xe6a   :  { %7934 = vst.msk [vmem:[#allocation2 + $0x68] sm:$0xff] %vm7920_vm15, %v7899_v57 }
 0xe6b   :  { %4084 = vst.msk [vmem:[#allocation2 + $0x78] sm:$0xff] %vm4068_vm1, %v4051_v21 }
 0xe6c   :  { %6010 = vst.msk [vmem:[#allocation2 + $0x78] sm:$0xff] %vm5994_vm9, %v5977_v30 }
 0xe71   :  { %v5975_v0 = vpop.permute.xlu1 %5974  ;;  %v7950_v15 = vld [vmem:[#allocation2 + $0x68] sm:$0xff] }
 0xe72   :  { %6009 = vst.msk [vmem:[#allocation2 + $0x70] sm:$0xff] %vm5994_vm9, %v5975_v0  ;;  %v7959_v25 = vpack.c.bf16 %v7950_v15, %v7949_v24 }
 0xe74   :  { %8320 = vmatmul.msk.bf16.gmra.mxu0 %vm121_vm0, %v7959_v25 }
 0xe7d   :  { %v7901_v62 = vpop.permute.xlu0 %7900 }
 0xe7e   :  { %7935 = vst.msk [vmem:[#allocation2 + $0x70] sm:$0xff] %vm7920_vm15, %v7901_v62 }
 0xe85   :  { %v7903_v9 = vpop.permute.xlu1 %7902  ;;  %v7951_v59 = vld [vmem:[#allocation2 + $0x70] sm:$0xff] }
 0xe86   :  { %7936 = vst.msk [vmem:[#allocation2 + $0x78] sm:$0xff] %vm7920_vm15, %v7903_v9 }
 0xe8d   :  { %v7952_v33 = vld [vmem:[#allocation2 + $0x78] sm:$0xff]  ;;  %v8019_v3 = vpop.f32.mrf.mxu0 }
 0xe8e   :  { %v7960_v41 = vpack.c.bf16 %v7952_v33, %v7951_v59  ;;  %v8020_v54 = vadd.f32 %v15613_v55, %v8019_v3 }
 0xe90   :  { %8321 = vmatmul.msk.bf16.gmra.mxu0 %vm121_vm0, %v7960_v41  ;;  %8056 = vst.msk [vmem:[#allocation6 + $0x10] sm:$0xff] %vm121_vm0, %v8020_v54 }
 0xe95   :  { %v8021_v29 = vpop.f32.mrf.mxu0 }
 0xe96   :  { %v8022_v5 = vadd.f32 %v15613_v55, %v8021_v29 }
 0xe98   :  { %8057 = vst.msk [vmem:[#allocation6 + $0x18] sm:$0xff] %vm121_vm0, %v8022_v5 }
 0xe9d   :  { %v8024_v8 = vpop.f32.mrf.mxu0 }
 0xe9e   :  { %v8025_v37 = vadd.f32 %v15613_v55, %v8024_v8 }
 0xea0   :  { %8058 = vst.msk [vmem:[#allocation6 + $0x20] sm:$0xff] %vm121_vm0, %v8025_v37 }
 0xea5   :  { %v8026_v43 = vpop.f32.mrf.mxu0 }
 0xea6   :  { %v8027_v16 = vadd.f32 %v15613_v55, %v8026_v43 }
 0xea8   :  { %8059 = vst.msk [vmem:[#allocation6 + $0x28] sm:$0xff] %vm121_vm0, %v8027_v16 }
 0xead   :  { %v8029_v34 = vpop.f32.mrf.mxu0 }
 0xeae   :  { %v8030_v47 = vadd.f32 %v15613_v55, %v8029_v34 }
 0xeb0   :  { %8060 = vst.msk [vmem:[#allocation6 + $0x30] sm:$0xff] %vm121_vm0, %v8030_v47 }
 0xeb5   :  { %v8031_v7 = vpop.f32.mrf.mxu0 }
 0xeb6   :  { %v8032_v26 = vadd.f32 %v15613_v55, %v8031_v7 }
 0xeb8   :  { %8061 = vst.msk [vmem:[#allocation6 + $0x38] sm:$0xff] %vm121_vm0, %v8032_v26 }
 0xebd   :  { %v8034_v52 = vpop.f32.mrf.mxu0 }
 0xebe   :  { %v8035_v20 = vadd.f32 %v15613_v55, %v8034_v52 }
 0xec0   :  { %8062 = vst.msk [vmem:[#allocation6 + $0x40] sm:$0xff] %vm121_vm0, %v8035_v20 }
 0xec5   :  { %v8036_v60 = vpop.f32.mrf.mxu0 }
 0xec6   :  { %v8037_v49 = vadd.f32 %v15613_v55, %v8036_v60 }
 0xec8   :  { %8063 = vst.msk [vmem:[#allocation6 + $0x48] sm:$0xff] %vm121_vm0, %v8037_v49 }
 0xecd   :  { %v8039_v10 = vpop.f32.mrf.mxu0 }
 0xece   :  { %v8040_v63 = vadd.f32 %v15613_v55, %v8039_v10 }
 0xed0   :  { %8064 = vst.msk [vmem:[#allocation6 + $0x50] sm:$0xff] %vm121_vm0, %v8040_v63 }
 0xed5   :  { %v8041_v2 = vpop.f32.mrf.mxu0 }
 0xed6   :  { %v8042_v39 = vadd.f32 %v15613_v55, %v8041_v2 }
 0xed8   :  { %8065 = vst.msk [vmem:[#allocation6 + $0x58] sm:$0xff] %vm121_vm0, %v8042_v39 }
 0xef1   :  { %v8044_v23 = vpop.f32.mrf.mxu0 }
 0xef2   :  { %v8045_v17 = vadd.f32 %v15613_v55, %v8044_v23 }
 0xef4   :  { %8066 = vst.msk [vmem:[#allocation6 + $0x60] sm:$0xff] %vm121_vm0, %v8045_v17 }
 0xef9   :  { %v8046_v1 = vpop.f32.mrf.mxu0 }
 0xefa   :  { %v8047_v58 = vadd.f32 %v15613_v55, %v8046_v1 }
 0xefc   :  { %8067 = vst.msk [vmem:[#allocation6 + $0x68] sm:$0xff] %vm121_vm0, %v8047_v58 }
 0xf0d   :  { %v8049_v46 = vpop.f32.mrf.mxu0 }
 0xf0e   :  { %v8050_v31 = vadd.f32 %v15613_v55, %v8049_v46 }
 0xf10   :  { %8068 = vst.msk [vmem:[#allocation6 + $0x70] sm:$0xff] %vm121_vm0, %v8050_v31 }
 0xf15   :  { %v8051_v35 = vpop.f32.mrf.mxu0 }
 0xf16   :  { %v8052_v12 = vadd.f32 %v15613_v55, %v8051_v35 }
 0xf18   :  { %8069 = vst.msk [vmem:[#allocation6 + $0x78] sm:$0xff] %vm121_vm0, %v8052_v12 }
 0xf19   :  { %8082 = dma.vmem_to_hbm [thread:$0]  %s8075_s18, 2048, %s8077_s6, [#allocation4], %s9166_s19, %s9166_s19, %s9162_s8  }
 0xf1a   :  { %9156 = dma.done.wait [#allocation4], 2048  }
 0xf1b   :  { %9157 = vsyncadd [#allocation4], 4294965248 }
 0xf1c   :  { %8087 = vsyncpa [#allocation4], 1 }
 0xf1d   :  { %8088 = vsyncpa [#allocation5], 1 }

</bundles_post_ra>
